<compile_context>
chip_gen: v6e
topology: v6e:2x2x1
jax: 0.10.0
libtpu: 0.0.40
codegen_flags: <defaults>
</compile_context>

<pallas_src>
import functools

import jax
import jax.numpy as jnp
from jax.experimental import pallas as pl
from jax.experimental.pallas import tpu as pltpu

BN_EPS = 1e-5
LEAKY_SLOPE = 0.2


def _ru(x, m):
    return (x + m - 1) // m * m


def _pick_vmem_limit():
    """Scoped-VMEM limit that is safe on v5e/v6e (128 MiB) and v7x (64 MiB/TC)."""
    cap = 64 * 1024 * 1024
    try:
        info = pltpu.get_tpu_info()
        cap = int(getattr(info, "vmem_capacity_bytes", cap)) or cap
    except Exception:
        pass
    # Clamp to 48 MiB: well above what these tiles need, and never exceeds the
    # 64 MiB per-core VMEM even if `cap` is reported per-chip on v7x.
    return int(min(48 * 1024 * 1024, max(32 * 1024 * 1024, cap - 16 * 1024 * 1024)))


_VMEM_LIMIT = _pick_vmem_limit()


def _pick_tk(kp, cap=1280):
    """Largest multiple of 128 that divides kp (<= cap): tight K tiling."""
    best = 128
    t = 128
    while t <= min(kp, cap):
        if kp % t == 0:
            best = t
        t += 128
    return best


# ----------------------------------------------------------------------------
# Pallas kernels
# ----------------------------------------------------------------------------
def _conv_bn_lrelu_kernel(x_ref, w_ref, b_ref, g_ref, bt_ref, o_ref, acc_ref,
                          *, m_true):
    """Fused (patches @ W + bias) -> BatchNorm(batch stats) -> LeakyReLU.

    grid = (Cout tiles j [parallel], K tiles k [arbitrary]); the whole M extent
    (batch*H*W) lives in one accumulator tile, so the training-mode batch
    statistics are final at k == nk-1 and the epilogue can normalize in place.

    x_ref : [Mp, tk] bf16   w_ref : [tk, tn] bf16
    b_ref / g_ref / bt_ref : [1, tn] f32 (conv bias, BN gamma, BN beta)
    o_ref : [Mp, tn] bf16   acc_ref : [Mp, tn] f32 VMEM accumulator
    """
    k = pl.program_id(1)
    nk = pl.num_programs(1)

    @pl.when(k == 0)
    def _():
        acc_ref[...] = jnp.zeros_like(acc_ref)

    acc_ref[...] += jnp.dot(x_ref[...], w_ref[...],
                            preferred_element_type=jnp.float32)

    @pl.when(k == nk - 1)
    def _():
        y = acc_ref[...] + b_ref[...]                      # pre-BN, f32
        rows = jax.lax.broadcasted_iota(jnp.int32, y.shape, 0)
        valid = rows < m_true                              # mask M padding rows
        inv_m = 1.0 / float(m_true)
        mean = jnp.sum(jnp.where(valid, y, 0.0), axis=0, keepdims=True) * inv_m
        d = jnp.where(valid, y - mean, 0.0)
        var = jnp.sum(d * d, axis=0, keepdims=True) * inv_m   # biased, two-pass
        scale = g_ref[...] * jax.lax.rsqrt(var + BN_EPS)
        shift = bt_ref[...] - mean * scale
        z = y * scale + shift
        o_ref[...] = jnp.where(z > 0, z, LEAKY_SLOPE * z).astype(o_ref.dtype)


def _fc_head_kernel(x_ref, w1_ref, b1_ref, w2_ref, b2_ref, o_ref, acc_ref):
    """Fused fc1(+bias+LeakyReLU) and fc2(+bias+Sigmoid); lth_rep stays in VMEM."""
    k = pl.program_id(0)

    @pl.when(k == 0)
    def _():
        acc_ref[...] = jnp.zeros_like(acc_ref)

    acc_ref[...] += jnp.dot(x_ref[...], w1_ref[...],
                            preferred_element_type=jnp.float32)

    @pl.when(k == pl.num_programs(0) - 1)
    def _():
        h = acc_ref[...] + b1_ref[...]
        h = jnp.where(h > 0, h, LEAKY_SLOPE * h)          # lth_rep, VMEM only
        # fc2 has N=1: VPU multiply + lane reduction instead of a 1-column MXU op.
        logit = jnp.sum(h * w2_ref[...], axis=1, keepdims=True) + b2_ref[...]
        # sigmoid(x) = 0.5*(tanh(x/2)+1): EUP op, no exp overflow.
        o_ref[...] = 0.5 * (jnp.tanh(0.5 * logit) + 1.0)


# ----------------------------------------------------------------------------
# Wrappers (tiling, padding, pallas_call)
# ----------------------------------------------------------------------------
def conv_bn_lrelu(patches, wp, bp, gp, btp, n_out):
    """[M,K] patches x pre-padded [Kp,Np] weights -> fused conv+BN+LeakyReLU."""
    M, K = patches.shape
    Kp, Np = wp.shape
    Mp = _ru(M, 16)
    # TODO(synk): add an M-tiled two-pass (stats then normalize) path for large
    # batch; at this batch the whole M extent fits one accumulator tile.
    assert Mp <= 2048, "fused-BN path assumes the whole M extent fits one tile"
    tn = 128                      # MXU-native on v5e; 2 parallel j blocks on 256ch
    tk = _pick_tk(Kp)

    xp = jnp.pad(patches.astype(jnp.bfloat16), ((0, Mp - M), (0, Kp - K)))

    out = pl.pallas_call(
        functools.partial(_conv_bn_lrelu_kernel, m_true=M),
        out_shape=jax.ShapeDtypeStruct((Mp, Np), jnp.bfloat16),
        grid=(Np // tn, Kp // tk),
        in_specs=[
            pl.BlockSpec((Mp, tk), lambda j, k: (0, k)),
            pl.BlockSpec((tk, tn), lambda j, k: (k, j)),
            pl.BlockSpec((1, tn), lambda j, k: (0, j)),
            pl.BlockSpec((1, tn), lambda j, k: (0, j)),
            pl.BlockSpec((1, tn), lambda j, k: (0, j)),
        ],
        out_specs=pl.BlockSpec((Mp, tn), lambda j, k: (0, j)),
        scratch_shapes=[pltpu.VMEM((Mp, tn), jnp.float32)],
        compiler_params=pltpu.CompilerParams(
            dimension_semantics=("parallel", "arbitrary"),
            vmem_limit_bytes=_VMEM_LIMIT),
        cost_estimate=pl.CostEstimate(
            flops=2 * Mp * Kp * Np + 10 * Mp * Np,
            transcendentals=Np,
            bytes_accessed=(Np // tn) * Mp * Kp * 2 + Kp * Np * 2
                           + Mp * Np * 2 + 3 * Np * 4),
    )(xp, wp, bp, gp, btp)

    return out[:M, :n_out]


def fc_head(feats, w1p, b1, w2, b2):
    """Fused lth_features (Linear+LeakyReLU) + sigmoid_output (Linear+Sigmoid)."""
    B, D = feats.shape
    Kp, N2 = w1p.shape
    Bp = _ru(B, 16)
    # tk=256 -> >=4 K steps so the fc1 weight DMA is hidden by double-buffering.
    tk = 256 if Kp % 256 == 0 else (128 if Kp % 128 == 0 else Kp)

    xp = jnp.pad(feats.astype(jnp.bfloat16), ((0, Bp - B), (0, Kp - D)))

    out = pl.pallas_call(
        _fc_head_kernel,
        out_shape=jax.ShapeDtypeStruct((Bp, 1), jnp.float32),
        grid=(Kp // tk,),
        in_specs=[
            pl.BlockSpec((Bp, tk), lambda k: (0, k)),
            pl.BlockSpec((tk, N2), lambda k: (k, 0)),
            pl.BlockSpec((1, N2), lambda k: (0, 0)),
            pl.BlockSpec((1, N2), lambda k: (0, 0)),
            pl.BlockSpec((1, 1), lambda k: (0, 0)),
        ],
        out_specs=pl.BlockSpec((Bp, 1), lambda k: (0, 0)),
        scratch_shapes=[pltpu.VMEM((Bp, N2), jnp.float32)],
        compiler_params=pltpu.CompilerParams(
            dimension_semantics=("arbitrary",),
            vmem_limit_bytes=_VMEM_LIMIT),
        cost_estimate=pl.CostEstimate(
            flops=2 * Bp * Kp * N2 + 4 * Bp * N2,
            transcendentals=Bp * N2 + Bp,
            bytes_accessed=Bp * Kp * 2 + Kp * N2 * 2 + 2 * N2 * 4 + Bp * 4),
    )(xp, w1p, b1, w2, b2)
    return out[:B]


# ----------------------------------------------------------------------------
# Parameters, one-time weight preparation, forward pass
# ----------------------------------------------------------------------------
def init_params(key, input_channels=3, feat_hw=2):
    """Deterministic synthetic parameters matching the module's shapes."""
    conv_cfg = [(input_channels, 32), (32, 128), (128, 256), (256, 256)]
    dim = 256 * feat_hw * feat_hw  # representation_size = (256, feat_hw, feat_hw)
    keys = jax.random.split(key, 4 * 4 + 4)
    params = {"convs": []}
    ki = 0
    for cin, cout in conv_cfg:
        w = 0.05 * jax.random.normal(keys[ki], (5, 5, cin, cout), jnp.float32); ki += 1
        b = 0.01 * jax.random.normal(keys[ki], (cout,), jnp.float32); ki += 1
        g = 1.0 + 0.01 * jax.random.normal(keys[ki], (cout,), jnp.float32); ki += 1
        bt = 0.01 * jax.random.normal(keys[ki], (cout,), jnp.float32); ki += 1
        params["convs"].append((w, b, g, bt))
    params["fc1_w"] = 0.02 * jax.random.normal(keys[ki], (dim, 2048), jnp.float32); ki += 1
    params["fc1_b"] = 0.01 * jax.random.normal(keys[ki], (2048,), jnp.float32); ki += 1
    params["fc2_w"] = 0.02 * jax.random.normal(keys[ki], (2048, 1), jnp.float32); ki += 1
    params["fc2_b"] = 0.01 * jax.random.normal(keys[ki], (1,), jnp.float32); ki += 1
    return params


def prepare_params(params, feat_hw):
    """One-time weight prep: flatten/transpose, permute fc1 rows, cast bf16, pad.

    Hoisted out of the forward pass so no transpose/pad/cast kernels run per call.
    """
    prep = {"convs": []}
    for (w, b, g, bt) in params["convs"]:
        kh, kw, cin, cout = w.shape
        K = kh * kw * cin
        Kp, Np = _ru(K, 128), _ru(cout, 128)
        # conv_general_dilated_patches orders features as (cin, kh, kw).
        w_flat = jnp.transpose(w, (2, 0, 1, 3)).reshape(K, cout)
        wp = jnp.pad(w_flat.astype(jnp.bfloat16), ((0, Kp - K), (0, Np - cout)))
        bp = jnp.pad(b.astype(jnp.float32).reshape(1, cout), ((0, 0), (0, Np - cout)))
        gp = jnp.pad(g.astype(jnp.float32).reshape(1, cout), ((0, 0), (0, Np - cout)))
        btp = jnp.pad(bt.astype(jnp.float32).reshape(1, cout), ((0, 0), (0, Np - cout)))
        prep["convs"].append((wp, bp, gp, btp, cout))

    # PyTorch flattens features in NCHW order; permute fc1's rows once to the
    # NHWC flatten order so no activation transpose is needed at runtime.
    cc = params["convs"][-1][0].shape[3]
    hh = ww = feat_hw
    dim = hh * ww * cc
    w1 = params["fc1_w"].reshape(cc, hh, ww, -1).transpose(1, 2, 0, 3).reshape(dim, -1)
    Kp1 = _ru(dim, 128)
    prep["fc1_w"] = jnp.pad(w1.astype(jnp.bfloat16), ((0, Kp1 - dim), (0, 0)))
    prep["fc1_b"] = params["fc1_b"].astype(jnp.float32).reshape(1, -1)
    prep["fc2_w"] = params["fc2_w"].astype(jnp.float32).reshape(1, -1)
    prep["fc2_b"] = params["fc2_b"].astype(jnp.float32).reshape(1, 1)
    return prep


def discriminator_forward(x_nchw, prep):
    """Discriminator.forward. Input: NCHW float32. Output: [N, 1] in [0, 1]."""
    batch = x_nchw.shape[0]
    x = jnp.transpose(x_nchw, (0, 2, 3, 1)).astype(jnp.bfloat16)  # NCHW -> NHWC
    strides = (1, 2, 2, 2)
    for (wp, bp, gp, btp, cout), stride in zip(prep["convs"], strides):
        # im2col as one XLA op; output feature order is (cin, kh, kw).
        # TODO(synk): fold the patch expansion into the Pallas kernel (kh*kw
        # shifted matmuls over a grid axis) to avoid materializing the patch
        # matrix in HBM at larger batch sizes.
        patches = jax.lax.conv_general_dilated_patches(
            x, (5, 5), (stride, stride), ((2, 2), (2, 2)),
            dimension_numbers=("NHWC", "HWIO", "NHWC"))
        n, ho, wo, kc = patches.shape
        patches = patches.reshape(n * ho * wo, kc)
        act = conv_bn_lrelu(patches, wp, bp, gp, btp, n_out=cout)   # [M, cout] bf16
        x = act.reshape(n, ho, wo, cout)

    n, hh, ww, cc = x.shape
    feats = x.reshape(batch, hh * ww * cc)
    return fc_head(feats, prep["fc1_w"], prep["fc1_b"], prep["fc2_w"], prep["fc2_b"])


if __name__ == "__main__":
    key = jax.random.PRNGKey(0)
    kx, kp = jax.random.split(key)

    # Small shapes: batch=2, input_channels=3, 16x16 spatial.
    # Stride pattern (1,2,2,2) gives 2x2 features -> representation_size
    # (256, 2, 2) -> dim = 1024.
    x = jax.random.normal(kx, (2, 3, 16, 16), jnp.float32)
    params = init_params(kp, input_channels=3, feat_hw=2)
    prep = prepare_params(params, feat_hw=2)        # one-time weight prep

    fwd = jax.jit(lambda xin: discriminator_forward(xin, prep))
    out = fwd(x)
    out = jax.block_until_ready(out)

    assert out.shape == (2, 1), out.shape
    assert bool(jnp.all(jnp.isfinite(out)))
    assert bool(jnp.all((out >= 0.0) & (out <= 1.0)))
    print("KERNEL_OK")
</pallas_src>

<mosaic_0001>
module attributes {stable_mosaic.version = 11 : i64} {
  func.func @_conv_bn_lrelu_kernel(%arg0: i32, %arg1: i32, %arg2: memref<512x128xbf16, #tpu.memory_space<vmem>>, %arg3: memref<128x128xbf16, #tpu.memory_space<vmem>>, %arg4: memref<1x128xf32, #tpu.memory_space<vmem>>, %arg5: memref<1x128xf32, #tpu.memory_space<vmem>>, %arg6: memref<1x128xf32, #tpu.memory_space<vmem>>, %arg7: memref<512x128xbf16, #tpu.memory_space<vmem>>, %arg8: memref<512x128xf32, #tpu.memory_space<vmem>>) attributes {dimension_semantics = [#tpu.dimension_semantics<parallel>, #tpu.dimension_semantics<arbitrary>], iteration_bounds = array<i64: 1, 1>, scalar_prefetch = 0 : i64, scratch_operands = 1 : i64, tpu.core_type = #tpu.core_type<tc>, window_params = [{transform_indices = @transform_0, window_bounds = array<i64: 512, 128>}, {transform_indices = @transform_1, window_bounds = array<i64: 128, 128>}, {transform_indices = @transform_2, window_bounds = array<i64: 1, 128>}, {transform_indices = @transform_3, window_bounds = array<i64: 1, 128>}, {transform_indices = @transform_4, window_bounds = array<i64: 1, 128>}, {transform_indices = @transform_5, window_bounds = array<i64: 512, 128>}]} {
    %c0_i32 = arith.constant 0 : i32
    %0 = arith.cmpi eq, %arg1, %c0_i32 : i32
    %1 = arith.extui %0 : i1 to i32
    %c0_i32_0 = arith.constant 0 : i32
    %2 = arith.cmpi ne, %1, %c0_i32_0 : i32
    scf.if %2 {
      %cst_10 = arith.constant 0.000000e+00 : f32
      %12 = vector.broadcast %cst_10 : f32 to vector<512x128xf32>
      %c0_11 = arith.constant 0 : index
      %c0_12 = arith.constant 0 : index
      %13 = vector.load %arg8[%c0_11, %c0_12] : memref<512x128xf32, #tpu.memory_space<vmem>>, vector<512x128xf32>
      tpu.vector_store %arg8[%c0_11, %c0_12], %12 {strides = array<i32>} : memref<512x128xf32, #tpu.memory_space<vmem>>, vector<512x128xf32>,
    } else {
    }
    %c0 = arith.constant 0 : index
    %c0_1 = arith.constant 0 : index
    %3 = vector.load %arg8[%c0, %c0_1] : memref<512x128xf32, #tpu.memory_space<vmem>>, vector<512x128xf32>
    %c0_2 = arith.constant 0 : index
    %c0_3 = arith.constant 0 : index
    %4 = vector.load %arg2[%c0_2, %c0_3] : memref<512x128xbf16, #tpu.memory_space<vmem>>, vector<512x128xbf16>
    %c0_4 = arith.constant 0 : index
    %c0_5 = arith.constant 0 : index
    %5 = vector.load %arg3[%c0_4, %c0_5] : memref<128x128xbf16, #tpu.memory_space<vmem>>, vector<128x128xbf16>
    %cst = arith.constant dense<0.000000e+00> : vector<512x128xf32>
    %6 = tpu.matmul %4, %5, %cst {dimension_numbers = #tpu.dot_dimension_numbers<[1], [0], [0], [1], [0, 0, 1, 1], [], []>} : vector<512x128xbf16>, vector<128x128xbf16>, vector<512x128xf32> -> vector<512x128xf32>
    %7 = arith.addf %3, %6 : vector<512x128xf32>
    %c0_6 = arith.constant 0 : index
    %c0_7 = arith.constant 0 : index
    %8 = vector.load %arg8[%c0_6, %c0_7] : memref<512x128xf32, #tpu.memory_space<vmem>>, vector<512x128xf32>
    tpu.vector_store %arg8[%c0_6, %c0_7], %7 {strides = array<i32>} : memref<512x128xf32, #tpu.memory_space<vmem>>, vector<512x128xf32>,
    %c0_i32_8 = arith.constant 0 : i32
    %9 = arith.cmpi eq, %arg1, %c0_i32_8 : i32
    %10 = arith.extui %9 : i1 to i32
    %c0_i32_9 = arith.constant 0 : i32
    %11 = arith.cmpi ne, %10, %c0_i32_9 : i32
    scf.if %11 {
      %c0_10 = arith.constant 0 : index
      %c0_11 = arith.constant 0 : index
      %12 = vector.load %arg8[%c0_10, %c0_11] : memref<512x128xf32, #tpu.memory_space<vmem>>, vector<512x128xf32>
      %c0_12 = arith.constant 0 : index
      %c0_13 = arith.constant 0 : index
      %13 = vector.load %arg4[%c0_12, %c0_13] : memref<1x128xf32, #tpu.memory_space<vmem>>, vector<1x128xf32>
      %14 = vector.broadcast %13 : vector<1x128xf32> to vector<512x128xf32>
      %15 = arith.addf %12, %14 : vector<512x128xf32>
      %16 = tpu.iota {dimensions = array<i32: 0>} : vector<512x128xi32>
      %c512_i32 = arith.constant 512 : i32
      %17 = vector.broadcast %c512_i32 : i32 to vector<512x128xi32>
      %18 = arith.cmpi slt, %16, %17 : vector<512x128xi32>
      %cst_14 = arith.constant 0.000000e+00 : f32
      %19 = vector.broadcast %cst_14 : f32 to vector<512x128xf32>
      %20 = arith.select %18, %15, %19 : vector<512x128xi1>, vector<512x128xf32>
      %cst_15 = arith.constant dense<0.000000e+00> : vector<128xf32>
      %21 = vector.multi_reduction <add>, %20, %cst_15 [0] : vector<512x128xf32> to vector<128xf32>
      %22 = vector.shape_cast %21 : vector<128xf32> to vector<1x128xf32>
      %cst_16 = arith.constant 0.001953125 : f32
      %23 = vector.broadcast %cst_16 : f32 to vector<1x128xf32>
      %24 = arith.mulf %22, %23 : vector<1x128xf32>
      %25 = vector.broadcast %24 : vector<1x128xf32> to vector<512x128xf32>
      %26 = arith.subf %15, %25 : vector<512x128xf32>
      %cst_17 = arith.constant 0.000000e+00 : f32
      %27 = vector.broadcast %cst_17 : f32 to vector<512x128xf32>
      %28 = arith.select %18, %26, %27 : vector<512x128xi1>, vector<512x128xf32>
      %29 = arith.mulf %28, %28 : vector<512x128xf32>
      %cst_18 = arith.constant dense<0.000000e+00> : vector<128xf32>
      %30 = vector.multi_reduction <add>, %29, %cst_18 [0] : vector<512x128xf32> to vector<128xf32>
      %31 = vector.shape_cast %30 : vector<128xf32> to vector<1x128xf32>
      %cst_19 = arith.constant 0.001953125 : f32
      %32 = vector.broadcast %cst_19 : f32 to vector<1x128xf32>
      %33 = arith.mulf %31, %32 : vector<1x128xf32>
      %c0_20 = arith.constant 0 : index
      %c0_21 = arith.constant 0 : index
      %34 = vector.load %arg5[%c0_20, %c0_21] : memref<1x128xf32, #tpu.memory_space<vmem>>, vector<1x128xf32>
      %cst_22 = arith.constant 9.99999974E-6 : f32
      %35 = vector.broadcast %cst_22 : f32 to vector<1x128xf32>
      %36 = arith.addf %33, %35 : vector<1x128xf32>
      %37 = math.rsqrt %36 : vector<1x128xf32>
      %38 = arith.mulf %34, %37 : vector<1x128xf32>
      %c0_23 = arith.constant 0 : index
      %c0_24 = arith.constant 0 : index
      %39 = vector.load %arg6[%c0_23, %c0_24] : memref<1x128xf32, #tpu.memory_space<vmem>>, vector<1x128xf32>
      %40 = arith.mulf %24, %38 : vector<1x128xf32>
      %41 = arith.subf %39, %40 : vector<1x128xf32>
      %42 = vector.broadcast %38 : vector<1x128xf32> to vector<512x128xf32>
      %43 = arith.mulf %15, %42 : vector<512x128xf32>
      %44 = vector.broadcast %41 : vector<1x128xf32> to vector<512x128xf32>
      %45 = arith.addf %43, %44 : vector<512x128xf32>
      %cst_25 = arith.constant 0.000000e+00 : f32
      %46 = vector.broadcast %cst_25 : f32 to vector<512x128xf32>
      %47 = arith.cmpf ogt, %45, %46 : vector<512x128xf32>
      %cst_26 = arith.constant 2.000000e-01 : f32
      %48 = vector.broadcast %cst_26 : f32 to vector<512x128xf32>
      %49 = arith.mulf %48, %45 : vector<512x128xf32>
      %50 = arith.select %47, %45, %49 : vector<512x128xi1>, vector<512x128xf32>
      %51 = arith.truncf %50 : vector<512x128xf32> to vector<512x128xbf16>
      %c0_27 = arith.constant 0 : index
      %c0_28 = arith.constant 0 : index
      %52 = vector.load %arg7[%c0_27, %c0_28] : memref<512x128xbf16, #tpu.memory_space<vmem>>, vector<512x128xbf16>
      tpu.vector_store %arg7[%c0_27, %c0_28], %51 {strides = array<i32>} : memref<512x128xbf16, #tpu.memory_space<vmem>>, vector<512x128xbf16>,
    } else {
    }
    return
  }
  func.func @transform_0(%arg0: i32, %arg1: i32) -> (i32, i32) {
    %c0_i32 = arith.constant 0 : i32
    %c0_i32_0 = arith.constant 0 : i32
    return %c0_i32, %arg1 : i32, i32
  }
  func.func @transform_1(%arg0: i32, %arg1: i32) -> (i32, i32) {
    %c0_i32 = arith.constant 0 : i32
    return %arg1, %arg0 : i32, i32
  }
  func.func @transform_2(%arg0: i32, %arg1: i32) -> (i32, i32) {
    %c0_i32 = arith.constant 0 : i32
    %c0_i32_0 = arith.constant 0 : i32
    return %c0_i32, %arg0 : i32, i32
  }
  func.func @transform_3(%arg0: i32, %arg1: i32) -> (i32, i32) {
    %c0_i32 = arith.constant 0 : i32
    %c0_i32_0 = arith.constant 0 : i32
    return %c0_i32, %arg0 : i32, i32
  }
  func.func @transform_4(%arg0: i32, %arg1: i32) -> (i32, i32) {
    %c0_i32 = arith.constant 0 : i32
    %c0_i32_0 = arith.constant 0 : i32
    return %c0_i32, %arg0 : i32, i32
  }
  func.func @transform_5(%arg0: i32, %arg1: i32) -> (i32, i32) {
    %c0_i32 = arith.constant 0 : i32
    %c0_i32_0 = arith.constant 0 : i32
    return %c0_i32, %arg0 : i32, i32
  }
}

module attributes {stable_mosaic.version = 11 : i64} {
  func.func @_conv_bn_lrelu_kernel(%arg0: i32, %arg1: i32, %arg2: memref<128x896xbf16, #tpu.memory_space<vmem>>, %arg3: memref<896x128xbf16, #tpu.memory_space<vmem>>, %arg4: memref<1x128xf32, #tpu.memory_space<vmem>>, %arg5: memref<1x128xf32, #tpu.memory_space<vmem>>, %arg6: memref<1x128xf32, #tpu.memory_space<vmem>>, %arg7: memref<128x128xbf16, #tpu.memory_space<vmem>>, %arg8: memref<128x128xf32, #tpu.memory_space<vmem>>) attributes {dimension_semantics = [#tpu.dimension_semantics<parallel>, #tpu.dimension_semantics<arbitrary>], iteration_bounds = array<i64: 1, 1>, scalar_prefetch = 0 : i64, scratch_operands = 1 : i64, tpu.core_type = #tpu.core_type<tc>, window_params = [{transform_indices = @transform_0, window_bounds = array<i64: 128, 896>}, {transform_indices = @transform_1, window_bounds = array<i64: 896, 128>}, {transform_indices = @transform_2, window_bounds = array<i64: 1, 128>}, {transform_indices = @transform_3, window_bounds = array<i64: 1, 128>}, {transform_indices = @transform_4, window_bounds = array<i64: 1, 128>}, {transform_indices = @transform_5, window_bounds = array<i64: 128, 128>}]} {
    %c0_i32 = arith.constant 0 : i32
    %0 = arith.cmpi eq, %arg1, %c0_i32 : i32
    %1 = arith.extui %0 : i1 to i32
    %c0_i32_0 = arith.constant 0 : i32
    %2 = arith.cmpi ne, %1, %c0_i32_0 : i32
    scf.if %2 {
      %cst_10 = arith.constant 0.000000e+00 : f32
      %12 = vector.broadcast %cst_10 : f32 to vector<128x128xf32>
      %c0_11 = arith.constant 0 : index
      %c0_12 = arith.constant 0 : index
      %13 = vector.load %arg8[%c0_11, %c0_12] : memref<128x128xf32, #tpu.memory_space<vmem>>, vector<128x128xf32>
      tpu.vector_store %arg8[%c0_11, %c0_12], %12 {strides = array<i32>} : memref<128x128xf32, #tpu.memory_space<vmem>>, vector<128x128xf32>,
    } else {
    }
    %c0 = arith.constant 0 : index
    %c0_1 = arith.constant 0 : index
    %3 = vector.load %arg8[%c0, %c0_1] : memref<128x128xf32, #tpu.memory_space<vmem>>, vector<128x128xf32>
    %c0_2 = arith.constant 0 : index
    %c0_3 = arith.constant 0 : index
    %4 = vector.load %arg2[%c0_2, %c0_3] : memref<128x896xbf16, #tpu.memory_space<vmem>>, vector<128x896xbf16>
    %c0_4 = arith.constant 0 : index
    %c0_5 = arith.constant 0 : index
    %5 = vector.load %arg3[%c0_4, %c0_5] : memref<896x128xbf16, #tpu.memory_space<vmem>>, vector<896x128xbf16>
    %cst = arith.constant dense<0.000000e+00> : vector<128x128xf32>
    %6 = tpu.matmul %4, %5, %cst {dimension_numbers = #tpu.dot_dimension_numbers<[1], [0], [0], [1], [0, 0, 1, 1], [], []>} : vector<128x896xbf16>, vector<896x128xbf16>, vector<128x128xf32> -> vector<128x128xf32>
    %7 = arith.addf %3, %6 : vector<128x128xf32>
    %c0_6 = arith.constant 0 : index
    %c0_7 = arith.constant 0 : index
    %8 = vector.load %arg8[%c0_6, %c0_7] : memref<128x128xf32, #tpu.memory_space<vmem>>, vector<128x128xf32>
    tpu.vector_store %arg8[%c0_6, %c0_7], %7 {strides = array<i32>} : memref<128x128xf32, #tpu.memory_space<vmem>>, vector<128x128xf32>,
    %c0_i32_8 = arith.constant 0 : i32
    %9 = arith.cmpi eq, %arg1, %c0_i32_8 : i32
    %10 = arith.extui %9 : i1 to i32
    %c0_i32_9 = arith.constant 0 : i32
    %11 = arith.cmpi ne, %10, %c0_i32_9 : i32
    scf.if %11 {
      %c0_10 = arith.constant 0 : index
      %c0_11 = arith.constant 0 : index
      %12 = vector.load %arg8[%c0_10, %c0_11] : memref<128x128xf32, #tpu.memory_space<vmem>>, vector<128x128xf32>
      %c0_12 = arith.constant 0 : index
      %c0_13 = arith.constant 0 : index
      %13 = vector.load %arg4[%c0_12, %c0_13] : memref<1x128xf32, #tpu.memory_space<vmem>>, vector<1x128xf32>
      %14 = vector.broadcast %13 : vector<1x128xf32> to vector<128x128xf32>
      %15 = arith.addf %12, %14 : vector<128x128xf32>
      %16 = tpu.iota {dimensions = array<i32: 0>} : vector<128x128xi32>
      %c128_i32 = arith.constant 128 : i32
      %17 = vector.broadcast %c128_i32 : i32 to vector<128x128xi32>
      %18 = arith.cmpi slt, %16, %17 : vector<128x128xi32>
      %cst_14 = arith.constant 0.000000e+00 : f32
      %19 = vector.broadcast %cst_14 : f32 to vector<128x128xf32>
      %20 = arith.select %18, %15, %19 : vector<128x128xi1>, vector<128x128xf32>
      %cst_15 = arith.constant dense<0.000000e+00> : vector<128xf32>
      %21 = vector.multi_reduction <add>, %20, %cst_15 [0] : vector<128x128xf32> to vector<128xf32>
      %22 = vector.shape_cast %21 : vector<128xf32> to vector<1x128xf32>
      %cst_16 = arith.constant 7.812500e-03 : f32
      %23 = vector.broadcast %cst_16 : f32 to vector<1x128xf32>
      %24 = arith.mulf %22, %23 : vector<1x128xf32>
      %25 = vector.broadcast %24 : vector<1x128xf32> to vector<128x128xf32>
      %26 = arith.subf %15, %25 : vector<128x128xf32>
      %cst_17 = arith.constant 0.000000e+00 : f32
      %27 = vector.broadcast %cst_17 : f32 to vector<128x128xf32>
      %28 = arith.select %18, %26, %27 : vector<128x128xi1>, vector<128x128xf32>
      %29 = arith.mulf %28, %28 : vector<128x128xf32>
      %cst_18 = arith.constant dense<0.000000e+00> : vector<128xf32>
      %30 = vector.multi_reduction <add>, %29, %cst_18 [0] : vector<128x128xf32> to vector<128xf32>
      %31 = vector.shape_cast %30 : vector<128xf32> to vector<1x128xf32>
      %cst_19 = arith.constant 7.812500e-03 : f32
      %32 = vector.broadcast %cst_19 : f32 to vector<1x128xf32>
      %33 = arith.mulf %31, %32 : vector<1x128xf32>
      %c0_20 = arith.constant 0 : index
      %c0_21 = arith.constant 0 : index
      %34 = vector.load %arg5[%c0_20, %c0_21] : memref<1x128xf32, #tpu.memory_space<vmem>>, vector<1x128xf32>
      %cst_22 = arith.constant 9.99999974E-6 : f32
      %35 = vector.broadcast %cst_22 : f32 to vector<1x128xf32>
      %36 = arith.addf %33, %35 : vector<1x128xf32>
      %37 = math.rsqrt %36 : vector<1x128xf32>
      %38 = arith.mulf %34, %37 : vector<1x128xf32>
      %c0_23 = arith.constant 0 : index
      %c0_24 = arith.constant 0 : index
      %39 = vector.load %arg6[%c0_23, %c0_24] : memref<1x128xf32, #tpu.memory_space<vmem>>, vector<1x128xf32>
      %40 = arith.mulf %24, %38 : vector<1x128xf32>
      %41 = arith.subf %39, %40 : vector<1x128xf32>
      %42 = vector.broadcast %38 : vector<1x128xf32> to vector<128x128xf32>
      %43 = arith.mulf %15, %42 : vector<128x128xf32>
      %44 = vector.broadcast %41 : vector<1x128xf32> to vector<128x128xf32>
      %45 = arith.addf %43, %44 : vector<128x128xf32>
      %cst_25 = arith.constant 0.000000e+00 : f32
      %46 = vector.broadcast %cst_25 : f32 to vector<128x128xf32>
      %47 = arith.cmpf ogt, %45, %46 : vector<128x128xf32>
      %cst_26 = arith.constant 2.000000e-01 : f32
      %48 = vector.broadcast %cst_26 : f32 to vector<128x128xf32>
      %49 = arith.mulf %48, %45 : vector<128x128xf32>
      %50 = arith.select %47, %45, %49 : vector<128x128xi1>, vector<128x128xf32>
      %51 = arith.truncf %50 : vector<128x128xf32> to vector<128x128xbf16>
      %c0_27 = arith.constant 0 : index
      %c0_28 = arith.constant 0 : index
      %52 = vector.load %arg7[%c0_27, %c0_28] : memref<128x128xbf16, #tpu.memory_space<vmem>>, vector<128x128xbf16>
      tpu.vector_store %arg7[%c0_27, %c0_28], %51 {strides = array<i32>} : memref<128x128xbf16, #tpu.memory_space<vmem>>, vector<128x128xbf16>,
    } else {
    }
    return
  }
  func.func @transform_0(%arg0: i32, %arg1: i32) -> (i32, i32) {
    %c0_i32 = arith.constant 0 : i32
    %c0_i32_0 = arith.constant 0 : i32
    return %c0_i32, %arg1 : i32, i32
  }
  func.func @transform_1(%arg0: i32, %arg1: i32) -> (i32, i32) {
    %c0_i32 = arith.constant 0 : i32
    return %arg1, %arg0 : i32, i32
  }
  func.func @transform_2(%arg0: i32, %arg1: i32) -> (i32, i32) {
    %c0_i32 = arith.constant 0 : i32
    %c0_i32_0 = arith.constant 0 : i32
    return %c0_i32, %arg0 : i32, i32
  }
  func.func @transform_3(%arg0: i32, %arg1: i32) -> (i32, i32) {
    %c0_i32 = arith.constant 0 : i32
    %c0_i32_0 = arith.constant 0 : i32
    return %c0_i32, %arg0 : i32, i32
  }
  func.func @transform_4(%arg0: i32, %arg1: i32) -> (i32, i32) {
    %c0_i32 = arith.constant 0 : i32
    %c0_i32_0 = arith.constant 0 : i32
    return %c0_i32, %arg0 : i32, i32
  }
  func.func @transform_5(%arg0: i32, %arg1: i32) -> (i32, i32) {
    %c0_i32 = arith.constant 0 : i32
    %c0_i32_0 = arith.constant 0 : i32
    return %c0_i32, %arg0 : i32, i32
  }
}

module attributes {stable_mosaic.version = 11 : i64} {
  func.func @_conv_bn_lrelu_kernel(%arg0: i32, %arg1: i32, %arg2: memref<32x640xbf16, #tpu.memory_space<vmem>>, %arg3: memref<640x128xbf16, #tpu.memory_space<vmem>>, %arg4: memref<1x128xf32, #tpu.memory_space<vmem>>, %arg5: memref<1x128xf32, #tpu.memory_space<vmem>>, %arg6: memref<1x128xf32, #tpu.memory_space<vmem>>, %arg7: memref<32x128xbf16, #tpu.memory_space<vmem>>, %arg8: memref<32x128xf32, #tpu.memory_space<vmem>>) attributes {dimension_semantics = [#tpu.dimension_semantics<parallel>, #tpu.dimension_semantics<arbitrary>], iteration_bounds = array<i64: 2, 5>, scalar_prefetch = 0 : i64, scratch_operands = 1 : i64, tpu.core_type = #tpu.core_type<tc>, window_params = [{transform_indices = @transform_0, window_bounds = array<i64: 32, 640>}, {transform_indices = @transform_1, window_bounds = array<i64: 640, 128>}, {transform_indices = @transform_2, window_bounds = array<i64: 1, 128>}, {transform_indices = @transform_3, window_bounds = array<i64: 1, 128>}, {transform_indices = @transform_4, window_bounds = array<i64: 1, 128>}, {transform_indices = @transform_5, window_bounds = array<i64: 32, 128>}]} {
    %c0_i32 = arith.constant 0 : i32
    %0 = arith.cmpi eq, %arg1, %c0_i32 : i32
    %1 = arith.extui %0 : i1 to i32
    %c0_i32_0 = arith.constant 0 : i32
    %2 = arith.cmpi ne, %1, %c0_i32_0 : i32
    scf.if %2 {
      %cst_9 = arith.constant 0.000000e+00 : f32
      %12 = vector.broadcast %cst_9 : f32 to vector<32x128xf32>
      %c0_10 = arith.constant 0 : index
      %c0_11 = arith.constant 0 : index
      %13 = vector.load %arg8[%c0_10, %c0_11] : memref<32x128xf32, #tpu.memory_space<vmem>>, vector<32x128xf32>
      tpu.vector_store %arg8[%c0_10, %c0_11], %12 {strides = array<i32>} : memref<32x128xf32, #tpu.memory_space<vmem>>, vector<32x128xf32>,
    } else {
    }
    %c0 = arith.constant 0 : index
    %c0_1 = arith.constant 0 : index
    %3 = vector.load %arg8[%c0, %c0_1] : memref<32x128xf32, #tpu.memory_space<vmem>>, vector<32x128xf32>
    %c0_2 = arith.constant 0 : index
    %c0_3 = arith.constant 0 : index
    %4 = vector.load %arg2[%c0_2, %c0_3] : memref<32x640xbf16, #tpu.memory_space<vmem>>, vector<32x640xbf16>
    %c0_4 = arith.constant 0 : index
    %c0_5 = arith.constant 0 : index
    %5 = vector.load %arg3[%c0_4, %c0_5] : memref<640x128xbf16, #tpu.memory_space<vmem>>, vector<640x128xbf16>
    %cst = arith.constant dense<0.000000e+00> : vector<32x128xf32>
    %6 = tpu.matmul %4, %5, %cst {dimension_numbers = #tpu.dot_dimension_numbers<[1], [0], [0], [1], [0, 0, 1, 1], [], []>} : vector<32x640xbf16>, vector<640x128xbf16>, vector<32x128xf32> -> vector<32x128xf32>
    %7 = arith.addf %3, %6 : vector<32x128xf32>
    %c0_6 = arith.constant 0 : index
    %c0_7 = arith.constant 0 : index
    %8 = vector.load %arg8[%c0_6, %c0_7] : memref<32x128xf32, #tpu.memory_space<vmem>>, vector<32x128xf32>
    tpu.vector_store %arg8[%c0_6, %c0_7], %7 {strides = array<i32>} : memref<32x128xf32, #tpu.memory_space<vmem>>, vector<32x128xf32>,
    %c4_i32 = arith.constant 4 : i32
    %9 = arith.cmpi eq, %arg1, %c4_i32 : i32
    %10 = arith.extui %9 : i1 to i32
    %c0_i32_8 = arith.constant 0 : i32
    %11 = arith.cmpi ne, %10, %c0_i32_8 : i32
    scf.if %11 {
      %c0_9 = arith.constant 0 : index
      %c0_10 = arith.constant 0 : index
      %12 = vector.load %arg8[%c0_9, %c0_10] : memref<32x128xf32, #tpu.memory_space<vmem>>, vector<32x128xf32>
      %c0_11 = arith.constant 0 : index
      %c0_12 = arith.constant 0 : index
      %13 = vector.load %arg4[%c0_11, %c0_12] : memref<1x128xf32, #tpu.memory_space<vmem>>, vector<1x128xf32>
      %14 = vector.broadcast %13 : vector<1x128xf32> to vector<32x128xf32>
      %15 = arith.addf %12, %14 : vector<32x128xf32>
      %16 = tpu.iota {dimensions = array<i32: 0>} : vector<32x128xi32>
      %c32_i32 = arith.constant 32 : i32
      %17 = vector.broadcast %c32_i32 : i32 to vector<32x128xi32>
      %18 = arith.cmpi slt, %16, %17 : vector<32x128xi32>
      %cst_13 = arith.constant 0.000000e+00 : f32
      %19 = vector.broadcast %cst_13 : f32 to vector<32x128xf32>
      %20 = arith.select %18, %15, %19 : vector<32x128xi1>, vector<32x128xf32>
      %cst_14 = arith.constant dense<0.000000e+00> : vector<128xf32>
      %21 = vector.multi_reduction <add>, %20, %cst_14 [0] : vector<32x128xf32> to vector<128xf32>
      %22 = vector.shape_cast %21 : vector<128xf32> to vector<1x128xf32>
      %cst_15 = arith.constant 3.125000e-02 : f32
      %23 = vector.broadcast %cst_15 : f32 to vector<1x128xf32>
      %24 = arith.mulf %22, %23 : vector<1x128xf32>
      %25 = vector.broadcast %24 : vector<1x128xf32> to vector<32x128xf32>
      %26 = arith.subf %15, %25 : vector<32x128xf32>
      %cst_16 = arith.constant 0.000000e+00 : f32
      %27 = vector.broadcast %cst_16 : f32 to vector<32x128xf32>
      %28 = arith.select %18, %26, %27 : vector<32x128xi1>, vector<32x128xf32>
      %29 = arith.mulf %28, %28 : vector<32x128xf32>
      %cst_17 = arith.constant dense<0.000000e+00> : vector<128xf32>
      %30 = vector.multi_reduction <add>, %29, %cst_17 [0] : vector<32x128xf32> to vector<128xf32>
      %31 = vector.shape_cast %30 : vector<128xf32> to vector<1x128xf32>
      %cst_18 = arith.constant 3.125000e-02 : f32
      %32 = vector.broadcast %cst_18 : f32 to vector<1x128xf32>
      %33 = arith.mulf %31, %32 : vector<1x128xf32>
      %c0_19 = arith.constant 0 : index
      %c0_20 = arith.constant 0 : index
      %34 = vector.load %arg5[%c0_19, %c0_20] : memref<1x128xf32, #tpu.memory_space<vmem>>, vector<1x128xf32>
      %cst_21 = arith.constant 9.99999974E-6 : f32
      %35 = vector.broadcast %cst_21 : f32 to vector<1x128xf32>
      %36 = arith.addf %33, %35 : vector<1x128xf32>
      %37 = math.rsqrt %36 : vector<1x128xf32>
      %38 = arith.mulf %34, %37 : vector<1x128xf32>
      %c0_22 = arith.constant 0 : index
      %c0_23 = arith.constant 0 : index
      %39 = vector.load %arg6[%c0_22, %c0_23] : memref<1x128xf32, #tpu.memory_space<vmem>>, vector<1x128xf32>
      %40 = arith.mulf %24, %38 : vector<1x128xf32>
      %41 = arith.subf %39, %40 : vector<1x128xf32>
      %42 = vector.broadcast %38 : vector<1x128xf32> to vector<32x128xf32>
      %43 = arith.mulf %15, %42 : vector<32x128xf32>
      %44 = vector.broadcast %41 : vector<1x128xf32> to vector<32x128xf32>
      %45 = arith.addf %43, %44 : vector<32x128xf32>
      %cst_24 = arith.constant 0.000000e+00 : f32
      %46 = vector.broadcast %cst_24 : f32 to vector<32x128xf32>
      %47 = arith.cmpf ogt, %45, %46 : vector<32x128xf32>
      %cst_25 = arith.constant 2.000000e-01 : f32
      %48 = vector.broadcast %cst_25 : f32 to vector<32x128xf32>
      %49 = arith.mulf %48, %45 : vector<32x128xf32>
      %50 = arith.select %47, %45, %49 : vector<32x128xi1>, vector<32x128xf32>
      %51 = arith.truncf %50 : vector<32x128xf32> to vector<32x128xbf16>
      %c0_26 = arith.constant 0 : index
      %c0_27 = arith.constant 0 : index
      %52 = vector.load %arg7[%c0_26, %c0_27] : memref<32x128xbf16, #tpu.memory_space<vmem>>, vector<32x128xbf16>
      tpu.vector_store %arg7[%c0_26, %c0_27], %51 {strides = array<i32>} : memref<32x128xbf16, #tpu.memory_space<vmem>>, vector<32x128xbf16>,
    } else {
    }
    return
  }
  func.func @transform_0(%arg0: i32, %arg1: i32) -> (i32, i32) {
    %c0_i32 = arith.constant 0 : i32
    %c0_i32_0 = arith.constant 0 : i32
    return %c0_i32, %arg1 : i32, i32
  }
  func.func @transform_1(%arg0: i32, %arg1: i32) -> (i32, i32) {
    %c0_i32 = arith.constant 0 : i32
    return %arg1, %arg0 : i32, i32
  }
  func.func @transform_2(%arg0: i32, %arg1: i32) -> (i32, i32) {
    %c0_i32 = arith.constant 0 : i32
    %c0_i32_0 = arith.constant 0 : i32
    return %c0_i32, %arg0 : i32, i32
  }
  func.func @transform_3(%arg0: i32, %arg1: i32) -> (i32, i32) {
    %c0_i32 = arith.constant 0 : i32
    %c0_i32_0 = arith.constant 0 : i32
    return %c0_i32, %arg0 : i32, i32
  }
  func.func @transform_4(%arg0: i32, %arg1: i32) -> (i32, i32) {
    %c0_i32 = arith.constant 0 : i32
    %c0_i32_0 = arith.constant 0 : i32
    return %c0_i32, %arg0 : i32, i32
  }
  func.func @transform_5(%arg0: i32, %arg1: i32) -> (i32, i32) {
    %c0_i32 = arith.constant 0 : i32
    %c0_i32_0 = arith.constant 0 : i32
    return %c0_i32, %arg0 : i32, i32
  }
}

module attributes {stable_mosaic.version = 11 : i64} {
  func.func @_conv_bn_lrelu_kernel(%arg0: i32, %arg1: i32, %arg2: memref<16x1280xbf16, #tpu.memory_space<vmem>>, %arg3: memref<1280x128xbf16, #tpu.memory_space<vmem>>, %arg4: memref<1x128xf32, #tpu.memory_space<vmem>>, %arg5: memref<1x128xf32, #tpu.memory_space<vmem>>, %arg6: memref<1x128xf32, #tpu.memory_space<vmem>>, %arg7: memref<16x128xbf16, #tpu.memory_space<vmem>>, %arg8: memref<16x128xf32, #tpu.memory_space<vmem>>) attributes {dimension_semantics = [#tpu.dimension_semantics<parallel>, #tpu.dimension_semantics<arbitrary>], iteration_bounds = array<i64: 2, 5>, scalar_prefetch = 0 : i64, scratch_operands = 1 : i64, tpu.core_type = #tpu.core_type<tc>, window_params = [{transform_indices = @transform_0, window_bounds = array<i64: 16, 1280>}, {transform_indices = @transform_1, window_bounds = array<i64: 1280, 128>}, {transform_indices = @transform_2, window_bounds = array<i64: 1, 128>}, {transform_indices = @transform_3, window_bounds = array<i64: 1, 128>}, {transform_indices = @transform_4, window_bounds = array<i64: 1, 128>}, {transform_indices = @transform_5, window_bounds = array<i64: 16, 128>}]} {
    %c0_i32 = arith.constant 0 : i32
    %0 = arith.cmpi eq, %arg1, %c0_i32 : i32
    %1 = arith.extui %0 : i1 to i32
    %c0_i32_0 = arith.constant 0 : i32
    %2 = arith.cmpi ne, %1, %c0_i32_0 : i32
    scf.if %2 {
      %cst_9 = arith.constant 0.000000e+00 : f32
      %12 = vector.broadcast %cst_9 : f32 to vector<16x128xf32>
      %c0_10 = arith.constant 0 : index
      %c0_11 = arith.constant 0 : index
      %13 = vector.load %arg8[%c0_10, %c0_11] : memref<16x128xf32, #tpu.memory_space<vmem>>, vector<16x128xf32>
      tpu.vector_store %arg8[%c0_10, %c0_11], %12 {strides = array<i32>} : memref<16x128xf32, #tpu.memory_space<vmem>>, vector<16x128xf32>,
    } else {
    }
    %c0 = arith.constant 0 : index
    %c0_1 = arith.constant 0 : index
    %3 = vector.load %arg8[%c0, %c0_1] : memref<16x128xf32, #tpu.memory_space<vmem>>, vector<16x128xf32>
    %c0_2 = arith.constant 0 : index
    %c0_3 = arith.constant 0 : index
    %4 = vector.load %arg2[%c0_2, %c0_3] : memref<16x1280xbf16, #tpu.memory_space<vmem>>, vector<16x1280xbf16>
    %c0_4 = arith.constant 0 : index
    %c0_5 = arith.constant 0 : index
    %5 = vector.load %arg3[%c0_4, %c0_5] : memref<1280x128xbf16, #tpu.memory_space<vmem>>, vector<1280x128xbf16>
    %cst = arith.constant dense<0.000000e+00> : vector<16x128xf32>
    %6 = tpu.matmul %4, %5, %cst {dimension_numbers = #tpu.dot_dimension_numbers<[1], [0], [0], [1], [0, 0, 1, 1], [], []>} : vector<16x1280xbf16>, vector<1280x128xbf16>, vector<16x128xf32> -> vector<16x128xf32>
    %7 = arith.addf %3, %6 : vector<16x128xf32>
    %c0_6 = arith.constant 0 : index
    %c0_7 = arith.constant 0 : index
    %8 = vector.load %arg8[%c0_6, %c0_7] : memref<16x128xf32, #tpu.memory_space<vmem>>, vector<16x128xf32>
    tpu.vector_store %arg8[%c0_6, %c0_7], %7 {strides = array<i32>} : memref<16x128xf32, #tpu.memory_space<vmem>>, vector<16x128xf32>,
    %c4_i32 = arith.constant 4 : i32
    %9 = arith.cmpi eq, %arg1, %c4_i32 : i32
    %10 = arith.extui %9 : i1 to i32
    %c0_i32_8 = arith.constant 0 : i32
    %11 = arith.cmpi ne, %10, %c0_i32_8 : i32
    scf.if %11 {
      %c0_9 = arith.constant 0 : index
      %c0_10 = arith.constant 0 : index
      %12 = vector.load %arg8[%c0_9, %c0_10] : memref<16x128xf32, #tpu.memory_space<vmem>>, vector<16x128xf32>
      %c0_11 = arith.constant 0 : index
      %c0_12 = arith.constant 0 : index
      %13 = vector.load %arg4[%c0_11, %c0_12] : memref<1x128xf32, #tpu.memory_space<vmem>>, vector<1x128xf32>
      %14 = vector.broadcast %13 : vector<1x128xf32> to vector<16x128xf32>
      %15 = arith.addf %12, %14 : vector<16x128xf32>
      %16 = tpu.iota {dimensions = array<i32: 0>} : vector<16x128xi32>
      %c8_i32 = arith.constant 8 : i32
      %17 = vector.broadcast %c8_i32 : i32 to vector<16x128xi32>
      %18 = arith.cmpi slt, %16, %17 : vector<16x128xi32>
      %cst_13 = arith.constant 0.000000e+00 : f32
      %19 = vector.broadcast %cst_13 : f32 to vector<16x128xf32>
      %20 = arith.select %18, %15, %19 : vector<16x128xi1>, vector<16x128xf32>
      %cst_14 = arith.constant dense<0.000000e+00> : vector<128xf32>
      %21 = vector.multi_reduction <add>, %20, %cst_14 [0] : vector<16x128xf32> to vector<128xf32>
      %22 = vector.shape_cast %21 : vector<128xf32> to vector<1x128xf32>
      %cst_15 = arith.constant 1.250000e-01 : f32
      %23 = vector.broadcast %cst_15 : f32 to vector<1x128xf32>
      %24 = arith.mulf %22, %23 : vector<1x128xf32>
      %25 = vector.broadcast %24 : vector<1x128xf32> to vector<16x128xf32>
      %26 = arith.subf %15, %25 : vector<16x128xf32>
      %cst_16 = arith.constant 0.000000e+00 : f32
      %27 = vector.broadcast %cst_16 : f32 to vector<16x128xf32>
      %28 = arith.select %18, %26, %27 : vector<16x128xi1>, vector<16x128xf32>
      %29 = arith.mulf %28, %28 : vector<16x128xf32>
      %cst_17 = arith.constant dense<0.000000e+00> : vector<128xf32>
      %30 = vector.multi_reduction <add>, %29, %cst_17 [0] : vector<16x128xf32> to vector<128xf32>
      %31 = vector.shape_cast %30 : vector<128xf32> to vector<1x128xf32>
      %cst_18 = arith.constant 1.250000e-01 : f32
      %32 = vector.broadcast %cst_18 : f32 to vector<1x128xf32>
      %33 = arith.mulf %31, %32 : vector<1x128xf32>
      %c0_19 = arith.constant 0 : index
      %c0_20 = arith.constant 0 : index
      %34 = vector.load %arg5[%c0_19, %c0_20] : memref<1x128xf32, #tpu.memory_space<vmem>>, vector<1x128xf32>
      %cst_21 = arith.constant 9.99999974E-6 : f32
      %35 = vector.broadcast %cst_21 : f32 to vector<1x128xf32>
      %36 = arith.addf %33, %35 : vector<1x128xf32>
      %37 = math.rsqrt %36 : vector<1x128xf32>
      %38 = arith.mulf %34, %37 : vector<1x128xf32>
      %c0_22 = arith.constant 0 : index
      %c0_23 = arith.constant 0 : index
      %39 = vector.load %arg6[%c0_22, %c0_23] : memref<1x128xf32, #tpu.memory_space<vmem>>, vector<1x128xf32>
      %40 = arith.mulf %24, %38 : vector<1x128xf32>
      %41 = arith.subf %39, %40 : vector<1x128xf32>
      %42 = vector.broadcast %38 : vector<1x128xf32> to vector<16x128xf32>
      %43 = arith.mulf %15, %42 : vector<16x128xf32>
      %44 = vector.broadcast %41 : vector<1x128xf32> to vector<16x128xf32>
      %45 = arith.addf %43, %44 : vector<16x128xf32>
      %cst_24 = arith.constant 0.000000e+00 : f32
      %46 = vector.broadcast %cst_24 : f32 to vector<16x128xf32>
      %47 = arith.cmpf ogt, %45, %46 : vector<16x128xf32>
      %cst_25 = arith.constant 2.000000e-01 : f32
      %48 = vector.broadcast %cst_25 : f32 to vector<16x128xf32>
      %49 = arith.mulf %48, %45 : vector<16x128xf32>
      %50 = arith.select %47, %45, %49 : vector<16x128xi1>, vector<16x128xf32>
      %51 = arith.truncf %50 : vector<16x128xf32> to vector<16x128xbf16>
      %c0_26 = arith.constant 0 : index
      %c0_27 = arith.constant 0 : index
      %52 = vector.load %arg7[%c0_26, %c0_27] : memref<16x128xbf16, #tpu.memory_space<vmem>>, vector<16x128xbf16>
      tpu.vector_store %arg7[%c0_26, %c0_27], %51 {strides = array<i32>} : memref<16x128xbf16, #tpu.memory_space<vmem>>, vector<16x128xbf16>,
    } else {
    }
    return
  }
  func.func @transform_0(%arg0: i32, %arg1: i32) -> (i32, i32) {
    %c0_i32 = arith.constant 0 : i32
    %c0_i32_0 = arith.constant 0 : i32
    return %c0_i32, %arg1 : i32, i32
  }
  func.func @transform_1(%arg0: i32, %arg1: i32) -> (i32, i32) {
    %c0_i32 = arith.constant 0 : i32
    return %arg1, %arg0 : i32, i32
  }
  func.func @transform_2(%arg0: i32, %arg1: i32) -> (i32, i32) {
    %c0_i32 = arith.constant 0 : i32
    %c0_i32_0 = arith.constant 0 : i32
    return %c0_i32, %arg0 : i32, i32
  }
  func.func @transform_3(%arg0: i32, %arg1: i32) -> (i32, i32) {
    %c0_i32 = arith.constant 0 : i32
    %c0_i32_0 = arith.constant 0 : i32
    return %c0_i32, %arg0 : i32, i32
  }
  func.func @transform_4(%arg0: i32, %arg1: i32) -> (i32, i32) {
    %c0_i32 = arith.constant 0 : i32
    %c0_i32_0 = arith.constant 0 : i32
    return %c0_i32, %arg0 : i32, i32
  }
  func.func @transform_5(%arg0: i32, %arg1: i32) -> (i32, i32) {
    %c0_i32 = arith.constant 0 : i32
    %c0_i32_0 = arith.constant 0 : i32
    return %c0_i32, %arg0 : i32, i32
  }
}

module attributes {stable_mosaic.version = 11 : i64} {
  func.func @_fc_head_kernel(%arg0: i32, %arg1: memref<16x256xbf16, #tpu.memory_space<vmem>>, %arg2: memref<256x2048xbf16, #tpu.memory_space<vmem>>, %arg3: memref<1x2048xf32, #tpu.memory_space<vmem>>, %arg4: memref<1x2048xf32, #tpu.memory_space<vmem>>, %arg5: memref<1x1xf32, #tpu.memory_space<vmem>>, %arg6: memref<16x1xf32, #tpu.memory_space<vmem>>, %arg7: memref<16x2048xf32, #tpu.memory_space<vmem>>) attributes {dimension_semantics = [#tpu.dimension_semantics<arbitrary>], iteration_bounds = array<i64: 4>, scalar_prefetch = 0 : i64, scratch_operands = 1 : i64, tpu.core_type = #tpu.core_type<tc>, window_params = [{transform_indices = @transform_0, window_bounds = array<i64: 16, 256>}, {transform_indices = @transform_1, window_bounds = array<i64: 256, 2048>}, {pipeline_mode = #tpu.pipeline_mode<synchronous>, transform_indices = @transform_2, window_bounds = array<i64: 1, 2048>}, {pipeline_mode = #tpu.pipeline_mode<synchronous>, transform_indices = @transform_3, window_bounds = array<i64: 1, 2048>}, {pipeline_mode = #tpu.pipeline_mode<synchronous>, transform_indices = @transform_4, window_bounds = array<i64: 1, 1>}, {pipeline_mode = #tpu.pipeline_mode<synchronous>, transform_indices = @transform_5, window_bounds = array<i64: 16, 1>}]} {
    %c0_i32 = arith.constant 0 : i32
    %0 = arith.cmpi eq, %arg0, %c0_i32 : i32
    %1 = arith.extui %0 : i1 to i32
    %c0_i32_0 = arith.constant 0 : i32
    %2 = arith.cmpi ne, %1, %c0_i32_0 : i32
    scf.if %2 {
      %cst_9 = arith.constant 0.000000e+00 : f32
      %12 = vector.broadcast %cst_9 : f32 to vector<16x2048xf32>
      %c0_10 = arith.constant 0 : index
      %c0_11 = arith.constant 0 : index
      %13 = vector.load %arg7[%c0_10, %c0_11] : memref<16x2048xf32, #tpu.memory_space<vmem>>, vector<16x2048xf32>
      tpu.vector_store %arg7[%c0_10, %c0_11], %12 {strides = array<i32>} : memref<16x2048xf32, #tpu.memory_space<vmem>>, vector<16x2048xf32>,
    } else {
    }
    %c0 = arith.constant 0 : index
    %c0_1 = arith.constant 0 : index
    %3 = vector.load %arg7[%c0, %c0_1] : memref<16x2048xf32, #tpu.memory_space<vmem>>, vector<16x2048xf32>
    %c0_2 = arith.constant 0 : index
    %c0_3 = arith.constant 0 : index
    %4 = vector.load %arg1[%c0_2, %c0_3] : memref<16x256xbf16, #tpu.memory_space<vmem>>, vector<16x256xbf16>
    %c0_4 = arith.constant 0 : index
    %c0_5 = arith.constant 0 : index
    %5 = vector.load %arg2[%c0_4, %c0_5] : memref<256x2048xbf16, #tpu.memory_space<vmem>>, vector<256x2048xbf16>
    %cst = arith.constant dense<0.000000e+00> : vector<16x2048xf32>
    %6 = tpu.matmul %4, %5, %cst {dimension_numbers = #tpu.dot_dimension_numbers<[1], [0], [0], [1], [0, 0, 1, 1], [], []>} : vector<16x256xbf16>, vector<256x2048xbf16>, vector<16x2048xf32> -> vector<16x2048xf32>
    %7 = arith.addf %3, %6 : vector<16x2048xf32>
    %c0_6 = arith.constant 0 : index
    %c0_7 = arith.constant 0 : index
    %8 = vector.load %arg7[%c0_6, %c0_7] : memref<16x2048xf32, #tpu.memory_space<vmem>>, vector<16x2048xf32>
    tpu.vector_store %arg7[%c0_6, %c0_7], %7 {strides = array<i32>} : memref<16x2048xf32, #tpu.memory_space<vmem>>, vector<16x2048xf32>,
    %c3_i32 = arith.constant 3 : i32
    %9 = arith.cmpi eq, %arg0, %c3_i32 : i32
    %10 = arith.extui %9 : i1 to i32
    %c0_i32_8 = arith.constant 0 : i32
    %11 = arith.cmpi ne, %10, %c0_i32_8 : i32
    scf.if %11 {
      %c0_9 = arith.constant 0 : index
      %c0_10 = arith.constant 0 : index
      %12 = vector.load %arg7[%c0_9, %c0_10] : memref<16x2048xf32, #tpu.memory_space<vmem>>, vector<16x2048xf32>
      %c0_11 = arith.constant 0 : index
      %c0_12 = arith.constant 0 : index
      %13 = vector.load %arg3[%c0_11, %c0_12] : memref<1x2048xf32, #tpu.memory_space<vmem>>, vector<1x2048xf32>
      %14 = vector.broadcast %13 : vector<1x2048xf32> to vector<16x2048xf32>
      %15 = arith.addf %12, %14 : vector<16x2048xf32>
      %cst_13 = arith.constant 0.000000e+00 : f32
      %16 = vector.broadcast %cst_13 : f32 to vector<16x2048xf32>
      %17 = arith.cmpf ogt, %15, %16 : vector<16x2048xf32>
      %cst_14 = arith.constant 2.000000e-01 : f32
      %18 = vector.broadcast %cst_14 : f32 to vector<16x2048xf32>
      %19 = arith.mulf %18, %15 : vector<16x2048xf32>
      %20 = arith.select %17, %15, %19 : vector<16x2048xi1>, vector<16x2048xf32>
      %c0_15 = arith.constant 0 : index
      %c0_16 = arith.constant 0 : index
      %21 = vector.load %arg4[%c0_15, %c0_16] : memref<1x2048xf32, #tpu.memory_space<vmem>>, vector<1x2048xf32>
      %22 = vector.broadcast %21 : vector<1x2048xf32> to vector<16x2048xf32>
      %23 = arith.mulf %20, %22 : vector<16x2048xf32>
      %cst_17 = arith.constant dense<0.000000e+00> : vector<16xf32>
      %24 = vector.multi_reduction <add>, %23, %cst_17 [1] : vector<16x2048xf32> to vector<16xf32>
      %25 = vector.shape_cast %24 : vector<16xf32> to vector<16x1xf32>
      %c0_18 = arith.constant 0 : index
      %c0_19 = arith.constant 0 : index
      %26 = vector.load %arg5[%c0_18, %c0_19] : memref<1x1xf32, #tpu.memory_space<vmem>>, vector<1x1xf32>
      %27 = vector.broadcast %26 : vector<1x1xf32> to vector<16x1xf32>
      %28 = arith.addf %25, %27 : vector<16x1xf32>
      %cst_20 = arith.constant 5.000000e-01 : f32
      %29 = vector.broadcast %cst_20 : f32 to vector<16x1xf32>
      %30 = arith.mulf %29, %28 : vector<16x1xf32>
      %31 = math.tanh %30 : vector<16x1xf32>
      %cst_21 = arith.constant 1.000000e+00 : f32
      %32 = vector.broadcast %cst_21 : f32 to vector<16x1xf32>
      %33 = arith.addf %31, %32 : vector<16x1xf32>
      %cst_22 = arith.constant 5.000000e-01 : f32
      %34 = vector.broadcast %cst_22 : f32 to vector<16x1xf32>
      %35 = arith.mulf %34, %33 : vector<16x1xf32>
      %c0_23 = arith.constant 0 : index
      %c0_24 = arith.constant 0 : index
      %36 = vector.load %arg6[%c0_23, %c0_24] : memref<16x1xf32, #tpu.memory_space<vmem>>, vector<16x1xf32>
      tpu.vector_store %arg6[%c0_23, %c0_24], %35 {strides = array<i32>} : memref<16x1xf32, #tpu.memory_space<vmem>>, vector<16x1xf32>,
    } else {
    }
    return
  }
  func.func @transform_0(%arg0: i32) -> (i32, i32) {
    %c0_i32 = arith.constant 0 : i32
    %c0_i32_0 = arith.constant 0 : i32
    return %c0_i32, %arg0 : i32, i32
  }
  func.func @transform_1(%arg0: i32) -> (i32, i32) {
    %c0_i32 = arith.constant 0 : i32
    %c0_i32_0 = arith.constant 0 : i32
    return %arg0, %c0_i32 : i32, i32
  }
  func.func @transform_2(%arg0: i32) -> (i32, i32) {
    %c0_i32 = arith.constant 0 : i32
    %c0_i32_0 = arith.constant 0 : i32
    %c0_i32_1 = arith.constant 0 : i32
    return %c0_i32, %c0_i32_0 : i32, i32
  }
  func.func @transform_3(%arg0: i32) -> (i32, i32) {
    %c0_i32 = arith.constant 0 : i32
    %c0_i32_0 = arith.constant 0 : i32
    %c0_i32_1 = arith.constant 0 : i32
    return %c0_i32, %c0_i32_0 : i32, i32
  }
  func.func @transform_4(%arg0: i32) -> (i32, i32) {
    %c0_i32 = arith.constant 0 : i32
    %c0_i32_0 = arith.constant 0 : i32
    %c0_i32_1 = arith.constant 0 : i32
    return %c0_i32, %c0_i32_0 : i32, i32
  }
  func.func @transform_5(%arg0: i32) -> (i32, i32) {
    %c0_i32 = arith.constant 0 : i32
    %c0_i32_0 = arith.constant 0 : i32
    %c0_i32_1 = arith.constant 0 : i32
    return %c0_i32, %c0_i32_0 : i32, i32
  }
}

</mosaic_0001>

<bundles_post_ra>
// kernel: _lambda_.5
= control target key start
LH: loop header
LB: loop body
LE: loop exit
PB: predicated region body
PF: predicated region fallthrough
CT: control target
= control target key end

     0   :  { %s4588_s1 = inlined_call_operand.vmem [shape: bf16[128,128], index: 1, kind: input, shape index: {}]   ;;  %s4589_s0 = inlined_call_operand.vmem [shape: bf16[512,128], index: 0, kind: input, shape index: {}]   ;;  %s4590_s2 = inlined_call_operand.vmem [shape: f32[1,128], index: 2, kind: input, shape index: {}]   ;;  %s4591_s3 = inlined_call_operand.vmem [shape: f32[1,128], index: 3, kind: input, shape index: {}]   ;;  %s4592_s4 = inlined_call_operand.vmem [shape: f32[1,128], index: 4, kind: input, shape index: {}]   ;;  %s4593_s5 = inlined_call_operand.vmem [shape: bf16[512,128], index: 5, kind: output, shape index: {}]  }
   0x1   :  { %v2712_v0 = vld [vmem:[%s4588_s1 + $0x38] sm:$0xff]   ;;  %v2713_v1 = vld [vmem:[%s4588_s1 + $0x30] sm:$0xff]   ;;  %v2714_v2 = vld [vmem:[%s4588_s1 + $0x28] sm:$0xff]  }
   0x2   :  { %2616 = vmatprep.subr.bf16.mxu0 %v2712_v0  ;;  %2696 = vmatprep.subr.bf16.mxu1 %v2712_v0  ;;  %v2715_v3 = vld [vmem:[%s4588_s1 + $0x20] sm:$0xff]   ;;  %v2716_v5 = vld [vmem:[%s4588_s1 + $0x18] sm:$0xff]   ;;  %v2717_v6 = vld [vmem:[%s4588_s1 + $0x10] sm:$0xff]  }
   0x3   :  { %2617 = vmatpush3.bf16.msra.mxu0 %v2712_v0  ;;  %2704 = vmatpush3.bf16.msra.mxu1 %v2712_v0  ;;  %v2720_v4 = vld [vmem:[%s4589_s0] sm:$0xff]   ;;  %v2718_v7 = vld [vmem:[%s4588_s1 + $0x8] sm:$0xff]   ;;  %v2722_v11 = vld [vmem:[%s4589_s0 + $0x10] sm:$0xff]  }
   0x4   :  { %2618 = vmatprep.subr.bf16.mxu0 %v2713_v1  ;;  %2697 = vmatprep.subr.bf16.mxu1 %v2713_v1  ;;  %v2719_v8 = vld [vmem:[%s4588_s1] sm:$0xff]   ;;  %v2721_v10 = vld [vmem:[%s4589_s0 + $0x8] sm:$0xff]   ;;  %v2738_v13 = vld [vmem:[%s4589_s0 + $0x90] sm:$0xff]  }
   0x5   :  { %2632 = vmatprep.mubr.bf16.mxu0 %v2720_v4  ;;  %v2736_v9 = vld [vmem:[%s4589_s0 + $0x80] sm:$0xff]   ;;  %v2737_v12 = vld [vmem:[%s4589_s0 + $0x88] sm:$0xff]   ;;  %v2723_v14 = vld [vmem:[%s4589_s0 + $0x18] sm:$0xff]  }
   0x6   :  { %2664 = vmatprep.mubr.bf16.mxu1 %v2736_v9  ;;  %v2724_v15 = vld [vmem:[%s4589_s0 + $0x20] sm:$0xff]   ;;  %v2739_v16 = vld [vmem:[%s4589_s0 + $0x98] sm:$0xff]   ;;  %v2725_v18 = vld [vmem:[%s4589_s0 + $0x28] sm:$0xff]  }
   0x7   :  { %2619 = vmatpush3.bf16.msra.mxu0 %v2713_v1  ;;  %2705 = vmatpush3.bf16.msra.mxu1 %v2713_v1  ;;  %v2740_v17 = vld [vmem:[%s4589_s0 + $0xa0] sm:$0xff]   ;;  %v2741_v19 = vld [vmem:[%s4589_s0 + $0xa8] sm:$0xff]   ;;  %v2726_v20 = vld [vmem:[%s4589_s0 + $0x30] sm:$0xff]  }
   0x8   :  { %2620 = vmatprep.subr.bf16.mxu0 %v2714_v2  ;;  %2698 = vmatprep.subr.bf16.mxu1 %v2714_v2  ;;  %v2742_v21 = vld [vmem:[%s4589_s0 + $0xb0] sm:$0xff]   ;;  %v2727_v22 = vld [vmem:[%s4589_s0 + $0x38] sm:$0xff]   ;;  %v2728_v24 = vld [vmem:[%s4589_s0 + $0x40] sm:$0xff]  }
   0x9   :  { %v2743_v23 = vld [vmem:[%s4589_s0 + $0xb8] sm:$0xff]   ;;  %v2744_v25 = vld [vmem:[%s4589_s0 + $0xc0] sm:$0xff]   ;;  %v2729_v26 = vld [vmem:[%s4589_s0 + $0x48] sm:$0xff]  }
   0xa   :  { %v2745_v27 = vld [vmem:[%s4589_s0 + $0xc8] sm:$0xff]   ;;  %v2730_v28 = vld [vmem:[%s4589_s0 + $0x50] sm:$0xff]   ;;  %v2731_v30 = vld [vmem:[%s4589_s0 + $0x58] sm:$0xff]  }
   0xb   :  { %2621 = vmatpush3.bf16.msra.mxu0 %v2714_v2  ;;  %2706 = vmatpush3.bf16.msra.mxu1 %v2714_v2  ;;  %v2746_v29 = vld [vmem:[%s4589_s0 + $0xd0] sm:$0xff]   ;;  %v2747_v31 = vld [vmem:[%s4589_s0 + $0xd8] sm:$0xff]   ;;  %v2732_v32 = vld [vmem:[%s4589_s0 + $0x60] sm:$0xff]  }
   0xc   :  { %2622 = vmatprep.subr.bf16.mxu0 %v2715_v3  ;;  %2699 = vmatprep.subr.bf16.mxu1 %v2715_v3  ;;  %v2748_v33 = vld [vmem:[%s4589_s0 + $0xe0] sm:$0xff]   ;;  %v2733_v34 = vld [vmem:[%s4589_s0 + $0x68] sm:$0xff]   ;;  %v2734_v36 = vld [vmem:[%s4589_s0 + $0x70] sm:$0xff]  }
   0xd   :  { %v2749_v35 = vld [vmem:[%s4589_s0 + $0xe8] sm:$0xff]   ;;  %v2750_v37 = vld [vmem:[%s4589_s0 + $0xf0] sm:$0xff]   ;;  %v2735_v38 = vld [vmem:[%s4589_s0 + $0x78] sm:$0xff]  }
   0xe   :  { %v2751_v39 = vld [vmem:[%s4589_s0 + $0xf8] sm:$0xff]   ;;  %v2909_v44 = vld [vmem:[%s4590_s2] ss:$0 sm:$0xff] }
   0xf   :  { %2623 = vmatpush3.bf16.msra.mxu0 %v2715_v3  ;;  %2707 = vmatpush3.bf16.msra.mxu1 %v2715_v3 }
  0x10   :  { %2624 = vmatprep.subr.bf16.mxu0 %v2716_v5  ;;  %2700 = vmatprep.subr.bf16.mxu1 %v2716_v5 }
  0x13   :  { %2625 = vmatpush3.bf16.msra.mxu0 %v2716_v5  ;;  %2708 = vmatpush3.bf16.msra.mxu1 %v2716_v5 }
  0x14   :  { %2626 = vmatprep.subr.bf16.mxu0 %v2717_v6  ;;  %2701 = vmatprep.subr.bf16.mxu1 %v2717_v6 }
  0x17   :  { %2627 = vmatpush3.bf16.msra.mxu0 %v2717_v6  ;;  %2709 = vmatpush3.bf16.msra.mxu1 %v2717_v6 }
  0x18   :  { %2628 = vmatprep.subr.bf16.mxu0 %v2718_v7  ;;  %2702 = vmatprep.subr.bf16.mxu1 %v2718_v7 }
  0x1b   :  { %2629 = vmatpush3.bf16.msra.mxu0 %v2718_v7  ;;  %2710 = vmatpush3.bf16.msra.mxu1 %v2718_v7 }
  0x1c   :  { %2630 = vmatprep.subr.bf16.mxu0 %v2719_v8  ;;  %2703 = vmatprep.subr.bf16.mxu1 %v2719_v8 }
  0x1f   :  { %2631 = vmatpush3.bf16.msra.mxu0 %v2719_v8  ;;  %2711 = vmatpush3.bf16.msra.mxu1 %v2719_v8 }
  0x22   :  { %2633 = vmatmul.mubr.bf16.vlgmr.msra.gmra.mxu0 %v2721_v10  ;;  %2665 = vmatmul.mubr.bf16.vlgmr.msra.gmra.mxu1 %v2737_v12 }
  0x23   :  { %2636 = vmatprep.mubr.bf16.mxu0 %v2722_v11  ;;  %2668 = vmatprep.mubr.bf16.mxu1 %v2738_v13 }
  0x2a   :  { %2637 = vmatmul.mubr.bf16.gmra.mxu0 %v2723_v14  ;;  %2669 = vmatmul.mubr.bf16.gmra.mxu1 %v2739_v16 }
  0x2b   :  { %2640 = vmatprep.mubr.bf16.mxu0 %v2724_v15  ;;  %2672 = vmatprep.mubr.bf16.mxu1 %v2740_v17 }
  0x32   :  { %2641 = vmatmul.mubr.bf16.gmra.mxu0 %v2725_v18  ;;  %2673 = vmatmul.mubr.bf16.gmra.mxu1 %v2741_v19 }
  0x33   :  { %2644 = vmatprep.mubr.bf16.mxu0 %v2726_v20  ;;  %2676 = vmatprep.mubr.bf16.mxu1 %v2742_v21 }
  0x3a   :  { %2645 = vmatmul.mubr.bf16.gmra.mxu0 %v2727_v22  ;;  %2677 = vmatmul.mubr.bf16.gmra.mxu1 %v2743_v23 }
  0x3b   :  { %2648 = vmatprep.mubr.bf16.mxu0 %v2728_v24  ;;  %2680 = vmatprep.mubr.bf16.mxu1 %v2744_v25 }
  0x42   :  { %2649 = vmatmul.mubr.bf16.gmra.mxu0 %v2729_v26  ;;  %2681 = vmatmul.mubr.bf16.gmra.mxu1 %v2745_v27 }
  0x43   :  { %2652 = vmatprep.mubr.bf16.mxu0 %v2730_v28  ;;  %2684 = vmatprep.mubr.bf16.mxu1 %v2746_v29 }
  0x4a   :  { %2653 = vmatmul.mubr.bf16.gmra.mxu0 %v2731_v30  ;;  %2685 = vmatmul.mubr.bf16.gmra.mxu1 %v2747_v31 }
  0x4b   :  { %2656 = vmatprep.mubr.bf16.mxu0 %v2732_v32  ;;  %2688 = vmatprep.mubr.bf16.mxu1 %v2748_v33 }
  0x52   :  { %2657 = vmatmul.mubr.bf16.gmra.mxu0 %v2733_v34  ;;  %2689 = vmatmul.mubr.bf16.gmra.mxu1 %v2749_v35 }
  0x53   :  { %2660 = vmatprep.mubr.bf16.mxu0 %v2734_v36  ;;  %2692 = vmatprep.mubr.bf16.mxu1 %v2750_v37 }
  0x5a   :  { %2661 = vmatmul.mubr.bf16.gmra.mxu0 %v2735_v38  ;;  %2693 = vmatmul.mubr.bf16.gmra.mxu1 %v2751_v39 }
  0xe2   :  { %v2634_v40 = vpop.f32.mrf.mxu0  ;;  %v2904_v43 = vpop.f32.mrf.mxu1 }
  0xe3   :  { %v2920_v50 = vadd.f32 %v2634_v40, %v2909_v44 }
  0xe4   :  { %v507_v41 = vpop.f32.mrf.mxu0  ;;  %v2917_v49 = vpop.f32.mrf.mxu1 }
  0xe5   :  { %v2912_v46 = vadd.f32 %v2909_v44, %v507_v41  ;;  %4667 = vst [vmem:[#allocation4_spill] sm:$0xff] %v2920_v50 }
  0xe6   :  { %v2635_v42 = vpop.f32.mrf.mxu0  ;;  %v2928_v56 = vpop.f32.mrf.mxu1 }
  0xe7   :  { %v2925_v53 = vadd.f32 %v2635_v42, %v2909_v44 }
  0xe8   :  { %v510_v45 = vpop.f32.mrf.mxu0  ;;  %v2938_v63 = vpop.f32.mrf.mxu1 }
  0xe9   :  { %v2915_v47 = vadd.f32 %v2909_v44, %v510_v45  ;;  %4668 = vst [vmem:[#allocation5_spill] sm:$0xff] %v2925_v53 }
  0xea   :  { %v2638_v48 = vpop.f32.mrf.mxu0  ;;  %v2948_v6 = vpop.f32.mrf.mxu1 }
  0xeb   :  { %4666 = vst [vmem:[#allocation3_spill] sm:$0xff] %v2915_v47  ;;  %v1221_v51 = vadd.f32 %v2915_v47, %v2912_v46  ;;  %v2941_v0 = vadd.f32 %v2638_v48, %v2909_v44 }
  0xec   :  { %v523_v52 = vpop.f32.mrf.mxu0  ;;  %v2958_v13 = vpop.f32.mrf.mxu1 }
  0xed   :  { %v1222_v54 = vadd.f32 %v1221_v51, %v2920_v50  ;;  %v2931_v57 = vadd.f32 %v2909_v44, %v523_v52 }
  0xee   :  { %v2639_v55 = vpop.f32.mrf.mxu0  ;;  %v2968_v20 = vpop.f32.mrf.mxu1 }
  0xef   :  { %4669 = vst [vmem:[#allocation6_spill] sm:$0xff] %v2931_v57  ;;  %v1223_v58 = vadd.f32 %v1222_v54, %v2925_v53  ;;  %v2945_v3 = vadd.f32 %v2639_v55, %v2909_v44 }
  0xf0   :  { %v526_v59 = vpop.f32.mrf.mxu0  ;;  %v2978_v27 = vpop.f32.mrf.mxu1 }
  0xf1   :  { %v1224_v60 = vadd.f32 %v1223_v58, %v2931_v57  ;;  %v2936_v61 = vadd.f32 %v2909_v44, %v526_v59 }
  0xf2   :  { %v2642_v62 = vpop.f32.mrf.mxu0  ;;  %v2988_v34 = vpop.f32.mrf.mxu1 }
  0xf3   :  { %v1225_v1 = vadd.f32 %v1224_v60, %v2936_v61  ;;  %v2961_v14 = vadd.f32 %v2642_v62, %v2909_v44 }
  0xf4   :  { %v539_v2 = vpop.f32.mrf.mxu0  ;;  %v2998_v41 = vpop.f32.mrf.mxu1 }
  0xf5   :  { %v1226_v4 = vadd.f32 %v1225_v1, %v2941_v0  ;;  %v2951_v7 = vadd.f32 %v2909_v44, %v539_v2 }
  0xf6   :  { %v2643_v5 = vpop.f32.mrf.mxu0  ;;  %v3008_v55 = vpop.f32.mrf.mxu1 }
  0xf7   :  { %v1227_v8 = vadd.f32 %v1226_v4, %v2945_v3  ;;  %v2965_v17 = vadd.f32 %v2643_v5, %v2909_v44 }
  0xf8   :  { %v542_v9 = vpop.f32.mrf.mxu0  ;;  %v670_v4 = vpop.f32.mrf.mxu1 }
  0xf9   :  { %v1228_v10 = vadd.f32 %v1227_v8, %v2951_v7  ;;  %v2956_v11 = vadd.f32 %v2909_v44, %v542_v9 }
  0xfa   :  { %v2646_v12 = vpop.f32.mrf.mxu0 }
  0xfb   :  { %v1229_v15 = vadd.f32 %v1228_v10, %v2956_v11  ;;  %v2981_v28 = vadd.f32 %v2646_v12, %v2909_v44 }
  0xfc   :  { %v555_v16 = vpop.f32.mrf.mxu0 }
  0xfd   :  { %v1230_v18 = vadd.f32 %v1229_v15, %v2961_v14  ;;  %v2971_v21 = vadd.f32 %v2909_v44, %v555_v16  ;;  %v2678_v16 = vpop.f32.mrf.mxu1 }
  0xfe   :  { %v2647_v19 = vpop.f32.mrf.mxu0 }
  0xff   :  { %v1231_v22 = vadd.f32 %v1230_v18, %v2965_v17  ;;  %v2985_v31 = vadd.f32 %v2647_v19, %v2909_v44 }
 0x100   :  { %v558_v23 = vpop.f32.mrf.mxu0 }
 0x101   :  { %v1232_v24 = vadd.f32 %v1231_v22, %v2971_v21  ;;  %v2976_v25 = vadd.f32 %v2909_v44, %v558_v23 }
 0x102   :  { %v2650_v26 = vpop.f32.mrf.mxu0 }
 0x103   :  { %v1233_v29 = vadd.f32 %v1232_v24, %v2976_v25  ;;  %v3001_v42 = vadd.f32 %v2650_v26, %v2909_v44 }
 0x104   :  { %v571_v30 = vpop.f32.mrf.mxu0 }
 0x105   :  { %v1234_v32 = vadd.f32 %v1233_v29, %v2981_v28  ;;  %v2991_v35 = vadd.f32 %v2909_v44, %v571_v30  ;;  %v683_v29 = vpop.f32.mrf.mxu1 }
 0x106   :  { %v2651_v33 = vpop.f32.mrf.mxu0 }
 0x107   :  { %v1235_v36 = vadd.f32 %v1234_v32, %v2985_v31  ;;  %v3005_v51 = vadd.f32 %v2651_v33, %v2909_v44 }
 0x108   :  { %v574_v37 = vpop.f32.mrf.mxu0 }
 0x109   :  { %v1236_v38 = vadd.f32 %v1235_v36, %v2991_v35  ;;  %v2996_v39 = vadd.f32 %v2909_v44, %v574_v37 }
 0x10a   :  { %v2654_v40 = vpop.f32.mrf.mxu0 }
 0x10b   :  { %v1237_v45 = vadd.f32 %v1236_v38, %v2996_v39  ;;  %v3019_v5 = vadd.f32 %v2654_v40, %v2909_v44  ;;  %v2679_v40 = vpop.f32.mrf.mxu1 }
 0x10c   :  { %v587_v48 = vpop.f32.mrf.mxu0 }
 0x10d   :  { %v1238_v52 = vadd.f32 %v1237_v45, %v3001_v42  ;;  %v3011_v58 = vadd.f32 %v2909_v44, %v587_v48 }
 0x10e   :  { %v2655_v54 = vpop.f32.mrf.mxu0 }
 0x10f   :  { %v1239_v59 = vadd.f32 %v1238_v52, %v3005_v51  ;;  %v3023_v10 = vadd.f32 %v2655_v54, %v2909_v44 }
 0x110   :  { %v590_v60 = vpop.f32.mrf.mxu0 }
 0x111   :  { %v1240_v62 = vadd.f32 %v1239_v59, %v3011_v58  ;;  %v3016_v1 = vadd.f32 %v2909_v44, %v590_v60  ;;  %v686_v60 = vpop.f32.mrf.mxu1 }
 0x112   :  { %v2658_v2 = vpop.f32.mrf.mxu0 }
 0x113   :  { %v1241_v8 = vadd.f32 %v1240_v62, %v3016_v1  ;;  %v3035_v30 = vadd.f32 %v2658_v2, %v2909_v44 }
 0x114   :  { %v603_v9 = vpop.f32.mrf.mxu0 }
 0x115   :  { %v1242_v12 = vadd.f32 %v1241_v8, %v3019_v5  ;;  %v3027_v18 = vadd.f32 %v2909_v44, %v603_v9 }
 0x116   :  { %v2659_v15 = vpop.f32.mrf.mxu0 }
 0x117   :  { %v1243_v19 = vadd.f32 %v1242_v12, %v3023_v10  ;;  %v3039_v36 = vadd.f32 %v2659_v15, %v2909_v44  ;;  %v2682_v12 = vpop.f32.mrf.mxu1  ;;  %v3060_v15 = vadd.f32 %v2909_v44, %v2917_v49 }
 0x118   :  { %v606_v22 = vpop.f32.mrf.mxu0 }
 0x119   :  { %v1244_v23 = vadd.f32 %v1243_v19, %v3027_v18  ;;  %v3032_v24 = vadd.f32 %v2909_v44, %v606_v22  ;;  %v3065_v22 = vadd.f32 %v2909_v44, %v2938_v63  ;;  %v3080_v63 = vadd.f32 %v2909_v44, %v2958_v13 }
 0x11a   :  { %v2662_v26 = vpop.f32.mrf.mxu0 }
 0x11b   :  { %v1245_v32 = vadd.f32 %v1244_v23, %v3032_v24  ;;  %v3051_v62 = vadd.f32 %v2662_v26, %v2909_v44  ;;  %v699_v26 = vpop.f32.mrf.mxu1  ;;  %4670 = vst [vmem:[#allocation7_spill] sm:$0xff] %v3080_v63 }
 0x11c   :  { %v619_v33 = vpop.f32.mrf.mxu0 }
 0x11d   :  { %v1246_v37 = vadd.f32 %v1245_v32, %v3035_v30  ;;  %v3043_v45 = vadd.f32 %v2909_v44, %v619_v33  ;;  %v3070_v32 = vadd.f32 %v2904_v43, %v2909_v44  ;;  %v3086_v43 = vadd.f32 %v2909_v44, %v2978_v27 }
 0x11e   :  { %v2663_v38 = vpop.f32.mrf.mxu0 }
 0x11f   :  { %v1247_v48 = vadd.f32 %v1246_v37, %v3039_v36  ;;  %v3055_v8 = vadd.f32 %v2663_v38, %v2909_v44  ;;  %v3075_v37 = vadd.f32 %v2928_v56, %v2909_v44  ;;  %v2683_v38 = vpop.f32.mrf.mxu1  ;;  %4671 = vst [vmem:[#allocation8_spill] sm:$0xff] %v3086_v43  ;;  %v3090_v56 = vadd.f32 %v2948_v6, %v2909_v44 }
 0x120   :  { %v622_v52 = vpop.f32.mrf.mxu0  ;;  %v3105_v6 = vadd.f32 %v2909_v44, %v670_v4 }
 0x121   :  { %v1248_v54 = vadd.f32 %v1247_v48, %v3043_v45  ;;  %v3048_v59 = vadd.f32 %v2909_v44, %v622_v52  ;;  %4672 = vst [vmem:[#allocation9_spill] sm:$0xff] %v3090_v56 }
 0x122   :  { %4674 = vst [vmem:[#allocation11_spill] sm:$0xff] %v3105_v6 }
 0x123   :  { %v1249_v2 = vadd.f32 %v1248_v54, %v3048_v59  ;;  %v702_v54 = vpop.f32.mrf.mxu1 }
 0x125   :  { %v1250_v9 = vadd.f32 %v1249_v2, %v3051_v62 }
 0x127   :  { %v1251_v19 = vadd.f32 %v1250_v9, %v3055_v8  ;;  %v3095_v9 = vadd.f32 %v2968_v20, %v2909_v44 }
 0x129   :  { %v1252_v23 = vadd.f32 %v1251_v19, %v3060_v15  ;;  %v2686_v19 = vpop.f32.mrf.mxu1 }
 0x12b   :  { %v1253_v33 = vadd.f32 %v1252_v23, %v3065_v22  ;;  %v3100_v23 = vadd.f32 %v2909_v44, %v2998_v41 }
 0x12d   :  { %v1254_v49 = vadd.f32 %v1253_v33, %v3070_v32  ;;  %4673 = vst [vmem:[#allocation10_spill] sm:$0xff] %v3100_v23 }
 0x12f   :  { %v1255_v48 = vadd.f32 %v1254_v49, %v3075_v37  ;;  %v715_v49 = vpop.f32.mrf.mxu1 }
 0x131   :  { %v1256_v52 = vadd.f32 %v1255_v48, %v3080_v63  ;;  %v3109_v48 = vadd.f32 %v2988_v34, %v2909_v44 }
 0x133   :  { %v1257_v2 = vadd.f32 %v1256_v52, %v3086_v43  ;;  %4675 = vst [vmem:[#allocation12_spill] sm:$0xff] %v3109_v48  ;;  %v3114_v52 = vadd.f32 %v3008_v55, %v2909_v44 }
 0x135   :  { %v1258_v13 = vadd.f32 %v1257_v2, %v3090_v56  ;;  %v2687_v2 = vpop.f32.mrf.mxu1 }
 0x137   :  { %v1259_v27 = vadd.f32 %v1258_v13, %v3095_v9  ;;  %v3118_v13 = vadd.f32 %v2909_v44, %v683_v29  ;;  %v718_v34 = vpop.f32.mrf.mxu1 }
 0x139   :  { %v1260_v33 = vadd.f32 %v1259_v27, %v3100_v23  ;;  %4676 = vst [vmem:[#allocation13_spill] sm:$0xff] %v3118_v13  ;;  %v3123_v23 = vadd.f32 %v2909_v44, %v686_v60  ;;  %v2690_v29 = vpop.f32.mrf.mxu1 }
 0x13b   :  { %v1261_v20 = vadd.f32 %v1260_v33, %v3105_v6  ;;  %v3126_v33 = vadd.f32 %v2678_v16, %v2909_v44  ;;  %v3130_v6 = vadd.f32 %v2679_v40, %v2909_v44  ;;  %v731_v16 = vpop.f32.mrf.mxu1 }
 0x13d   :  { %v1262_v41 = vadd.f32 %v1261_v20, %v3109_v48  ;;  %4677 = vst [vmem:[#allocation14_spill] sm:$0xff] %v3126_v33  ;;  %v3134_v48 = vadd.f32 %v2909_v44, %v699_v26  ;;  %v2691_v26 = vpop.f32.mrf.mxu1 }
 0x13f   :  { %v1263_v4 = vadd.f32 %v1262_v41, %v3114_v52  ;;  %4678 = vst [vmem:[#allocation15_spill] sm:$0xff] %v3134_v48 }
 0x141   :  { %v1264_v27 = vadd.f32 %v1263_v4, %v3118_v13  ;;  %v3139_v4 = vadd.f32 %v2909_v44, %v702_v54  ;;  %v3142_v13 = vadd.f32 %v2682_v12, %v2909_v44  ;;  %v734_v12 = vpop.f32.mrf.mxu1 }
 0x143   :  { %v1265_v55 = vadd.f32 %v1264_v27, %v3123_v23  ;;  %4679 = vst [vmem:[#allocation16_spill] sm:$0xff] %v3142_v13  ;;  %v3146_v27 = vadd.f32 %v2683_v38, %v2909_v44 }
 0x145   :  { %v1266_v20 = vadd.f32 %v1265_v55, %v3126_v33  ;;  %v3150_v33 = vadd.f32 %v2909_v44, %v715_v49  ;;  %v2694_v49 = vpop.f32.mrf.mxu1 }
 0x147   :  { %v1267_v41 = vadd.f32 %v1266_v20, %v3130_v6  ;;  %4680 = vst [vmem:[#allocation17_spill] sm:$0xff] %v3150_v33 }
 0x149   :  { %v1268_v60 = vadd.f32 %v1267_v41, %v3134_v48  ;;  %v3155_v41 = vadd.f32 %v2909_v44, %v718_v34  ;;  %v3158_v48 = vadd.f32 %v2686_v19, %v2909_v44  ;;  %v747_v19 = vpop.f32.mrf.mxu1 }
 0x14b   :  { %v1269_v40 = vadd.f32 %v1268_v60, %v3139_v4  ;;  %4681 = vst [vmem:[#allocation18_spill] sm:$0xff] %v3155_v41  ;;  %4682 = vst [vmem:[#allocation19_spill] sm:$0xff] %v3158_v48  ;;  %v3162_v60 = vadd.f32 %v2687_v2, %v2909_v44 }
 0x14d   :  { %v1270_v55 = vadd.f32 %v1269_v40, %v3142_v13  ;;  %4683 = vst [vmem:[#allocation20_spill] sm:$0xff] %v3162_v60  ;;  %v3166_v13 = vadd.f32 %v2909_v44, %v731_v16  ;;  %v2695_v16 = vpop.f32.mrf.mxu1 }
 0x14f   :  { %v1271_v20 = vadd.f32 %v1270_v55, %v3146_v27  ;;  %4684 = vst [vmem:[#allocation21_spill] sm:$0xff] %v3166_v13 }
 0x151   :  { %v1272_v54 = vadd.f32 %v1271_v20, %v3150_v33  ;;  %v3171_v20 = vadd.f32 %v2909_v44, %v734_v12  ;;  %v3174_v33 = vadd.f32 %v2690_v29, %v2909_v44 }
 0x153   :  { %v1273_v38 = vadd.f32 %v1272_v54, %v3155_v41  ;;  %4685 = vst [vmem:[#allocation22_spill] sm:$0xff] %v3171_v20  ;;  %4686 = vst [vmem:[#allocation23_spill] sm:$0xff] %v3174_v33  ;;  %v3178_v54 = vadd.f32 %v2691_v26, %v2909_v44 }
 0x155   :  { %v1274_v40 = vadd.f32 %v1273_v38, %v3158_v48  ;;  %4687 = vst [vmem:[#allocation24_spill] sm:$0xff] %v3178_v54 }
 0x157   :  { %v1275_v55 = vadd.f32 %v1274_v40, %v3162_v60  ;;  %v3183_v40 = vadd.f32 %v2909_v44, %v747_v19 }
 0x159   :  { %v1276_v34 = vadd.f32 %v1275_v55, %v3166_v13  ;;  %4688 = vst [vmem:[#allocation25_spill] sm:$0xff] %v3183_v40  ;;  %v750_v55 = vpop.f32.mrf.mxu1 }
 0x15a   :  { %v3187_v13 = vadd.f32 %v2909_v44, %v750_v55 }
 0x15b   :  { %v1277_v2 = vadd.f32 %v1276_v34, %v3171_v20  ;;  %v3191_v34 = vadd.f32 %v2694_v49, %v2909_v44 }
 0x15c   :  { %4689 = vst [vmem:[#allocation26_spill] sm:$0xff] %v3187_v13 }
 0x15d   :  { %v1278_v38 = vadd.f32 %v1277_v2, %v3174_v33  ;;  %4690 = vst [vmem:[#allocation27_spill] sm:$0xff] %v3191_v34  ;;  %v3195_v2 = vadd.f32 %v2695_v16, %v2909_v44 }
 0x15f   :  { %v1279_v48 = vadd.f32 %v1278_v38, %v3178_v54 }
 0x161   :  { %v1280_v12 = vadd.f32 %v1279_v48, %v3183_v40 }
 0x163   :  { %v1281_v29 = vadd.f32 %v1280_v12, %v3187_v13 }
 0x165   :  { %v1282_v26 = vadd.f32 %v1281_v29, %v3191_v34 }
 0x167   :  { %v1283_v38 = vadd.f32 %v1282_v26, %v3195_v2 }
 0x169   :  { %v1284_v19 = vrot.slane %v1283_v38, 4 }
 0x16b   :  { %v1285_v54 = vadd.f32 %v1284_v19, %v1283_v38 }
 0x16d   :  { %v1286_v33 = vrot.slane %v1285_v54, 2 }
 0x16f   :  { %v1287_v20 = vadd.f32 %v1286_v33, %v1285_v54 }
 0x171   :  { %v1288_v48 = vrot.slane %v1287_v20, 1 }
 0x173   :  { %v1289_v40 = vadd.f32 %v1288_v48, %v1287_v20 }
 0x175   :  { %v3198_v55 = vmul.f32 0.001953125, %v1289_v40 }
 0x177   :  { %v1291_v12 = vsub.f32 %v2912_v46, %v3198_v55  ;;  %v1292_v49 = vsub.f32 %v2915_v47, %v3198_v55  ;;  %v1293_v44 = vsub.f32 %v2920_v50, %v3198_v55  ;;  %v1294_v26 = vsub.f32 %v2925_v53, %v3198_v55 }
 0x178   :  { %v1295_v33 = vsub.f32 %v2931_v57, %v3198_v55  ;;  %v1296_v40 = vsub.f32 %v2936_v61, %v3198_v55  ;;  %v1297_v48 = vsub.f32 %v2941_v0, %v3198_v55  ;;  %v1299_v57 = vsub.f32 %v2951_v7, %v3198_v55 }
 0x179   :  { %v1419_v16 = vmul.f32 %v1291_v12, %v1291_v12  ;;  %v1420_v29 = vmul.f32 %v1292_v49, %v1292_v49  ;;  %v1421_v20 = vmul.f32 %v1293_v44, %v1293_v44  ;;  %v1422_v38 = vmul.f32 %v1294_v26, %v1294_v26 }
 0x17a   :  { %v1423_v47 = vmul.f32 %v1295_v33, %v1295_v33  ;;  %v1298_v12 = vsub.f32 %v2945_v3, %v3198_v55  ;;  %v1424_v49 = vmul.f32 %v1296_v40, %v1296_v40  ;;  %v1425_v44 = vmul.f32 %v1297_v48, %v1297_v48 }
 0x17b   :  { %v1483_v54 = vadd.f32 %v1420_v29, %v1419_v16  ;;  %v1300_v29 = vsub.f32 %v2956_v11, %v3198_v55  ;;  %v1427_v33 = vmul.f32 %v1299_v57, %v1299_v57 }
 0x17c   :  { %v1426_v26 = vmul.f32 %v1298_v12, %v1298_v12 }
 0x17d   :  { %v1484_v19 = vadd.f32 %v1483_v54, %v1421_v20  ;;  %v1301_v54 = vsub.f32 %v2961_v14, %v3198_v55  ;;  %v1428_v40 = vmul.f32 %v1300_v29, %v1300_v29 }
 0x17f   :  { %v1485_v50 = vadd.f32 %v1484_v19, %v1422_v38  ;;  %v1302_v19 = vsub.f32 %v2965_v17, %v3198_v55  ;;  %v1429_v48 = vmul.f32 %v1301_v54, %v1301_v54 }
 0x181   :  { %v1486_v53 = vadd.f32 %v1485_v50, %v1423_v47  ;;  %v1303_v50 = vsub.f32 %v2971_v21, %v3198_v55  ;;  %v1430_v12 = vmul.f32 %v1302_v19, %v1302_v19 }
 0x183   :  { %v1487_v16 = vadd.f32 %v1486_v53, %v1424_v49  ;;  %v1304_v49 = vsub.f32 %v2976_v25, %v3198_v55  ;;  %v1431_v57 = vmul.f32 %v1303_v50, %v1303_v50 }
 0x185   :  { %v1488_v20 = vadd.f32 %v1487_v16, %v1425_v44  ;;  %v1305_v16 = vsub.f32 %v2981_v28, %v3198_v55  ;;  %v1432_v29 = vmul.f32 %v1304_v49, %v1304_v49 }
 0x187   :  { %v1489_v38 = vadd.f32 %v1488_v20, %v1426_v26  ;;  %v1306_v20 = vsub.f32 %v2985_v31, %v3198_v55  ;;  %v1433_v54 = vmul.f32 %v1305_v16, %v1305_v16 }
 0x189   :  { %v1490_v47 = vadd.f32 %v1489_v38, %v1427_v33  ;;  %v1307_v38 = vsub.f32 %v2991_v35, %v3198_v55  ;;  %v1434_v19 = vmul.f32 %v1306_v20, %v1306_v20 }
 0x18b   :  { %v1491_v53 = vadd.f32 %v1490_v47, %v1428_v40  ;;  %v1308_v47 = vsub.f32 %v2996_v39, %v3198_v55  ;;  %v1435_v50 = vmul.f32 %v1307_v38, %v1307_v38 }
 0x18d   :  { %v1492_v44 = vadd.f32 %v1491_v53, %v1429_v48  ;;  %v1309_v53 = vsub.f32 %v3001_v42, %v3198_v55  ;;  %v1436_v49 = vmul.f32 %v1308_v47, %v1308_v47 }
 0x18f   :  { %v1493_v26 = vadd.f32 %v1492_v44, %v1430_v12  ;;  %v1310_v44 = vsub.f32 %v3005_v51, %v3198_v55  ;;  %v1437_v16 = vmul.f32 %v1309_v53, %v1309_v53 }
 0x191   :  { %v1494_v33 = vadd.f32 %v1493_v26, %v1431_v57  ;;  %v1311_v26 = vsub.f32 %v3011_v58, %v3198_v55  ;;  %v1438_v20 = vmul.f32 %v1310_v44, %v1310_v44 }
 0x193   :  { %v1495_v40 = vadd.f32 %v1494_v33, %v1432_v29  ;;  %v1312_v33 = vsub.f32 %v3016_v1, %v3198_v55  ;;  %v1439_v38 = vmul.f32 %v1311_v26, %v1311_v26 }
 0x195   :  { %v1496_v48 = vadd.f32 %v1495_v40, %v1433_v54  ;;  %v1313_v40 = vsub.f32 %v3019_v5, %v3198_v55  ;;  %v1440_v47 = vmul.f32 %v1312_v33, %v1312_v33 }
 0x197   :  { %v1497_v12 = vadd.f32 %v1496_v48, %v1434_v19  ;;  %v1314_v48 = vsub.f32 %v3023_v10, %v3198_v55  ;;  %v1441_v53 = vmul.f32 %v1313_v40, %v1313_v40 }
 0x199   :  { %v1498_v57 = vadd.f32 %v1497_v12, %v1435_v50  ;;  %v1315_v12 = vsub.f32 %v3027_v18, %v3198_v55  ;;  %v1442_v44 = vmul.f32 %v1314_v48, %v1314_v48 }
 0x19b   :  { %v1499_v29 = vadd.f32 %v1498_v57, %v1436_v49  ;;  %v1316_v57 = vsub.f32 %v3032_v24, %v3198_v55  ;;  %v1443_v26 = vmul.f32 %v1315_v12, %v1315_v12 }
 0x19d   :  { %v1500_v54 = vadd.f32 %v1499_v29, %v1437_v16  ;;  %v1317_v29 = vsub.f32 %v3035_v30, %v3198_v55  ;;  %v1444_v33 = vmul.f32 %v1316_v57, %v1316_v57 }
 0x19f   :  { %v1501_v19 = vadd.f32 %v1500_v54, %v1438_v20  ;;  %v1318_v54 = vsub.f32 %v3039_v36, %v3198_v55  ;;  %v1445_v40 = vmul.f32 %v1317_v29, %v1317_v29 }
 0x1a1   :  { %v1502_v50 = vadd.f32 %v1501_v19, %v1439_v38  ;;  %v1319_v19 = vsub.f32 %v3043_v45, %v3198_v55  ;;  %v1446_v48 = vmul.f32 %v1318_v54, %v1318_v54 }
 0x1a3   :  { %v1503_v49 = vadd.f32 %v1502_v50, %v1440_v47  ;;  %v1320_v50 = vsub.f32 %v3048_v59, %v3198_v55  ;;  %v1447_v12 = vmul.f32 %v1319_v19, %v1319_v19 }
 0x1a5   :  { %v1504_v16 = vadd.f32 %v1503_v49, %v1441_v53  ;;  %v1321_v49 = vsub.f32 %v3051_v62, %v3198_v55  ;;  %v1448_v57 = vmul.f32 %v1320_v50, %v1320_v50 }
 0x1a7   :  { %v1505_v20 = vadd.f32 %v1504_v16, %v1442_v44  ;;  %v1322_v16 = vsub.f32 %v3055_v8, %v3198_v55  ;;  %v1449_v29 = vmul.f32 %v1321_v49, %v1321_v49 }
 0x1a9   :  { %v1506_v38 = vadd.f32 %v1505_v20, %v1443_v26  ;;  %v1323_v20 = vsub.f32 %v3060_v15, %v3198_v55  ;;  %v1450_v54 = vmul.f32 %v1322_v16, %v1322_v16 }
 0x1ab   :  { %v1507_v47 = vadd.f32 %v1506_v38, %v1444_v33  ;;  %v1324_v38 = vsub.f32 %v3065_v22, %v3198_v55  ;;  %v1451_v19 = vmul.f32 %v1323_v20, %v1323_v20 }
 0x1ad   :  { %v1508_v53 = vadd.f32 %v1507_v47, %v1445_v40  ;;  %v1325_v47 = vsub.f32 %v3070_v32, %v3198_v55  ;;  %v1452_v50 = vmul.f32 %v1324_v38, %v1324_v38 }
 0x1af   :  { %v1509_v44 = vadd.f32 %v1508_v53, %v1446_v48  ;;  %v1326_v53 = vsub.f32 %v3075_v37, %v3198_v55  ;;  %v1453_v49 = vmul.f32 %v1325_v47, %v1325_v47 }
 0x1b1   :  { %v1510_v26 = vadd.f32 %v1509_v44, %v1447_v12  ;;  %v1327_v44 = vsub.f32 %v3080_v63, %v3198_v55  ;;  %v1454_v16 = vmul.f32 %v1326_v53, %v1326_v53 }
 0x1b3   :  { %v1511_v33 = vadd.f32 %v1510_v26, %v1448_v57  ;;  %v1328_v26 = vsub.f32 %v3086_v43, %v3198_v55  ;;  %v1455_v20 = vmul.f32 %v1327_v44, %v1327_v44 }
 0x1b5   :  { %v1512_v40 = vadd.f32 %v1511_v33, %v1449_v29  ;;  %v1329_v33 = vsub.f32 %v3090_v56, %v3198_v55  ;;  %v1456_v38 = vmul.f32 %v1328_v26, %v1328_v26 }
 0x1b7   :  { %v1513_v48 = vadd.f32 %v1512_v40, %v1450_v54  ;;  %v1330_v40 = vsub.f32 %v3095_v9, %v3198_v55  ;;  %v1457_v47 = vmul.f32 %v1329_v33, %v1329_v33 }
 0x1b9   :  { %v1514_v12 = vadd.f32 %v1513_v48, %v1451_v19  ;;  %v4691_v48 = vld [vmem:[#allocation10_spill] sm:$0xff]  ;;  %v1458_v53 = vmul.f32 %v1330_v40, %v1330_v40 }
 0x1ba   :  { %v1331_v63 = vsub.f32 %v4691_v48, %v3198_v55 }
 0x1bb   :  { %v1515_v57 = vadd.f32 %v1514_v12, %v1452_v50  ;;  %v4692_v12 = vld [vmem:[#allocation11_spill] sm:$0xff] }
 0x1bc   :  { %v1332_v43 = vsub.f32 %v4692_v12, %v3198_v55  ;;  %v1459_v44 = vmul.f32 %v1331_v63, %v1331_v63 }
 0x1bd   :  { %v1516_v29 = vadd.f32 %v1515_v57, %v1453_v49  ;;  %v4693_v57 = vld [vmem:[#allocation12_spill] sm:$0xff] }
 0x1be   :  { %v1333_v56 = vsub.f32 %v4693_v57, %v3198_v55  ;;  %v1460_v26 = vmul.f32 %v1332_v43, %v1332_v43 }
 0x1bf   :  { %v1517_v54 = vadd.f32 %v1516_v29, %v1454_v16  ;;  %v1334_v29 = vsub.f32 %v3114_v52, %v3198_v55 }
 0x1c0   :  { %v1461_v33 = vmul.f32 %v1333_v56, %v1333_v56 }
 0x1c1   :  { %v1518_v19 = vadd.f32 %v1517_v54, %v1455_v20  ;;  %v4694_v54 = vld [vmem:[#allocation13_spill] sm:$0xff]  ;;  %v1462_v40 = vmul.f32 %v1334_v29, %v1334_v29 }
 0x1c2   :  { %v1335_v48 = vsub.f32 %v4694_v54, %v3198_v55 }
 0x1c3   :  { %v1519_v50 = vadd.f32 %v1518_v19, %v1456_v38  ;;  %v1336_v19 = vsub.f32 %v3123_v23, %v3198_v55 }
 0x1c4   :  { %v1463_v63 = vmul.f32 %v1335_v48, %v1335_v48 }
 0x1c5   :  { %v1520_v49 = vadd.f32 %v1519_v50, %v1457_v47  ;;  %v4695_v50 = vld [vmem:[#allocation14_spill] sm:$0xff]  ;;  %v1464_v43 = vmul.f32 %v1336_v19, %v1336_v19 }
 0x1c6   :  { %v1337_v57 = vsub.f32 %v4695_v50, %v3198_v55 }
 0x1c7   :  { %v1521_v16 = vadd.f32 %v1520_v49, %v1458_v53  ;;  %v1338_v49 = vsub.f32 %v3130_v6, %v3198_v55 }
 0x1c8   :  { %v1465_v56 = vmul.f32 %v1337_v57, %v1337_v57 }
 0x1c9   :  { %v1522_v20 = vadd.f32 %v1521_v16, %v1459_v44  ;;  %v4696_v16 = vld [vmem:[#allocation15_spill] sm:$0xff]  ;;  %v1466_v29 = vmul.f32 %v1338_v49, %v1338_v49 }
 0x1ca   :  { %v1339_v54 = vsub.f32 %v4696_v16, %v3198_v55 }
 0x1cb   :  { %v1523_v38 = vadd.f32 %v1522_v20, %v1460_v26  ;;  %v1340_v20 = vsub.f32 %v3139_v4, %v3198_v55 }
 0x1cc   :  { %v1467_v48 = vmul.f32 %v1339_v54, %v1339_v54 }
 0x1cd   :  { %v1524_v47 = vadd.f32 %v1523_v38, %v1461_v33  ;;  %v4697_v38 = vld [vmem:[#allocation16_spill] sm:$0xff]  ;;  %v1468_v19 = vmul.f32 %v1340_v20, %v1340_v20 }
 0x1ce   :  { %v1341_v50 = vsub.f32 %v4697_v38, %v3198_v55 }
 0x1cf   :  { %v1525_v53 = vadd.f32 %v1524_v47, %v1462_v40  ;;  %v1342_v47 = vsub.f32 %v3146_v27, %v3198_v55 }
 0x1d0   :  { %v1469_v57 = vmul.f32 %v1341_v50, %v1341_v50 }
 0x1d1   :  { %v1526_v44 = vadd.f32 %v1525_v53, %v1463_v63  ;;  %v4698_v53 = vld [vmem:[#allocation17_spill] sm:$0xff]  ;;  %v1470_v49 = vmul.f32 %v1342_v47, %v1342_v47 }
 0x1d2   :  { %v1343_v16 = vsub.f32 %v4698_v53, %v3198_v55 }
 0x1d3   :  { %v1527_v26 = vadd.f32 %v1526_v44, %v1464_v43  ;;  %v1344_v44 = vsub.f32 %v3155_v41, %v3198_v55 }
 0x1d4   :  { %v1471_v54 = vmul.f32 %v1343_v16, %v1343_v16 }
 0x1d5   :  { %v1528_v33 = vadd.f32 %v1527_v26, %v1465_v56  ;;  %v4699_v26 = vld [vmem:[#allocation19_spill] sm:$0xff]  ;;  %v1472_v20 = vmul.f32 %v1344_v44, %v1344_v44 }
 0x1d6   :  { %v1345_v38 = vsub.f32 %v4699_v26, %v3198_v55 }
 0x1d7   :  { %v1529_v40 = vadd.f32 %v1528_v33, %v1466_v29  ;;  %v1346_v33 = vsub.f32 %v3162_v60, %v3198_v55 }
 0x1d8   :  { %v1473_v50 = vmul.f32 %v1345_v38, %v1345_v38 }
 0x1d9   :  { %v1530_v63 = vadd.f32 %v1529_v40, %v1467_v48  ;;  %v4700_v40 = vld [vmem:[#allocation21_spill] sm:$0xff]  ;;  %v1474_v47 = vmul.f32 %v1346_v33, %v1346_v33 }
 0x1da   :  { %v1347_v53 = vsub.f32 %v4700_v40, %v3198_v55 }
 0x1db   :  { %v1531_v43 = vadd.f32 %v1530_v63, %v1468_v19  ;;  %v4701_v63 = vld [vmem:[#allocation22_spill] sm:$0xff] }
 0x1dc   :  { %v1348_v41 = vsub.f32 %v4701_v63, %v3198_v55  ;;  %v1475_v16 = vmul.f32 %v1347_v53, %v1347_v53 }
 0x1dd   :  { %v1532_v56 = vadd.f32 %v1531_v43, %v1469_v57  ;;  %v4702_v43 = vld [vmem:[#allocation23_spill] sm:$0xff] }
 0x1de   :  { %v1349_v26 = vsub.f32 %v4702_v43, %v3198_v55  ;;  %v1476_v44 = vmul.f32 %v1348_v41, %v1348_v41 }
 0x1df   :  { %v1533_v29 = vadd.f32 %v1532_v56, %v1470_v49  ;;  %v4703_v56 = vld [vmem:[#allocation24_spill] sm:$0xff] }
 0x1e0   :  { %v1350_v60 = vsub.f32 %v4703_v56, %v3198_v55  ;;  %v1477_v38 = vmul.f32 %v1349_v26, %v1349_v26 }
 0x1e1   :  { %v1534_v48 = vadd.f32 %v1533_v29, %v1471_v54  ;;  %v4704_v29 = vld [vmem:[#allocation25_spill] sm:$0xff] }
 0x1e2   :  { %v1351_v40 = vsub.f32 %v4704_v29, %v3198_v55  ;;  %v1478_v33 = vmul.f32 %v1350_v60, %v1350_v60 }
 0x1e3   :  { %v1535_v19 = vadd.f32 %v1534_v48, %v1472_v20  ;;  %v1352_v48 = vsub.f32 %v3187_v13, %v3198_v55 }
 0x1e4   :  { %v1479_v53 = vmul.f32 %v1351_v40, %v1351_v40  ;;  %v1561_v40 = vlaneseq }
 0x1e5   :  { %v1536_v57 = vadd.f32 %v1535_v19, %v1473_v50  ;;  %v1353_v19 = vsub.f32 %v3191_v34, %v3198_v55  ;;  %v1480_v41 = vmul.f32 %v1352_v48, %v1352_v48  ;;  %v1553_v48 = vld [vmem:[%s4591_s3] sm:$0x1] }
 0x1e7   :  { %v1537_v49 = vadd.f32 %v1536_v57, %v1474_v47  ;;  %v1354_v57 = vsub.f32 %v3195_v2, %v3198_v55 }
 0x1e9   :  { %v1538_v54 = vadd.f32 %v1537_v49, %v1475_v16  ;;  %v1481_v49 = vmul.f32 %v1353_v19, %v1353_v19  ;;  %v1482_v29 = vmul.f32 %v1354_v57, %v1354_v57  ;;  %v4706_v57 = vld [vmem:[#allocation4_spill] sm:$0xff] }
 0x1eb   :  { %v1539_v20 = vadd.f32 %v1538_v54, %v1476_v44 }
 0x1ed   :  { %v1540_v50 = vadd.f32 %v1539_v20, %v1477_v38 }
 0x1ef   :  { %v1541_v47 = vadd.f32 %v1540_v50, %v1478_v33  ;;  %v1562_v50 = vshrl.u32 %v1561_v40, 7  ;;  %v4710_v40 = vld [vmem:[#allocation8_spill] sm:$0xff] }
 0x1f1   :  { %v1542_v16 = vadd.f32 %v1541_v47, %v1479_v53  ;;  %v1563_v53 = vsub.s32 0, %v1562_v50 }
 0x1f3   :  { %v1543_v56 = vadd.f32 %v1542_v16, %v1480_v41 }
 0x1f5   :  { %v1544_v26 = vadd.f32 %v1543_v56, %v1481_v49  ;;  %v4708_v49 = vld [vmem:[#allocation6_spill] sm:$0xff] }
 0x1f7   :  { %v1545_v44 = vadd.f32 %v1544_v26, %v1482_v29 }
 0x1f9   :  { %v1546_v54 = vrot.slane %v1545_v44, 4 }
 0x1fb   :  { %v1547_v43 = vadd.f32 %v1546_v54, %v1545_v44 }
 0x1fd   :  { %v1548_v13 = vrot.slane %v1547_v43, 2 }
 0x1ff   :  { %v1549_v60 = vadd.f32 %v1548_v13, %v1547_v43  ;;  %v1557_v13 = vld [vmem:[%s4592_s4] sm:$0x1] }
 0x201   :  { %v1550_v38 = vrot.slane %v1549_v60, 1 }
 0x203   :  { %v1551_v20 = vadd.f32 %v1550_v38, %v1549_v60 }
 0x205   :  { %v1552_v63 = vmul.f32 0.001953125, %v1551_v20  ;;  %v4709_v20 = vld [vmem:[#allocation7_spill] sm:$0xff] }
 0x207   :  { %v1554_v34 = vadd.f32 1e-05, %v1552_v63  ;;  %v4705_v63 = vld [vmem:[#allocation3_spill] sm:$0xff] }
 0x209   :  { %2752 = vrsqrt.f32 %v1554_v34 }
 0x216   :  { %v2753_v33 = vpop.eup %2752 }
 0x217   :  { %v1556_v19 = vmul.f32 %v2753_v33, %v1553_v48  ;;  %v4711_v33 = vld [vmem:[#allocation9_spill] sm:$0xff]  ;;  %v4712_v48 = vld [vmem:[#allocation10_spill] sm:$0xff] }
 0x219   :  { %v1558_v56 = vmul.f32 %v1556_v19, %v3198_v55  ;;  %v3335_v43 = vrot.slane %v1556_v19, %v1563_v53  ;;  %v4707_v55 = vld [vmem:[#allocation5_spill] sm:$0xff]  ;;  %v4713_v19 = vld [vmem:[#allocation12_spill] sm:$0xff] }
 0x21b   :  { %v1559_v29 = vsub.f32 %v1557_v13, %v1558_v56  ;;  %v3339_v34 = vmul.f32 %v3335_v43, %v2912_v46  ;;  %v3343_v47 = vmul.f32 %v3335_v43, %v4705_v63  ;;  %v3347_v41 = vmul.f32 %v3335_v43, %v4706_v57  ;;  %v4714_v63 = vld [vmem:[#allocation13_spill] sm:$0xff] }
 0x21c   :  { %v3351_v16 = vmul.f32 %v3335_v43, %v4707_v55  ;;  %v3355_v26 = vmul.f32 %v3335_v43, %v4708_v49  ;;  %v3359_v46 = vmul.f32 %v3335_v43, %v2936_v61  ;;  %v3363_v44 = vmul.f32 %v3335_v43, %v2941_v0  ;;  %v4715_v55 = vld [vmem:[#allocation14_spill] sm:$0xff] }
 0x21d   :  { %v3367_v54 = vmul.f32 %v3335_v43, %v2945_v3  ;;  %v3371_v60 = vmul.f32 %v3335_v43, %v2951_v7  ;;  %v3375_v38 = vmul.f32 %v3335_v43, %v2956_v11  ;;  %v3379_v61 = vmul.f32 %v3335_v43, %v2961_v14 }
 0x21e   :  { %v3383_v0 = vmul.f32 %v3335_v43, %v2965_v17  ;;  %v3387_v3 = vmul.f32 %v3335_v43, %v2971_v21  ;;  %v3391_v7 = vmul.f32 %v3335_v43, %v2976_v25  ;;  %v3395_v11 = vmul.f32 %v3335_v43, %v2981_v28 }
 0x21f   :  { %v3399_v14 = vmul.f32 %v3335_v43, %v2985_v31  ;;  %v3403_v17 = vmul.f32 %v3335_v43, %v2991_v35  ;;  %v3407_v21 = vmul.f32 %v3335_v43, %v2996_v39  ;;  %v3411_v25 = vmul.f32 %v3335_v43, %v3001_v42 }
 0x220   :  { %v3415_v28 = vmul.f32 %v3335_v43, %v3005_v51  ;;  %v3419_v31 = vmul.f32 %v3335_v43, %v3011_v58  ;;  %v3423_v35 = vmul.f32 %v3335_v43, %v3016_v1  ;;  %v3427_v39 = vmul.f32 %v3335_v43, %v3019_v5 }
 0x221   :  { %v3431_v42 = vmul.f32 %v3335_v43, %v3023_v10  ;;  %v3435_v51 = vmul.f32 %v3335_v43, %v3027_v18  ;;  %v3439_v58 = vmul.f32 %v3335_v43, %v3032_v24  ;;  %v3443_v1 = vmul.f32 %v3335_v43, %v3035_v30 }
 0x222   :  { %v3447_v5 = vmul.f32 %v3335_v43, %v3039_v36  ;;  %v3451_v10 = vmul.f32 %v3335_v43, %v3043_v45  ;;  %v3455_v18 = vmul.f32 %v3335_v43, %v3048_v59  ;;  %v3459_v24 = vmul.f32 %v3335_v43, %v3051_v62 }
 0x223   :  { %v3463_v30 = vmul.f32 %v3335_v43, %v3055_v8  ;;  %v3467_v36 = vmul.f32 %v3335_v43, %v3060_v15  ;;  %v3471_v45 = vmul.f32 %v3335_v43, %v3065_v22  ;;  %v3475_v59 = vmul.f32 %v3335_v43, %v3070_v32 }
 0x224   :  { %v3479_v62 = vmul.f32 %v3335_v43, %v3075_v37  ;;  %v3483_v8 = vmul.f32 %v3335_v43, %v4709_v20  ;;  %v3487_v15 = vmul.f32 %v3335_v43, %v4710_v40  ;;  %v3491_v22 = vmul.f32 %v3335_v43, %v4711_v33  ;;  %v4716_v20 = vld [vmem:[#allocation15_spill] sm:$0xff]  ;;  %v4718_v33 = vld [vmem:[#allocation16_spill] sm:$0xff] }
 0x225   :  { %v3495_v32 = vmul.f32 %v3335_v43, %v3095_v9  ;;  %v3499_v37 = vmul.f32 %v3335_v43, %v4712_v48  ;;  %v3503_v50 = vmul.f32 %v3335_v43, %v4692_v12  ;;  %v3507_v56 = vmul.f32 %v3335_v43, %v4713_v19 }
 0x226   :  { %v3511_v13 = vmul.f32 %v3335_v43, %v3114_v52  ;;  %v3515_v9 = vmul.f32 %v3335_v43, %v4714_v63  ;;  %v3519_v57 = vmul.f32 %v3335_v43, %v3123_v23  ;;  %v3523_v12 = vmul.f32 %v3335_v43, %v4715_v55  ;;  %v4722_v55 = vld [vmem:[#allocation18_spill] sm:$0xff] }
 0x227   :  { %v3527_v49 = vmul.f32 %v3335_v43, %v3130_v6  ;;  %v3531_v52 = vmul.f32 %v3335_v43, %v4716_v20  ;;  %v3535_v40 = vmul.f32 %v3335_v43, %v3139_v4  ;;  %v3539_v23 = vmul.f32 %v3335_v43, %v4718_v33  ;;  %v4720_v6 = vld [vmem:[#allocation17_spill] sm:$0xff]  ;;  %v4724_v4 = vld [vmem:[#allocation19_spill] sm:$0xff]  ;;  %v4726_v33 = vld [vmem:[#allocation20_spill] sm:$0xff] }
 0x228   :  { %v3541_v48 = vrot.slane %v1559_v29, %v1563_v53  ;;  %v3545_v19 = vmul.f32 %v3335_v43, %v3146_v27  ;;  %v3549_v63 = vmul.f32 %v3335_v43, %v4720_v6  ;;  %v3553_v20 = vmul.f32 %v3335_v43, %v4722_v55  ;;  %v4728_v29 = vld [vmem:[#allocation21_spill] sm:$0xff] }
 0x229   :  { %4717 = vst [vmem:[#allocation11_spill] sm:$0xff] %v3535_v40  ;;  %v3557_v40 = vmul.f32 %v3335_v43, %v4724_v4  ;;  %v3561_v53 = vmul.f32 %v3335_v43, %v4726_v33  ;;  %v3565_v27 = vmul.f32 %v3335_v43, %v4728_v29 }
 0x22a   :  { %4719 = vst [vmem:[#allocation3_spill] sm:$0xff] %v3545_v19  ;;  %4721 = vst [vmem:[#allocation4_spill] sm:$0xff] %v3549_v63  ;;  %v4730_v19 = vld [vmem:[#allocation22_spill] sm:$0xff]  ;;  %v4731_v63 = vld [vmem:[#allocation23_spill] sm:$0xff] }
 0x22b   :  { %4723 = vst [vmem:[#allocation5_spill] sm:$0xff] %v3553_v20  ;;  %4725 = vst [vmem:[#allocation6_spill] sm:$0xff] %v3557_v40  ;;  %v3569_v6 = vmul.f32 %v3335_v43, %v4730_v19  ;;  %v3573_v55 = vmul.f32 %v3335_v43, %v4731_v63  ;;  %v4732_v20 = vld [vmem:[#allocation24_spill] sm:$0xff]  ;;  %v4733_v40 = vld [vmem:[#allocation25_spill] sm:$0xff]  ;;  %v3593_v63 = vmul.f32 %v3335_v43, %v3195_v2 }
 0x22c   :  { %4727 = vst [vmem:[#allocation7_spill] sm:$0xff] %v3561_v53  ;;  %4729 = vst [vmem:[#allocation8_spill] sm:$0xff] %v3565_v27  ;;  %v3577_v4 = vmul.f32 %v3335_v43, %v4732_v20  ;;  %v3581_v33 = vmul.f32 %v3335_v43, %v4733_v40  ;;  %v4734_v53 = vld [vmem:[#allocation26_spill] sm:$0xff]  ;;  %v4735_v27 = vld [vmem:[#allocation27_spill] sm:$0xff]  ;;  %v3597_v20 = vadd.f32 %v3541_v48, %v3339_v34 }
 0x22d   :  { %v3585_v29 = vmul.f32 %v3335_v43, %v4734_v53  ;;  %v3589_v19 = vmul.f32 %v3335_v43, %v4735_v27  ;;  %v3601_v40 = vadd.f32 %v3541_v48, %v3343_v47  ;;  %v3605_v53 = vadd.f32 %v3541_v48, %v3347_v41 }
 0x22e   :  { %v3609_v27 = vadd.f32 %v3541_v48, %v3351_v16  ;;  %v3613_v2 = vadd.f32 %v3541_v48, %v3355_v26  ;;  %v3617_v43 = vadd.f32 %v3541_v48, %v3359_v46  ;;  %v3621_v34 = vadd.f32 %v3541_v48, %v3363_v44 }
 0x22f   :  { %v3625_v47 = vadd.f32 %v3541_v48, %v3367_v54  ;;  %v3629_v41 = vadd.f32 %v3541_v48, %v3371_v60  ;;  %v3633_v16 = vadd.f32 %v3541_v48, %v3375_v38  ;;  %v3637_v26 = vadd.f32 %v3541_v48, %v3379_v61 }
 0x230   :  { %v3641_v46 = vadd.f32 %v3541_v48, %v3383_v0  ;;  %v3645_v44 = vadd.f32 %v3541_v48, %v3387_v3  ;;  %v3649_v54 = vadd.f32 %v3541_v48, %v3391_v7  ;;  %v3653_v60 = vadd.f32 %v3541_v48, %v3395_v11 }
 0x231   :  { %v3657_v38 = vadd.f32 %v3541_v48, %v3399_v14  ;;  %v3661_v61 = vadd.f32 %v3541_v48, %v3403_v17  ;;  %v3665_v0 = vadd.f32 %v3541_v48, %v3407_v21  ;;  %v3669_v3 = vadd.f32 %v3541_v48, %v3411_v25 }
 0x232   :  { %v3673_v7 = vadd.f32 %v3541_v48, %v3415_v28  ;;  %v3677_v11 = vadd.f32 %v3541_v48, %v3419_v31  ;;  %v3681_v14 = vadd.f32 %v3541_v48, %v3423_v35  ;;  %v3685_v17 = vadd.f32 %v3541_v48, %v3427_v39 }
 0x233   :  { %v3689_v21 = vadd.f32 %v3541_v48, %v3431_v42  ;;  %v3693_v25 = vadd.f32 %v3541_v48, %v3435_v51  ;;  %v3697_v28 = vadd.f32 %v3541_v48, %v3439_v58  ;;  %v3701_v31 = vadd.f32 %v3541_v48, %v3443_v1 }
 0x234   :  { %v3705_v35 = vadd.f32 %v3541_v48, %v3447_v5  ;;  %v3709_v39 = vadd.f32 %v3541_v48, %v3451_v10  ;;  %v3713_v42 = vadd.f32 %v3541_v48, %v3455_v18  ;;  %v3717_v51 = vadd.f32 %v3541_v48, %v3459_v24 }
 0x235   :  { %v3721_v58 = vadd.f32 %v3541_v48, %v3463_v30  ;;  %v3725_v1 = vadd.f32 %v3541_v48, %v3467_v36  ;;  %v3729_v5 = vadd.f32 %v3541_v48, %v3471_v45  ;;  %v3733_v10 = vadd.f32 %v3541_v48, %v3475_v59 }
 0x236   :  { %v3737_v18 = vadd.f32 %v3541_v48, %v3479_v62  ;;  %v3741_v24 = vadd.f32 %v3541_v48, %v3483_v8  ;;  %v3745_v30 = vadd.f32 %v3541_v48, %v3487_v15  ;;  %v3749_v36 = vadd.f32 %v3541_v48, %v3491_v22 }
 0x237   :  { %v3753_v45 = vadd.f32 %v3541_v48, %v3495_v32  ;;  %v3757_v59 = vadd.f32 %v3541_v48, %v3499_v37  ;;  %v3761_v62 = vadd.f32 %v3541_v48, %v3503_v50  ;;  %v3765_v8 = vadd.f32 %v3541_v48, %v3507_v56 }
 0x238   :  { %v3769_v15 = vadd.f32 %v3541_v48, %v3511_v13  ;;  %v3773_v22 = vadd.f32 %v3541_v48, %v3515_v9  ;;  %v3777_v32 = vadd.f32 %v3541_v48, %v3519_v57  ;;  %v3781_v37 = vadd.f32 %v3541_v48, %v3523_v12  ;;  %v4741_v13 = vld [vmem:[#allocation11_spill] sm:$0xff] }
 0x239   :  { %4736 = vst [vmem:[#allocation9_spill] sm:$0xff] %v3761_v62  ;;  %v3785_v50 = vadd.f32 %v3541_v48, %v3527_v49  ;;  %v3789_v56 = vadd.f32 %v3541_v48, %v3531_v52  ;;  %v3793_v9 = vadd.f32 %v3541_v48, %v4741_v13  ;;  %v3797_v57 = vadd.f32 %v3541_v48, %v3539_v23 }
 0x23a   :  { %4737 = vst [vmem:[#allocation10_spill] sm:$0xff] %v3777_v32  ;;  %4738 = vst [vmem:[#allocation12_spill] sm:$0xff] %v3781_v37  ;;  %v4744_v32 = vld [vmem:[#allocation3_spill] sm:$0xff]  ;;  %v4746_v37 = vld [vmem:[#allocation4_spill] sm:$0xff]  ;;  %vm1700_vm0 = vcmp.gt.f32.partialorder %v3597_v20, 0.0  ;;  %vm1701_vm1 = vcmp.gt.f32.partialorder %v3601_v40, 0.0 }
 0x23b   :  { %4739 = vst [vmem:[#allocation13_spill] sm:$0xff] %v3785_v50  ;;  %4740 = vst [vmem:[#allocation14_spill] sm:$0xff] %v3789_v56  ;;  %v3801_v12 = vadd.f32 %v3541_v48, %v4744_v32  ;;  %v3805_v49 = vadd.f32 %v3541_v48, %v4746_v37  ;;  %v4748_v50 = vld [vmem:[#allocation5_spill] sm:$0xff]  ;;  %v4750_v56 = vld [vmem:[#allocation6_spill] sm:$0xff]  ;;  %v3825_v37 = vadd.f32 %v3541_v48, %v3569_v6  ;;  %vm1702_vm2 = vcmp.gt.f32.partialorder %v3605_v53, 0.0 }
 0x23c   :  { %4742 = vst [vmem:[#allocation15_spill] sm:$0xff] %v3793_v9  ;;  %4743 = vst [vmem:[#allocation16_spill] sm:$0xff] %v3797_v57  ;;  %v3809_v52 = vadd.f32 %v3541_v48, %v4748_v50  ;;  %v3813_v13 = vadd.f32 %v3541_v48, %v4750_v56  ;;  %v4752_v9 = vld [vmem:[#allocation7_spill] sm:$0xff]  ;;  %v4754_v57 = vld [vmem:[#allocation8_spill] sm:$0xff]  ;;  %v3829_v50 = vadd.f32 %v3541_v48, %v3573_v55  ;;  %vm1703_vm3 = vcmp.gt.f32.partialorder %v3609_v27, 0.0 }
 0x23d   :  { %4745 = vst [vmem:[#allocation17_spill] sm:$0xff] %v3801_v12  ;;  %4747 = vst [vmem:[#allocation18_spill] sm:$0xff] %v3805_v49  ;;  %v3817_v23 = vadd.f32 %v3541_v48, %v4752_v9  ;;  %v3821_v32 = vadd.f32 %v3541_v48, %v4754_v57  ;;  %v3833_v56 = vadd.f32 %v3541_v48, %v3577_v4  ;;  %vm1704_vm4 = vcmp.gt.f32.partialorder %v3613_v2, 0.0 }
 0x23e   :  { %4749 = vst [vmem:[#allocation19_spill] sm:$0xff] %v3809_v52  ;;  %4751 = vst [vmem:[#allocation20_spill] sm:$0xff] %v3813_v13  ;;  %v3837_v9 = vadd.f32 %v3541_v48, %v3581_v33  ;;  %v3841_v57 = vadd.f32 %v3541_v48, %v3585_v29  ;;  %vm1705_vm5 = vcmp.gt.f32.partialorder %v3617_v43, 0.0  ;;  %vm1706_vm6 = vcmp.gt.f32.partialorder %v3621_v34, 0.0 }
 0x23f   :  { %4753 = vst [vmem:[#allocation21_spill] sm:$0xff] %v3817_v23  ;;  %4755 = vst [vmem:[#allocation22_spill] sm:$0xff] %v3821_v32  ;;  %vm1707_vm7 = vcmp.gt.f32.partialorder %v3625_v47, 0.0  ;;  %vm1708_vm8 = vcmp.gt.f32.partialorder %v3629_v41, 0.0  ;;  %v3854_v6 = vadd.f32 %v3541_v48, %v3589_v19  ;;  %vm1709_vm9 = vcmp.gt.f32.partialorder %v3633_v16, 0.0 }
 0x240   :  { %4756 = vst [vmem:[#allocation23_spill] sm:$0xff] %v3825_v37  ;;  %4757 = vst [vmem:[#allocation24_spill] sm:$0xff] %v3829_v50  ;;  %v1764_v55 = vmul.f32 0.2, %v3597_v20  ;;  %v1765_v4 = vmul.f32 0.2, %v3601_v40  ;;  %v3862_v29 = vadd.f32 %v3541_v48, %v3593_v63 }
 0x241   :  { %4758 = vst [vmem:[#allocation25_spill] sm:$0xff] %v3833_v56  ;;  %4759 = vst [vmem:[#allocation26_spill] sm:$0xff] %v3837_v9  ;;  %v1766_v33 = vmul.f32 0.2, %v3605_v53  ;;  %vm1710_vm10 = vcmp.gt.f32.partialorder %v3637_v26, 0.0  ;;  %vm1711_vm11 = vcmp.gt.f32.partialorder %v3641_v46, 0.0 }
 0x242   :  { %4760 = vst [vmem:[#allocation27_spill] sm:$0xff] %v3841_v57  ;;  %4761 = vst [vmem:[#allocation11_spill] sm:$0xff] %v3854_v6  ;;  %v1767_v57 = vmul.f32 0.2, %v3609_v27  ;;  %v1768_v9 = vmul.f32 0.2, %v3613_v2  ;;  %v3875_v48 = vsel %vm1700_vm0, %v3597_v20, %v1764_v55  ;;  %v3886_v32 = vsel %vm1701_vm1, %v3601_v40, %v1765_v4 }
 0x243   :  { %4762 = vst [vmem:[#allocation3_spill] sm:$0xff] %v3862_v29  ;;  %v1769_v19 = vmul.f32 0.2, %v3617_v43  ;;  %v1770_v6 = vmul.f32 0.2, %v3621_v34  ;;  %4763 = vst [vmem:[#allocation4_spill] sm:$0xff] %v3875_v48  ;;  %v3901_v48 = vsel %vm1702_vm2, %v3605_v53, %v1766_v33 }
 0x244   :  { %v1771_v56 = vmul.f32 0.2, %v3625_v47  ;;  %v1772_v50 = vmul.f32 0.2, %v3629_v41  ;;  %vm1712_vm12 = vcmp.gt.f32.partialorder %v3645_v44, 0.0  ;;  %4764 = vst [vmem:[#allocation5_spill] sm:$0xff] %v3886_v32  ;;  %v3916_v13 = vsel %vm1703_vm3, %v3609_v27, %v1767_v57 }
 0x245   :  { %v1773_v63 = vmul.f32 0.2, %v3633_v16  ;;  %v1774_v29 = vmul.f32 0.2, %v3637_v26  ;;  %v3881_v37 = vmul.f32 0.2, %v3641_v46 }
 0x246   :  { %vm1713_vm13 = vcmp.gt.f32.partialorder %v3649_v54, 0.0  ;;  %v3890_v23 = vmul.f32 0.2, %v3645_v44  ;;  %v3893_v20 = vmul.f32 0.2, %v3649_v54  ;;  %4765 = vst [vmem:[#allocation6_spill] sm:$0xff] %v3901_v48 }
 0x247   :  { %v3896_v55 = vmul.f32 0.2, %v3653_v60  ;;  %vm1714_vm14 = vcmp.gt.f32.partialorder %v3653_v60, 0.0  ;;  %v3905_v40 = vmul.f32 0.2, %v3657_v38  ;;  %4767 = vst [vmem:[#allocation8_spill] sm:$0xff] %v3916_v13 }
 0x248   :  { %v3908_v4 = vmul.f32 0.2, %v3661_v61  ;;  %v3911_v32 = vmul.f32 0.2, %v3665_v0  ;;  %vm1715_vm15 = vcmp.gt.f32.partialorder %v3657_v38, 0.0  ;;  %vm1716_vm0 = vcmp.gt.f32.partialorder %v3661_v61, 0.0 }
 0x249   :  { %v3920_v53 = vmul.f32 0.2, %v3669_v3  ;;  %v3923_v33 = vmul.f32 0.2, %v3673_v7  ;;  %v3926_v48 = vmul.f32 0.2, %v3677_v11 }
 0x24a   :  { %4766 = vst [vmem:[#allocation7_spill] sm:$0xff] %v3911_v32  ;;  %v3931_v32 = vsel %vm1704_vm4, %v3613_v2, %v1768_v9  ;;  %v3935_v27 = vmul.f32 0.2, %v3681_v14  ;;  %v3938_v57 = vmul.f32 0.2, %v3685_v17  ;;  %vm1717_vm1 = vcmp.gt.f32.partialorder %v3665_v0, 0.0 }
 0x24b   :  { %4768 = vst [vmem:[#allocation28_spill] sm:$0xff] %v3926_v48  ;;  %4769 = vst [vmem:[#allocation29_spill] sm:$0xff] %v3931_v32  ;;  %v3941_v13 = vmul.f32 0.2, %v3689_v21  ;;  %v3946_v48 = vsel %vm1705_vm5, %v3617_v43, %v1769_v19  ;;  %v3950_v2 = vmul.f32 0.2, %v3693_v25 }
 0x24c   :  { %4771 = vst [vmem:[#allocation31_spill] sm:$0xff] %v3946_v48  ;;  %v3953_v9 = vmul.f32 0.2, %v3697_v28  ;;  %v3956_v32 = vmul.f32 0.2, %v3701_v31  ;;  %vm1718_vm2 = vcmp.gt.f32.partialorder %v3669_v3, 0.0 }
 0x24d   :  { %4770 = vst [vmem:[#allocation30_spill] sm:$0xff] %v3941_v13  ;;  %v3961_v13 = vsel %vm1706_vm6, %v3621_v34, %v1770_v6  ;;  %v3965_v43 = vmul.f32 0.2, %v3705_v35  ;;  %v3968_v19 = vmul.f32 0.2, %v3709_v39  ;;  %vm1719_vm3 = vcmp.gt.f32.partialorder %v3673_v7, 0.0 }
 0x24e   :  { %4772 = vst [vmem:[#allocation32_spill] sm:$0xff] %v3956_v32  ;;  %4773 = vst [vmem:[#allocation33_spill] sm:$0xff] %v3961_v13  ;;  %v3971_v48 = vmul.f32 0.2, %v3713_v42  ;;  %v3976_v32 = vsel %vm1707_vm7, %v3625_v47, %v1771_v56  ;;  %v3982_v34 = vmul.f32 0.2, %v3717_v51  ;;  %v3993_v47 = vsel %vm1708_vm8, %v3629_v41, %v1772_v50 }
 0x24f   :  { %4774 = vst [vmem:[#allocation34_spill] sm:$0xff] %v3976_v32  ;;  %v3985_v6 = vmul.f32 0.2, %v3721_v58  ;;  %v3988_v13 = vmul.f32 0.2, %v3725_v1  ;;  %4776 = vst [vmem:[#allocation36_spill] sm:$0xff] %v3993_v47  ;;  %v4011_v41 = vsel %vm1709_vm9, %v3633_v16, %v1773_v63  ;;  %v4029_v16 = vsel %vm1710_vm10, %v3637_v26, %v1774_v29 }
 0x250   :  { %vm1722_vm6 = vcmp.gt.f32.partialorder %v3685_v17, 0.0  ;;  %v4000_v56 = vmul.f32 0.2, %v3729_v5  ;;  %v4003_v32 = vmul.f32 0.2, %v3733_v10  ;;  %4778 = vst [vmem:[#allocation38_spill] sm:$0xff] %v4011_v41  ;;  %v4048_v26 = vsel %vm1711_vm11, %v3641_v46, %v3881_v37 }
 0x251   :  { %4775 = vst [vmem:[#allocation35_spill] sm:$0xff] %v3988_v13  ;;  %v4006_v13 = vmul.f32 0.2, %v3737_v18  ;;  %vm1726_vm8 = vcmp.gt.f32.partialorder %v3701_v31, 0.0  ;;  %v4018_v50 = vmul.f32 0.2, %v3741_v24  ;;  %v4067_v46 = vsel %vm1712_vm12, %v3645_v44, %v3890_v23 }
 0x252   :  { %v4021_v47 = vmul.f32 0.2, %v3745_v30  ;;  %4780 = vst [vmem:[#allocation40_spill] sm:$0xff] %v4029_v16  ;;  %vm1730_vm9 = vcmp.gt.f32.partialorder %v3717_v51, 0.0  ;;  %v4036_v63 = vmul.f32 0.2, %v3753_v45  ;;  %v4086_v44 = vsel %vm1713_vm13, %v3649_v54, %v3893_v20 }
 0x253   :  { %4777 = vst [vmem:[#allocation37_spill] sm:$0xff] %v4006_v13  ;;  %v4024_v13 = vmul.f32 0.2, %v3749_v36  ;;  %v4039_v41 = vmul.f32 0.2, %v3757_v59  ;;  %4783 = vst [vmem:[#allocation43_spill] sm:$0xff] %v4048_v26  ;;  %v4105_v54 = vsel %vm1714_vm14, %v3653_v60, %v3896_v55  ;;  %v4124_v60 = vsel %vm1715_vm15, %v3657_v38, %v3905_v40 }
 0x254   :  { %vm1734_vm10 = vcmp.gt.f32.partialorder %v3733_v10, 0.0  ;;  %v4055_v29 = vmul.f32 0.2, %v3765_v8  ;;  %v4058_v16 = vmul.f32 0.2, %v3769_v15  ;;  %4787 = vst [vmem:[#allocation47_spill] sm:$0xff] %v4067_v46  ;;  %v4137_v38 = vsel %vm1716_vm0, %v3661_v61, %v3908_v4 }
 0x255   :  { %4779 = vst [vmem:[#allocation39_spill] sm:$0xff] %v4024_v13  ;;  %4781 = vst [vmem:[#allocation41_spill] sm:$0xff] %v4039_v41  ;;  %v4042_v13 = vmul.f32 0.2, %v3761_v62  ;;  %vm1738_vm11 = vcmp.gt.f32.partialorder %v3749_v36, 0.0  ;;  %v4788_v37 = vld [vmem:[#allocation10_spill] sm:$0xff] }
 0x256   :  { %4784 = vst [vmem:[#allocation44_spill] sm:$0xff] %v4055_v29  ;;  %4785 = vst [vmem:[#allocation45_spill] sm:$0xff] %v4058_v16  ;;  %v4074_v26 = vmul.f32 0.2, %v4788_v37  ;;  %v4790_v16 = vld [vmem:[#allocation12_spill] sm:$0xff]  ;;  %vm1742_vm12 = vcmp.gt.f32.partialorder %v3765_v8, 0.0 }
 0x257   :  { %4782 = vst [vmem:[#allocation42_spill] sm:$0xff] %v4042_v13  ;;  %v4061_v13 = vmul.f32 0.2, %v3773_v22  ;;  %v4077_v29 = vmul.f32 0.2, %v4790_v16  ;;  %4794 = vst [vmem:[#allocation48_spill] sm:$0xff] %v4086_v44 }
 0x258   :  { %4789 = vst [vmem:[#allocation10_spill] sm:$0xff] %v4074_v26  ;;  %v4795_v23 = vld [vmem:[#allocation14_spill] sm:$0xff]  ;;  %4800 = vst [vmem:[#allocation50_spill] sm:$0xff] %v4105_v54  ;;  %vm1746_vm13 = vcmp.gt.f32.partialorder %v4790_v16, 0.0  ;;  %v4112_v20 = vmul.f32 0.2, %v3801_v12 }
 0x259   :  { %4786 = vst [vmem:[#allocation46_spill] sm:$0xff] %v4061_v13  ;;  %4791 = vst [vmem:[#allocation12_spill] sm:$0xff] %v4077_v29  ;;  %v4792_v13 = vld [vmem:[#allocation13_spill] sm:$0xff]  ;;  %v4093_v46 = vmul.f32 0.2, %v4795_v23  ;;  %v4796_v29 = vld [vmem:[#allocation15_spill] sm:$0xff] }
 0x25a   :  { %v4080_v41 = vmul.f32 0.2, %v4792_v13  ;;  %v4096_v26 = vmul.f32 0.2, %v4796_v29  ;;  %4801 = vst [vmem:[#allocation51_spill] sm:$0xff] %v4112_v20  ;;  %4804 = vst [vmem:[#allocation54_spill] sm:$0xff] %v4124_v60 }
 0x25b   :  { %v4115_v44 = vmul.f32 0.2, %v3805_v49  ;;  %v4805_v55 = vld [vmem:[#allocation20_spill] sm:$0xff]  ;;  %v4807_v29 = vld [vmem:[#allocation22_spill] sm:$0xff]  ;;  %4808 = vst [vmem:[#allocation55_spill] sm:$0xff] %v4137_v38  ;;  %v4809_v40 = vld [vmem:[#allocation23_spill] sm:$0xff] }
 0x25c   :  { %4793 = vst [vmem:[#allocation13_spill] sm:$0xff] %v4080_v41  ;;  %4797 = vst [vmem:[#allocation14_spill] sm:$0xff] %v4096_v26  ;;  %v4798_v41 = vld [vmem:[#allocation16_spill] sm:$0xff]  ;;  %v1818_v54 = vmul.f32 0.2, %v4805_v55  ;;  %vm1754_vm15 = vcmp.gt.f32.partialorder %v4805_v55, 0.0 }
 0x25d   :  { %v4099_v62 = vmul.f32 0.2, %v4798_v41  ;;  %4802 = vst [vmem:[#allocation52_spill] sm:$0xff] %v4115_v44  ;;  %vm1750_vm14 = vcmp.gt.f32.partialorder %v4798_v41, 0.0  ;;  %v4806_v44 = vld [vmem:[#allocation21_spill] sm:$0xff]  ;;  %v4812_v26 = vld [vmem:[#allocation7_spill] sm:$0xff] }
 0x25e   :  { %v1819_v20 = vmul.f32 0.2, %v4806_v44  ;;  %v1821_v60 = vmul.f32 0.2, %v4809_v40  ;;  %v4811_v12 = vld [vmem:[#allocation25_spill] sm:$0xff]  ;;  %v4150_v61 = vsel %vm1717_vm1, %v3665_v0, %v4812_v26  ;;  %v4814_v4 = vld [vmem:[#allocation26_spill] sm:$0xff]  ;;  %v4163_v0 = vsel %vm1718_vm2, %v3669_v3, %v3920_v53 }
 0x25f   :  { %4799 = vst [vmem:[#allocation49_spill] sm:$0xff] %v4099_v62  ;;  %v4118_v62 = vmul.f32 0.2, %v3809_v52  ;;  %v4810_v52 = vld [vmem:[#allocation24_spill] sm:$0xff]  ;;  %v1823_v41 = vmul.f32 0.2, %v4811_v12  ;;  %v4190_v53 = vsel %vm1722_vm6, %v3685_v17, %v3938_v57 }
 0x260   :  { %v1822_v49 = vmul.f32 0.2, %v4810_v52  ;;  %4813 = vst [vmem:[#allocation24_spill] sm:$0xff] %v4150_v61  ;;  %vm1758_vm0 = vcmp.gt.f32.partialorder %v4810_v52, 0.0  ;;  %vm1760_vm4 = vcmp.gt.f32.partialorder %v4814_v4, 0.0  ;;  %v4815_v38 = vld [vmem:[#allocation27_spill] sm:$0xff] }
 0x261   :  { %4803 = vst [vmem:[#allocation53_spill] sm:$0xff] %v4118_v62  ;;  %v1820_v62 = vmul.f32 0.2, %v4807_v29  ;;  %v1824_v40 = vmul.f32 0.2, %v4814_v4  ;;  %v4816_v44 = vld [vmem:[#allocation11_spill] sm:$0xff]  ;;  %v4172_v4 = vsel %vm1719_vm3, %v3673_v7, %v3923_v33 }
 0x262   :  { %v1825_v29 = vmul.f32 0.2, %v4815_v38  ;;  %v1826_v55 = vmul.f32 0.2, %v4816_v44  ;;  %vm1762_vm1 = vcmp.gt.f32.partialorder %v4816_v44, 0.0  ;;  %v4817_v26 = vld [vmem:[#allocation3_spill] sm:$0xff] }
 0x263   :  { %vm1763_vm5 = vcmp.gt.f32.partialorder %v4817_v26, 0.0  ;;  %v1827_v61 = vmul.f32 0.2, %v4817_v26  ;;  %v4818_v38 = vld [vmem:[#allocation28_spill] sm:$0xff]  ;;  %vm4819_vm7 = vcmp.gt.f32.partialorder %v3677_v11, 0.0  ;;  %vm4820_vm2 = vcmp.gt.f32.partialorder %v3681_v14, 0.0 }
 0x264   :  { %v4178_v12 = vsel %vm4819_vm7, %v3677_v11, %v4818_v38  ;;  %v4184_v3 = vsel %vm4820_vm2, %v3681_v14, %v3935_v27  ;;  %v4821_v7 = vld [vmem:[#allocation30_spill] sm:$0xff]  ;;  %vm4822_vm3 = vcmp.gt.f32.partialorder %v3689_v21, 0.0  ;;  %vm4823_vm7 = vcmp.gt.f32.partialorder %v3693_v25, 0.0  ;;  %v4825_v17 = vld [vmem:[#allocation32_spill] sm:$0xff]  ;;  %v4856_v38 = vld [vmem:[#allocation15_spill] sm:$0xff] }
 0x265   :  { %v4196_v33 = vsel %vm4822_vm3, %v3689_v21, %v4821_v7  ;;  %v4202_v11 = vsel %vm4823_vm7, %v3693_v25, %v3950_v2  ;;  %vm4824_vm2 = vcmp.gt.f32.partialorder %v3697_v28, 0.0  ;;  %v4214_v27 = vsel %vm1726_vm8, %v3701_v31, %v4825_v17  ;;  %v4859_v17 = vld [vmem:[#allocation16_spill] sm:$0xff] }
 0x266   :  { %v4208_v14 = vsel %vm4824_vm2, %v3697_v28, %v3953_v9  ;;  %vm4826_vm6 = vcmp.gt.f32.partialorder %v3705_v35, 0.0  ;;  %vm4827_vm3 = vcmp.gt.f32.partialorder %v3709_v39, 0.0  ;;  %vm4828_vm7 = vcmp.gt.f32.partialorder %v3713_v42, 0.0  ;;  %v4842_v9 = vld [vmem:[#allocation9_spill] sm:$0xff] }
 0x267   :  { %v4220_v21 = vsel %vm4826_vm6, %v3705_v35, %v3965_v43  ;;  %v4226_v25 = vsel %vm4827_vm3, %v3709_v39, %v3968_v19  ;;  %v4232_v28 = vsel %vm4828_vm7, %v3713_v42, %v3971_v48  ;;  %v4238_v31 = vsel %vm1730_vm9, %v3717_v51, %v3982_v34  ;;  %v4830_v39 = vld [vmem:[#allocation35_spill] sm:$0xff] }
 0x268   :  { %vm4829_vm8 = vcmp.gt.f32.partialorder %v3721_v58, 0.0  ;;  %vm4831_vm2 = vcmp.gt.f32.partialorder %v3725_v1, 0.0  ;;  %vm4832_vm6 = vcmp.gt.f32.partialorder %v3729_v5, 0.0  ;;  %v4262_v51 = vsel %vm1734_vm10, %v3733_v10, %v4003_v32  ;;  %v4837_v10 = vld [vmem:[#allocation39_spill] sm:$0xff] }
 0x269   :  { %v4244_v35 = vsel %vm4829_vm8, %v3721_v58, %v3985_v6  ;;  %v4250_v57 = vsel %vm4831_vm2, %v3725_v1, %v4830_v39  ;;  %v4256_v42 = vsel %vm4832_vm6, %v3729_v5, %v4000_v56  ;;  %v4833_v58 = vld [vmem:[#allocation37_spill] sm:$0xff]  ;;  %vm4834_vm9 = vcmp.gt.f32.partialorder %v3737_v18, 0.0 }
 0x26a   :  { %v4268_v48 = vsel %vm4834_vm9, %v3737_v18, %v4833_v58  ;;  %vm4835_vm3 = vcmp.gt.f32.partialorder %v3741_v24, 0.0  ;;  %vm4836_vm7 = vcmp.gt.f32.partialorder %v3745_v30, 0.0  ;;  %v4286_v32 = vsel %vm1738_vm11, %v3749_v36, %v4837_v10  ;;  %v4844_v36 = vld [vmem:[#allocation44_spill] sm:$0xff]  ;;  %v4861_v58 = vld [vmem:[#allocation17_spill] sm:$0xff] }
 0x26b   :  { %v4274_v1 = vsel %vm4835_vm3, %v3741_v24, %v4018_v50  ;;  %v4280_v5 = vsel %vm4836_vm7, %v3745_v30, %v4021_v47  ;;  %vm4838_vm10 = vcmp.gt.f32.partialorder %v3753_v45, 0.0  ;;  %v4839_v24 = vld [vmem:[#allocation41_spill] sm:$0xff]  ;;  %vm4840_vm8 = vcmp.gt.f32.partialorder %v3757_v59, 0.0  ;;  %v4841_v30 = vld [vmem:[#allocation42_spill] sm:$0xff] }
 0x26c   :  { %v4292_v18 = vsel %vm4838_vm10, %v3753_v45, %v4036_v63  ;;  %v4298_v2 = vsel %vm4840_vm8, %v3757_v59, %v4839_v24  ;;  %vm4843_vm2 = vcmp.gt.f32.partialorder %v4842_v9, 0.0  ;;  %v4310_v19 = vsel %vm1742_vm12, %v3765_v8, %v4844_v36  ;;  %v4845_v45 = vld [vmem:[#allocation45_spill] sm:$0xff]  ;;  %v4847_v59 = vld [vmem:[#allocation46_spill] sm:$0xff]  ;;  %v4851_v8 = vld [vmem:[#allocation12_spill] sm:$0xff] }
 0x26d   :  { %v4304_v43 = vsel %vm4843_vm2, %v4842_v9, %v4841_v30  ;;  %vm4846_vm11 = vcmp.gt.f32.partialorder %v3769_v15, 0.0  ;;  %vm4848_vm6 = vcmp.gt.f32.partialorder %v3773_v22, 0.0  ;;  %v4849_v47 = vld [vmem:[#allocation10_spill] sm:$0xff]  ;;  %vm4850_vm9 = vcmp.gt.f32.partialorder %v4788_v37, 0.0  ;;  %v4866_v30 = vld [vmem:[#allocation53_spill] sm:$0xff]  ;;  %v4867_v9 = vld [vmem:[#allocation19_spill] sm:$0xff] }
 0x26e   :  { %v4316_v34 = vsel %vm4846_vm11, %v3769_v15, %v4845_v45  ;;  %v4322_v6 = vsel %vm4848_vm6, %v3773_v22, %v4847_v59  ;;  %v4328_v56 = vsel %vm4850_vm9, %v4788_v37, %v4849_v47  ;;  %v4334_v50 = vsel %vm1746_vm13, %v4790_v16, %v4851_v8  ;;  %v4852_v15 = vld [vmem:[#allocation13_spill] sm:$0xff]  ;;  %v4855_v37 = vld [vmem:[#allocation14_spill] sm:$0xff]  ;;  %v4869_v45 = vld [vmem:[#allocation20_spill] sm:$0xff] }
 0x26f   :  { %vm4853_vm12 = vcmp.gt.f32.partialorder %v4792_v13, 0.0  ;;  %vm4854_vm3 = vcmp.gt.f32.partialorder %v4795_v23, 0.0  ;;  %vm4857_vm7 = vcmp.gt.f32.partialorder %v4856_v38, 0.0  ;;  %v4858_v16 = vld [vmem:[#allocation49_spill] sm:$0xff]  ;;  %vm4862_vm13 = vcmp.gt.f32.partialorder %v4861_v58, 0.0 }
 0x270   :  { %v4340_v63 = vsel %vm4853_vm12, %v4792_v13, %v4852_v15  ;;  %v4346_v22 = vsel %vm4854_vm3, %v4795_v23, %v4093_v46  ;;  %v4352_v7 = vsel %vm4857_vm7, %v4856_v38, %v4855_v37  ;;  %v4358_v39 = vsel %vm1750_vm14, %v4859_v17, %v4858_v16  ;;  %v4860_v13 = vld [vmem:[#allocation51_spill] sm:$0xff]  ;;  %v4863_v46 = vld [vmem:[#allocation52_spill] sm:$0xff]  ;;  %v4864_v23 = vld [vmem:[#allocation18_spill] sm:$0xff] }
 0x271   :  { %v4364_v10 = vsel %vm4862_vm13, %v4861_v58, %v4860_v13  ;;  %vm4865_vm10 = vcmp.gt.f32.partialorder %v4864_v23, 0.0  ;;  %vm4868_vm8 = vcmp.gt.f32.partialorder %v4867_v9, 0.0  ;;  %v4381_v59 = vsel %vm1754_vm15, %v4869_v45, %v1818_v54  ;;  %v4870_v47 = vld [vmem:[#allocation21_spill] sm:$0xff]  ;;  %v4872_v15 = vld [vmem:[#allocation22_spill] sm:$0xff]  ;;  %v4874_v38 = vld [vmem:[#allocation23_spill] sm:$0xff] }
 0x272   :  { %v4370_v24 = vsel %vm4865_vm10, %v4864_v23, %v4863_v46  ;;  %v4376_v36 = vsel %vm4868_vm8, %v4867_v9, %v4866_v30  ;;  %vm4871_vm14 = vcmp.gt.f32.partialorder %v4870_v47, 0.0  ;;  %vm4873_vm2 = vcmp.gt.f32.partialorder %v4872_v15, 0.0  ;;  %v4876_v17 = vld [vmem:[#allocation25_spill] sm:$0xff]  ;;  %v4878_v13 = vld [vmem:[#allocation26_spill] sm:$0xff]  ;;  %v4879_v58 = vld [vmem:[#allocation27_spill] sm:$0xff] }
 0x273   :  { %v4386_v8 = vsel %vm4871_vm14, %v4870_v47, %v1819_v20  ;;  %v4391_v37 = vsel %vm4873_vm2, %v4872_v15, %v1820_v62  ;;  %vm4875_vm11 = vcmp.gt.f32.partialorder %v4874_v38, 0.0  ;;  %v4401_v54 = vsel %vm1758_vm0, %v4810_v52, %v1822_v49  ;;  %v4884_v46 = vld [vmem:[#allocation5_spill] sm:$0xff]  ;;  %v4886_v30 = vld [vmem:[#allocation8_spill] sm:$0xff]  ;;  %v4888_v47 = vld [vmem:[#allocation31_spill] sm:$0xff] }
 0x274   :  { %v4396_v16 = vsel %vm4875_vm11, %v4874_v38, %v1821_v60  ;;  %vm4877_vm15 = vcmp.gt.f32.partialorder %v4876_v17, 0.0  ;;  %v4411_v62 = vsel %vm1760_vm4, %v4878_v13, %v1824_v40  ;;  %vm4880_vm6 = vcmp.gt.f32.partialorder %v4879_v58, 0.0  ;;  %v4885_v40 = vld [vmem:[#allocation6_spill] sm:$0xff]  ;;  %v4887_v45 = vld [vmem:[#allocation29_spill] sm:$0xff]  ;;  %v4891_v13 = vld [vmem:[#allocation36_spill] sm:$0xff] }
 0x275   :  { %v4406_v20 = vsel %vm4877_vm15, %v4876_v17, %v1823_v41  ;;  %v4416_v60 = vsel %vm4880_vm6, %v4879_v58, %v1825_v29  ;;  %v4421_v49 = vsel %vm1762_vm1, %v4816_v44, %v1826_v55  ;;  %v4426_v52 = vsel %vm1763_vm5, %v4817_v26, %v1827_v61  ;;  %v4883_v41 = vld [vmem:[#allocation4_spill] sm:$0xff]  ;;  %v4889_v15 = vld [vmem:[#allocation33_spill] sm:$0xff]  ;;  %v4890_v38 = vld [vmem:[#allocation34_spill] sm:$0xff] }
 0x276   :  { %4881 = vst [vmem:[#allocation7_spill] sm:$0xff] %v4416_v60  ;;  %4882 = vst [vmem:[#allocation11_spill] sm:$0xff] %v4421_v49  ;;  %v2388_v23 = vpack.c.bf16 %v4884_v46, %v4883_v41  ;;  %v2393_v9 = vpack.c.bf16 %v4886_v30, %v4885_v40  ;;  %v2398_v29 = vpack.c.bf16 %v4888_v47, %v4887_v45  ;;  %v4892_v44 = vld [vmem:[#allocation38_spill] sm:$0xff]  ;;  %v4893_v58 = vld [vmem:[#allocation40_spill] sm:$0xff] }
 0x277   :  { %v2403_v17 = vpack.c.bf16 %v4890_v38, %v4889_v15  ;;  %v2408_v55 = vpack.c.bf16 %v4892_v44, %v4891_v13  ;;  %v4894_v49 = vld [vmem:[#allocation43_spill] sm:$0xff]  ;;  %v4896_v26 = vld [vmem:[#allocation48_spill] sm:$0xff]  ;;  %v4897_v46 = vld [vmem:[#allocation50_spill] sm:$0xff] }
 0x278   :  { %v2413_v60 = vpack.c.bf16 %v4894_v49, %v4893_v58  ;;  %2389 = vst [vmem:[%s4593_s5] sm:$0xff] %v2388_v23   ;;  %2545 = vst [vmem:[%s4593_s5 + $0x8] sm:$0xff] %v2393_v9   ;;  %v4895_v61 = vld [vmem:[#allocation47_spill] sm:$0xff]  ;;  %v4898_v40 = vld [vmem:[#allocation54_spill] sm:$0xff]  ;;  %v2433_v49 = vpack.c.bf16 %v4172_v4, %v4163_v0  ;;  %v2438_v23 = vpack.c.bf16 %v4184_v3, %v4178_v12 }
 0x279   :  { %v2418_v41 = vpack.c.bf16 %v4896_v26, %v4895_v61  ;;  %v2423_v30 = vpack.c.bf16 %v4898_v40, %v4897_v46  ;;  %v4899_v45 = vld [vmem:[#allocation55_spill] sm:$0xff]  ;;  %v4900_v47 = vld [vmem:[#allocation24_spill] sm:$0xff]  ;;  %2546 = vst [vmem:[%s4593_s5 + $0x10] sm:$0xff] %v2398_v29   ;;  %2547 = vst [vmem:[%s4593_s5 + $0x18] sm:$0xff] %v2403_v17   ;;  %v2443_v4 = vpack.c.bf16 %v4196_v33, %v4190_v53 }
 0x27a   :  { %v2428_v15 = vpack.c.bf16 %v4900_v47, %v4899_v45  ;;  %2548 = vst [vmem:[%s4593_s5 + $0x20] sm:$0xff] %v2408_v55   ;;  %2549 = vst [vmem:[%s4593_s5 + $0x28] sm:$0xff] %v2413_v60   ;;  %v2448_v0 = vpack.c.bf16 %v4208_v14, %v4202_v11  ;;  %v2453_v9 = vpack.c.bf16 %v4220_v21, %v4214_v27 }
 0x27b   :  { %2550 = vst [vmem:[%s4593_s5 + $0x30] sm:$0xff] %v2418_v41   ;;  %2551 = vst [vmem:[%s4593_s5 + $0x38] sm:$0xff] %v2423_v30   ;;  %v2458_v12 = vpack.c.bf16 %v4232_v28, %v4226_v25  ;;  %v2463_v3 = vpack.c.bf16 %v4244_v35, %v4238_v31  ;;  %v2468_v53 = vpack.c.bf16 %v4256_v42, %v4250_v57 }
 0x27c   :  { %2552 = vst [vmem:[%s4593_s5 + $0x40] sm:$0xff] %v2428_v15   ;;  %2553 = vst [vmem:[%s4593_s5 + $0x48] sm:$0xff] %v2433_v49   ;;  %v2473_v33 = vpack.c.bf16 %v4268_v48, %v4262_v51  ;;  %v2478_v11 = vpack.c.bf16 %v4280_v5, %v4274_v1  ;;  %v2483_v14 = vpack.c.bf16 %v4292_v18, %v4286_v32 }
 0x27d   :  { %2554 = vst [vmem:[%s4593_s5 + $0x50] sm:$0xff] %v2438_v23   ;;  %2555 = vst [vmem:[%s4593_s5 + $0x58] sm:$0xff] %v2443_v4   ;;  %v2488_v27 = vpack.c.bf16 %v4304_v43, %v4298_v2  ;;  %v2493_v21 = vpack.c.bf16 %v4316_v34, %v4310_v19  ;;  %v2498_v25 = vpack.c.bf16 %v4328_v56, %v4322_v6  ;;  %v4901_v1 = vld [vmem:[#allocation7_spill] sm:$0xff] }
 0x27e   :  { %2556 = vst [vmem:[%s4593_s5 + $0x60] sm:$0xff] %v2448_v0   ;;  %2557 = vst [vmem:[%s4593_s5 + $0x68] sm:$0xff] %v2453_v9   ;;  %v2503_v28 = vpack.c.bf16 %v4340_v63, %v4334_v50  ;;  %v2508_v31 = vpack.c.bf16 %v4352_v7, %v4346_v22  ;;  %v2513_v35 = vpack.c.bf16 %v4364_v10, %v4358_v39  ;;  %v4902_v32 = vld [vmem:[#allocation11_spill] sm:$0xff] }
 0x27f   :  { %2558 = vst [vmem:[%s4593_s5 + $0x70] sm:$0xff] %v2458_v12   ;;  %2559 = vst [vmem:[%s4593_s5 + $0x78] sm:$0xff] %v2463_v3   ;;  %v2518_v57 = vpack.c.bf16 %v4376_v36, %v4370_v24  ;;  %v2523_v42 = vpack.c.bf16 %v4386_v8, %v4381_v59  ;;  %v2528_v51 = vpack.c.bf16 %v4396_v16, %v4391_v37 }
 0x280   :  { %2560 = vst [vmem:[%s4593_s5 + $0x80] sm:$0xff] %v2468_v53   ;;  %2561 = vst [vmem:[%s4593_s5 + $0x88] sm:$0xff] %v2473_v33   ;;  %v2533_v48 = vpack.c.bf16 %v4406_v20, %v4401_v54  ;;  %v2538_v5 = vpack.c.bf16 %v4901_v1, %v4411_v62  ;;  %v2543_v18 = vpack.c.bf16 %v4426_v52, %v4902_v32 }
 0x281   :  { %2562 = vst [vmem:[%s4593_s5 + $0x90] sm:$0xff] %v2478_v11   ;;  %2563 = vst [vmem:[%s4593_s5 + $0x98] sm:$0xff] %v2483_v14  }
 0x282   :  { %2564 = vst [vmem:[%s4593_s5 + $0xa0] sm:$0xff] %v2488_v27   ;;  %2565 = vst [vmem:[%s4593_s5 + $0xa8] sm:$0xff] %v2493_v21  }
 0x283   :  { %2566 = vst [vmem:[%s4593_s5 + $0xb0] sm:$0xff] %v2498_v25   ;;  %2567 = vst [vmem:[%s4593_s5 + $0xb8] sm:$0xff] %v2503_v28  }
 0x284   :  { %2568 = vst [vmem:[%s4593_s5 + $0xc0] sm:$0xff] %v2508_v31   ;;  %2569 = vst [vmem:[%s4593_s5 + $0xc8] sm:$0xff] %v2513_v35  }
 0x285   :  { %2570 = vst [vmem:[%s4593_s5 + $0xd0] sm:$0xff] %v2518_v57   ;;  %2571 = vst [vmem:[%s4593_s5 + $0xd8] sm:$0xff] %v2523_v42  }
 0x286   :  { %2572 = vst [vmem:[%s4593_s5 + $0xe0] sm:$0xff] %v2528_v51   ;;  %2573 = vst [vmem:[%s4593_s5 + $0xe8] sm:$0xff] %v2533_v48  }
 0x287   :  { %2574 = vst [vmem:[%s4593_s5 + $0xf0] sm:$0xff] %v2538_v5   ;;  %2575 = vst [vmem:[%s4593_s5 + $0xf8] sm:$0xff] %v2543_v18  }

// kernel: _lambda_.6
= control target key start
LH: loop header
LB: loop body
LE: loop exit
PB: predicated region body
PF: predicated region fallthrough
CT: control target
= control target key end

     0   :  { %s2895_s1 = inlined_call_operand.vmem [shape: bf16[896,128], index: 1, kind: input, shape index: {}]   ;;  %s2896_s0 = inlined_call_operand.vmem [shape: bf16[128,896], index: 0, kind: input, shape index: {}]   ;;  %s2897_s2 = inlined_call_operand.vmem [shape: f32[1,128], index: 2, kind: input, shape index: {}]   ;;  %s2898_s3 = inlined_call_operand.vmem [shape: f32[1,128], index: 3, kind: input, shape index: {}]   ;;  %s2899_s4 = inlined_call_operand.vmem [shape: f32[1,128], index: 4, kind: input, shape index: {}]   ;;  %s2900_s5 = inlined_call_operand.vmem [shape: bf16[128,128], index: 5, kind: output, shape index: {}]  }
   0x1   :  { %v2075_v0 = vld [vmem:[%s2895_s1 + $0x78] sm:$0xff]   ;;  %v2079_v4 = vld [vmem:[%s2895_s1 + $0x70] sm:$0xff]   ;;  %v2083_v8 = vld [vmem:[%s2895_s1 + $0x68] sm:$0xff]  }
   0x2   :  { %v2076_v1 = vld [vmem:[%s2895_s1 + $0xf8] sm:$0xff]   ;;  %1835 = vmatprep.subr.bf16.mxu0 %v2075_v0  ;;  %v2080_v5 = vld [vmem:[%s2895_s1 + $0xf0] sm:$0xff]   ;;  %v2084_v9 = vld [vmem:[%s2895_s1 + $0xe8] sm:$0xff]  }
   0x3   :  { %v2077_v2 = vld [vmem:[%s2895_s1 + $0x38] sm:$0xff]   ;;  %1899 = vmatprep.subr.bf16.mxu1 %v2076_v1  ;;  %v2081_v6 = vld [vmem:[%s2895_s1 + $0x30] sm:$0xff]   ;;  %v2085_v10 = vld [vmem:[%s2895_s1 + $0x28] sm:$0xff]  }
   0x4   :  { %v2078_v3 = vld [vmem:[%s2895_s1 + $0xb8] sm:$0xff]   ;;  %1836 = vmatpush3.bf16.msra.mxu0 %v2077_v2  ;;  %v2082_v7 = vld [vmem:[%s2895_s1 + $0xb0] sm:$0xff]   ;;  %v2086_v11 = vld [vmem:[%s2895_s1 + $0xa8] sm:$0xff]  }
   0x5   :  { %1900 = vmatpush3.bf16.msra.mxu1 %v2078_v3  ;;  %1837 = vmatprep.subr.bf16.mxu0 %v2079_v4  ;;  %v2087_v12 = vld [vmem:[%s2895_s1 + $0x60] sm:$0xff]   ;;  %v2091_v16 = vld [vmem:[%s2895_s1 + $0x58] sm:$0xff]   ;;  %v2095_v20 = vld [vmem:[%s2895_s1 + $0x50] sm:$0xff]  }
   0x6   :  { %1901 = vmatprep.subr.bf16.mxu1 %v2080_v5  ;;  %v2088_v13 = vld [vmem:[%s2895_s1 + $0xe0] sm:$0xff]   ;;  %v2092_v17 = vld [vmem:[%s2895_s1 + $0xd8] sm:$0xff]   ;;  %v2096_v21 = vld [vmem:[%s2895_s1 + $0xd0] sm:$0xff]  }
   0x7   :  { %v2089_v14 = vld [vmem:[%s2895_s1 + $0x20] sm:$0xff]   ;;  %v2093_v18 = vld [vmem:[%s2895_s1 + $0x18] sm:$0xff]   ;;  %v2097_v22 = vld [vmem:[%s2895_s1 + $0x10] sm:$0xff]  }
   0x8   :  { %1838 = vmatpush3.bf16.msra.mxu0 %v2081_v6  ;;  %v2090_v15 = vld [vmem:[%s2895_s1 + $0xa0] sm:$0xff]   ;;  %v2094_v19 = vld [vmem:[%s2895_s1 + $0x98] sm:$0xff]   ;;  %v2098_v23 = vld [vmem:[%s2895_s1 + $0x90] sm:$0xff]  }
   0x9   :  { %1902 = vmatpush3.bf16.msra.mxu1 %v2082_v7  ;;  %1839 = vmatprep.subr.bf16.mxu0 %v2083_v8  ;;  %v2099_v24 = vld [vmem:[%s2895_s1 + $0x48] sm:$0xff]   ;;  %v2103_v28 = vld [vmem:[%s2895_s1 + $0x40] sm:$0xff]   ;;  %v2113_v36 = vld [vmem:[%s2895_s1 + $0x178] sm:$0xff]  }
   0xa   :  { %1903 = vmatprep.subr.bf16.mxu1 %v2084_v9  ;;  %v2100_v25 = vld [vmem:[%s2895_s1 + $0xc8] sm:$0xff]   ;;  %v2104_v29 = vld [vmem:[%s2895_s1 + $0xc0] sm:$0xff]   ;;  %v2114_v37 = vld [vmem:[%s2895_s1 + $0x138] sm:$0xff]  }
   0xb   :  { %v2101_v26 = vld [vmem:[%s2895_s1 + $0x8] sm:$0xff]   ;;  %v2105_v30 = vld [vmem:[%s2895_s1] sm:$0xff]   ;;  %v2115_v38 = vld [vmem:[%s2896_s0 + $0x3c] ss:$28 sps:$4 sm:$0xff]  }
   0xc   :  { %1840 = vmatpush3.bf16.msra.mxu0 %v2085_v10  ;;  %v2102_v27 = vld [vmem:[%s2895_s1 + $0x88] sm:$0xff]   ;;  %v2106_v31 = vld [vmem:[%s2895_s1 + $0x80] sm:$0xff]   ;;  %v2119_v40 = vld [vmem:[%s2896_s0 + $0x38] ss:$28 sps:$4 sm:$0xff]  }
   0xd   :  { %1904 = vmatpush3.bf16.msra.mxu1 %v2086_v11  ;;  %1841 = vmatprep.subr.bf16.mxu0 %v2087_v12  ;;  %v2107_v32 = vld [vmem:[%s2896_s0] ss:$28 sps:$4 sm:$0xff]   ;;  %v2110_v34 = vld [vmem:[%s2896_s0 + $0x8] ss:$28 sps:$4 sm:$0xff]   ;;  %v2121_v42 = vld [vmem:[%s2895_s1 + $0x170] sm:$0xff]  }
   0xe   :  { %1905 = vmatprep.subr.bf16.mxu1 %v2088_v13  ;;  %v2109_v33 = vld [vmem:[%s2896_s0 + $0x4] ss:$28 sps:$4 sm:$0xff]   ;;  %v2112_v35 = vld [vmem:[%s2896_s0 + $0xc] ss:$28 sps:$4 sm:$0xff]   ;;  %v2122_v43 = vld [vmem:[%s2895_s1 + $0x130] sm:$0xff]  }
   0xf   :  { %889 = vmatprep.mubr.bf16.mxu0 %v2109_v33  ;;  %986 = vmatprep.mubr.bf16.mxu1 %v2112_v35  ;;  %v2117_v39 = vld [vmem:[%s2896_s0 + $0x44] ss:$28 sps:$4 sm:$0xff]   ;;  %v2123_v44 = vld [vmem:[%s2896_s0 + $0x74] ss:$28 sps:$4 sm:$0xff]   ;;  %v2125_v45 = vld [vmem:[%s2896_s0 + $0x7c] ss:$28 sps:$4 sm:$0xff]  }
  0x10   :  { %1842 = vmatpush3.bf16.msra.mxu0 %v2089_v14  ;;  %v2120_v41 = vld [vmem:[%s2896_s0 + $0x40] ss:$28 sps:$4 sm:$0xff]   ;;  %v2129_v46 = vld [vmem:[%s2895_s1 + $0x168] sm:$0xff]   ;;  %v2128_v49 = vld [vmem:[%s2896_s0 + $0x78] ss:$28 sps:$4 sm:$0xff]  }
  0x11   :  { %1906 = vmatpush3.bf16.msra.mxu1 %v2090_v15  ;;  %1843 = vmatprep.subr.bf16.mxu0 %v2091_v16  ;;  %v2130_v47 = vld [vmem:[%s2895_s1 + $0x128] sm:$0xff]   ;;  %v2133_v51 = vld [vmem:[%s2896_s0 + $0xb4] ss:$28 sps:$4 sm:$0xff]   ;;  %v2137_v52 = vld [vmem:[%s2895_s1 + $0x160] sm:$0xff]  }
  0x12   :  { %1907 = vmatprep.subr.bf16.mxu1 %v2092_v17  ;;  %v2127_v48 = vld [vmem:[%s2896_s0 + $0x70] ss:$28 sps:$4 sm:$0xff]   ;;  %v2138_v53 = vld [vmem:[%s2895_s1 + $0x120] sm:$0xff]   ;;  %v2145_v55 = vld [vmem:[%s2895_s1 + $0x158] sm:$0xff]  }
  0x13   :  { %v2131_v50 = vld [vmem:[%s2896_s0 + $0xac] ss:$28 sps:$4 sm:$0xff]   ;;  %v2146_v57 = vld [vmem:[%s2895_s1 + $0x1b8] sm:$0xff]   ;;  %v2139_v59 = vld [vmem:[%s2896_s0 + $0xe4] ss:$28 sps:$4 sm:$0xff]  }
  0x14   :  { %1844 = vmatpush3.bf16.msra.mxu0 %v2093_v18  ;;  %v2135_v54 = vld [vmem:[%s2896_s0 + $0xa8] ss:$28 sps:$4 sm:$0xff]   ;;  %v2136_v56 = vld [vmem:[%s2896_s0 + $0xb0] ss:$28 sps:$4 sm:$0xff]   ;;  %v2147_v58 = vld [vmem:[%s2895_s1 + $0x118] sm:$0xff]  }
  0x15   :  { %1908 = vmatpush3.bf16.msra.mxu1 %v2094_v19  ;;  %1845 = vmatprep.subr.bf16.mxu0 %v2095_v20  ;;  %v2141_v60 = vld [vmem:[%s2896_s0 + $0xec] ss:$28 sps:$4 sm:$0xff]   ;;  %v2154_v61 = vld [vmem:[%s2895_s1 + $0x150] sm:$0xff]   ;;  %v2143_v1 = vld [vmem:[%s2896_s0 + $0xe0] ss:$28 sps:$4 sm:$0xff]  }
  0x16   :  { %1909 = vmatprep.subr.bf16.mxu1 %v2096_v21  ;;  %v2155_v62 = vld [vmem:[%s2895_s1 + $0x1b0] sm:$0xff]   ;;  %v2157_v0 = vld [vmem:[%s2895_s1 + $0x1a8] sm:$0xff]   ;;  %v2148_v3 = vld [vmem:[%s2896_s0 + $0x11c] ss:$28 sps:$4 sm:$0xff]  }
  0x17   :  { %v2156_v63 = vld [vmem:[%s2895_s1 + $0x110] sm:$0xff]   ;;  %v2144_v2 = vld [vmem:[%s2896_s0 + $0xe8] ss:$28 sps:$4 sm:$0xff]   ;;  %v2167_v8 = vld [vmem:[%s2895_s1 + $0x198] sm:$0xff]  }
  0x18   :  { %1846 = vmatpush3.bf16.msra.mxu0 %v2097_v22  ;;  %v2150_v4 = vld [vmem:[%s2896_s0 + $0x124] ss:$28 sps:$4 sm:$0xff]   ;;  %v2164_v5 = vld [vmem:[%s2895_s1 + $0x148] sm:$0xff]   ;;  %v2152_v9 = vld [vmem:[%s2896_s0 + $0x118] ss:$28 sps:$4 sm:$0xff]  }
  0x19   :  { %1910 = vmatpush3.bf16.msra.mxu1 %v2098_v23  ;;  %1847 = vmatprep.subr.bf16.mxu0 %v2099_v24  ;;  %v2165_v6 = vld [vmem:[%s2895_s1 + $0x1a0] sm:$0xff]   ;;  %v2166_v7 = vld [vmem:[%s2895_s1 + $0x108] sm:$0xff]   ;;  %v2158_v11 = vld [vmem:[%s2896_s0 + $0x154] ss:$28 sps:$4 sm:$0xff]  }
  0x1a   :  { %1911 = vmatprep.subr.bf16.mxu1 %v2100_v25  ;;  %v2153_v10 = vld [vmem:[%s2896_s0 + $0x120] ss:$28 sps:$4 sm:$0xff]   ;;  %v2175_v14 = vld [vmem:[%s2895_s1 + $0x190] sm:$0xff]   ;;  %v2177_v16 = vld [vmem:[%s2895_s1 + $0x188] sm:$0xff]  }
  0x1b   :  { %v2160_v12 = vld [vmem:[%s2896_s0 + $0x15c] ss:$28 sps:$4 sm:$0xff]   ;;  %v2174_v13 = vld [vmem:[%s2895_s1 + $0x140] sm:$0xff]   ;;  %v2162_v17 = vld [vmem:[%s2896_s0 + $0x150] ss:$28 sps:$4 sm:$0xff]  }
  0x1c   :  { %1848 = vmatpush3.bf16.msra.mxu0 %v2101_v26  ;;  %v2176_v15 = vld [vmem:[%s2895_s1 + $0x100] sm:$0xff]   ;;  %v2163_v18 = vld [vmem:[%s2896_s0 + $0x158] ss:$28 sps:$4 sm:$0xff]   ;;  %v2168_v19 = vld [vmem:[%s2896_s0 + $0x18c] ss:$28 sps:$4 sm:$0xff]  }
  0x1d   :  { %1912 = vmatpush3.bf16.msra.mxu1 %v2102_v27  ;;  %1849 = vmatprep.subr.bf16.mxu0 %v2103_v28  ;;  %v2170_v20 = vld [vmem:[%s2896_s0 + $0x194] ss:$28 sps:$4 sm:$0xff]   ;;  %v2181_v21 = vld [vmem:[%s2895_s1 + $0x180] sm:$0xff]   ;;  %v2184_v28 = vld [vmem:[%s2896_s0 + $0x4c] ss:$28 sps:$4 sm:$0xff]  }
  0x1e   :  { %1913 = vmatprep.subr.bf16.mxu1 %v2104_v29  ;;  %v2172_v22 = vld [vmem:[%s2896_s0 + $0x188] ss:$28 sps:$4 sm:$0xff]   ;;  %v2173_v23 = vld [vmem:[%s2896_s0 + $0x190] ss:$28 sps:$4 sm:$0xff]   ;;  %v2182_v25 = vld [vmem:[%s2896_s0 + $0x18] ss:$28 sps:$4 sm:$0xff]  }
  0x1f   :  { %v2180_v24 = vld [vmem:[%s2896_s0 + $0x14] ss:$28 sps:$4 sm:$0xff]   ;;  %v2190_v29 = vld [vmem:[%s2896_s0 + $0x88] ss:$28 sps:$4 sm:$0xff]   ;;  %v2192_v35 = vld [vmem:[%s2896_s0 + $0xbc] ss:$28 sps:$4 sm:$0xff]  }
  0x20   :  { %1850 = vmatpush3.bf16.msra.mxu0 %v2105_v30  ;;  %v2178_v26 = vld [vmem:[%s2896_s0 + $0x10] ss:$28 sps:$4 sm:$0xff]   ;;  %v2186_v30 = vld [vmem:[%s2896_s0 + $0x48] ss:$28 sps:$4 sm:$0xff]   ;;  %v2198_v33 = vld [vmem:[%s2896_s0 + $0xf8] ss:$28 sps:$4 sm:$0xff]  }
  0x21   :  { %1914 = vmatpush3.bf16.msra.mxu1 %v2106_v31  ;;  %1963 = vmatprep.subr.bf16.mxu0 %v2113_v36  ;;  %v2183_v27 = vld [vmem:[%s2896_s0 + $0x50] ss:$28 sps:$4 sm:$0xff]   ;;  %v2187_v31 = vld [vmem:[%s2896_s0 + $0x84] ss:$28 sps:$4 sm:$0xff]  }
  0x22   :  { %2043 = vmatprep.subr.bf16.mxu1 %v2146_v57  ;;  %v2199_v36 = vld [vmem:[%s2896_s0 + $0x130] ss:$28 sps:$4 sm:$0xff]  }
  0x23   :  { %890 = vmatmul.mubr.bf16.vlgmr.msra.gmra.mxu0 %v2107_v32  ;;  %v2191_v32 = vld [vmem:[%s2896_s0 + $0xc0] ss:$28 sps:$4 sm:$0xff]  }
  0x24   :  { %987 = vmatmul.mubr.bf16.vlgmr.msra.gmra.mxu1 %v2110_v34  ;;  %1964 = vmatpush3.bf16.msra.mxu0 %v2114_v37  ;;  %v2189_v34 = vld [vmem:[%s2896_s0 + $0x80] ss:$28 sps:$4 sm:$0xff]   ;;  %v2206_v37 = vld [vmem:[%s2896_s0 + $0x168] ss:$28 sps:$4 sm:$0xff]  }
  0x25   :  { %897 = vmatprep.mubr.bf16.mxu0 %v2115_v38  ;;  %994 = vmatprep.mubr.bf16.mxu1 %v2117_v39  ;;  %v2194_v38 = vld [vmem:[%s2896_s0 + $0xb8] ss:$28 sps:$4 sm:$0xff]  }
  0x26   :  { %1965 = vmatprep.subr.bf16.mxu0 %v2121_v42  ;;  %2044 = vmatpush3.bf16.msra.mxu1 %v2146_v57  ;;  %v2195_v39 = vld [vmem:[%s2896_s0 + $0xf4] ss:$28 sps:$4 sm:$0xff]   ;;  %v2200_v42 = vld [vmem:[%s2896_s0 + $0x12c] ss:$28 sps:$4 sm:$0xff]  }
  0x27   :  { %2045 = vmatprep.subr.bf16.mxu1 %v2155_v62 }
  0x28   :  { %1966 = vmatpush3.bf16.msra.mxu0 %v2122_v43  ;;  %v2202_v43 = vld [vmem:[%s2896_s0 + $0x128] ss:$28 sps:$4 sm:$0xff]  }
  0x29   :  { %1967 = vmatprep.subr.bf16.mxu0 %v2129_v46  ;;  %v2208_v46 = vld [vmem:[%s2896_s0 + $0x19c] ss:$28 sps:$4 sm:$0xff]  }
  0x2a   :  { %2046 = vmatpush3.bf16.msra.mxu1 %v2155_v62 }
  0x2b   :  { %898 = vmatmul.mubr.bf16.gmra.mxu0 %v2119_v40  ;;  %2047 = vmatprep.subr.bf16.mxu1 %v2157_v0  ;;  %v2207_v40 = vld [vmem:[%s2896_s0 + $0x1a0] ss:$28 sps:$4 sm:$0xff]  }
  0x2c   :  { %995 = vmatmul.mubr.bf16.gmra.mxu1 %v2120_v41  ;;  %905 = vmatprep.mubr.bf16.mxu0 %v2123_v44  ;;  %v2197_v41 = vld [vmem:[%s2896_s0 + $0xf0] ss:$28 sps:$4 sm:$0xff]   ;;  %v2203_v44 = vld [vmem:[%s2896_s0 + $0x164] ss:$28 sps:$4 sm:$0xff]  }
  0x2d   :  { %1002 = vmatprep.mubr.bf16.mxu1 %v2125_v45  ;;  %1968 = vmatpush3.bf16.msra.mxu0 %v2130_v47  ;;  %v2205_v45 = vld [vmem:[%s2896_s0 + $0x160] ss:$28 sps:$4 sm:$0xff]   ;;  %v2210_v47 = vld [vmem:[%s2896_s0 + $0x198] ss:$28 sps:$4 sm:$0xff]  }
  0x2e   :  { %1969 = vmatprep.subr.bf16.mxu0 %v2137_v52  ;;  %2048 = vmatpush3.bf16.msra.mxu1 %v2157_v0 }
  0x2f   :  { %2049 = vmatprep.subr.bf16.mxu1 %v2165_v6 }
  0x31   :  { %1970 = vmatpush3.bf16.msra.mxu0 %v2138_v53 }
  0x32   :  { %1971 = vmatprep.subr.bf16.mxu0 %v2145_v55  ;;  %2050 = vmatpush3.bf16.msra.mxu1 %v2165_v6 }
  0x33   :  { %906 = vmatmul.mubr.bf16.gmra.mxu0 %v2127_v48  ;;  %2051 = vmatprep.subr.bf16.mxu1 %v2167_v8 }
  0x34   :  { %1003 = vmatmul.mubr.bf16.gmra.mxu1 %v2128_v49  ;;  %913 = vmatprep.mubr.bf16.mxu0 %v2131_v50 }
  0x35   :  { %1010 = vmatprep.mubr.bf16.mxu1 %v2133_v51  ;;  %1972 = vmatpush3.bf16.msra.mxu0 %v2147_v58 }
  0x36   :  { %1973 = vmatprep.subr.bf16.mxu0 %v2154_v61  ;;  %2052 = vmatpush3.bf16.msra.mxu1 %v2167_v8 }
  0x37   :  { %2053 = vmatprep.subr.bf16.mxu1 %v2175_v14 }
  0x39   :  { %1974 = vmatpush3.bf16.msra.mxu0 %v2156_v63 }
  0x3a   :  { %1975 = vmatprep.subr.bf16.mxu0 %v2164_v5  ;;  %2054 = vmatpush3.bf16.msra.mxu1 %v2175_v14 }
  0x3b   :  { %914 = vmatmul.mubr.bf16.gmra.mxu0 %v2135_v54  ;;  %2055 = vmatprep.subr.bf16.mxu1 %v2177_v16 }
  0x3c   :  { %1011 = vmatmul.mubr.bf16.gmra.mxu1 %v2136_v56  ;;  %921 = vmatprep.mubr.bf16.mxu0 %v2139_v59 }
  0x3d   :  { %1018 = vmatprep.mubr.bf16.mxu1 %v2141_v60  ;;  %1976 = vmatpush3.bf16.msra.mxu0 %v2166_v7 }
  0x3e   :  { %1977 = vmatprep.subr.bf16.mxu0 %v2174_v13  ;;  %2056 = vmatpush3.bf16.msra.mxu1 %v2177_v16 }
  0x3f   :  { %2057 = vmatprep.subr.bf16.mxu1 %v2181_v21 }
  0x41   :  { %1978 = vmatpush3.bf16.msra.mxu0 %v2176_v15 }
  0x42   :  { %2058 = vmatpush3.bf16.msra.mxu1 %v2181_v21 }
  0x43   :  { %922 = vmatmul.mubr.bf16.gmra.mxu0 %v2143_v1 }
  0x44   :  { %1019 = vmatmul.mubr.bf16.gmra.mxu1 %v2144_v2  ;;  %929 = vmatprep.mubr.bf16.mxu0 %v2148_v3 }
  0x45   :  { %1026 = vmatprep.mubr.bf16.mxu1 %v2150_v4 }
  0x4b   :  { %930 = vmatmul.mubr.bf16.gmra.mxu0 %v2152_v9 }
  0x4c   :  { %1027 = vmatmul.mubr.bf16.gmra.mxu1 %v2153_v10  ;;  %937 = vmatprep.mubr.bf16.mxu0 %v2158_v11 }
  0x4d   :  { %1034 = vmatprep.mubr.bf16.mxu1 %v2160_v12 }
  0x53   :  { %938 = vmatmul.mubr.bf16.gmra.mxu0 %v2162_v17 }
  0x54   :  { %1035 = vmatmul.mubr.bf16.gmra.mxu1 %v2163_v18  ;;  %945 = vmatprep.mubr.bf16.mxu0 %v2168_v19 }
  0x55   :  { %1042 = vmatprep.mubr.bf16.mxu1 %v2170_v20 }
  0x5b   :  { %946 = vmatmul.mubr.bf16.gmra.mxu0 %v2172_v22 }
  0x5c   :  { %1043 = vmatmul.mubr.bf16.gmra.mxu1 %v2173_v23  ;;  %1083 = vmatprep.mubr.bf16.mxu0 %v2180_v24 }
  0x5d   :  { %2059 = vmatprep.mubr.bf16.mxu1 %v2182_v25 }
  0x63   :  { %1084 = vmatmul.mubr.bf16.vlgmr.msra.gmra.mxu0 %v2178_v26 }
  0x64   :  { %2060 = vmatmul.mubr.bf16.vlgmr.msra.gmra.mxu1 %v2183_v27  ;;  %1091 = vmatprep.mubr.bf16.mxu0 %v2184_v28 }
  0x65   :  { %2063 = vmatprep.mubr.bf16.mxu1 %v2190_v29 }
  0x6b   :  { %1092 = vmatmul.mubr.bf16.gmra.mxu0 %v2186_v30 }
  0x6c   :  { %1099 = vmatprep.mubr.bf16.mxu0 %v2187_v31  ;;  %2064 = vmatmul.mubr.bf16.gmra.mxu1 %v2191_v32 }
  0x6d   :  { %2067 = vmatprep.mubr.bf16.mxu1 %v2198_v33 }
  0x73   :  { %1100 = vmatmul.mubr.bf16.gmra.mxu0 %v2189_v34 }
  0x74   :  { %1107 = vmatprep.mubr.bf16.mxu0 %v2192_v35  ;;  %2068 = vmatmul.mubr.bf16.gmra.mxu1 %v2199_v36 }
  0x75   :  { %2071 = vmatprep.mubr.bf16.mxu1 %v2206_v37 }
  0x7b   :  { %1108 = vmatmul.mubr.bf16.gmra.mxu0 %v2194_v38 }
  0x7c   :  { %1115 = vmatprep.mubr.bf16.mxu0 %v2195_v39  ;;  %2072 = vmatmul.mubr.bf16.gmra.mxu1 %v2207_v40 }
  0x83   :  { %1116 = vmatmul.mubr.bf16.gmra.mxu0 %v2197_v41 }
  0x84   :  { %1123 = vmatprep.mubr.bf16.mxu0 %v2200_v42 }
  0x8b   :  { %1124 = vmatmul.mubr.bf16.gmra.mxu0 %v2202_v43 }
  0x8c   :  { %1131 = vmatprep.mubr.bf16.mxu0 %v2203_v44 }
  0x93   :  { %1132 = vmatmul.mubr.bf16.gmra.mxu0 %v2205_v45 }
  0x94   :  { %1139 = vmatprep.mubr.bf16.mxu0 %v2208_v46 }
  0x9b   :  { %1140 = vmatmul.mubr.bf16.gmra.mxu0 %v2210_v47 }
  0xe3   :  { %v1851_v48 = vpop.f32.mrf.mxu0 }
  0xe4   :  { %v1915_v49 = vpop.f32.mrf.mxu1 }
  0xe5   :  { %v1852_v50 = vpop.f32.mrf.mxu0 }
  0xe6   :  { %v1853_v51 = vadd.f32 %v1852_v50, %v1851_v48  ;;  %v1916_v52 = vpop.f32.mrf.mxu1 }
  0xe7   :  { %v1917_v53 = vadd.f32 %v1916_v52, %v1915_v49  ;;  %v1854_v54 = vpop.f32.mrf.mxu0 }
  0xe8   :  { %v2579_v55 = vpop.f32.mrf.mxu1 }
  0xe9   :  { %v2581_v56 = vadd.f32 %v1917_v53, %v1853_v51  ;;  %v1855_v57 = vpop.f32.mrf.mxu0 }
  0xea   :  { %v2583_v58 = vadd.f32 %v1855_v57, %v1854_v54  ;;  %v2585_v59 = vpop.f32.mrf.mxu1 }
  0xeb   :  { %v1857_v60 = vpop.f32.mrf.mxu0 }
  0xec   :  { %v2587_v61 = vpop.f32.mrf.mxu1 }
  0xed   :  { %v1858_v62 = vpop.f32.mrf.mxu0 }
  0xee   :  { %v2589_v63 = vadd.f32 %v1858_v62, %v1857_v60  ;;  %v2591_v0 = vpop.f32.mrf.mxu1 }
  0xef   :  { %v1860_v1 = vpop.f32.mrf.mxu0 }
  0xf0   :  { %v2593_v2 = vpop.f32.mrf.mxu1 }
  0xf1   :  { %v1861_v3 = vpop.f32.mrf.mxu0 }
  0xf2   :  { %v2595_v4 = vadd.f32 %v1861_v3, %v1860_v1  ;;  %v2597_v5 = vpop.f32.mrf.mxu1 }
  0xf3   :  { %v1863_v6 = vpop.f32.mrf.mxu0 }
  0xf4   :  { %v2599_v7 = vpop.f32.mrf.mxu1 }
  0xf5   :  { %v1864_v8 = vpop.f32.mrf.mxu0 }
  0xf6   :  { %v2601_v9 = vadd.f32 %v1864_v8, %v1863_v6  ;;  %v2603_v10 = vpop.f32.mrf.mxu1 }
  0xf7   :  { %v1866_v11 = vpop.f32.mrf.mxu0 }
  0xf8   :  { %v2605_v12 = vpop.f32.mrf.mxu1 }
  0xf9   :  { %v1867_v13 = vpop.f32.mrf.mxu0 }
  0xfa   :  { %v2607_v14 = vadd.f32 %v1867_v13, %v1866_v11  ;;  %v2609_v15 = vpop.f32.mrf.mxu1 }
  0xfb   :  { %v1869_v16 = vpop.f32.mrf.mxu0 }
  0xfc   :  { %v2611_v17 = vpop.f32.mrf.mxu1 }
  0xfd   :  { %v1870_v18 = vpop.f32.mrf.mxu0 }
  0xfe   :  { %v2613_v19 = vadd.f32 %v1870_v18, %v1869_v16  ;;  %v2615_v20 = vpop.f32.mrf.mxu1 }
  0xff   :  { %v1872_v21 = vpop.f32.mrf.mxu0 }
 0x100   :  { %v2617_v22 = vpop.f32.mrf.mxu1 }
 0x101   :  { %v1873_v23 = vpop.f32.mrf.mxu0 }
 0x102   :  { %v2619_v24 = vadd.f32 %v1873_v23, %v1872_v21  ;;  %v2621_v25 = vpop.f32.mrf.mxu1 }
 0x103   :  { %v1875_v26 = vpop.f32.mrf.mxu0 }
 0x104   :  { %v2623_v27 = vpop.f32.mrf.mxu1 }
 0x105   :  { %v1876_v28 = vpop.f32.mrf.mxu0 }
 0x106   :  { %v2625_v29 = vadd.f32 %v1876_v28, %v1875_v26  ;;  %v2627_v30 = vpop.f32.mrf.mxu1 }
 0x107   :  { %v1878_v31 = vpop.f32.mrf.mxu0 }
 0x108   :  { %v2629_v32 = vpop.f32.mrf.mxu1 }
 0x109   :  { %v1879_v33 = vpop.f32.mrf.mxu0 }
 0x10a   :  { %v2631_v34 = vadd.f32 %v1879_v33, %v1878_v31  ;;  %v2633_v35 = vpop.f32.mrf.mxu1 }
 0x10b   :  { %v1881_v36 = vpop.f32.mrf.mxu0 }
 0x10c   :  { %v2635_v37 = vpop.f32.mrf.mxu1 }
 0x10d   :  { %v1882_v38 = vpop.f32.mrf.mxu0 }
 0x10e   :  { %v2637_v39 = vadd.f32 %v1882_v38, %v1881_v36  ;;  %v2639_v40 = vpop.f32.mrf.mxu1 }
 0x10f   :  { %v1884_v41 = vpop.f32.mrf.mxu0 }
 0x110   :  { %2901 = vst [vmem:[#allocation3_spill] sm:$0xff] %v2637_v39  ;;  %v2641_v42 = vpop.f32.mrf.mxu1 }
 0x111   :  { %v1885_v43 = vpop.f32.mrf.mxu0 }
 0x112   :  { %v2643_v44 = vadd.f32 %v1885_v43, %v1884_v41  ;;  %v2645_v45 = vpop.f32.mrf.mxu1 }
 0x113   :  { %v1887_v46 = vpop.f32.mrf.mxu0 }
 0x114   :  { %2902 = vst [vmem:[#allocation4_spill] sm:$0xff] %v2643_v44  ;;  %v2647_v47 = vpop.f32.mrf.mxu1 }
 0x115   :  { %v1888_v48 = vpop.f32.mrf.mxu0 }
 0x116   :  { %v2649_v49 = vadd.f32 %v1888_v48, %v1887_v46  ;;  %v2651_v50 = vpop.f32.mrf.mxu1 }
 0x117   :  { %2904 = vst [vmem:[#allocation6_spill] sm:$0xff] %v2651_v50  ;;  %v1890_v51 = vpop.f32.mrf.mxu0 }
 0x118   :  { %2903 = vst [vmem:[#allocation5_spill] sm:$0xff] %v2649_v49  ;;  %v2653_v52 = vpop.f32.mrf.mxu1 }
 0x119   :  { %2905 = vst [vmem:[#allocation7_spill] sm:$0xff] %v2653_v52  ;;  %v1891_v53 = vpop.f32.mrf.mxu0 }
 0x11a   :  { %v2655_v54 = vadd.f32 %v1891_v53, %v1890_v51  ;;  %v2657_v57 = vpop.f32.mrf.mxu1 }
 0x11b   :  { %2907 = vst [vmem:[#allocation9_spill] sm:$0xff] %v2657_v57  ;;  %v1893_v60 = vpop.f32.mrf.mxu0 }
 0x11c   :  { %2906 = vst [vmem:[#allocation8_spill] sm:$0xff] %v2655_v54  ;;  %v2659_v62 = vpop.f32.mrf.mxu1  ;;  %v1926_v54 = vadd.f32 %v2597_v5, %v2593_v2 }
 0x11d   :  { %2908 = vst [vmem:[#allocation10_spill] sm:$0xff] %v2659_v62  ;;  %v1894_v1 = vpop.f32.mrf.mxu0 }
 0x11e   :  { %v2661_v3 = vadd.f32 %v1894_v1, %v1893_v60  ;;  %v2663_v6 = vpop.f32.mrf.mxu1 }
 0x11f   :  { %2910 = vst [vmem:[#allocation12_spill] sm:$0xff] %v2663_v6  ;;  %v2665_v8 = vpop.f32.mrf.mxu0 }
 0x120   :  { %2909 = vst [vmem:[#allocation11_spill] sm:$0xff] %v2661_v3  ;;  %2911 = vst [vmem:[#allocation13_spill] sm:$0xff] %v2665_v8  ;;  %v2667_v11 = vpop.f32.mrf.mxu1  ;;  %v1923_v8 = vadd.f32 %v2591_v0, %v2587_v61 }
 0x121   :  { %2912 = vst [vmem:[#allocation14_spill] sm:$0xff] %v2667_v11  ;;  %v2669_v13 = vpop.f32.mrf.mxu0 }
 0x122   :  { %2913 = vst [vmem:[#allocation15_spill] sm:$0xff] %v2669_v13  ;;  %v2671_v18 = vpop.f32.mrf.mxu1  ;;  %v997_v39 = vadd.f32 %v1923_v8, %v2589_v63 }
 0x123   :  { %v1979_v16 = vpop.f32.mrf.mxu0  ;;  %2914 = vst [vmem:[#allocation16_spill] sm:$0xff] %v2671_v18  ;;  %v1920_v18 = vadd.f32 %v2585_v59, %v2579_v55  ;;  %v1929_v55 = vadd.f32 %v2603_v10, %v2599_v7 }
 0x124   :  { %v2061_v26 = vpop.f32.mrf.mxu1 }
 0x125   :  { %v1980_v21 = vpop.f32.mrf.mxu0  ;;  %v992_v57 = vadd.f32 %v1920_v18, %v2583_v58  ;;  %v1005_v63 = vadd.f32 %v1929_v55, %v2601_v9  ;;  %v2702_v9 = vld [vmem:[%s2897_s2] ss:$0 sm:$0xff]  ;;  %v1950_v55 = vadd.f32 %v2645_v45, %v2641_v42 }
 0x126   :  { %v1182_v31 = vpop.f32.mrf.mxu1  ;;  %v1981_v52 = vadd.f32 %v1980_v21, %v1979_v16 }
 0x127   :  { %v1982_v23 = vpop.f32.mrf.mxu0 }
 0x128   :  { %v2062_v38 = vpop.f32.mrf.mxu1  ;;  %v1086_v2 = vadd.f32 %v1981_v52, %v2581_v56 }
 0x129   :  { %v1983_v28 = vpop.f32.mrf.mxu0 }
 0x12a   :  { %v1185_v46 = vpop.f32.mrf.mxu1  ;;  %v1984_v3 = vadd.f32 %v1983_v28, %v1982_v23  ;;  %v1000_v23 = vadd.f32 %v1926_v54, %v2595_v4  ;;  %v1932_v28 = vadd.f32 %v2609_v15, %v2605_v12  ;;  %v1183_v54 = vadd.f32 %v1182_v31, %v1086_v2  ;;  %v2916_v2 = vld [vmem:[#allocation3_spill] sm:$0xff] }
 0x12b   :  { %v1985_v33 = vpop.f32.mrf.mxu0 }
 0x12c   :  { %v2673_v53 = vpop.f32.mrf.mxu1  ;;  %v1089_v59 = vadd.f32 %v1984_v3, %v992_v57  ;;  %v1935_v3 = vadd.f32 %v2615_v20, %v2611_v17  ;;  %v1008_v4 = vadd.f32 %v1932_v28, %v2607_v14 }
 0x12d   :  { %v1986_v36 = vpop.f32.mrf.mxu0 }
 0x12e   :  { %v1198_v11 = vpop.f32.mrf.mxu1  ;;  %v1987_v49 = vadd.f32 %v1986_v36, %v1985_v33  ;;  %v1186_v8 = vadd.f32 %v1185_v46, %v1089_v59  ;;  %v1013_v21 = vadd.f32 %v1935_v3, %v2613_v19 }
 0x12f   :  { %v1988_v41 = vpop.f32.mrf.mxu0 }
 0x130   :  { %v2679_v6 = vpop.f32.mrf.mxu1  ;;  %v1094_v58 = vadd.f32 %v1987_v49, %v997_v39  ;;  %v1938_v49 = vadd.f32 %v2621_v25, %v2617_v22  ;;  %v2705_v52 = vadd.f32 %v2702_v9, %v1186_v8  ;;  %v1944_v22 = vadd.f32 %v2633_v35, %v2629_v32 }
 0x131   :  { %v1989_v43 = vpop.f32.mrf.mxu0  ;;  %v2713_v25 = vadd.f32 %v2702_v9, %v1183_v54  ;;  %v2920_v54 = vld [vmem:[#allocation9_spill] sm:$0xff] }
 0x132   :  { %v1990_v50 = vadd.f32 %v1989_v43, %v1988_v41  ;;  %v1201_v61 = vpop.f32.mrf.mxu1  ;;  %v1191_v12 = vadd.f32 %v2061_v26, %v1094_v58  ;;  %v1941_v26 = vadd.f32 %v2627_v30, %v2623_v27  ;;  %v1947_v43 = vadd.f32 %v2639_v40, %v2635_v37  ;;  %v2915_v37 = vld [vmem:[#allocation6_spill] sm:$0xff] }
 0x133   :  { %v1991_v48 = vpop.f32.mrf.mxu0  ;;  %v1368_v27 = vadd.f32 %v2705_v52, %v2713_v25  ;;  %v1953_v40 = vadd.f32 %v2915_v37, %v2647_v47  ;;  %v2928_v37 = vld [vmem:[#allocation16_spill] sm:$0xff] }
 0x134   :  { %v2691_v18 = vpop.f32.mrf.mxu1  ;;  %v1097_v7 = vadd.f32 %v1990_v50, %v1000_v23  ;;  %v1029_v58 = vadd.f32 %v1947_v43, %v2916_v2 }
 0x135   :  { %v1992_v51 = vpop.f32.mrf.mxu0 }
 0x136   :  { %v1993_v5 = vadd.f32 %v1992_v51, %v1991_v48  ;;  %v1214_v39 = vpop.f32.mrf.mxu1  ;;  %v1194_v17 = vadd.f32 %v2062_v38, %v1097_v7  ;;  %v1016_v38 = vadd.f32 %v1938_v49, %v2619_v24  ;;  %v1024_v48 = vadd.f32 %v1944_v22, %v2631_v34  ;;  %v2921_v22 = vld [vmem:[#allocation8_spill] sm:$0xff] }
 0x137   :  { %v1994_v60 = vpop.f32.mrf.mxu0 }
 0x138   :  { %v1102_v15 = vadd.f32 %v1993_v5, %v1005_v63  ;;  %v2070_v36 = vpop.f32.mrf.mxu1  ;;  %v2722_v30 = vadd.f32 %v2702_v9, %v1194_v17  ;;  %v2917_v63 = vld [vmem:[#allocation4_spill] sm:$0xff] }
 0x139   :  { %v1995_v1 = vpop.f32.mrf.mxu0  ;;  %v1032_v8 = vadd.f32 %v1950_v55, %v2917_v63  ;;  %v2925_v55 = vld [vmem:[#allocation13_spill] sm:$0xff] }
 0x13a   :  { %v1996_v10 = vadd.f32 %v1995_v1, %v1994_v60  ;;  %v1217_v60 = vpop.f32.mrf.mxu1 }
 0x13b   :  { %v1997_v13 = vpop.f32.mrf.mxu0 }
 0x13c   :  { %v1105_v20 = vadd.f32 %v1996_v10, %v1008_v4  ;;  %v2073_v28 = vpop.f32.mrf.mxu1  ;;  %v2919_v4 = vld [vmem:[#allocation7_spill] sm:$0xff] }
 0x13d   :  { %v1998_v62 = vpop.f32.mrf.mxu0 }
 0x13e   :  { %v1999_v50 = vadd.f32 %v1998_v62, %v1997_v13  ;;  %v2716_v62 = vadd.f32 %v2702_v9, %v1191_v12  ;;  %v1199_v13 = vadd.f32 %v1198_v11, %v1102_v15  ;;  %v1202_v32 = vadd.f32 %v1201_v61, %v1105_v20 }
 0x13f   :  { %v2000_v44 = vpop.f32.mrf.mxu0  ;;  %v1956_v12 = vadd.f32 %v2920_v54, %v2919_v4 }
 0x140   :  { %v1110_v41 = vadd.f32 %v1999_v50, %v1013_v21  ;;  %v1369_v24 = vadd.f32 %v1368_v27, %v2716_v62  ;;  %v2730_v51 = vadd.f32 %v2702_v9, %v1199_v13  ;;  %v2739_v34 = vadd.f32 %v2702_v9, %v1202_v32 }
 0x141   :  { %v2001_v0 = vpop.f32.mrf.mxu0  ;;  %v1040_v13 = vadd.f32 %v1956_v12, %v2921_v22 }
 0x142   :  { %v2002_v31 = vadd.f32 %v2001_v0, %v2000_v44  ;;  %v1021_v44 = vadd.f32 %v1941_v26, %v2625_v29  ;;  %v1207_v59 = vadd.f32 %v2673_v53, %v1110_v41  ;;  %v1370_v0 = vadd.f32 %v1369_v24, %v2722_v30 }
 0x143   :  { %v2003_v16 = vpop.f32.mrf.mxu0 }
 0x144   :  { %v1113_v11 = vadd.f32 %v2002_v31, %v1016_v38  ;;  %v1371_v45 = vadd.f32 %v1370_v0, %v2730_v51  ;;  %v2746_v47 = vadd.f32 %v2702_v9, %v1207_v59  ;;  %v2923_v38 = vld [vmem:[#allocation12_spill] sm:$0xff]  ;;  %v2926_v59 = vld [vmem:[#allocation15_spill] sm:$0xff] }
 0x145   :  { %v2004_v57 = vpop.f32.mrf.mxu0 }
 0x146   :  { %v2005_v19 = vadd.f32 %v2004_v57, %v2003_v16  ;;  %v1210_v5 = vadd.f32 %v2679_v6, %v1113_v11  ;;  %v2918_v57 = vld [vmem:[#allocation5_spill] sm:$0xff]  ;;  %v1372_v15 = vadd.f32 %v1371_v45, %v2739_v34 }
 0x147   :  { %v2006_v56 = vpop.f32.mrf.mxu0  ;;  %v1037_v3 = vadd.f32 %v1953_v40, %v2918_v57 }
 0x148   :  { %v1118_v29 = vadd.f32 %v2005_v19, %v1021_v44  ;;  %v2753_v49 = vadd.f32 %v2702_v9, %v1210_v5  ;;  %v1373_v21 = vadd.f32 %v1372_v15, %v2746_v47 }
 0x149   :  { %v2007_v14 = vpop.f32.mrf.mxu0 }
 0x14a   :  { %v2008_v46 = vadd.f32 %v2007_v14, %v2006_v56  ;;  %v1215_v7 = vadd.f32 %v1214_v39, %v1118_v29  ;;  %v1230_v56 = vpop.f32.mrf.mxu1  ;;  %v1374_v32 = vadd.f32 %v1373_v21, %v2753_v49  ;;  %v1898_v29 = vadd.f32 %v2926_v59, %v2925_v55 }
 0x14b   :  { %v2009_v33 = vpop.f32.mrf.mxu0 }
 0x14c   :  { %v1121_v16 = vadd.f32 %v2008_v46, %v1024_v48  ;;  %v2757_v39 = vadd.f32 %v2702_v9, %v1215_v7  ;;  %v2074_v27 = vpop.f32.mrf.mxu1 }
 0x14d   :  { %v2010_v35 = vpop.f32.mrf.mxu0 }
 0x14e   :  { %v2011_v61 = vadd.f32 %v2010_v35, %v2009_v33  ;;  %v1218_v50 = vadd.f32 %v1217_v60, %v1121_v16  ;;  %v2922_v33 = vld [vmem:[#allocation10_spill] sm:$0xff]  ;;  %v1375_v46 = vadd.f32 %v1374_v32, %v2757_v39  ;;  %v2924_v60 = vld [vmem:[#allocation11_spill] sm:$0xff]  ;;  %v1233_v0 = vpop.f32.mrf.mxu1 }
 0x14f   :  { %v2012_v1 = vpop.f32.mrf.mxu0  ;;  %v1959_v41 = vadd.f32 %v2923_v38, %v2922_v33 }
 0x150   :  { %v1126_v10 = vadd.f32 %v2011_v61, %v1029_v58  ;;  %v2765_v35 = vadd.f32 %v2702_v9, %v1218_v50  ;;  %v2927_v61 = vld [vmem:[#allocation14_spill] sm:$0xff] }
 0x151   :  { %v2013_v23 = vpop.f32.mrf.mxu0  ;;  %v1962_v40 = vadd.f32 %v2928_v37, %v2927_v61 }
 0x152   :  { %v2014_v42 = vadd.f32 %v2013_v23, %v2012_v1  ;;  %v1223_v26 = vadd.f32 %v2691_v18, %v1126_v10  ;;  %v1045_v1 = vadd.f32 %v1959_v41, %v2924_v60 }
 0x153   :  { %v2015_v53 = vpop.f32.mrf.mxu0  ;;  %v1048_v63 = vadd.f32 %v1962_v40, %v1898_v29 }
 0x154   :  { %v1129_v17 = vadd.f32 %v2014_v42, %v1032_v8  ;;  %v2769_v18 = vadd.f32 %v2702_v9, %v1223_v26 }
 0x155   :  { %v2016_v6 = vpop.f32.mrf.mxu0 }
 0x156   :  { %v2017_v20 = vadd.f32 %v2016_v6, %v2015_v53  ;;  %v1226_v44 = vadd.f32 %v2070_v36, %v1129_v17  ;;  %v1376_v36 = vadd.f32 %v1375_v46, %v2765_v35 }
 0x157   :  { %v2018_v14 = vpop.f32.mrf.mxu0 }
 0x158   :  { %v1134_v31 = vadd.f32 %v2017_v20, %v1037_v3  ;;  %v2778_v2 = vadd.f32 %v2702_v9, %v1226_v44  ;;  %v1377_v42 = vadd.f32 %v1376_v36, %v2769_v18 }
 0x159   :  { %v2019_v19 = vpop.f32.mrf.mxu0 }
 0x15a   :  { %v2020_v43 = vadd.f32 %v2019_v19, %v2018_v14  ;;  %v1231_v48 = vadd.f32 %v1230_v56, %v1134_v31  ;;  %v1378_v7 = vadd.f32 %v1377_v42, %v2778_v2 }
 0x15b   :  { %v2021_v11 = vpop.f32.mrf.mxu0 }
 0x15c   :  { %v1137_v24 = vadd.f32 %v2020_v43, %v1040_v13  ;;  %v2782_v45 = vadd.f32 %v2702_v9, %v1231_v48 }
 0x15d   :  { %v2022_v23 = vpop.f32.mrf.mxu0 }
 0x15e   :  { %v1234_v58 = vadd.f32 %v1233_v0, %v1137_v24  ;;  %v2023_v5 = vadd.f32 %v2022_v23, %v2021_v11  ;;  %v1379_v4 = vadd.f32 %v1378_v7, %v2782_v45 }
 0x15f   :  { %v2024_v16 = vpop.f32.mrf.mxu0 }
 0x160   :  { %v1142_v53 = vadd.f32 %v2023_v5, %v1045_v1  ;;  %v2786_v10 = vadd.f32 %v2702_v9, %v1234_v58 }
 0x161   :  { %v2025_v8 = vpop.f32.mrf.mxu0 }
 0x162   :  { %v1239_v57 = vadd.f32 %v2073_v28, %v1142_v53  ;;  %v2026_v3 = vadd.f32 %v2025_v8, %v2024_v16  ;;  %v1380_v15 = vadd.f32 %v1379_v4, %v2786_v10 }
 0x164   :  { %v2790_v54 = vadd.f32 %v2702_v9, %v1239_v57  ;;  %v1145_v12 = vadd.f32 %v2026_v3, %v1048_v63 }
 0x166   :  { %v1242_v6 = vadd.f32 %v2074_v27, %v1145_v12  ;;  %v1381_v56 = vadd.f32 %v1380_v15, %v2790_v54 }
 0x168   :  { %v2795_v50 = vadd.f32 %v2702_v9, %v1242_v6 }
 0x16a   :  { %v1382_v17 = vadd.f32 %v1381_v56, %v2795_v50 }
 0x16c   :  { %v1383_v20 = vrot.slane %v1382_v17, 4 }
 0x16e   :  { %v1384_v14 = vadd.f32 %v1383_v20, %v1382_v17 }
 0x170   :  { %v1385_v28 = vrot.slane %v1384_v14, 2 }
 0x172   :  { %v1386_v21 = vadd.f32 %v1385_v28, %v1384_v14 }
 0x174   :  { %v1387_v26 = vrot.slane %v1386_v21, 1 }
 0x176   :  { %v1388_v31 = vadd.f32 %v1387_v26, %v1386_v21 }
 0x178   :  { %v2798_v22 = vmul.f32 0.0078125, %v1388_v31 }
 0x17a   :  { %v1390_v13 = vsub.f32 %v2713_v25, %v2798_v22  ;;  %v1391_v33 = vsub.f32 %v2705_v52, %v2798_v22  ;;  %v1392_v9 = vsub.f32 %v2716_v62, %v2798_v22  ;;  %v1393_v19 = vsub.f32 %v2722_v30, %v2798_v22 }
 0x17b   :  { %v1394_v27 = vsub.f32 %v2730_v51, %v2798_v22  ;;  %v1395_v43 = vsub.f32 %v2739_v34, %v2798_v22  ;;  %v1396_v48 = vsub.f32 %v2746_v47, %v2798_v22  ;;  %v1397_v1 = vsub.f32 %v2753_v49, %v2798_v22 }
 0x17c   :  { %v1422_v38 = vmul.f32 %v1390_v13, %v1390_v13  ;;  %v1423_v41 = vmul.f32 %v1391_v33, %v1391_v33  ;;  %v1424_v32 = vmul.f32 %v1392_v9, %v1392_v9  ;;  %v1425_v11 = vmul.f32 %v1393_v19, %v1393_v19 }
 0x17d   :  { %v1426_v24 = vmul.f32 %v1394_v27, %v1394_v27  ;;  %v1427_v55 = vmul.f32 %v1395_v43, %v1395_v43  ;;  %v1398_v29 = vsub.f32 %v2757_v39, %v2798_v22  ;;  %v1428_v61 = vmul.f32 %v1396_v48, %v1396_v48 }
 0x17e   :  { %v1438_v44 = vadd.f32 %v1423_v41, %v1422_v38  ;;  %v1399_v40 = vsub.f32 %v2765_v35, %v2798_v22  ;;  %v1429_v0 = vmul.f32 %v1397_v1, %v1397_v1  ;;  %v1400_v36 = vsub.f32 %v2769_v18, %v2798_v22 }
 0x17f   :  { %v1430_v58 = vmul.f32 %v1398_v29, %v1398_v29  ;;  %v1401_v16 = vsub.f32 %v2778_v2, %v2798_v22  ;;  %v1402_v63 = vsub.f32 %v2782_v45, %v2798_v22  ;;  %v1403_v57 = vsub.f32 %v2786_v10, %v2798_v22 }
 0x180   :  { %v1439_v46 = vadd.f32 %v1438_v44, %v1424_v32  ;;  %v1431_v42 = vmul.f32 %v1399_v40, %v1399_v40  ;;  %v1432_v8 = vmul.f32 %v1400_v36, %v1400_v36  ;;  %v1404_v12 = vsub.f32 %v2790_v54, %v2798_v22 }
 0x181   :  { %v1433_v3 = vmul.f32 %v1401_v16, %v1401_v16  ;;  %v1434_v15 = vmul.f32 %v1402_v63, %v1402_v63  ;;  %v1405_v56 = vsub.f32 %v2795_v50, %v2798_v22  ;;  %v1435_v17 = vmul.f32 %v1403_v57, %v1403_v57 }
 0x182   :  { %v1440_v60 = vadd.f32 %v1439_v46, %v1425_v11  ;;  %v1436_v14 = vmul.f32 %v1404_v12, %v1404_v12  ;;  %v1468_v44 = vlaneseq  ;;  %v1460_v11 = vld [vmem:[%s2898_s3] sm:$0x1] }
 0x183   :  { %v1437_v21 = vmul.f32 %v1405_v56, %v1405_v56 }
 0x184   :  { %v1441_v59 = vadd.f32 %v1440_v60, %v1426_v24  ;;  %v1469_v43 = vshrl.u32 %v1468_v44, 7  ;;  %v1464_v60 = vld [vmem:[%s2899_s4] sm:$0x1] }
 0x186   :  { %v1442_v37 = vadd.f32 %v1441_v59, %v1427_v55  ;;  %v1470_v46 = vsub.s32 0, %v1469_v43 }
 0x188   :  { %v1443_v23 = vadd.f32 %v1442_v37, %v1428_v61 }
 0x18a   :  { %v1444_v5 = vadd.f32 %v1443_v23, %v1429_v0 }
 0x18c   :  { %v1445_v53 = vadd.f32 %v1444_v5, %v1430_v58 }
 0x18e   :  { %v1446_v7 = vadd.f32 %v1445_v53, %v1431_v42 }
 0x190   :  { %v1447_v4 = vadd.f32 %v1446_v7, %v1432_v8 }
 0x192   :  { %v1448_v6 = vadd.f32 %v1447_v4, %v1433_v3 }
 0x194   :  { %v1449_v20 = vadd.f32 %v1448_v6, %v1434_v15 }
 0x196   :  { %v1450_v28 = vadd.f32 %v1449_v20, %v1435_v17 }
 0x198   :  { %v1451_v26 = vadd.f32 %v1450_v28, %v1436_v14 }
 0x19a   :  { %v1452_v31 = vadd.f32 %v1451_v26, %v1437_v21 }
 0x19c   :  { %v1453_v13 = vrot.slane %v1452_v31, 4 }
 0x19e   :  { %v1454_v33 = vadd.f32 %v1453_v13, %v1452_v31 }
 0x1a0   :  { %v1455_v9 = vrot.slane %v1454_v33, 2 }
 0x1a2   :  { %v1456_v38 = vadd.f32 %v1455_v9, %v1454_v33 }
 0x1a4   :  { %v1457_v41 = vrot.slane %v1456_v38, 1 }
 0x1a6   :  { %v1458_v19 = vadd.f32 %v1457_v41, %v1456_v38 }
 0x1a8   :  { %v1459_v27 = vmul.f32 0.0078125, %v1458_v19 }
 0x1aa   :  { %v1461_v32 = vadd.f32 1e-05, %v1459_v27 }
 0x1ac   :  { %2211 = vrsqrt.f32 %v1461_v32 }
 0x1b9   :  { %v2212_v48 = vpop.eup %2211 }
 0x1ba   :  { %v1463_v24 = vmul.f32 %v2212_v48, %v1460_v11 }
 0x1bc   :  { %v1465_v1 = vmul.f32 %v1463_v24, %v2798_v22  ;;  %v1471_v55 = vrot.slane %v1463_v24, %v1470_v46 }
 0x1be   :  { %v1466_v59 = vsub.f32 %v1464_v60, %v1465_v1  ;;  %v1473_v29 = vmul.f32 %v1471_v55, %v2713_v25  ;;  %v1474_v61 = vmul.f32 %v1471_v55, %v2705_v52  ;;  %v1475_v37 = vmul.f32 %v1471_v55, %v2716_v62 }
 0x1bf   :  { %v1476_v40 = vmul.f32 %v1471_v55, %v2722_v30  ;;  %v1477_v0 = vmul.f32 %v1471_v55, %v2730_v51  ;;  %v1478_v23 = vmul.f32 %v1471_v55, %v2739_v34  ;;  %v1479_v36 = vmul.f32 %v1471_v55, %v2746_v47 }
 0x1c0   :  { %v1480_v58 = vmul.f32 %v1471_v55, %v2753_v49  ;;  %v1481_v22 = vmul.f32 %v1471_v55, %v2757_v39  ;;  %v1482_v5 = vmul.f32 %v1471_v55, %v2765_v35  ;;  %v1483_v25 = vmul.f32 %v1471_v55, %v2769_v18 }
 0x1c1   :  { %v1484_v52 = vmul.f32 %v1471_v55, %v2778_v2  ;;  %v1493_v16 = vrot.slane %v1466_v59, %v1470_v46  ;;  %v1485_v62 = vmul.f32 %v1471_v55, %v2782_v45  ;;  %v1486_v30 = vmul.f32 %v1471_v55, %v2786_v10 }
 0x1c2   :  { %v1487_v51 = vmul.f32 %v1471_v55, %v2790_v54  ;;  %v1488_v34 = vmul.f32 %v1471_v55, %v2795_v50 }
 0x1c3   :  { %v1495_v47 = vadd.f32 %v1493_v16, %v1473_v29  ;;  %v1496_v42 = vadd.f32 %v1493_v16, %v1474_v61  ;;  %v1497_v49 = vadd.f32 %v1493_v16, %v1475_v37  ;;  %v1498_v53 = vadd.f32 %v1493_v16, %v1476_v40 }
 0x1c4   :  { %v1499_v39 = vadd.f32 %v1493_v16, %v1477_v0  ;;  %v1500_v63 = vadd.f32 %v1493_v16, %v1478_v23  ;;  %v1501_v35 = vadd.f32 %v1493_v16, %v1479_v36  ;;  %v1502_v8 = vadd.f32 %v1493_v16, %v1480_v58 }
 0x1c5   :  { %v1503_v18 = vadd.f32 %v1493_v16, %v1481_v22  ;;  %v1504_v7 = vadd.f32 %v1493_v16, %v1482_v5  ;;  %v1505_v2 = vadd.f32 %v1493_v16, %v1483_v25  ;;  %v1506_v57 = vadd.f32 %v1493_v16, %v1484_v52 }
 0x1c6   :  { %v1507_v3 = vadd.f32 %v1493_v16, %v1485_v62  ;;  %v1508_v45 = vadd.f32 %v1493_v16, %v1486_v30  ;;  %v1509_v4 = vadd.f32 %v1493_v16, %v1487_v51  ;;  %v1510_v10 = vadd.f32 %v1493_v16, %v1488_v34 }
 0x1c7   :  { %vm1511_vm0 = vcmp.gt.f32.partialorder %v1495_v47, 0.0  ;;  %vm1512_vm1 = vcmp.gt.f32.partialorder %v1496_v42, 0.0  ;;  %vm1513_vm2 = vcmp.gt.f32.partialorder %v1497_v49, 0.0  ;;  %vm1514_vm3 = vcmp.gt.f32.partialorder %v1498_v53, 0.0 }
 0x1c8   :  { %vm1515_vm4 = vcmp.gt.f32.partialorder %v1499_v39, 0.0  ;;  %vm1516_vm5 = vcmp.gt.f32.partialorder %v1500_v63, 0.0  ;;  %vm1517_vm6 = vcmp.gt.f32.partialorder %v1501_v35, 0.0  ;;  %vm1518_vm7 = vcmp.gt.f32.partialorder %v1502_v8, 0.0 }
 0x1c9   :  { %vm1519_vm8 = vcmp.gt.f32.partialorder %v1503_v18, 0.0  ;;  %vm1520_vm9 = vcmp.gt.f32.partialorder %v1504_v7, 0.0  ;;  %vm1521_vm10 = vcmp.gt.f32.partialorder %v1505_v2, 0.0  ;;  %vm1522_vm11 = vcmp.gt.f32.partialorder %v1506_v57, 0.0 }
 0x1ca   :  { %vm1523_vm12 = vcmp.gt.f32.partialorder %v1507_v3, 0.0  ;;  %vm1524_vm13 = vcmp.gt.f32.partialorder %v1508_v45, 0.0  ;;  %vm1525_vm14 = vcmp.gt.f32.partialorder %v1509_v4, 0.0  ;;  %vm1526_vm15 = vcmp.gt.f32.partialorder %v1510_v10, 0.0 }
 0x1cb   :  { %v1527_v54 = vmul.f32 0.2, %v1495_v47  ;;  %v1528_v50 = vmul.f32 0.2, %v1496_v42  ;;  %v1529_v12 = vmul.f32 0.2, %v1497_v49 }
 0x1cc   :  { %v1530_v15 = vmul.f32 0.2, %v1498_v53  ;;  %v1531_v6 = vmul.f32 0.2, %v1499_v39  ;;  %v1532_v56 = vmul.f32 0.2, %v1500_v63 }
 0x1cd   :  { %v1533_v17 = vmul.f32 0.2, %v1501_v35  ;;  %v1534_v20 = vmul.f32 0.2, %v1502_v8  ;;  %v1535_v14 = vmul.f32 0.2, %v1503_v18  ;;  %v1543_v28 = vsel %vm1511_vm0, %v1495_v47, %v1527_v54 }
 0x1ce   :  { %v1536_v21 = vmul.f32 0.2, %v1504_v7  ;;  %v1537_v26 = vmul.f32 0.2, %v1505_v2  ;;  %v1538_v31 = vmul.f32 0.2, %v1506_v57  ;;  %v1544_v13 = vsel %vm1512_vm1, %v1496_v42, %v1528_v50 }
 0x1cf   :  { %v1539_v33 = vmul.f32 0.2, %v1507_v3  ;;  %v1540_v9 = vmul.f32 0.2, %v1508_v45  ;;  %v1541_v38 = vmul.f32 0.2, %v1509_v4  ;;  %v1545_v41 = vsel %vm1513_vm2, %v1497_v49, %v1529_v12 }
 0x1d0   :  { %v1542_v19 = vmul.f32 0.2, %v1510_v10  ;;  %v1546_v27 = vsel %vm1514_vm3, %v1498_v53, %v1530_v15  ;;  %v1547_v32 = vsel %vm1515_vm4, %v1499_v39, %v1531_v6  ;;  %v1548_v44 = vsel %vm1516_vm5, %v1500_v63, %v1532_v56 }
 0x1d1   :  { %v1549_v43 = vsel %vm1517_vm6, %v1501_v35, %v1533_v17  ;;  %v1550_v11 = vsel %vm1518_vm7, %v1502_v8, %v1534_v20  ;;  %v1551_v46 = vsel %vm1519_vm8, %v1503_v18, %v1535_v14  ;;  %v1552_v48 = vsel %vm1520_vm9, %v1504_v7, %v1536_v21 }
 0x1d2   :  { %v1553_v24 = vsel %vm1521_vm10, %v1505_v2, %v1537_v26  ;;  %v1554_v60 = vsel %vm1522_vm11, %v1506_v57, %v1538_v31  ;;  %v1555_v1 = vsel %vm1523_vm12, %v1507_v3, %v1539_v33  ;;  %v1556_v55 = vsel %vm1524_vm13, %v1508_v45, %v1540_v9 }
 0x1d3   :  { %v1557_v59 = vsel %vm1525_vm14, %v1509_v4, %v1541_v38  ;;  %v1558_v29 = vsel %vm1526_vm15, %v1510_v10, %v1542_v19  ;;  %v1791_v61 = vpack.c.bf16 %v1544_v13, %v1543_v28  ;;  %v1796_v37 = vpack.c.bf16 %v1546_v27, %v1545_v41 }
 0x1d4   :  { %v1801_v40 = vpack.c.bf16 %v1548_v44, %v1547_v32  ;;  %v1806_v0 = vpack.c.bf16 %v1550_v11, %v1549_v43  ;;  %v1811_v23 = vpack.c.bf16 %v1552_v48, %v1551_v46  ;;  %v1816_v36 = vpack.c.bf16 %v1554_v60, %v1553_v24 }
 0x1d5   :  { %1792 = vst [vmem:[%s2900_s5] sm:$0xff] %v1791_v61   ;;  %1828 = vst [vmem:[%s2900_s5 + $0x8] sm:$0xff] %v1796_v37   ;;  %v1821_v58 = vpack.c.bf16 %v1556_v55, %v1555_v1  ;;  %v1826_v22 = vpack.c.bf16 %v1558_v29, %v1557_v59 }
 0x1d6   :  { %1829 = vst [vmem:[%s2900_s5 + $0x10] sm:$0xff] %v1801_v40   ;;  %1830 = vst [vmem:[%s2900_s5 + $0x18] sm:$0xff] %v1806_v0  }
 0x1d7   :  { %1831 = vst [vmem:[%s2900_s5 + $0x20] sm:$0xff] %v1811_v23   ;;  %1832 = vst [vmem:[%s2900_s5 + $0x28] sm:$0xff] %v1816_v36  }
 0x1d8   :  { %1833 = vst [vmem:[%s2900_s5 + $0x30] sm:$0xff] %v1821_v58   ;;  %1834 = vst [vmem:[%s2900_s5 + $0x38] sm:$0xff] %v1826_v22  }

// kernel: _lambda_.7
= control target key start
LH: loop header
LB: loop body
LE: loop exit
PB: predicated region body
PF: predicated region fallthrough
CT: control target
= control target key end

     0   :  { %s2433_s0 = inlined_call_operand.vmem [shape: bf16[32,3200], index: 0, kind: input, shape index: {}]   ;;  %s2434_s1 = inlined_call_operand.vmem [shape: bf16[3200,256], index: 1, kind: input, shape index: {}]   ;;  %s2435_s2 = inlined_call_operand.vmem [shape: f32[1,256], index: 2, kind: input, shape index: {}]   ;;  %s2436_s3 = inlined_call_operand.vmem [shape: f32[1,256], index: 3, kind: input, shape index: {}]   ;;  %s2437_s4 = inlined_call_operand.vmem [shape: f32[1,256], index: 4, kind: input, shape index: {}]   ;;  %s2438_s5 = inlined_call_operand.vmem [shape: bf16[32,256], index: 5, kind: output, shape index: {}]  }
   0x1   :  { %2442 = sst [smem:[#allocation9_spill]] %s2433_s0 }
   0x2   :  { %2443 = sst [smem:[#allocation10_spill]] %s2434_s1 }
   0x3   :  { %s2016_s18 = smov 0   ;;  %s2018_s19 = smov 0  }
   0x4   :  { %s2020_s20 = smov 0   ;;  %s2022_s21 = smov 0  }
   0x5   :  { %s2024_s22 = smov 0   ;;  %s2026_s23 = smov 0  }
   0x6   :  { %s2028_s24 = smov 0   ;;  %s2030_s25 = smov 0  }
   0x7   :  { %s2032_s26 = smov 0   ;;  %s2034_s27 = smov 0  }
   0x8   :  { %s2036_s28 = smov 0  }
   0x9 LB: > { %2444 = sst [smem:[#allocation6_spill]] %s1979_s27  ;;  %s1567_s29 = sadd.s32 4294967295, %s1983_s28   ;;  %s1983_s28 = sphi %s2036_s28, %s15_s28   ;;  %s1979_s27 = sphi %s2034_s27, %s2454_s27   ;;  %s1975_s26 = sphi %s2032_s26, %s2462_s26   ;;  %s1971_s25 = sphi %s2030_s25, %s2452_s25   ;;  %s1967_s24 = sphi %s2028_s24, %s2461_s24   ;;  %s1963_s23 = sphi %s2026_s23, %s2460_s23   ;;  %s1959_s22 = sphi %s2024_s22, %s2459_s22   ;;  %s1955_s21 = sphi %s2022_s21, %s2458_s21   ;;  %s1951_s20 = sphi %s2020_s20, %s2457_s20   ;;  %s1947_s19 = sphi %s2018_s19, %s2456_s19   ;;  %s1943_s18 = sphi %s2016_s18, %s2455_s18  }
   0xa   : > { %s24_s30 = sadd.s32 1, %s1975_s26  ;;  %s27_s6 = sadd.s32 1, %s1979_s27 }
   0xb   : > { %p25_p0 = scmp.ge.s32.totalorder %s24_s30, 5  ;;  %s34_s7 = sadd.s32 1, %s1963_s23 }
   0xc   : > { %p41_p1 = scmp.ne.s32.totalorder %s1963_s23, %s1959_s22  ;;  %p42_p2 = scmp.eq.s32.totalorder %s1983_s28, 0 }
   0xd   : > { %s2464_s30 = smov (%p25_p0, %s24_s30), 0  ;;  %s2466_s6 = smov (!%p25_p0, %s27_s6), %s1979_s27 }
   0xe   : > { %2445 = sst [smem:[#allocation7_spill]] %s2464_s30  ;;  %s31_s8 = ssub.s32 %s1975_s26, %s2464_s30 }
   0xf   : > { %p29_p3 = scmp.ge.s32.totalorder %s2466_s6, 2  ;;  %p32_p4 = scmp.eq.s32.totalorder %s31_s8, 0 }
  0x10   : > { %p2083_p5 = por %p42_p2, %p41_p1  ;;  %s62_s10 = sadd.s32 1, %s1955_s21 }
  0x11   : > { %s2468_s6 = smov (%p29_p3, %s2466_s6), 0  ;;  %p69_p6 = scmp.ne.s32.totalorder %s1955_s21, %s1951_s20 }
  0x12   : > { %2447 = sst [smem:[#allocation8_spill]] %s2468_s6  ;;  %s58_s12 = ssub.s32 %s1979_s27, %s2468_s6 }
  0x13   : > { %s2091_s11 = scalar_select %p32_p4, %s1963_s23, %s34_s7  }
  0x14   : > { %s59_s13 = sor.u32 %s58_s12, %s31_s8  ;;  %p164_p7 = scmp.eq.s32.totalorder %s58_s12, 0 }
  0x15   : > { %p60_p8 = scmp.eq.s32.totalorder %s59_s13, 0  ;;  %p2097_p9 = por %p69_p6, %p42_p2 }
  0x16   : > { %s166_s15 = sadd.s32 1, %s1947_s19  ;;  %p176_p10 = scmp.ne.s32.totalorder %s1947_s19, %s1943_s18 }
  0x17   : > { %s2105_s16 = scalar_select %p60_p8, %s1955_s21, %s62_s10  }
  0x18   : > { %s2108_s17 = scalar_select %p164_p7, %s1947_s19, %s166_s15  }
  0x19   : > { %p177_p11 = scmp.eq.s32.totalorder %s1567_s29, 9  ;;  %p1570_p13 = scmp.ge.s32.totalorder %s1983_s28, 10 }
  0x1b   : > { %p2110_p12 = por %p177_p11, %p176_p10  ;;  %199 = sbr.rel (%p1570_p13) target bundleno = 109 (0x6d), region = 16 }
  0x20   : > { %202 = sbr.rel (!%p2083_p5) target bundleno = 47 (0x2f), region = 20  ;;  %s204_s7 = sand.u32 (%p2083_p5), 1, %s1963_s23  }
  0x21   : > { %s1645_s8 = smul.u32 (%p2083_p5), 20, %s1975_s26  ;;  %s2450_s0 = sld [smem:[#allocation9_spill]] (%p2083_p5) }
  0x22   : > { %s1748_s12 = smul.u32 (%p2083_p5), 80, %s204_s7 }
  0x24   : > { %s206_s29 = scalar_lea.vmem (%p2083_p5), [#allocation3], %s1748_s12 }
  0x27   : > { %s209_s15 = scalar_lea.vmem %s2450_s0, %s1645_s8 }
  0x28   : > { %v224_v0 = vld [vmem:[%s209_s15] sm:$0xff]  ;;  %v226_v1 = vld [vmem:[%s209_s15 + $0x8] sm:$0xff]  ;;  %v234_v5 = vld [vmem:[%s209_s15 + $0xd0] sm:$0xff] }
  0x29   : > { %v228_v2 = vld [vmem:[%s209_s15 + $0x64] sm:$0xff]  ;;  %225 = vst [vmem:[%s206_s29] sm:$0xff] %v224_v0  ;;  %227 = vst [vmem:[%s206_s29 + $0x8] sm:$0xff] %v226_v1  ;;  %v230_v3 = vld [vmem:[%s209_s15 + $0x6c] sm:$0xff] }
  0x2a   : > { %229 = vst [vmem:[%s206_s29 + $0x14] sm:$0xff] %v228_v2  ;;  %v232_v4 = vld [vmem:[%s209_s15 + $0xc8] sm:$0xff]  ;;  %231 = vst [vmem:[%s206_s29 + $0x1c] sm:$0xff] %v230_v3  ;;  %v238_v7 = vld [vmem:[%s209_s15 + $0x134] sm:$0xff] }
  0x2b   : > { %233 = vst [vmem:[%s206_s29 + $0x28] sm:$0xff] %v232_v4  ;;  %235 = vst [vmem:[%s206_s29 + $0x30] sm:$0xff] %v234_v5  ;;  %v236_v6 = vld [vmem:[%s209_s15 + $0x12c] sm:$0xff]  ;;  %v1574_v9 = vld [vmem:[%s209_s15 + $0x74] sm:$0xf] }
  0x2c   : > { %v1572_v8 = vld [vmem:[%s209_s15 + $0x10] sm:$0xf]  ;;  %237 = vst [vmem:[%s206_s29 + $0x3c] sm:$0xff] %v236_v6  ;;  %239 = vst [vmem:[%s206_s29 + $0x44] sm:$0xff] %v238_v7  ;;  %v1576_v10 = vld [vmem:[%s209_s15 + $0xd8] sm:$0xf] }
  0x2d   : > { %1573 = vst [vmem:[%s206_s29 + $0x10] sm:$0xf] %v1572_v8  ;;  %v1578_v11 = vld [vmem:[%s209_s15 + $0x13c] sm:$0xf]  ;;  %1575 = vst [vmem:[%s206_s29 + $0x24] sm:$0xf] %v1574_v9 }
  0x2e   : > { %1577 = vst [vmem:[%s206_s29 + $0x38] sm:$0xf] %v1576_v10  ;;  %1579 = vst [vmem:[%s206_s29 + $0x4c] sm:$0xf] %v1578_v11 }
  0x2f PF: > { %261 = sbr.rel (!%p2097_p9) target bundleno = 109 (0x6d), region = 46  ;;  %s263_s9 = sand.u32 (%p2097_p9), 1, %s1955_s21  }
  0x30   : > { %s1646_s7 = smul.u32 (%p2097_p9), 160, %s1975_s26  ;;  %s2451_s1 = sld [smem:[#allocation10_spill]] (%p2097_p9) }
  0x31   : > { %s1749_s8 = smul.u32 (%p2097_p9), 320, %s263_s9 }
  0x32   : > { %s268_s12 = sadd.s32 (%p2097_p9), %s1979_s27, %s1646_s7 }
  0x33   : > { %s1581_s10 = sshll.u32 (%p2097_p9), %s268_s12, 2  ;;  %s2135_s14 = scalar_lea.vmem (%p2097_p9), [#allocation4], %s1749_s8 }
  0x36   : > { %s2130_s6 = scalar_lea.vmem %s2451_s1, %s1581_s10 }
  0x37   : > { %v287_v12 = vld [vmem:[%s2130_s6] sm:$0xf]  ;;  %v289_v13 = vld [vmem:[%s2130_s6 + $0x8] sm:$0xf]  ;;  %v291_v14 = vld [vmem:[%s2130_s6 + $0x10] sm:$0xf] }
  0x38   : > { %288 = vst [vmem:[%s2135_s14] sm:$0xf] %v287_v12  ;;  %290 = vst [vmem:[%s2135_s14 + $0x4] sm:$0xf] %v289_v13  ;;  %v293_v15 = vld [vmem:[%s2130_s6 + $0x18] sm:$0xf] }
  0x39   : > { %292 = vst [vmem:[%s2135_s14 + $0x8] sm:$0xf] %v291_v14  ;;  %v295_v16 = vld [vmem:[%s2130_s6 + $0x20] sm:$0xf]  ;;  %v297_v17 = vld [vmem:[%s2130_s6 + $0x28] sm:$0xf] }
  0x3a   : > { %294 = vst [vmem:[%s2135_s14 + $0xc] sm:$0xf] %v293_v15  ;;  %296 = vst [vmem:[%s2135_s14 + $0x10] sm:$0xf] %v295_v16  ;;  %v299_v18 = vld [vmem:[%s2130_s6 + $0x30] sm:$0xf] }
  0x3b   : > { %298 = vst [vmem:[%s2135_s14 + $0x14] sm:$0xf] %v297_v17  ;;  %v301_v19 = vld [vmem:[%s2130_s6 + $0x38] sm:$0xf]  ;;  %v303_v20 = vld [vmem:[%s2130_s6 + $0x40] sm:$0xf] }
  0x3c   : > { %300 = vst [vmem:[%s2135_s14 + $0x18] sm:$0xf] %v299_v18  ;;  %302 = vst [vmem:[%s2135_s14 + $0x1c] sm:$0xf] %v301_v19  ;;  %v305_v21 = vld [vmem:[%s2130_s6 + $0x48] sm:$0xf] }
  0x3d   : > { %304 = vst [vmem:[%s2135_s14 + $0x20] sm:$0xf] %v303_v20  ;;  %v307_v22 = vld [vmem:[%s2130_s6 + $0x50] sm:$0xf]  ;;  %v309_v23 = vld [vmem:[%s2130_s6 + $0x58] sm:$0xf] }
  0x3e   : > { %306 = vst [vmem:[%s2135_s14 + $0x24] sm:$0xf] %v305_v21  ;;  %308 = vst [vmem:[%s2135_s14 + $0x28] sm:$0xf] %v307_v22  ;;  %v311_v24 = vld [vmem:[%s2130_s6 + $0x60] sm:$0xf] }
  0x3f   : > { %310 = vst [vmem:[%s2135_s14 + $0x2c] sm:$0xf] %v309_v23  ;;  %v313_v25 = vld [vmem:[%s2130_s6 + $0x68] sm:$0xf]  ;;  %v315_v26 = vld [vmem:[%s2130_s6 + $0x70] sm:$0xf] }
  0x40   : > { %312 = vst [vmem:[%s2135_s14 + $0x30] sm:$0xf] %v311_v24  ;;  %314 = vst [vmem:[%s2135_s14 + $0x34] sm:$0xf] %v313_v25  ;;  %v317_v27 = vld [vmem:[%s2130_s6 + $0x78] sm:$0xf] }
  0x41   : > { %316 = vst [vmem:[%s2135_s14 + $0x38] sm:$0xf] %v315_v26  ;;  %v319_v28 = vld [vmem:[%s2130_s6 + $0x80] sm:$0xf]  ;;  %v321_v29 = vld [vmem:[%s2130_s6 + $0x88] sm:$0xf] }
  0x42   : > { %318 = vst [vmem:[%s2135_s14 + $0x3c] sm:$0xf] %v317_v27  ;;  %320 = vst [vmem:[%s2135_s14 + $0x40] sm:$0xf] %v319_v28  ;;  %v323_v30 = vld [vmem:[%s2130_s6 + $0x90] sm:$0xf] }
  0x43   : > { %322 = vst [vmem:[%s2135_s14 + $0x44] sm:$0xf] %v321_v29  ;;  %v325_v31 = vld [vmem:[%s2130_s6 + $0x98] sm:$0xf]  ;;  %v327_v32 = vld [vmem:[%s2130_s6 + $0xa0] sm:$0xf] }
  0x44   : > { %324 = vst [vmem:[%s2135_s14 + $0x48] sm:$0xf] %v323_v30  ;;  %326 = vst [vmem:[%s2135_s14 + $0x4c] sm:$0xf] %v325_v31  ;;  %v329_v33 = vld [vmem:[%s2130_s6 + $0xa8] sm:$0xf] }
  0x45   : > { %328 = vst [vmem:[%s2135_s14 + $0x50] sm:$0xf] %v327_v32  ;;  %v331_v34 = vld [vmem:[%s2130_s6 + $0xb0] sm:$0xf]  ;;  %v333_v35 = vld [vmem:[%s2130_s6 + $0xb8] sm:$0xf] }
  0x46   : > { %330 = vst [vmem:[%s2135_s14 + $0x54] sm:$0xf] %v329_v33  ;;  %332 = vst [vmem:[%s2135_s14 + $0x58] sm:$0xf] %v331_v34  ;;  %v335_v36 = vld [vmem:[%s2130_s6 + $0xc0] sm:$0xf] }
  0x47   : > { %334 = vst [vmem:[%s2135_s14 + $0x5c] sm:$0xf] %v333_v35  ;;  %v337_v37 = vld [vmem:[%s2130_s6 + $0xc8] sm:$0xf]  ;;  %v339_v38 = vld [vmem:[%s2130_s6 + $0xd0] sm:$0xf] }
  0x48   : > { %336 = vst [vmem:[%s2135_s14 + $0x60] sm:$0xf] %v335_v36  ;;  %338 = vst [vmem:[%s2135_s14 + $0x64] sm:$0xf] %v337_v37  ;;  %v341_v39 = vld [vmem:[%s2130_s6 + $0xd8] sm:$0xf] }
  0x49   : > { %340 = vst [vmem:[%s2135_s14 + $0x68] sm:$0xf] %v339_v38  ;;  %v343_v40 = vld [vmem:[%s2130_s6 + $0xe0] sm:$0xf]  ;;  %v345_v41 = vld [vmem:[%s2130_s6 + $0xe8] sm:$0xf] }
  0x4a   : > { %342 = vst [vmem:[%s2135_s14 + $0x6c] sm:$0xf] %v341_v39  ;;  %344 = vst [vmem:[%s2135_s14 + $0x70] sm:$0xf] %v343_v40  ;;  %v347_v42 = vld [vmem:[%s2130_s6 + $0xf0] sm:$0xf] }
  0x4b   : > { %346 = vst [vmem:[%s2135_s14 + $0x74] sm:$0xf] %v345_v41  ;;  %v349_v43 = vld [vmem:[%s2130_s6 + $0xf8] sm:$0xf]  ;;  %v351_v44 = vld [vmem:[%s2130_s6 + $0x100] sm:$0xf] }
  0x4c   : > { %348 = vst [vmem:[%s2135_s14 + $0x78] sm:$0xf] %v347_v42  ;;  %350 = vst [vmem:[%s2135_s14 + $0x7c] sm:$0xf] %v349_v43  ;;  %v353_v45 = vld [vmem:[%s2130_s6 + $0x108] sm:$0xf] }
  0x4d   : > { %352 = vst [vmem:[%s2135_s14 + $0x80] sm:$0xf] %v351_v44  ;;  %v355_v46 = vld [vmem:[%s2130_s6 + $0x110] sm:$0xf]  ;;  %v357_v47 = vld [vmem:[%s2130_s6 + $0x118] sm:$0xf] }
  0x4e   : > { %354 = vst [vmem:[%s2135_s14 + $0x84] sm:$0xf] %v353_v45  ;;  %356 = vst [vmem:[%s2135_s14 + $0x88] sm:$0xf] %v355_v46  ;;  %v359_v48 = vld [vmem:[%s2130_s6 + $0x120] sm:$0xf] }
  0x4f   : > { %358 = vst [vmem:[%s2135_s14 + $0x8c] sm:$0xf] %v357_v47  ;;  %v361_v49 = vld [vmem:[%s2130_s6 + $0x128] sm:$0xf]  ;;  %v363_v50 = vld [vmem:[%s2130_s6 + $0x130] sm:$0xf] }
  0x50   : > { %360 = vst [vmem:[%s2135_s14 + $0x90] sm:$0xf] %v359_v48  ;;  %362 = vst [vmem:[%s2135_s14 + $0x94] sm:$0xf] %v361_v49  ;;  %v365_v51 = vld [vmem:[%s2130_s6 + $0x138] sm:$0xf] }
  0x51   : > { %364 = vst [vmem:[%s2135_s14 + $0x98] sm:$0xf] %v363_v50  ;;  %v367_v52 = vld [vmem:[%s2130_s6 + $0x140] sm:$0xf]  ;;  %v369_v53 = vld [vmem:[%s2130_s6 + $0x148] sm:$0xf] }
  0x52   : > { %366 = vst [vmem:[%s2135_s14 + $0x9c] sm:$0xf] %v365_v51  ;;  %368 = vst [vmem:[%s2135_s14 + $0xa0] sm:$0xf] %v367_v52  ;;  %v371_v54 = vld [vmem:[%s2130_s6 + $0x150] sm:$0xf] }
  0x53   : > { %370 = vst [vmem:[%s2135_s14 + $0xa4] sm:$0xf] %v369_v53  ;;  %v373_v55 = vld [vmem:[%s2130_s6 + $0x158] sm:$0xf]  ;;  %v375_v56 = vld [vmem:[%s2130_s6 + $0x160] sm:$0xf] }
  0x54   : > { %372 = vst [vmem:[%s2135_s14 + $0xa8] sm:$0xf] %v371_v54  ;;  %374 = vst [vmem:[%s2135_s14 + $0xac] sm:$0xf] %v373_v55  ;;  %v377_v57 = vld [vmem:[%s2130_s6 + $0x168] sm:$0xf] }
  0x55   : > { %376 = vst [vmem:[%s2135_s14 + $0xb0] sm:$0xf] %v375_v56  ;;  %v379_v58 = vld [vmem:[%s2130_s6 + $0x170] sm:$0xf]  ;;  %v381_v59 = vld [vmem:[%s2130_s6 + $0x178] sm:$0xf] }
  0x56   : > { %378 = vst [vmem:[%s2135_s14 + $0xb4] sm:$0xf] %v377_v57  ;;  %380 = vst [vmem:[%s2135_s14 + $0xb8] sm:$0xf] %v379_v58  ;;  %v383_v60 = vld [vmem:[%s2130_s6 + $0x180] sm:$0xf] }
  0x57   : > { %382 = vst [vmem:[%s2135_s14 + $0xbc] sm:$0xf] %v381_v59  ;;  %v385_v61 = vld [vmem:[%s2130_s6 + $0x188] sm:$0xf]  ;;  %v387_v62 = vld [vmem:[%s2130_s6 + $0x190] sm:$0xf] }
  0x58   : > { %384 = vst [vmem:[%s2135_s14 + $0xc0] sm:$0xf] %v383_v60  ;;  %386 = vst [vmem:[%s2135_s14 + $0xc4] sm:$0xf] %v385_v61  ;;  %v389_v63 = vld [vmem:[%s2130_s6 + $0x198] sm:$0xf] }
  0x59   : > { %388 = vst [vmem:[%s2135_s14 + $0xc8] sm:$0xf] %v387_v62  ;;  %v391_v0 = vld [vmem:[%s2130_s6 + $0x1a0] sm:$0xf]  ;;  %v393_v1 = vld [vmem:[%s2130_s6 + $0x1a8] sm:$0xf] }
  0x5a   : > { %390 = vst [vmem:[%s2135_s14 + $0xcc] sm:$0xf] %v389_v63  ;;  %392 = vst [vmem:[%s2135_s14 + $0xd0] sm:$0xf] %v391_v0  ;;  %v395_v2 = vld [vmem:[%s2130_s6 + $0x1b0] sm:$0xf] }
  0x5b   : > { %394 = vst [vmem:[%s2135_s14 + $0xd4] sm:$0xf] %v393_v1  ;;  %v397_v3 = vld [vmem:[%s2130_s6 + $0x1b8] sm:$0xf]  ;;  %v399_v4 = vld [vmem:[%s2130_s6 + $0x1c0] sm:$0xf] }
  0x5c   : > { %396 = vst [vmem:[%s2135_s14 + $0xd8] sm:$0xf] %v395_v2  ;;  %398 = vst [vmem:[%s2135_s14 + $0xdc] sm:$0xf] %v397_v3  ;;  %v401_v5 = vld [vmem:[%s2130_s6 + $0x1c8] sm:$0xf] }
  0x5d   : > { %400 = vst [vmem:[%s2135_s14 + $0xe0] sm:$0xf] %v399_v4  ;;  %v403_v6 = vld [vmem:[%s2130_s6 + $0x1d0] sm:$0xf]  ;;  %v405_v7 = vld [vmem:[%s2130_s6 + $0x1d8] sm:$0xf] }
  0x5e   : > { %402 = vst [vmem:[%s2135_s14 + $0xe4] sm:$0xf] %v401_v5  ;;  %404 = vst [vmem:[%s2135_s14 + $0xe8] sm:$0xf] %v403_v6  ;;  %v407_v8 = vld [vmem:[%s2130_s6 + $0x1e0] sm:$0xf] }
  0x5f   : > { %406 = vst [vmem:[%s2135_s14 + $0xec] sm:$0xf] %v405_v7  ;;  %v409_v9 = vld [vmem:[%s2130_s6 + $0x1e8] sm:$0xf]  ;;  %v411_v10 = vld [vmem:[%s2130_s6 + $0x1f0] sm:$0xf] }
  0x60   : > { %408 = vst [vmem:[%s2135_s14 + $0xf0] sm:$0xf] %v407_v8  ;;  %410 = vst [vmem:[%s2135_s14 + $0xf4] sm:$0xf] %v409_v9  ;;  %v413_v11 = vld [vmem:[%s2130_s6 + $0x1f8] sm:$0xf] }
  0x61   : > { %412 = vst [vmem:[%s2135_s14 + $0xf8] sm:$0xf] %v411_v10  ;;  %v415_v12 = vld [vmem:[%s2130_s6 + $0x200] sm:$0xf]  ;;  %v417_v13 = vld [vmem:[%s2130_s6 + $0x208] sm:$0xf] }
  0x62   : > { %414 = vst [vmem:[%s2135_s14 + $0xfc] sm:$0xf] %v413_v11  ;;  %416 = vst [vmem:[%s2135_s14 + $0x100] sm:$0xf] %v415_v12  ;;  %v419_v14 = vld [vmem:[%s2130_s6 + $0x210] sm:$0xf] }
  0x63   : > { %418 = vst [vmem:[%s2135_s14 + $0x104] sm:$0xf] %v417_v13  ;;  %v421_v15 = vld [vmem:[%s2130_s6 + $0x218] sm:$0xf]  ;;  %v423_v16 = vld [vmem:[%s2130_s6 + $0x220] sm:$0xf] }
  0x64   : > { %420 = vst [vmem:[%s2135_s14 + $0x108] sm:$0xf] %v419_v14  ;;  %422 = vst [vmem:[%s2135_s14 + $0x10c] sm:$0xf] %v421_v15  ;;  %v425_v17 = vld [vmem:[%s2130_s6 + $0x228] sm:$0xf] }
  0x65   : > { %424 = vst [vmem:[%s2135_s14 + $0x110] sm:$0xf] %v423_v16  ;;  %v427_v18 = vld [vmem:[%s2130_s6 + $0x230] sm:$0xf]  ;;  %v429_v19 = vld [vmem:[%s2130_s6 + $0x238] sm:$0xf] }
  0x66   : > { %426 = vst [vmem:[%s2135_s14 + $0x114] sm:$0xf] %v425_v17  ;;  %428 = vst [vmem:[%s2135_s14 + $0x118] sm:$0xf] %v427_v18  ;;  %v431_v20 = vld [vmem:[%s2130_s6 + $0x240] sm:$0xf] }
  0x67   : > { %430 = vst [vmem:[%s2135_s14 + $0x11c] sm:$0xf] %v429_v19  ;;  %v433_v21 = vld [vmem:[%s2130_s6 + $0x248] sm:$0xf]  ;;  %v435_v22 = vld [vmem:[%s2130_s6 + $0x250] sm:$0xf] }
  0x68   : > { %432 = vst [vmem:[%s2135_s14 + $0x120] sm:$0xf] %v431_v20  ;;  %434 = vst [vmem:[%s2135_s14 + $0x124] sm:$0xf] %v433_v21  ;;  %v437_v23 = vld [vmem:[%s2130_s6 + $0x258] sm:$0xf] }
  0x69   : > { %436 = vst [vmem:[%s2135_s14 + $0x128] sm:$0xf] %v435_v22  ;;  %v439_v24 = vld [vmem:[%s2130_s6 + $0x260] sm:$0xf]  ;;  %v441_v25 = vld [vmem:[%s2130_s6 + $0x268] sm:$0xf] }
  0x6a   : > { %438 = vst [vmem:[%s2135_s14 + $0x12c] sm:$0xf] %v437_v23  ;;  %440 = vst [vmem:[%s2135_s14 + $0x130] sm:$0xf] %v439_v24  ;;  %v443_v26 = vld [vmem:[%s2130_s6 + $0x270] sm:$0xf] }
  0x6b   : > { %442 = vst [vmem:[%s2135_s14 + $0x134] sm:$0xf] %v441_v25  ;;  %v445_v27 = vld [vmem:[%s2130_s6 + $0x278] sm:$0xf]  ;;  %444 = vst [vmem:[%s2135_s14 + $0x138] sm:$0xf] %v443_v26 }
  0x6c   : > { %446 = vst [vmem:[%s2135_s14 + $0x13c] sm:$0xf] %v445_v27 }
  0x6d PF: > { %p1582_p0 = scmp.ge.s32.totalorder %s1983_s28, 1  ;;  %p647_p1 = scmp.lt.s32.totalorder %s1983_s28, 11 }
  0x6f   : > { %p648_p2 = pnand %p1582_p0, %p647_p1 }
  0x70   : > { %s654_s0 = sand.u32 (!%p648_p2), 1, %s1959_s22   ;;  %s661_s15 = sand.u32 (!%p648_p2), 1, %s1951_s20  }
  0x71   : > { %651 = sbr.rel (%p648_p2) target bundleno = 492 (0x1ec), region = 99  ;;  %s697_s9 = sand.u32 (!%p648_p2), 1, %s1943_s18  }
  0x72   : > { %s1750_s29 = smul.u32 (!%p648_p2), 80, %s654_s0  ;;  %s1583_s7 = sshll.u32 (!%p648_p2), %s697_s9, 4 }
  0x73   : > { %s1751_s6 = smul.u32 (!%p648_p2), 320, %s661_s15  ;;  %p702_p3 = scmp.lt.s32.totalorder (!%p648_p2), %s1971_s25, 1 }
  0x74   : > { %s2315_s0 = scalar_lea.vmem (!%p648_p2), [#allocation3], %s1750_s29  ;;  %s2319_s9 = scalar_lea.vmem (!%p648_p2), [#allocation5], %s1583_s7 }
  0x75   : > { %s2317_s15 = scalar_lea.vmem (!%p648_p2), [#allocation4], %s1751_s6  ;;  %p1584_p4 = scmp.ne.s32.totalorder (!%p648_p2), %s1967_s24, 0 }
  0x76   : > { %s2301_s8 = scalar_select %p702_p3, %s1971_s25, 1 }
  0x77   : > { %715 = sbr.rel (%p1584_p4) target bundleno = 127 (0x7f), region = 111 }
  0x78   : > { %s704_s13 = scalar_lea.vmem %s2435_s2, %s2301_s8  ;;  %s707_s27 = scalar_lea.vmem %s2436_s3, %s2301_s8 }
  0x79   : > { %s710_s18 = scalar_lea.vmem %s2437_s4, %s2301_s8 }
  0x7c   : > { %v1985_v28 = vmov 0.0  }
  0x7d   : > { %716 = vst [vmem:[#allocation2 + $0x10] sm:$0xff] %v1985_v28  ;;  %717 = vst [vmem:[#allocation2] sm:$0xff] %v1985_v28 }
  0x7e   : > { %718 = vst [vmem:[#allocation2 + $0x18] sm:$0xff] %v1985_v28  ;;  %719 = vst [vmem:[#allocation2 + $0x8] sm:$0xff] %v1985_v28 }
  0x7f PF: > { %v1841_v29 = vld [vmem:[%s2317_s15 + $0x78] sm:$0xff]   ;;  %v1845_v33 = vld [vmem:[%s2317_s15 + $0x70] sm:$0xff]   ;;  %v1849_v37 = vld [vmem:[%s2317_s15 + $0x68] sm:$0xff]   ;;  %p1635_p5 = scmp.ne.s32.totalorder %s1967_s24, 4 }
  0x80   : > { %v1842_v30 = vld [vmem:[%s2317_s15 + $0xf8] sm:$0xff]   ;;  %1662 = vmatprep.subr.bf16.mxu0 %v1841_v29  ;;  %v1846_v34 = vld [vmem:[%s2317_s15 + $0xf0] sm:$0xff]   ;;  %v1850_v38 = vld [vmem:[%s2317_s15 + $0xe8] sm:$0xff]  }
  0x81   : > { %v1843_v31 = vld [vmem:[%s2317_s15 + $0x38] sm:$0xff]   ;;  %1690 = vmatprep.subr.bf16.mxu1 %v1842_v30  ;;  %v1847_v35 = vld [vmem:[%s2317_s15 + $0x30] sm:$0xff]   ;;  %v1851_v39 = vld [vmem:[%s2317_s15 + $0x28] sm:$0xff]  }
  0x82   : > { %v1844_v32 = vld [vmem:[%s2317_s15 + $0xb8] sm:$0xff]   ;;  %1663 = vmatpush3.bf16.msra.mxu0 %v1843_v31  ;;  %v1848_v36 = vld [vmem:[%s2317_s15 + $0xb0] sm:$0xff]   ;;  %v1852_v40 = vld [vmem:[%s2317_s15 + $0xa8] sm:$0xff]  }
  0x83   : > { %1691 = vmatpush3.bf16.msra.mxu1 %v1844_v32  ;;  %1664 = vmatprep.subr.bf16.mxu0 %v1845_v33  ;;  %v1853_v41 = vld [vmem:[%s2317_s15 + $0x60] sm:$0xff]   ;;  %v1857_v45 = vld [vmem:[%s2317_s15 + $0x58] sm:$0xff]   ;;  %v1861_v49 = vld [vmem:[%s2317_s15 + $0x50] sm:$0xff]  }
  0x84   : > { %1692 = vmatprep.subr.bf16.mxu1 %v1846_v34  ;;  %v1854_v42 = vld [vmem:[%s2317_s15 + $0xe0] sm:$0xff]   ;;  %v1858_v46 = vld [vmem:[%s2317_s15 + $0xd8] sm:$0xff]   ;;  %v1862_v50 = vld [vmem:[%s2317_s15 + $0xd0] sm:$0xff]  }
  0x85   : > { %v1855_v43 = vld [vmem:[%s2317_s15 + $0x20] sm:$0xff]   ;;  %v1859_v47 = vld [vmem:[%s2317_s15 + $0x18] sm:$0xff]   ;;  %v1863_v51 = vld [vmem:[%s2317_s15 + $0x10] sm:$0xff]  }
  0x86   : > { %1665 = vmatpush3.bf16.msra.mxu0 %v1847_v35  ;;  %v1856_v44 = vld [vmem:[%s2317_s15 + $0xa0] sm:$0xff]   ;;  %v1860_v48 = vld [vmem:[%s2317_s15 + $0x98] sm:$0xff]   ;;  %v1864_v52 = vld [vmem:[%s2317_s15 + $0x90] sm:$0xff]  }
  0x87   : > { %1693 = vmatpush3.bf16.msra.mxu1 %v1848_v36  ;;  %1666 = vmatprep.subr.bf16.mxu0 %v1849_v37  ;;  %v1865_v53 = vld [vmem:[%s2317_s15 + $0x48] sm:$0xff]   ;;  %v1869_v57 = vld [vmem:[%s2317_s15 + $0x40] sm:$0xff]   ;;  %v1879_v1 = vld [vmem:[%s2317_s15 + $0x138] sm:$0xff]  }
  0x88   : > { %1694 = vmatprep.subr.bf16.mxu1 %v1850_v38  ;;  %v1866_v54 = vld [vmem:[%s2317_s15 + $0xc8] sm:$0xff]   ;;  %v1870_v58 = vld [vmem:[%s2317_s15 + $0xc0] sm:$0xff]   ;;  %v1880_v2 = vld [vmem:[%s2317_s15 + $0x130] sm:$0xff]  }
  0x89   : > { %v1867_v55 = vld [vmem:[%s2317_s15 + $0x8] sm:$0xff]   ;;  %v1871_v59 = vld [vmem:[%s2317_s15] sm:$0xff]   ;;  %v1883_v10 = vld [vmem:[%s2317_s15 + $0x118] sm:$0xff]  }
  0x8a   : > { %1667 = vmatpush3.bf16.msra.mxu0 %v1851_v39  ;;  %v1868_v56 = vld [vmem:[%s2317_s15 + $0x88] sm:$0xff]   ;;  %v1872_v60 = vld [vmem:[%s2317_s15 + $0x80] sm:$0xff]   ;;  %v1890_v11 = vld [vmem:[%s2317_s15 + $0x110] sm:$0xff]  }
  0x8b   : > { %1695 = vmatpush3.bf16.msra.mxu1 %v1852_v40  ;;  %1668 = vmatprep.subr.bf16.mxu0 %v1853_v41  ;;  %v1873_v61 = vld [vmem:[%s2315_s0] ss:$20 sps:$4 sm:$0xff]   ;;  %v1875_v62 = vld [vmem:[%s2315_s0 + $0x4] ss:$20 sps:$4 sm:$0xff]   ;;  %v1876_v63 = vld [vmem:[%s2315_s0 + $0x8] ss:$20 sps:$4 sm:$0xff]  }
  0x8c   : > { %1696 = vmatprep.subr.bf16.mxu1 %v1854_v42  ;;  %v1878_v0 = vld [vmem:[%s2315_s0 + $0xc] ss:$20 sps:$4 sm:$0xff]   ;;  %1140 = vmatprep.mubr.bf16.mxu0 %v1875_v62  ;;  %v1886_v5 = vld [vmem:[%s2315_s0 + $0x34] ss:$20 sps:$4 sm:$0xff]   ;;  %v1889_v7 = vld [vmem:[%s2315_s0 + $0x30] ss:$20 sps:$4 sm:$0xff]  }
  0x8d   : > { %1189 = vmatprep.mubr.bf16.mxu1 %v1878_v0  ;;  %v1881_v3 = vld [vmem:[%s2317_s15 + $0x128] sm:$0xff]   ;;  %v1882_v8 = vld [vmem:[%s2317_s15 + $0x120] sm:$0xff]   ;;  %v722_v38 = vld [vmem:[#allocation2 + $0x18] sm:$0xff] }
  0x8e   : > { %1669 = vmatpush3.bf16.msra.mxu0 %v1855_v43  ;;  %v1884_v4 = vld [vmem:[%s2315_s0 + $0x2c] ss:$20 sps:$4 sm:$0xff]   ;;  %v1888_v6 = vld [vmem:[%s2315_s0 + $0x28] ss:$20 sps:$4 sm:$0xff]   ;;  %v1893_v9 = vld [vmem:[%s2315_s0 + $0x10] ss:$20 sps:$4 sm:$0xff]  }
  0x8f   : > { %1697 = vmatpush3.bf16.msra.mxu1 %v1856_v44  ;;  %1670 = vmatprep.subr.bf16.mxu0 %v1857_v45  ;;  %v1891_v12 = vld [vmem:[%s2317_s15 + $0x108] sm:$0xff]   ;;  %v1892_v13 = vld [vmem:[%s2317_s15 + $0x100] sm:$0xff]   ;;  %v720_v44 = vld [vmem:[#allocation2 + $0x10] sm:$0xff] }
  0x90   : > { %1698 = vmatprep.subr.bf16.mxu1 %v1858_v46  ;;  %v1894_v14 = vld [vmem:[%s2315_s0 + $0x38] ss:$20 sps:$4 sm:$0xff]  }
  0x92   : > { %1671 = vmatpush3.bf16.msra.mxu0 %v1859_v47 }
  0x93   : > { %1699 = vmatpush3.bf16.msra.mxu1 %v1860_v48  ;;  %1672 = vmatprep.subr.bf16.mxu0 %v1861_v49  ;;  %v723_v49 = vld [vmem:[#allocation2 + $0x8] sm:$0xff] }
  0x94   : > { %1700 = vmatprep.subr.bf16.mxu1 %v1862_v50 }
  0x96   : > { %1673 = vmatpush3.bf16.msra.mxu0 %v1863_v51 }
  0x97   : > { %1701 = vmatpush3.bf16.msra.mxu1 %v1864_v52  ;;  %1674 = vmatprep.subr.bf16.mxu0 %v1865_v53 }
  0x98   : > { %1702 = vmatprep.subr.bf16.mxu1 %v1866_v54  ;;  %v721_v54 = vld [vmem:[#allocation2] sm:$0xff] }
  0x9a   : > { %1675 = vmatpush3.bf16.msra.mxu0 %v1867_v55 }
  0x9b   : > { %1703 = vmatpush3.bf16.msra.mxu1 %v1868_v56  ;;  %1676 = vmatprep.subr.bf16.mxu0 %v1869_v57 }
  0x9c   : > { %1704 = vmatprep.subr.bf16.mxu1 %v1870_v58 }
  0x9e   : > { %1677 = vmatpush3.bf16.msra.mxu0 %v1871_v59 }
  0x9f   : > { %1705 = vmatpush3.bf16.msra.mxu1 %v1872_v60  ;;  %1728 = vmatprep.subr.bf16.mxu0 %v1879_v1 }
  0xa1   : > { %1141 = vmatmul.mubr.bf16.vlgmr.msra.gmra.mxu0 %v1873_v61 }
  0xa2   : > { %1190 = vmatmul.mubr.bf16.vlgmr.msra.gmra.mxu1 %v1876_v63  ;;  %1729 = vmatpush3.bf16.msra.mxu0 %v1879_v1 }
  0xa3   : > { %1730 = vmatprep.subr.bf16.mxu0 %v1880_v2  ;;  %1148 = vmatprep.mubr.bf16.mxu0 %v1884_v4 }
  0xa4   : > { %1197 = vmatprep.mubr.bf16.mxu1 %v1886_v5 }
  0xa6   : > { %1731 = vmatpush3.bf16.msra.mxu0 %v1880_v2 }
  0xa7   : > { %1732 = vmatprep.subr.bf16.mxu0 %v1881_v3 }
  0xa9   : > { %1149 = vmatmul.mubr.bf16.gmra.mxu0 %v1888_v6 }
  0xaa   : > { %1198 = vmatmul.mubr.bf16.gmra.mxu1 %v1889_v7  ;;  %1733 = vmatpush3.bf16.msra.mxu0 %v1881_v3 }
  0xab   : > { %1734 = vmatprep.subr.bf16.mxu0 %v1882_v8  ;;  %1744 = vmatprep.mubr.bf16.mxu0 %v1893_v9 }
  0xae   : > { %1735 = vmatpush3.bf16.msra.mxu0 %v1882_v8 }
  0xaf   : > { %1736 = vmatprep.subr.bf16.mxu0 %v1883_v10 }
  0xb2   : > { %1737 = vmatpush3.bf16.msra.mxu0 %v1883_v10 }
  0xb3   : > { %1738 = vmatprep.subr.bf16.mxu0 %v1890_v11 }
  0xb6   : > { %1739 = vmatpush3.bf16.msra.mxu0 %v1890_v11 }
  0xb7   : > { %1740 = vmatprep.subr.bf16.mxu0 %v1891_v12 }
  0xba   : > { %1741 = vmatpush3.bf16.msra.mxu0 %v1891_v12 }
  0xbb   : > { %1742 = vmatprep.subr.bf16.mxu0 %v1892_v13 }
  0xbe   : > { %1743 = vmatpush3.bf16.msra.mxu0 %v1892_v13 }
  0xc1   : > { %1745 = vmatmul.mubr.bf16.vlgmr.msra.gmra.mxu0 %v1894_v14 }
 0x161   : > { %v1678_v15 = vpop.f32.mrf.mxu0 }
 0x162   : > { %v1706_v16 = vpop.f32.mrf.mxu1 }
 0x163   : > { %v1679_v17 = vpop.f32.mrf.mxu0 }
 0x164   : > { %v1707_v18 = vpop.f32.mrf.mxu1  ;;  %v1680_v33 = vadd.f32 %v1679_v17, %v1678_v15 }
 0x165   : > { %v1681_v19 = vpop.f32.mrf.mxu0  ;;  %v1708_v34 = vadd.f32 %v1707_v18, %v1706_v16 }
 0x166   : > { %v1709_v20 = vpop.f32.mrf.mxu1 }
 0x167   : > { %v1682_v21 = vpop.f32.mrf.mxu0  ;;  %v1192_v43 = vadd.f32 %v1708_v34, %v1680_v33 }
 0x168   : > { %v1710_v22 = vpop.f32.mrf.mxu1  ;;  %v1683_v40 = vadd.f32 %v1682_v21, %v1681_v19 }
 0x169   : > { %v1684_v23 = vpop.f32.mrf.mxu0  ;;  %v1711_v41 = vadd.f32 %v1710_v22, %v1709_v20 }
 0x16a   : > { %v1712_v24 = vpop.f32.mrf.mxu1 }
 0x16b   : > { %v1685_v25 = vpop.f32.mrf.mxu0  ;;  %v1195_v53 = vadd.f32 %v1711_v41, %v1683_v40 }
 0x16c   : > { %v1713_v26 = vpop.f32.mrf.mxu1  ;;  %v1686_v29 = vadd.f32 %v1685_v25, %v1684_v23 }
 0x16d   : > { %v1687_v27 = vpop.f32.mrf.mxu0  ;;  %v1714_v30 = vadd.f32 %v1713_v26, %v1712_v24 }
 0x16e   : > { %v1715_v28 = vpop.f32.mrf.mxu1 }
 0x16f   : > { %v1688_v31 = vpop.f32.mrf.mxu0  ;;  %v1200_v37 = vadd.f32 %v1714_v30, %v1686_v29 }
 0x170   : > { %v1716_v32 = vpop.f32.mrf.mxu1  ;;  %v1689_v35 = vadd.f32 %v1688_v31, %v1687_v27 }
 0x171   : > { %v1717_v36 = vadd.f32 %v1716_v32, %v1715_v28 }
 0x173   : > { %v1203_v48 = vadd.f32 %v1717_v36, %v1689_v35 }
 0x181   : > { %v1746_v39 = vpop.f32.mrf.mxu0 }
 0x182   : > { %v1249_v42 = vadd.f32 %v1746_v39, %v1200_v37 }
 0x183   : > { %v1240_v45 = vpop.f32.mrf.mxu0 }
 0x184   : > { %v1257_v46 = vadd.f32 %v1249_v42, %v722_v38  ;;  %v1241_v47 = vadd.f32 %v1240_v45, %v1192_v43 }
 0x185   : > { %v1747_v50 = vpop.f32.mrf.mxu0 }
 0x186   : > { %1261 = vst [vmem:[#allocation2 + $0x18] sm:$0xff] %v1257_v46  ;;  %v1255_v51 = vadd.f32 %v1241_v47, %v720_v44  ;;  %v1252_v52 = vadd.f32 %v1747_v50, %v1203_v48 }
 0x187   : > { %v1243_v55 = vpop.f32.mrf.mxu0 }
 0x188   : > { %1259 = vst [vmem:[#allocation2 + $0x10] sm:$0xff] %v1255_v51  ;;  %v1258_v56 = vadd.f32 %v1252_v52, %v723_v49  ;;  %v1244_v57 = vadd.f32 %v1243_v55, %v1195_v53  ;;  %1266 = sbr.rel (%p1635_p5) target bundleno = 483 (0x1e3), region = 115 }
 0x18a   : > { %1262 = vst [vmem:[#allocation2 + $0x8] sm:$0xff] %v1258_v56  ;;  %v1256_v58 = vadd.f32 %v1244_v57, %v721_v54 }
 0x18c   : > { %1260 = vst [vmem:[#allocation2] sm:$0xff] %v1256_v58 }
 0x18d   : > { %v1269_v61 = vld [vmem:[#allocation2 + $0x18] sm:$0xff]  ;;  %v1636_v63 = vld [vmem:[%s704_s13] ss:$0 sm:$0xff]  ;;  %v1335_v33 = vlaneseq }
 0x18e   : > { %v1280_v2 = vadd.f32 %v1636_v63, %v1269_v61  ;;  %v1327_v35 = vld [vmem:[%s707_s27] sm:$0x1] }
 0x18f   : > { %v1267_v59 = vld [vmem:[#allocation2 + $0x10] sm:$0xff]  ;;  %v1336_v34 = vshrl.u32 %v1335_v33, 7  ;;  %v1331_v39 = vld [vmem:[%s710_s18] sm:$0x1] }
 0x190   : > { %v1278_v0 = vadd.f32 %v1636_v63, %v1267_v59 }
 0x191   : > { %v1270_v62 = vld [vmem:[#allocation2 + $0x8] sm:$0xff]  ;;  %v1337_v36 = vsub.s32 0, %v1336_v34 }
 0x192   : > { %v1281_v3 = vadd.f32 %v1636_v63, %v1270_v62 }
 0x193   : > { %v1268_v60 = vld [vmem:[#allocation2] sm:$0xff] }
 0x194   : > { %v1279_v1 = vadd.f32 %v1636_v63, %v1268_v60 }
 0x196   : > { %v1295_v4 = vadd.f32 %v1279_v1, %v1278_v0 }
 0x198   : > { %v1296_v5 = vadd.f32 %v1295_v4, %v1280_v2 }
 0x19a   : > { %v1297_v6 = vadd.f32 %v1296_v5, %v1281_v3 }
 0x19c   : > { %v1298_v7 = vrot.slane %v1297_v6, 4 }
 0x19e   : > { %v1299_v8 = vadd.f32 %v1298_v7, %v1297_v6 }
 0x1a0   : > { %v1300_v9 = vrot.slane %v1299_v8, 2 }
 0x1a2   : > { %v1301_v10 = vadd.f32 %v1300_v9, %v1299_v8 }
 0x1a4   : > { %v1302_v11 = vrot.slane %v1301_v10, 1 }
 0x1a6   : > { %v1303_v12 = vadd.f32 %v1302_v11, %v1301_v10 }
 0x1a8   : > { %v1304_v13 = vmul.f32 0.03125, %v1303_v12 }
 0x1aa   : > { %v1305_v14 = vsub.f32 %v1278_v0, %v1304_v13  ;;  %v1306_v15 = vsub.f32 %v1279_v1, %v1304_v13  ;;  %v1307_v16 = vsub.f32 %v1280_v2, %v1304_v13  ;;  %v1308_v17 = vsub.f32 %v1281_v3, %v1304_v13 }
 0x1ac   : > { %v1313_v18 = vmul.f32 %v1305_v14, %v1305_v14  ;;  %v1314_v19 = vmul.f32 %v1306_v15, %v1306_v15  ;;  %v1315_v20 = vmul.f32 %v1307_v16, %v1307_v16  ;;  %v1316_v21 = vmul.f32 %v1308_v17, %v1308_v17 }
 0x1ae   : > { %v1317_v22 = vadd.f32 %v1314_v19, %v1313_v18 }
 0x1b0   : > { %v1318_v23 = vadd.f32 %v1317_v22, %v1315_v20 }
 0x1b2   : > { %v1319_v24 = vadd.f32 %v1318_v23, %v1316_v21 }
 0x1b4   : > { %v1320_v25 = vrot.slane %v1319_v24, 4 }
 0x1b6   : > { %v1321_v26 = vadd.f32 %v1320_v25, %v1319_v24 }
 0x1b8   : > { %v1322_v27 = vrot.slane %v1321_v26, 2 }
 0x1ba   : > { %v1323_v28 = vadd.f32 %v1322_v27, %v1321_v26 }
 0x1bc   : > { %v1324_v29 = vrot.slane %v1323_v28, 1 }
 0x1be   : > { %v1325_v30 = vadd.f32 %v1324_v29, %v1323_v28 }
 0x1c0   : > { %v1326_v31 = vmul.f32 0.03125, %v1325_v30 }
 0x1c2   : > { %v1328_v32 = vadd.f32 1e-05, %v1326_v31 }
 0x1c4   : > { %1895 = vrsqrt.f32 %v1328_v32 }
 0x1d1   : > { %v1896_v37 = vpop.eup %1895 }
 0x1d2   : > { %v1330_v38 = vmul.f32 %v1896_v37, %v1327_v35 }
 0x1d4   : > { %v1332_v40 = vmul.f32 %v1330_v38, %v1304_v13  ;;  %v1338_v41 = vrot.slane %v1330_v38, %v1337_v36 }
 0x1d6   : > { %v1333_v42 = vsub.f32 %v1331_v39, %v1332_v40  ;;  %v1340_v43 = vmul.f32 %v1338_v41, %v1278_v0  ;;  %v1341_v44 = vmul.f32 %v1338_v41, %v1279_v1  ;;  %v1342_v45 = vmul.f32 %v1338_v41, %v1280_v2 }
 0x1d7   : > { %v1343_v46 = vmul.f32 %v1338_v41, %v1281_v3 }
 0x1d8   : > { %v1348_v47 = vrot.slane %v1333_v42, %v1337_v36 }
 0x1da   : > { %v1350_v48 = vadd.f32 %v1348_v47, %v1340_v43  ;;  %v1351_v49 = vadd.f32 %v1348_v47, %v1341_v44  ;;  %v1352_v50 = vadd.f32 %v1348_v47, %v1342_v45  ;;  %v1353_v51 = vadd.f32 %v1348_v47, %v1343_v46 }
 0x1dc   : > { %vm1354_vm0 = vcmp.gt.f32.partialorder %v1350_v48, 0.0  ;;  %vm1355_vm1 = vcmp.gt.f32.partialorder %v1351_v49, 0.0  ;;  %v1358_v52 = vmul.f32 0.2, %v1350_v48  ;;  %v1359_v53 = vmul.f32 0.2, %v1351_v49 }
 0x1dd   : > { %vm1356_vm2 = vcmp.gt.f32.partialorder %v1352_v50, 0.0  ;;  %vm1357_vm3 = vcmp.gt.f32.partialorder %v1353_v51, 0.0  ;;  %v1360_v54 = vmul.f32 0.2, %v1352_v50  ;;  %v1361_v55 = vmul.f32 0.2, %v1353_v51 }
 0x1de   : > { %v1362_v56 = vsel %vm1354_vm0, %v1350_v48, %v1358_v52  ;;  %v1363_v57 = vsel %vm1355_vm1, %v1351_v49, %v1359_v53 }
 0x1df   : > { %v1654_v58 = vpack.c.bf16 %v1363_v57, %v1362_v56  ;;  %v1364_v59 = vsel %vm1356_vm2, %v1352_v50, %v1360_v54  ;;  %v1365_v60 = vsel %vm1357_vm3, %v1353_v51, %v1361_v55 }
 0x1e0   : > { %v1659_v61 = vpack.c.bf16 %v1365_v60, %v1364_v59 }
 0x1e1   : > { %1655 = vst [vmem:[%s2319_s9] sm:$0xff] %v1654_v58  }
 0x1e2   : > { %1661 = vst [vmem:[%s2319_s9 + $0x8] sm:$0xff] %v1659_v61  }
 0x1e3 PF: > { %1392 = sbr.rel (!%p2110_p12) target bundleno = 492 (0x1ec), region = 119  ;;  %s1642_s27 = sshll.u32 (%p2110_p12), %s1971_s25, 2 }
 0x1e4   : > { %s1394_s13 = scalar_lea.vmem (%p2110_p12), %s2438_s5, %s1642_s27 }
 0x1e8   : > { %v1411_v62 = vld [vmem:[%s2319_s9] sm:$0xf]  ;;  %v1413_v63 = vld [vmem:[%s2319_s9 + $0x4] sm:$0xf] }
 0x1e9   : > { %v1415_v0 = vld [vmem:[%s2319_s9 + $0x8] sm:$0xf]  ;;  %v1417_v1 = vld [vmem:[%s2319_s9 + $0xc] sm:$0xf]  ;;  %1412 = vst [vmem:[%s1394_s13] sm:$0xf] %v1411_v62 }
 0x1ea   : > { %1414 = vst [vmem:[%s1394_s13 + $0x8] sm:$0xf] %v1413_v63  ;;  %1416 = vst [vmem:[%s1394_s13 + $0x10] sm:$0xf] %v1415_v0 }
 0x1eb   : > { %1418 = vst [vmem:[%s1394_s13 + $0x18] sm:$0xf] %v1417_v1 }
 0x1ec PF: > { %s15_s28 = sadd.s32 1, %s1983_s28   ;;  %s2452_s25 = sld [smem:[#allocation6_spill]] }
 0x1ed   : > { %p12_p6 = scmp.ge.s32.totalorder %s15_s28, 12   ;;  %s2453_s30 = sld [smem:[#allocation7_spill]] }
 0x1ee   : > { %s2454_s27 = sld [smem:[#allocation8_spill]]  ;;  %s2455_s18 = smov %s1947_s19 }
 0x1ef   : > { %s2456_s19 = smov %s2108_s17  ;;  %s2457_s20 = smov %s1955_s21 }
 0x1f0   : > { %s2458_s21 = smov %s2105_s16  ;;  %s2459_s22 = smov %s1963_s23 }
 0x1f1   : > { %s2460_s23 = smov %s2091_s11  ;;  %s2461_s24 = smov %s1975_s26 }
 0x1f2   :  { %14 = sbr.rel (!%p12_p6) target bundleno = 9 (0x9), region = 214 }
 0x1f3   : > { %s2462_s26 = smov %s2453_s30 }

// kernel: _lambda_.8
= control target key start
LH: loop header
LB: loop body
LE: loop exit
PB: predicated region body
PF: predicated region fallthrough
CT: control target
= control target key end

     0   :  { %s3337_s0 = inlined_call_operand.vmem [shape: bf16[16,6400], index: 0, kind: input, shape index: {}]   ;;  %s3338_s1 = inlined_call_operand.vmem [shape: bf16[6400,256], index: 1, kind: input, shape index: {}]   ;;  %s3339_s2 = inlined_call_operand.vmem [shape: f32[1,256], index: 2, kind: input, shape index: {}]   ;;  %s3340_s3 = inlined_call_operand.vmem [shape: f32[1,256], index: 3, kind: input, shape index: {}]   ;;  %s3341_s4 = inlined_call_operand.vmem [shape: f32[1,256], index: 4, kind: input, shape index: {}]   ;;  %s3342_s5 = inlined_call_operand.vmem [shape: bf16[16,256], index: 5, kind: output, shape index: {}]  }
   0x1   :  { %3346 = sst [smem:[#allocation9_spill]] %s3337_s0 }
   0x2   :  { %3347 = sst [smem:[#allocation10_spill]] %s3338_s1 }
   0x3   :  { %s2723_s18 = smov 0   ;;  %s2725_s19 = smov 0  }
   0x4   :  { %s2727_s20 = smov 0   ;;  %s2729_s21 = smov 0  }
   0x5   :  { %s2731_s22 = smov 0   ;;  %s2733_s23 = smov 0  }
   0x6   :  { %s2735_s24 = smov 0   ;;  %s2737_s25 = smov 0  }
   0x7   :  { %s2739_s26 = smov 0   ;;  %s2741_s27 = smov 0  }
   0x8   :  { %s2743_s28 = smov 0  }
   0x9 LB: > { %3348 = sst [smem:[#allocation6_spill]] %s2686_s27  ;;  %s2187_s29 = sadd.s32 4294967295, %s2690_s28   ;;  %s2690_s28 = sphi %s2743_s28, %s15_s28   ;;  %s2686_s27 = sphi %s2741_s27, %s3358_s27   ;;  %s2682_s26 = sphi %s2739_s26, %s3366_s26   ;;  %s2678_s25 = sphi %s2737_s25, %s3356_s25   ;;  %s2674_s24 = sphi %s2735_s24, %s3365_s24   ;;  %s2670_s23 = sphi %s2733_s23, %s3364_s23   ;;  %s2666_s22 = sphi %s2731_s22, %s3363_s22   ;;  %s2662_s21 = sphi %s2729_s21, %s3362_s21   ;;  %s2658_s20 = sphi %s2727_s20, %s3361_s20   ;;  %s2654_s19 = sphi %s2725_s19, %s3360_s19   ;;  %s2650_s18 = sphi %s2723_s18, %s3359_s18  }
   0xa   : > { %s24_s30 = sadd.s32 1, %s2682_s26  ;;  %s27_s6 = sadd.s32 1, %s2686_s27 }
   0xb   : > { %p25_p0 = scmp.ge.s32.totalorder %s24_s30, 5  ;;  %s34_s7 = sadd.s32 1, %s2670_s23 }
   0xc   : > { %p41_p1 = scmp.ne.s32.totalorder %s2670_s23, %s2666_s22  ;;  %p42_p2 = scmp.eq.s32.totalorder %s2690_s28, 0 }
   0xd   : > { %s3368_s30 = smov (%p25_p0, %s24_s30), 0  ;;  %s3370_s6 = smov (!%p25_p0, %s27_s6), %s2686_s27 }
   0xe   : > { %3349 = sst [smem:[#allocation7_spill]] %s3368_s30  ;;  %s31_s8 = ssub.s32 %s2682_s26, %s3368_s30 }
   0xf   : > { %p29_p3 = scmp.ge.s32.totalorder %s3370_s6, 2  ;;  %p32_p4 = scmp.eq.s32.totalorder %s31_s8, 0 }
  0x10   : > { %p2790_p5 = por %p42_p2, %p41_p1  ;;  %s62_s10 = sadd.s32 1, %s2662_s21 }
  0x11   : > { %s3372_s6 = smov (%p29_p3, %s3370_s6), 0  ;;  %p69_p6 = scmp.ne.s32.totalorder %s2662_s21, %s2658_s20 }
  0x12   : > { %3351 = sst [smem:[#allocation8_spill]] %s3372_s6  ;;  %s58_s12 = ssub.s32 %s2686_s27, %s3372_s6 }
  0x13   : > { %s2798_s11 = scalar_select %p32_p4, %s2670_s23, %s34_s7  }
  0x14   : > { %s59_s13 = sor.u32 %s58_s12, %s31_s8  ;;  %p164_p7 = scmp.eq.s32.totalorder %s58_s12, 0 }
  0x15   : > { %p60_p8 = scmp.eq.s32.totalorder %s59_s13, 0  ;;  %p2804_p9 = por %p69_p6, %p42_p2 }
  0x16   : > { %s166_s15 = sadd.s32 1, %s2654_s19  ;;  %p176_p10 = scmp.ne.s32.totalorder %s2654_s19, %s2650_s18 }
  0x17   : > { %s2812_s16 = scalar_select %p60_p8, %s2662_s21, %s62_s10  }
  0x18   : > { %s2815_s17 = scalar_select %p164_p7, %s2654_s19, %s166_s15  }
  0x19   : > { %p177_p11 = scmp.eq.s32.totalorder %s2187_s29, 9  ;;  %p2190_p13 = scmp.ge.s32.totalorder %s2690_s28, 10 }
  0x1b   : > { %p2817_p12 = por %p177_p11, %p176_p10  ;;  %199 = sbr.rel (%p2190_p13) target bundleno = 161 (0xa1), region = 16 }
  0x20   : > { %202 = sbr.rel (!%p2790_p5) target bundleno = 46 (0x2e), region = 20  ;;  %s204_s7 = sand.u32 (%p2790_p5), 1, %s2670_s23  }
  0x21   : > { %s2295_s8 = smul.u32 (%p2790_p5), 40, %s2682_s26  ;;  %s3354_s0 = sld [smem:[#allocation9_spill]] (%p2790_p5) }
  0x22   : > { %s2414_s12 = smul.u32 (%p2790_p5), 80, %s204_s7 }
  0x24   : > { %s206_s29 = scalar_lea.vmem (%p2790_p5), [#allocation3], %s2414_s12 }
  0x27   : > { %s209_s15 = scalar_lea.vmem %s3354_s0, %s2295_s8 }
  0x28   : > { %v222_v0 = vld [vmem:[%s209_s15] sm:$0xff]  ;;  %v224_v1 = vld [vmem:[%s209_s15 + $0x8] sm:$0xff]  ;;  %v226_v2 = vld [vmem:[%s209_s15 + $0x10] sm:$0xff] }
  0x29   : > { %223 = vst [vmem:[%s206_s29] sm:$0xff] %v222_v0  ;;  %225 = vst [vmem:[%s206_s29 + $0x8] sm:$0xff] %v224_v1  ;;  %v228_v3 = vld [vmem:[%s209_s15 + $0x18] sm:$0xff]  ;;  %v230_v4 = vld [vmem:[%s209_s15 + $0x20] sm:$0xff] }
  0x2a   : > { %227 = vst [vmem:[%s206_s29 + $0x10] sm:$0xff] %v226_v2  ;;  %v232_v5 = vld [vmem:[%s209_s15 + $0xc8] sm:$0xff]  ;;  %229 = vst [vmem:[%s206_s29 + $0x18] sm:$0xff] %v228_v3  ;;  %v234_v6 = vld [vmem:[%s209_s15 + $0xd0] sm:$0xff] }
  0x2b   : > { %231 = vst [vmem:[%s206_s29 + $0x20] sm:$0xff] %v230_v4  ;;  %233 = vst [vmem:[%s206_s29 + $0x28] sm:$0xff] %v232_v5  ;;  %v236_v7 = vld [vmem:[%s209_s15 + $0xd8] sm:$0xff]  ;;  %v238_v8 = vld [vmem:[%s209_s15 + $0xe0] sm:$0xff] }
  0x2c   : > { %235 = vst [vmem:[%s206_s29 + $0x30] sm:$0xff] %v234_v6  ;;  %237 = vst [vmem:[%s206_s29 + $0x38] sm:$0xff] %v236_v7  ;;  %v240_v9 = vld [vmem:[%s209_s15 + $0xe8] sm:$0xff] }
  0x2d   : > { %239 = vst [vmem:[%s206_s29 + $0x40] sm:$0xff] %v238_v8  ;;  %241 = vst [vmem:[%s206_s29 + $0x48] sm:$0xff] %v240_v9 }
  0x2e PF: > { %247 = sbr.rel (!%p2804_p9) target bundleno = 161 (0xa1), region = 43  ;;  %s249_s9 = sand.u32 (%p2804_p9), 1, %s2662_s21  }
  0x2f   : > { %s2296_s7 = smul.u32 (%p2804_p9), 320, %s2682_s26  ;;  %s3355_s1 = sld [smem:[#allocation10_spill]] (%p2804_p9) }
  0x30   : > { %s2415_s8 = smul.u32 (%p2804_p9), 640, %s249_s9 }
  0x31   : > { %s254_s12 = sadd.s32 (%p2804_p9), %s2686_s27, %s2296_s7 }
  0x32   : > { %s2193_s10 = sshll.u32 (%p2804_p9), %s254_s12, 2  ;;  %s2842_s14 = scalar_lea.vmem (%p2804_p9), [#allocation4], %s2415_s8 }
  0x35   : > { %s2837_s6 = scalar_lea.vmem %s3355_s1, %s2193_s10 }
  0x36   : > { %v273_v10 = vld [vmem:[%s2837_s6] sm:$0xf]  ;;  %v275_v11 = vld [vmem:[%s2837_s6 + $0x8] sm:$0xf]  ;;  %v277_v12 = vld [vmem:[%s2837_s6 + $0x10] sm:$0xf] }
  0x37   : > { %274 = vst [vmem:[%s2842_s14] sm:$0xf] %v273_v10  ;;  %276 = vst [vmem:[%s2842_s14 + $0x4] sm:$0xf] %v275_v11  ;;  %v279_v13 = vld [vmem:[%s2837_s6 + $0x18] sm:$0xf] }
  0x38   : > { %278 = vst [vmem:[%s2842_s14 + $0x8] sm:$0xf] %v277_v12  ;;  %v281_v14 = vld [vmem:[%s2837_s6 + $0x20] sm:$0xf]  ;;  %v283_v15 = vld [vmem:[%s2837_s6 + $0x28] sm:$0xf] }
  0x39   : > { %280 = vst [vmem:[%s2842_s14 + $0xc] sm:$0xf] %v279_v13  ;;  %282 = vst [vmem:[%s2842_s14 + $0x10] sm:$0xf] %v281_v14  ;;  %v285_v16 = vld [vmem:[%s2837_s6 + $0x30] sm:$0xf] }
  0x3a   : > { %284 = vst [vmem:[%s2842_s14 + $0x14] sm:$0xf] %v283_v15  ;;  %v287_v17 = vld [vmem:[%s2837_s6 + $0x38] sm:$0xf]  ;;  %v289_v18 = vld [vmem:[%s2837_s6 + $0x40] sm:$0xf] }
  0x3b   : > { %286 = vst [vmem:[%s2842_s14 + $0x18] sm:$0xf] %v285_v16  ;;  %288 = vst [vmem:[%s2842_s14 + $0x1c] sm:$0xf] %v287_v17  ;;  %v291_v19 = vld [vmem:[%s2837_s6 + $0x48] sm:$0xf] }
  0x3c   : > { %290 = vst [vmem:[%s2842_s14 + $0x20] sm:$0xf] %v289_v18  ;;  %v293_v20 = vld [vmem:[%s2837_s6 + $0x50] sm:$0xf]  ;;  %v295_v21 = vld [vmem:[%s2837_s6 + $0x58] sm:$0xf] }
  0x3d   : > { %292 = vst [vmem:[%s2842_s14 + $0x24] sm:$0xf] %v291_v19  ;;  %294 = vst [vmem:[%s2842_s14 + $0x28] sm:$0xf] %v293_v20  ;;  %v297_v22 = vld [vmem:[%s2837_s6 + $0x60] sm:$0xf] }
  0x3e   : > { %296 = vst [vmem:[%s2842_s14 + $0x2c] sm:$0xf] %v295_v21  ;;  %v299_v23 = vld [vmem:[%s2837_s6 + $0x68] sm:$0xf]  ;;  %v301_v24 = vld [vmem:[%s2837_s6 + $0x70] sm:$0xf] }
  0x3f   : > { %298 = vst [vmem:[%s2842_s14 + $0x30] sm:$0xf] %v297_v22  ;;  %300 = vst [vmem:[%s2842_s14 + $0x34] sm:$0xf] %v299_v23  ;;  %v303_v25 = vld [vmem:[%s2837_s6 + $0x78] sm:$0xf] }
  0x40   : > { %302 = vst [vmem:[%s2842_s14 + $0x38] sm:$0xf] %v301_v24  ;;  %v305_v26 = vld [vmem:[%s2837_s6 + $0x80] sm:$0xf]  ;;  %v307_v27 = vld [vmem:[%s2837_s6 + $0x88] sm:$0xf] }
  0x41   : > { %304 = vst [vmem:[%s2842_s14 + $0x3c] sm:$0xf] %v303_v25  ;;  %306 = vst [vmem:[%s2842_s14 + $0x40] sm:$0xf] %v305_v26  ;;  %v309_v28 = vld [vmem:[%s2837_s6 + $0x90] sm:$0xf] }
  0x42   : > { %308 = vst [vmem:[%s2842_s14 + $0x44] sm:$0xf] %v307_v27  ;;  %v311_v29 = vld [vmem:[%s2837_s6 + $0x98] sm:$0xf]  ;;  %v313_v30 = vld [vmem:[%s2837_s6 + $0xa0] sm:$0xf] }
  0x43   : > { %310 = vst [vmem:[%s2842_s14 + $0x48] sm:$0xf] %v309_v28  ;;  %312 = vst [vmem:[%s2842_s14 + $0x4c] sm:$0xf] %v311_v29  ;;  %v315_v31 = vld [vmem:[%s2837_s6 + $0xa8] sm:$0xf] }
  0x44   : > { %314 = vst [vmem:[%s2842_s14 + $0x50] sm:$0xf] %v313_v30  ;;  %v317_v32 = vld [vmem:[%s2837_s6 + $0xb0] sm:$0xf]  ;;  %v319_v33 = vld [vmem:[%s2837_s6 + $0xb8] sm:$0xf] }
  0x45   : > { %316 = vst [vmem:[%s2842_s14 + $0x54] sm:$0xf] %v315_v31  ;;  %318 = vst [vmem:[%s2842_s14 + $0x58] sm:$0xf] %v317_v32  ;;  %v321_v34 = vld [vmem:[%s2837_s6 + $0xc0] sm:$0xf] }
  0x46   : > { %320 = vst [vmem:[%s2842_s14 + $0x5c] sm:$0xf] %v319_v33  ;;  %v323_v35 = vld [vmem:[%s2837_s6 + $0xc8] sm:$0xf]  ;;  %v325_v36 = vld [vmem:[%s2837_s6 + $0xd0] sm:$0xf] }
  0x47   : > { %322 = vst [vmem:[%s2842_s14 + $0x60] sm:$0xf] %v321_v34  ;;  %324 = vst [vmem:[%s2842_s14 + $0x64] sm:$0xf] %v323_v35  ;;  %v327_v37 = vld [vmem:[%s2837_s6 + $0xd8] sm:$0xf] }
  0x48   : > { %326 = vst [vmem:[%s2842_s14 + $0x68] sm:$0xf] %v325_v36  ;;  %v329_v38 = vld [vmem:[%s2837_s6 + $0xe0] sm:$0xf]  ;;  %v331_v39 = vld [vmem:[%s2837_s6 + $0xe8] sm:$0xf] }
  0x49   : > { %328 = vst [vmem:[%s2842_s14 + $0x6c] sm:$0xf] %v327_v37  ;;  %330 = vst [vmem:[%s2842_s14 + $0x70] sm:$0xf] %v329_v38  ;;  %v333_v40 = vld [vmem:[%s2837_s6 + $0xf0] sm:$0xf] }
  0x4a   : > { %332 = vst [vmem:[%s2842_s14 + $0x74] sm:$0xf] %v331_v39  ;;  %v335_v41 = vld [vmem:[%s2837_s6 + $0xf8] sm:$0xf]  ;;  %v337_v42 = vld [vmem:[%s2837_s6 + $0x100] sm:$0xf] }
  0x4b   : > { %334 = vst [vmem:[%s2842_s14 + $0x78] sm:$0xf] %v333_v40  ;;  %336 = vst [vmem:[%s2842_s14 + $0x7c] sm:$0xf] %v335_v41  ;;  %v339_v43 = vld [vmem:[%s2837_s6 + $0x108] sm:$0xf] }
  0x4c   : > { %338 = vst [vmem:[%s2842_s14 + $0x80] sm:$0xf] %v337_v42  ;;  %v341_v44 = vld [vmem:[%s2837_s6 + $0x110] sm:$0xf]  ;;  %v343_v45 = vld [vmem:[%s2837_s6 + $0x118] sm:$0xf] }
  0x4d   : > { %340 = vst [vmem:[%s2842_s14 + $0x84] sm:$0xf] %v339_v43  ;;  %342 = vst [vmem:[%s2842_s14 + $0x88] sm:$0xf] %v341_v44  ;;  %v345_v46 = vld [vmem:[%s2837_s6 + $0x120] sm:$0xf] }
  0x4e   : > { %344 = vst [vmem:[%s2842_s14 + $0x8c] sm:$0xf] %v343_v45  ;;  %v347_v47 = vld [vmem:[%s2837_s6 + $0x128] sm:$0xf]  ;;  %v349_v48 = vld [vmem:[%s2837_s6 + $0x130] sm:$0xf] }
  0x4f   : > { %346 = vst [vmem:[%s2842_s14 + $0x90] sm:$0xf] %v345_v46  ;;  %348 = vst [vmem:[%s2842_s14 + $0x94] sm:$0xf] %v347_v47  ;;  %v351_v49 = vld [vmem:[%s2837_s6 + $0x138] sm:$0xf] }
  0x50   : > { %350 = vst [vmem:[%s2842_s14 + $0x98] sm:$0xf] %v349_v48  ;;  %v353_v50 = vld [vmem:[%s2837_s6 + $0x140] sm:$0xf]  ;;  %v355_v51 = vld [vmem:[%s2837_s6 + $0x148] sm:$0xf] }
  0x51   : > { %352 = vst [vmem:[%s2842_s14 + $0x9c] sm:$0xf] %v351_v49  ;;  %354 = vst [vmem:[%s2842_s14 + $0xa0] sm:$0xf] %v353_v50  ;;  %v357_v52 = vld [vmem:[%s2837_s6 + $0x150] sm:$0xf] }
  0x52   : > { %356 = vst [vmem:[%s2842_s14 + $0xa4] sm:$0xf] %v355_v51  ;;  %v359_v53 = vld [vmem:[%s2837_s6 + $0x158] sm:$0xf]  ;;  %v361_v54 = vld [vmem:[%s2837_s6 + $0x160] sm:$0xf] }
  0x53   : > { %358 = vst [vmem:[%s2842_s14 + $0xa8] sm:$0xf] %v357_v52  ;;  %360 = vst [vmem:[%s2842_s14 + $0xac] sm:$0xf] %v359_v53  ;;  %v363_v55 = vld [vmem:[%s2837_s6 + $0x168] sm:$0xf] }
  0x54   : > { %362 = vst [vmem:[%s2842_s14 + $0xb0] sm:$0xf] %v361_v54  ;;  %v365_v56 = vld [vmem:[%s2837_s6 + $0x170] sm:$0xf]  ;;  %v367_v57 = vld [vmem:[%s2837_s6 + $0x178] sm:$0xf] }
  0x55   : > { %364 = vst [vmem:[%s2842_s14 + $0xb4] sm:$0xf] %v363_v55  ;;  %366 = vst [vmem:[%s2842_s14 + $0xb8] sm:$0xf] %v365_v56  ;;  %v369_v58 = vld [vmem:[%s2837_s6 + $0x180] sm:$0xf] }
  0x56   : > { %368 = vst [vmem:[%s2842_s14 + $0xbc] sm:$0xf] %v367_v57  ;;  %v371_v59 = vld [vmem:[%s2837_s6 + $0x188] sm:$0xf]  ;;  %v373_v60 = vld [vmem:[%s2837_s6 + $0x190] sm:$0xf] }
  0x57   : > { %370 = vst [vmem:[%s2842_s14 + $0xc0] sm:$0xf] %v369_v58  ;;  %372 = vst [vmem:[%s2842_s14 + $0xc4] sm:$0xf] %v371_v59  ;;  %v375_v61 = vld [vmem:[%s2837_s6 + $0x198] sm:$0xf] }
  0x58   : > { %374 = vst [vmem:[%s2842_s14 + $0xc8] sm:$0xf] %v373_v60  ;;  %v377_v62 = vld [vmem:[%s2837_s6 + $0x1a0] sm:$0xf]  ;;  %v379_v63 = vld [vmem:[%s2837_s6 + $0x1a8] sm:$0xf] }
  0x59   : > { %376 = vst [vmem:[%s2842_s14 + $0xcc] sm:$0xf] %v375_v61  ;;  %378 = vst [vmem:[%s2842_s14 + $0xd0] sm:$0xf] %v377_v62  ;;  %v381_v0 = vld [vmem:[%s2837_s6 + $0x1b0] sm:$0xf] }
  0x5a   : > { %380 = vst [vmem:[%s2842_s14 + $0xd4] sm:$0xf] %v379_v63  ;;  %v383_v1 = vld [vmem:[%s2837_s6 + $0x1b8] sm:$0xf]  ;;  %v385_v2 = vld [vmem:[%s2837_s6 + $0x1c0] sm:$0xf] }
  0x5b   : > { %382 = vst [vmem:[%s2842_s14 + $0xd8] sm:$0xf] %v381_v0  ;;  %384 = vst [vmem:[%s2842_s14 + $0xdc] sm:$0xf] %v383_v1  ;;  %v387_v3 = vld [vmem:[%s2837_s6 + $0x1c8] sm:$0xf] }
  0x5c   : > { %386 = vst [vmem:[%s2842_s14 + $0xe0] sm:$0xf] %v385_v2  ;;  %v389_v4 = vld [vmem:[%s2837_s6 + $0x1d0] sm:$0xf]  ;;  %v391_v5 = vld [vmem:[%s2837_s6 + $0x1d8] sm:$0xf] }
  0x5d   : > { %388 = vst [vmem:[%s2842_s14 + $0xe4] sm:$0xf] %v387_v3  ;;  %390 = vst [vmem:[%s2842_s14 + $0xe8] sm:$0xf] %v389_v4  ;;  %v393_v6 = vld [vmem:[%s2837_s6 + $0x1e0] sm:$0xf] }
  0x5e   : > { %392 = vst [vmem:[%s2842_s14 + $0xec] sm:$0xf] %v391_v5  ;;  %v395_v7 = vld [vmem:[%s2837_s6 + $0x1e8] sm:$0xf]  ;;  %v397_v8 = vld [vmem:[%s2837_s6 + $0x1f0] sm:$0xf] }
  0x5f   : > { %394 = vst [vmem:[%s2842_s14 + $0xf0] sm:$0xf] %v393_v6  ;;  %396 = vst [vmem:[%s2842_s14 + $0xf4] sm:$0xf] %v395_v7  ;;  %v399_v9 = vld [vmem:[%s2837_s6 + $0x1f8] sm:$0xf] }
  0x60   : > { %398 = vst [vmem:[%s2842_s14 + $0xf8] sm:$0xf] %v397_v8  ;;  %v401_v10 = vld [vmem:[%s2837_s6 + $0x200] sm:$0xf]  ;;  %v403_v11 = vld [vmem:[%s2837_s6 + $0x208] sm:$0xf] }
  0x61   : > { %400 = vst [vmem:[%s2842_s14 + $0xfc] sm:$0xf] %v399_v9  ;;  %402 = vst [vmem:[%s2842_s14 + $0x100] sm:$0xf] %v401_v10  ;;  %v405_v12 = vld [vmem:[%s2837_s6 + $0x210] sm:$0xf] }
  0x62   : > { %404 = vst [vmem:[%s2842_s14 + $0x104] sm:$0xf] %v403_v11  ;;  %v407_v13 = vld [vmem:[%s2837_s6 + $0x218] sm:$0xf]  ;;  %v409_v14 = vld [vmem:[%s2837_s6 + $0x220] sm:$0xf] }
  0x63   : > { %406 = vst [vmem:[%s2842_s14 + $0x108] sm:$0xf] %v405_v12  ;;  %408 = vst [vmem:[%s2842_s14 + $0x10c] sm:$0xf] %v407_v13  ;;  %v411_v15 = vld [vmem:[%s2837_s6 + $0x228] sm:$0xf] }
  0x64   : > { %410 = vst [vmem:[%s2842_s14 + $0x110] sm:$0xf] %v409_v14  ;;  %v413_v16 = vld [vmem:[%s2837_s6 + $0x230] sm:$0xf]  ;;  %v415_v17 = vld [vmem:[%s2837_s6 + $0x238] sm:$0xf] }
  0x65   : > { %412 = vst [vmem:[%s2842_s14 + $0x114] sm:$0xf] %v411_v15  ;;  %414 = vst [vmem:[%s2842_s14 + $0x118] sm:$0xf] %v413_v16  ;;  %v417_v18 = vld [vmem:[%s2837_s6 + $0x240] sm:$0xf] }
  0x66   : > { %416 = vst [vmem:[%s2842_s14 + $0x11c] sm:$0xf] %v415_v17  ;;  %v419_v19 = vld [vmem:[%s2837_s6 + $0x248] sm:$0xf]  ;;  %v421_v20 = vld [vmem:[%s2837_s6 + $0x250] sm:$0xf] }
  0x67   : > { %418 = vst [vmem:[%s2842_s14 + $0x120] sm:$0xf] %v417_v18  ;;  %420 = vst [vmem:[%s2842_s14 + $0x124] sm:$0xf] %v419_v19  ;;  %v423_v21 = vld [vmem:[%s2837_s6 + $0x258] sm:$0xf] }
  0x68   : > { %422 = vst [vmem:[%s2842_s14 + $0x128] sm:$0xf] %v421_v20  ;;  %v425_v22 = vld [vmem:[%s2837_s6 + $0x260] sm:$0xf]  ;;  %v427_v23 = vld [vmem:[%s2837_s6 + $0x268] sm:$0xf] }
  0x69   : > { %424 = vst [vmem:[%s2842_s14 + $0x12c] sm:$0xf] %v423_v21  ;;  %426 = vst [vmem:[%s2842_s14 + $0x130] sm:$0xf] %v425_v22  ;;  %v429_v24 = vld [vmem:[%s2837_s6 + $0x270] sm:$0xf] }
  0x6a   : > { %428 = vst [vmem:[%s2842_s14 + $0x134] sm:$0xf] %v427_v23  ;;  %v431_v25 = vld [vmem:[%s2837_s6 + $0x278] sm:$0xf]  ;;  %v433_v26 = vld [vmem:[%s2837_s6 + $0x280] sm:$0xf] }
  0x6b   : > { %430 = vst [vmem:[%s2842_s14 + $0x138] sm:$0xf] %v429_v24  ;;  %432 = vst [vmem:[%s2842_s14 + $0x13c] sm:$0xf] %v431_v25  ;;  %v435_v27 = vld [vmem:[%s2837_s6 + $0x288] sm:$0xf] }
  0x6c   : > { %434 = vst [vmem:[%s2842_s14 + $0x140] sm:$0xf] %v433_v26  ;;  %v437_v28 = vld [vmem:[%s2837_s6 + $0x290] sm:$0xf]  ;;  %v439_v29 = vld [vmem:[%s2837_s6 + $0x298] sm:$0xf] }
  0x6d   : > { %436 = vst [vmem:[%s2842_s14 + $0x144] sm:$0xf] %v435_v27  ;;  %438 = vst [vmem:[%s2842_s14 + $0x148] sm:$0xf] %v437_v28  ;;  %v441_v30 = vld [vmem:[%s2837_s6 + $0x2a0] sm:$0xf] }
  0x6e   : > { %440 = vst [vmem:[%s2842_s14 + $0x14c] sm:$0xf] %v439_v29  ;;  %v443_v31 = vld [vmem:[%s2837_s6 + $0x2a8] sm:$0xf]  ;;  %v445_v32 = vld [vmem:[%s2837_s6 + $0x2b0] sm:$0xf] }
  0x6f   : > { %442 = vst [vmem:[%s2842_s14 + $0x150] sm:$0xf] %v441_v30  ;;  %444 = vst [vmem:[%s2842_s14 + $0x154] sm:$0xf] %v443_v31  ;;  %v447_v33 = vld [vmem:[%s2837_s6 + $0x2b8] sm:$0xf] }
  0x70   : > { %446 = vst [vmem:[%s2842_s14 + $0x158] sm:$0xf] %v445_v32  ;;  %v449_v34 = vld [vmem:[%s2837_s6 + $0x2c0] sm:$0xf]  ;;  %v451_v35 = vld [vmem:[%s2837_s6 + $0x2c8] sm:$0xf] }
  0x71   : > { %448 = vst [vmem:[%s2842_s14 + $0x15c] sm:$0xf] %v447_v33  ;;  %450 = vst [vmem:[%s2842_s14 + $0x160] sm:$0xf] %v449_v34  ;;  %v453_v36 = vld [vmem:[%s2837_s6 + $0x2d0] sm:$0xf] }
  0x72   : > { %452 = vst [vmem:[%s2842_s14 + $0x164] sm:$0xf] %v451_v35  ;;  %v455_v37 = vld [vmem:[%s2837_s6 + $0x2d8] sm:$0xf]  ;;  %v457_v38 = vld [vmem:[%s2837_s6 + $0x2e0] sm:$0xf] }
  0x73   : > { %454 = vst [vmem:[%s2842_s14 + $0x168] sm:$0xf] %v453_v36  ;;  %456 = vst [vmem:[%s2842_s14 + $0x16c] sm:$0xf] %v455_v37  ;;  %v459_v39 = vld [vmem:[%s2837_s6 + $0x2e8] sm:$0xf] }
  0x74   : > { %458 = vst [vmem:[%s2842_s14 + $0x170] sm:$0xf] %v457_v38  ;;  %v461_v40 = vld [vmem:[%s2837_s6 + $0x2f0] sm:$0xf]  ;;  %v463_v41 = vld [vmem:[%s2837_s6 + $0x2f8] sm:$0xf] }
  0x75   : > { %460 = vst [vmem:[%s2842_s14 + $0x174] sm:$0xf] %v459_v39  ;;  %462 = vst [vmem:[%s2842_s14 + $0x178] sm:$0xf] %v461_v40  ;;  %v465_v42 = vld [vmem:[%s2837_s6 + $0x300] sm:$0xf] }
  0x76   : > { %464 = vst [vmem:[%s2842_s14 + $0x17c] sm:$0xf] %v463_v41  ;;  %v467_v43 = vld [vmem:[%s2837_s6 + $0x308] sm:$0xf]  ;;  %v469_v44 = vld [vmem:[%s2837_s6 + $0x310] sm:$0xf] }
  0x77   : > { %466 = vst [vmem:[%s2842_s14 + $0x180] sm:$0xf] %v465_v42  ;;  %468 = vst [vmem:[%s2842_s14 + $0x184] sm:$0xf] %v467_v43  ;;  %v471_v45 = vld [vmem:[%s2837_s6 + $0x318] sm:$0xf] }
  0x78   : > { %470 = vst [vmem:[%s2842_s14 + $0x188] sm:$0xf] %v469_v44  ;;  %v473_v46 = vld [vmem:[%s2837_s6 + $0x320] sm:$0xf]  ;;  %v475_v47 = vld [vmem:[%s2837_s6 + $0x328] sm:$0xf] }
  0x79   : > { %472 = vst [vmem:[%s2842_s14 + $0x18c] sm:$0xf] %v471_v45  ;;  %474 = vst [vmem:[%s2842_s14 + $0x190] sm:$0xf] %v473_v46  ;;  %v477_v48 = vld [vmem:[%s2837_s6 + $0x330] sm:$0xf] }
  0x7a   : > { %476 = vst [vmem:[%s2842_s14 + $0x194] sm:$0xf] %v475_v47  ;;  %v479_v49 = vld [vmem:[%s2837_s6 + $0x338] sm:$0xf]  ;;  %v481_v50 = vld [vmem:[%s2837_s6 + $0x340] sm:$0xf] }
  0x7b   : > { %478 = vst [vmem:[%s2842_s14 + $0x198] sm:$0xf] %v477_v48  ;;  %480 = vst [vmem:[%s2842_s14 + $0x19c] sm:$0xf] %v479_v49  ;;  %v483_v51 = vld [vmem:[%s2837_s6 + $0x348] sm:$0xf] }
  0x7c   : > { %482 = vst [vmem:[%s2842_s14 + $0x1a0] sm:$0xf] %v481_v50  ;;  %v485_v52 = vld [vmem:[%s2837_s6 + $0x350] sm:$0xf]  ;;  %v487_v53 = vld [vmem:[%s2837_s6 + $0x358] sm:$0xf] }
  0x7d   : > { %484 = vst [vmem:[%s2842_s14 + $0x1a4] sm:$0xf] %v483_v51  ;;  %486 = vst [vmem:[%s2842_s14 + $0x1a8] sm:$0xf] %v485_v52  ;;  %v489_v54 = vld [vmem:[%s2837_s6 + $0x360] sm:$0xf] }
  0x7e   : > { %488 = vst [vmem:[%s2842_s14 + $0x1ac] sm:$0xf] %v487_v53  ;;  %v491_v55 = vld [vmem:[%s2837_s6 + $0x368] sm:$0xf]  ;;  %v493_v56 = vld [vmem:[%s2837_s6 + $0x370] sm:$0xf] }
  0x7f   : > { %490 = vst [vmem:[%s2842_s14 + $0x1b0] sm:$0xf] %v489_v54  ;;  %492 = vst [vmem:[%s2842_s14 + $0x1b4] sm:$0xf] %v491_v55  ;;  %v495_v57 = vld [vmem:[%s2837_s6 + $0x378] sm:$0xf] }
  0x80   : > { %494 = vst [vmem:[%s2842_s14 + $0x1b8] sm:$0xf] %v493_v56  ;;  %v497_v58 = vld [vmem:[%s2837_s6 + $0x380] sm:$0xf]  ;;  %v499_v59 = vld [vmem:[%s2837_s6 + $0x388] sm:$0xf] }
  0x81   : > { %496 = vst [vmem:[%s2842_s14 + $0x1bc] sm:$0xf] %v495_v57  ;;  %498 = vst [vmem:[%s2842_s14 + $0x1c0] sm:$0xf] %v497_v58  ;;  %v501_v60 = vld [vmem:[%s2837_s6 + $0x390] sm:$0xf] }
  0x82   : > { %500 = vst [vmem:[%s2842_s14 + $0x1c4] sm:$0xf] %v499_v59  ;;  %v503_v61 = vld [vmem:[%s2837_s6 + $0x398] sm:$0xf]  ;;  %v505_v62 = vld [vmem:[%s2837_s6 + $0x3a0] sm:$0xf] }
  0x83   : > { %502 = vst [vmem:[%s2842_s14 + $0x1c8] sm:$0xf] %v501_v60  ;;  %504 = vst [vmem:[%s2842_s14 + $0x1cc] sm:$0xf] %v503_v61  ;;  %v507_v63 = vld [vmem:[%s2837_s6 + $0x3a8] sm:$0xf] }
  0x84   : > { %506 = vst [vmem:[%s2842_s14 + $0x1d0] sm:$0xf] %v505_v62  ;;  %v509_v0 = vld [vmem:[%s2837_s6 + $0x3b0] sm:$0xf]  ;;  %v511_v1 = vld [vmem:[%s2837_s6 + $0x3b8] sm:$0xf] }
  0x85   : > { %508 = vst [vmem:[%s2842_s14 + $0x1d4] sm:$0xf] %v507_v63  ;;  %510 = vst [vmem:[%s2842_s14 + $0x1d8] sm:$0xf] %v509_v0  ;;  %v513_v2 = vld [vmem:[%s2837_s6 + $0x3c0] sm:$0xf] }
  0x86   : > { %512 = vst [vmem:[%s2842_s14 + $0x1dc] sm:$0xf] %v511_v1  ;;  %v515_v3 = vld [vmem:[%s2837_s6 + $0x3c8] sm:$0xf]  ;;  %v517_v4 = vld [vmem:[%s2837_s6 + $0x3d0] sm:$0xf] }
  0x87   : > { %514 = vst [vmem:[%s2842_s14 + $0x1e0] sm:$0xf] %v513_v2  ;;  %516 = vst [vmem:[%s2842_s14 + $0x1e4] sm:$0xf] %v515_v3  ;;  %v519_v5 = vld [vmem:[%s2837_s6 + $0x3d8] sm:$0xf] }
  0x88   : > { %518 = vst [vmem:[%s2842_s14 + $0x1e8] sm:$0xf] %v517_v4  ;;  %v521_v6 = vld [vmem:[%s2837_s6 + $0x3e0] sm:$0xf]  ;;  %v523_v7 = vld [vmem:[%s2837_s6 + $0x3e8] sm:$0xf] }
  0x89   : > { %520 = vst [vmem:[%s2842_s14 + $0x1ec] sm:$0xf] %v519_v5  ;;  %522 = vst [vmem:[%s2842_s14 + $0x1f0] sm:$0xf] %v521_v6  ;;  %v525_v8 = vld [vmem:[%s2837_s6 + $0x3f0] sm:$0xf] }
  0x8a   : > { %524 = vst [vmem:[%s2842_s14 + $0x1f4] sm:$0xf] %v523_v7  ;;  %v527_v9 = vld [vmem:[%s2837_s6 + $0x3f8] sm:$0xf]  ;;  %v529_v10 = vld [vmem:[%s2837_s6 + $0x400] sm:$0xf] }
  0x8b   : > { %526 = vst [vmem:[%s2842_s14 + $0x1f8] sm:$0xf] %v525_v8  ;;  %528 = vst [vmem:[%s2842_s14 + $0x1fc] sm:$0xf] %v527_v9  ;;  %v531_v11 = vld [vmem:[%s2837_s6 + $0x408] sm:$0xf] }
  0x8c   : > { %530 = vst [vmem:[%s2842_s14 + $0x200] sm:$0xf] %v529_v10  ;;  %v533_v12 = vld [vmem:[%s2837_s6 + $0x410] sm:$0xf]  ;;  %v535_v13 = vld [vmem:[%s2837_s6 + $0x418] sm:$0xf] }
  0x8d   : > { %532 = vst [vmem:[%s2842_s14 + $0x204] sm:$0xf] %v531_v11  ;;  %534 = vst [vmem:[%s2842_s14 + $0x208] sm:$0xf] %v533_v12  ;;  %v537_v14 = vld [vmem:[%s2837_s6 + $0x420] sm:$0xf] }
  0x8e   : > { %536 = vst [vmem:[%s2842_s14 + $0x20c] sm:$0xf] %v535_v13  ;;  %v539_v15 = vld [vmem:[%s2837_s6 + $0x428] sm:$0xf]  ;;  %v541_v16 = vld [vmem:[%s2837_s6 + $0x430] sm:$0xf] }
  0x8f   : > { %538 = vst [vmem:[%s2842_s14 + $0x210] sm:$0xf] %v537_v14  ;;  %540 = vst [vmem:[%s2842_s14 + $0x214] sm:$0xf] %v539_v15  ;;  %v543_v17 = vld [vmem:[%s2837_s6 + $0x438] sm:$0xf] }
  0x90   : > { %542 = vst [vmem:[%s2842_s14 + $0x218] sm:$0xf] %v541_v16  ;;  %v545_v18 = vld [vmem:[%s2837_s6 + $0x440] sm:$0xf]  ;;  %v547_v19 = vld [vmem:[%s2837_s6 + $0x448] sm:$0xf] }
  0x91   : > { %544 = vst [vmem:[%s2842_s14 + $0x21c] sm:$0xf] %v543_v17  ;;  %546 = vst [vmem:[%s2842_s14 + $0x220] sm:$0xf] %v545_v18  ;;  %v549_v20 = vld [vmem:[%s2837_s6 + $0x450] sm:$0xf] }
  0x92   : > { %548 = vst [vmem:[%s2842_s14 + $0x224] sm:$0xf] %v547_v19  ;;  %v551_v21 = vld [vmem:[%s2837_s6 + $0x458] sm:$0xf]  ;;  %v553_v22 = vld [vmem:[%s2837_s6 + $0x460] sm:$0xf] }
  0x93   : > { %550 = vst [vmem:[%s2842_s14 + $0x228] sm:$0xf] %v549_v20  ;;  %552 = vst [vmem:[%s2842_s14 + $0x22c] sm:$0xf] %v551_v21  ;;  %v555_v23 = vld [vmem:[%s2837_s6 + $0x468] sm:$0xf] }
  0x94   : > { %554 = vst [vmem:[%s2842_s14 + $0x230] sm:$0xf] %v553_v22  ;;  %v557_v24 = vld [vmem:[%s2837_s6 + $0x470] sm:$0xf]  ;;  %v559_v25 = vld [vmem:[%s2837_s6 + $0x478] sm:$0xf] }
  0x95   : > { %556 = vst [vmem:[%s2842_s14 + $0x234] sm:$0xf] %v555_v23  ;;  %558 = vst [vmem:[%s2842_s14 + $0x238] sm:$0xf] %v557_v24  ;;  %v561_v26 = vld [vmem:[%s2837_s6 + $0x480] sm:$0xf] }
  0x96   : > { %560 = vst [vmem:[%s2842_s14 + $0x23c] sm:$0xf] %v559_v25  ;;  %v563_v27 = vld [vmem:[%s2837_s6 + $0x488] sm:$0xf]  ;;  %v565_v28 = vld [vmem:[%s2837_s6 + $0x490] sm:$0xf] }
  0x97   : > { %562 = vst [vmem:[%s2842_s14 + $0x240] sm:$0xf] %v561_v26  ;;  %564 = vst [vmem:[%s2842_s14 + $0x244] sm:$0xf] %v563_v27  ;;  %v567_v29 = vld [vmem:[%s2837_s6 + $0x498] sm:$0xf] }
  0x98   : > { %566 = vst [vmem:[%s2842_s14 + $0x248] sm:$0xf] %v565_v28  ;;  %v569_v30 = vld [vmem:[%s2837_s6 + $0x4a0] sm:$0xf]  ;;  %v571_v31 = vld [vmem:[%s2837_s6 + $0x4a8] sm:$0xf] }
  0x99   : > { %568 = vst [vmem:[%s2842_s14 + $0x24c] sm:$0xf] %v567_v29  ;;  %570 = vst [vmem:[%s2842_s14 + $0x250] sm:$0xf] %v569_v30  ;;  %v573_v32 = vld [vmem:[%s2837_s6 + $0x4b0] sm:$0xf] }
  0x9a   : > { %572 = vst [vmem:[%s2842_s14 + $0x254] sm:$0xf] %v571_v31  ;;  %v575_v33 = vld [vmem:[%s2837_s6 + $0x4b8] sm:$0xf]  ;;  %v577_v34 = vld [vmem:[%s2837_s6 + $0x4c0] sm:$0xf] }
  0x9b   : > { %574 = vst [vmem:[%s2842_s14 + $0x258] sm:$0xf] %v573_v32  ;;  %576 = vst [vmem:[%s2842_s14 + $0x25c] sm:$0xf] %v575_v33  ;;  %v579_v35 = vld [vmem:[%s2837_s6 + $0x4c8] sm:$0xf] }
  0x9c   : > { %578 = vst [vmem:[%s2842_s14 + $0x260] sm:$0xf] %v577_v34  ;;  %v581_v36 = vld [vmem:[%s2837_s6 + $0x4d0] sm:$0xf]  ;;  %v583_v37 = vld [vmem:[%s2837_s6 + $0x4d8] sm:$0xf] }
  0x9d   : > { %580 = vst [vmem:[%s2842_s14 + $0x264] sm:$0xf] %v579_v35  ;;  %582 = vst [vmem:[%s2842_s14 + $0x268] sm:$0xf] %v581_v36  ;;  %v585_v38 = vld [vmem:[%s2837_s6 + $0x4e0] sm:$0xf] }
  0x9e   : > { %584 = vst [vmem:[%s2842_s14 + $0x26c] sm:$0xf] %v583_v37  ;;  %v587_v39 = vld [vmem:[%s2837_s6 + $0x4e8] sm:$0xf]  ;;  %v589_v40 = vld [vmem:[%s2837_s6 + $0x4f0] sm:$0xf] }
  0x9f   : > { %586 = vst [vmem:[%s2842_s14 + $0x270] sm:$0xf] %v585_v38  ;;  %588 = vst [vmem:[%s2842_s14 + $0x274] sm:$0xf] %v587_v39  ;;  %v591_v41 = vld [vmem:[%s2837_s6 + $0x4f8] sm:$0xf] }
  0xa0   : > { %590 = vst [vmem:[%s2842_s14 + $0x278] sm:$0xf] %v589_v40  ;;  %592 = vst [vmem:[%s2842_s14 + $0x27c] sm:$0xf] %v591_v41 }
  0xa1 PF: > { %p2194_p0 = scmp.ge.s32.totalorder %s2690_s28, 1  ;;  %p953_p1 = scmp.lt.s32.totalorder %s2690_s28, 11 }
  0xa3   : > { %p954_p2 = pnand %p2194_p0, %p953_p1 }
  0xa4   : > { %s960_s0 = sand.u32 (!%p954_p2), 1, %s2666_s22   ;;  %s967_s15 = sand.u32 (!%p954_p2), 1, %s2658_s20  }
  0xa5   : > { %957 = sbr.rel (%p954_p2) target bundleno = 559 (0x22f), region = 96  ;;  %s1003_s9 = sand.u32 (!%p954_p2), 1, %s2650_s18  }
  0xa6   : > { %s2416_s29 = smul.u32 (!%p954_p2), 80, %s960_s0  ;;  %s2195_s6 = sshll.u32 (!%p954_p2), %s1003_s9, 3 }
  0xa7   : > { %s2417_s7 = smul.u32 (!%p954_p2), 640, %s967_s15  ;;  %p1008_p3 = scmp.lt.s32.totalorder (!%p954_p2), %s2678_s25, 1 }
  0xa8   : > { %s3182_s0 = scalar_lea.vmem (!%p954_p2), [#allocation3], %s2416_s29  ;;  %s3186_s9 = scalar_lea.vmem (!%p954_p2), [#allocation5], %s2195_s6 }
  0xa9   : > { %s3184_s15 = scalar_lea.vmem (!%p954_p2), [#allocation4], %s2417_s7  ;;  %p2196_p4 = scmp.ne.s32.totalorder (!%p954_p2), %s2674_s24, 0 }
  0xaa   : > { %s3168_s8 = scalar_select %p1008_p3, %s2678_s25, 1 }
  0xab   : > { %1021 = sbr.rel (%p2196_p4) target bundleno = 178 (0xb2), region = 108 }
  0xac   : > { %s1010_s13 = scalar_lea.vmem %s3339_s2, %s3168_s8  ;;  %s1013_s27 = scalar_lea.vmem %s3340_s3, %s3168_s8 }
  0xad   : > { %s1016_s18 = scalar_lea.vmem %s3341_s4, %s3168_s8 }
  0xb0   : > { %v2692_v42 = vmov 0.0  }
  0xb1   : > { %1022 = vst [vmem:[#allocation2] sm:$0xff] %v2692_v42  ;;  %1023 = vst [vmem:[#allocation2 + $0x8] sm:$0xff] %v2692_v42 }
  0xb2 PF: > { %v2507_v43 = vld [vmem:[%s3184_s15 + $0x78] sm:$0xff]   ;;  %v2511_v47 = vld [vmem:[%s3184_s15 + $0x70] sm:$0xff]   ;;  %v2515_v51 = vld [vmem:[%s3184_s15 + $0x68] sm:$0xff]   ;;  %p2287_p5 = scmp.ne.s32.totalorder %s2674_s24, 4 }
  0xb3   : > { %v2508_v44 = vld [vmem:[%s3184_s15 + $0xf8] sm:$0xff]   ;;  %2304 = vmatprep.subr.bf16.mxu0 %v2507_v43  ;;  %v2512_v48 = vld [vmem:[%s3184_s15 + $0xf0] sm:$0xff]   ;;  %v2516_v52 = vld [vmem:[%s3184_s15 + $0xe8] sm:$0xff]  }
  0xb4   : > { %v2509_v45 = vld [vmem:[%s3184_s15 + $0x38] sm:$0xff]   ;;  %2326 = vmatprep.subr.bf16.mxu1 %v2508_v44  ;;  %v2513_v49 = vld [vmem:[%s3184_s15 + $0x30] sm:$0xff]   ;;  %v2517_v53 = vld [vmem:[%s3184_s15 + $0x28] sm:$0xff]  }
  0xb5   : > { %v2510_v46 = vld [vmem:[%s3184_s15 + $0xb8] sm:$0xff]   ;;  %2305 = vmatpush3.bf16.msra.mxu0 %v2509_v45  ;;  %v2514_v50 = vld [vmem:[%s3184_s15 + $0xb0] sm:$0xff]   ;;  %v2518_v54 = vld [vmem:[%s3184_s15 + $0xa8] sm:$0xff]  }
  0xb6   : > { %2327 = vmatpush3.bf16.msra.mxu1 %v2510_v46  ;;  %2306 = vmatprep.subr.bf16.mxu0 %v2511_v47  ;;  %v2519_v55 = vld [vmem:[%s3184_s15 + $0x60] sm:$0xff]   ;;  %v2523_v59 = vld [vmem:[%s3184_s15 + $0x58] sm:$0xff]   ;;  %v2527_v63 = vld [vmem:[%s3184_s15 + $0x50] sm:$0xff]  }
  0xb7   : > { %2328 = vmatprep.subr.bf16.mxu1 %v2512_v48  ;;  %v2520_v56 = vld [vmem:[%s3184_s15 + $0xe0] sm:$0xff]   ;;  %v2524_v60 = vld [vmem:[%s3184_s15 + $0xd8] sm:$0xff]   ;;  %v2528_v0 = vld [vmem:[%s3184_s15 + $0xd0] sm:$0xff]  }
  0xb8   : > { %v2521_v57 = vld [vmem:[%s3184_s15 + $0x20] sm:$0xff]   ;;  %v2525_v61 = vld [vmem:[%s3184_s15 + $0x18] sm:$0xff]   ;;  %v2529_v1 = vld [vmem:[%s3184_s15 + $0x10] sm:$0xff]  }
  0xb9   : > { %2307 = vmatpush3.bf16.msra.mxu0 %v2513_v49  ;;  %v2522_v58 = vld [vmem:[%s3184_s15 + $0xa0] sm:$0xff]   ;;  %v2526_v62 = vld [vmem:[%s3184_s15 + $0x98] sm:$0xff]   ;;  %v2530_v2 = vld [vmem:[%s3184_s15 + $0x90] sm:$0xff]  }
  0xba   : > { %2329 = vmatpush3.bf16.msra.mxu1 %v2514_v50  ;;  %2308 = vmatprep.subr.bf16.mxu0 %v2515_v51  ;;  %v2531_v3 = vld [vmem:[%s3184_s15 + $0x48] sm:$0xff]   ;;  %v2535_v7 = vld [vmem:[%s3184_s15 + $0x40] sm:$0xff]   ;;  %v2545_v15 = vld [vmem:[%s3184_s15 + $0x178] sm:$0xff]  }
  0xbb   : > { %2330 = vmatprep.subr.bf16.mxu1 %v2516_v52  ;;  %v2532_v4 = vld [vmem:[%s3184_s15 + $0xc8] sm:$0xff]   ;;  %v2536_v8 = vld [vmem:[%s3184_s15 + $0xc0] sm:$0xff]   ;;  %v2546_v16 = vld [vmem:[%s3184_s15 + $0x138] sm:$0xff]  }
  0xbc   : > { %v2533_v5 = vld [vmem:[%s3184_s15 + $0x8] sm:$0xff]   ;;  %v2537_v9 = vld [vmem:[%s3184_s15] sm:$0xff]   ;;  %v2547_v17 = vld [vmem:[%s3184_s15 + $0x1f8] sm:$0xff]  }
  0xbd   : > { %2309 = vmatpush3.bf16.msra.mxu0 %v2517_v53  ;;  %v2534_v6 = vld [vmem:[%s3184_s15 + $0x88] sm:$0xff]   ;;  %v2538_v10 = vld [vmem:[%s3184_s15 + $0x80] sm:$0xff]   ;;  %v2548_v18 = vld [vmem:[%s3184_s15 + $0x1b8] sm:$0xff]  }
  0xbe   : > { %2331 = vmatpush3.bf16.msra.mxu1 %v2518_v54  ;;  %2310 = vmatprep.subr.bf16.mxu0 %v2519_v55  ;;  %v2539_v11 = vld [vmem:[%s3182_s0] ss:$40 sps:$4 sm:$0xff]   ;;  %v2541_v12 = vld [vmem:[%s3182_s0 + $0x4] ss:$40 sps:$4 sm:$0xff]   ;;  %v2576_v46 = vld [vmem:[%s3182_s0 + $0x10] ss:$40 sps:$4 sm:$0xff]  }
  0xbf   : > { %2332 = vmatprep.subr.bf16.mxu1 %v2520_v56  ;;  %v2542_v13 = vld [vmem:[%s3182_s0 + $0x8] ss:$40 sps:$4 sm:$0xff]   ;;  %v2544_v14 = vld [vmem:[%s3182_s0 + $0xc] ss:$40 sps:$4 sm:$0xff]   ;;  %1758 = vmatprep.mubr.bf16.mxu0 %v2541_v12  ;;  %v2581_v50 = vld [vmem:[%s3182_s0 + $0x18] ss:$40 sps:$4 sm:$0xff]  }
  0xc0   : > { %1799 = vmatprep.mubr.bf16.mxu1 %v2544_v14  ;;  %v2549_v19 = vld [vmem:[%s3184_s15 + $0x170] sm:$0xff]   ;;  %v2553_v23 = vld [vmem:[%s3184_s15 + $0x168] sm:$0xff]   ;;  %v2557_v27 = vld [vmem:[%s3184_s15 + $0x160] sm:$0xff]  }
  0xc1   : > { %2311 = vmatpush3.bf16.msra.mxu0 %v2521_v57  ;;  %v2550_v20 = vld [vmem:[%s3184_s15 + $0x130] sm:$0xff]   ;;  %v2554_v24 = vld [vmem:[%s3184_s15 + $0x128] sm:$0xff]   ;;  %v2558_v28 = vld [vmem:[%s3184_s15 + $0x120] sm:$0xff]  }
  0xc2   : > { %2333 = vmatpush3.bf16.msra.mxu1 %v2522_v58  ;;  %2312 = vmatprep.subr.bf16.mxu0 %v2523_v59  ;;  %v2551_v21 = vld [vmem:[%s3184_s15 + $0x1f0] sm:$0xff]   ;;  %v2555_v25 = vld [vmem:[%s3184_s15 + $0x1e8] sm:$0xff]   ;;  %v2559_v29 = vld [vmem:[%s3184_s15 + $0x1e0] sm:$0xff]  }
  0xc3   : > { %2334 = vmatprep.subr.bf16.mxu1 %v2524_v60  ;;  %v2552_v22 = vld [vmem:[%s3184_s15 + $0x1b0] sm:$0xff]   ;;  %v2556_v26 = vld [vmem:[%s3184_s15 + $0x1a8] sm:$0xff]   ;;  %v2560_v30 = vld [vmem:[%s3184_s15 + $0x1a0] sm:$0xff]  }
  0xc4   : > { %v2561_v31 = vld [vmem:[%s3184_s15 + $0x158] sm:$0xff]   ;;  %v2565_v35 = vld [vmem:[%s3184_s15 + $0x150] sm:$0xff]   ;;  %v2569_v39 = vld [vmem:[%s3184_s15 + $0x148] sm:$0xff]  }
  0xc5   : > { %2313 = vmatpush3.bf16.msra.mxu0 %v2525_v61  ;;  %v2562_v32 = vld [vmem:[%s3184_s15 + $0x118] sm:$0xff]   ;;  %v2566_v36 = vld [vmem:[%s3184_s15 + $0x110] sm:$0xff]   ;;  %v2570_v40 = vld [vmem:[%s3184_s15 + $0x108] sm:$0xff]  }
  0xc6   : > { %2335 = vmatpush3.bf16.msra.mxu1 %v2526_v62  ;;  %2314 = vmatprep.subr.bf16.mxu0 %v2527_v63  ;;  %v2563_v33 = vld [vmem:[%s3184_s15 + $0x1d8] sm:$0xff]   ;;  %v2567_v37 = vld [vmem:[%s3184_s15 + $0x1d0] sm:$0xff]   ;;  %v2571_v41 = vld [vmem:[%s3184_s15 + $0x1c8] sm:$0xff]  }
  0xc7   : > { %2336 = vmatprep.subr.bf16.mxu1 %v2528_v0  ;;  %v2564_v34 = vld [vmem:[%s3184_s15 + $0x198] sm:$0xff]   ;;  %v2568_v38 = vld [vmem:[%s3184_s15 + $0x190] sm:$0xff]   ;;  %v2572_v42 = vld [vmem:[%s3184_s15 + $0x188] sm:$0xff]  }
  0xc8   : > { %v2573_v43 = vld [vmem:[%s3184_s15 + $0x140] sm:$0xff]   ;;  %v2580_v49 = vld [vmem:[%s3184_s15 + $0x278] sm:$0xff]   ;;  %v2585_v53 = vld [vmem:[%s3184_s15 + $0x270] sm:$0xff]  }
  0xc9   : > { %2315 = vmatpush3.bf16.msra.mxu0 %v2529_v1  ;;  %v2574_v44 = vld [vmem:[%s3184_s15 + $0x100] sm:$0xff]   ;;  %v2584_v52 = vld [vmem:[%s3184_s15 + $0x238] sm:$0xff]   ;;  %v2586_v54 = vld [vmem:[%s3184_s15 + $0x230] sm:$0xff]  }
  0xca   : > { %2337 = vmatpush3.bf16.msra.mxu1 %v2530_v2  ;;  %2316 = vmatprep.subr.bf16.mxu0 %v2531_v3  ;;  %v2575_v45 = vld [vmem:[%s3184_s15 + $0x1c0] sm:$0xff]   ;;  %v2587_v55 = vld [vmem:[%s3184_s15 + $0x268] sm:$0xff]   ;;  %v2591_v59 = vld [vmem:[%s3184_s15 + $0x258] sm:$0xff]  }
  0xcb   : > { %2338 = vmatprep.subr.bf16.mxu1 %v2532_v4  ;;  %v2578_v47 = vld [vmem:[%s3182_s0 + $0x14] ss:$40 sps:$4 sm:$0xff]   ;;  %v2601_v62 = vld [vmem:[%s3182_s0 + $0x24] ss:$40 sps:$4 sm:$0xff]   ;;  %v2599_v4 = vld [vmem:[%s3182_s0 + $0x20] ss:$40 sps:$4 sm:$0xff]  }
  0xcc   : > { %v2579_v48 = vld [vmem:[%s3184_s15 + $0x180] sm:$0xff]   ;;  %v2588_v56 = vld [vmem:[%s3184_s15 + $0x228] sm:$0xff]   ;;  %v2592_v60 = vld [vmem:[%s3184_s15 + $0x218] sm:$0xff]  }
  0xcd   : > { %2317 = vmatpush3.bf16.msra.mxu0 %v2533_v5  ;;  %v2583_v51 = vld [vmem:[%s3182_s0 + $0x1c] ss:$40 sps:$4 sm:$0xff]  }
  0xce   : > { %2339 = vmatpush3.bf16.msra.mxu1 %v2534_v6  ;;  %2318 = vmatprep.subr.bf16.mxu0 %v2535_v7  ;;  %v2589_v57 = vld [vmem:[%s3184_s15 + $0x260] sm:$0xff]   ;;  %v2593_v61 = vld [vmem:[%s3184_s15 + $0x250] sm:$0xff]   ;;  %v2595_v0 = vld [vmem:[%s3184_s15 + $0x248] sm:$0xff]  }
  0xcf   : > { %2340 = vmatprep.subr.bf16.mxu1 %v2536_v8  ;;  %v2590_v58 = vld [vmem:[%s3184_s15 + $0x220] sm:$0xff]   ;;  %v2594_v63 = vld [vmem:[%s3184_s15 + $0x210] sm:$0xff]   ;;  %v2596_v1 = vld [vmem:[%s3184_s15 + $0x208] sm:$0xff]  }
  0xd0   : > { %v2597_v2 = vld [vmem:[%s3184_s15 + $0x240] sm:$0xff]  }
  0xd1   : > { %2319 = vmatpush3.bf16.msra.mxu0 %v2537_v9  ;;  %v2598_v3 = vld [vmem:[%s3184_s15 + $0x200] sm:$0xff]  }
  0xd2   : > { %2341 = vmatpush3.bf16.msra.mxu1 %v2538_v10  ;;  %2348 = vmatprep.subr.bf16.mxu0 %v2545_v15 }
  0xd3   : > { %2370 = vmatprep.subr.bf16.mxu1 %v2547_v17 }
  0xd4   : > { %1759 = vmatmul.mubr.bf16.vlgmr.msra.gmra.mxu0 %v2539_v11 }
  0xd5   : > { %1800 = vmatmul.mubr.bf16.vlgmr.msra.gmra.mxu1 %v2542_v13  ;;  %2349 = vmatpush3.bf16.msra.mxu0 %v2546_v16 }
  0xd6   : > { %2371 = vmatpush3.bf16.msra.mxu1 %v2548_v18  ;;  %2350 = vmatprep.subr.bf16.mxu0 %v2549_v19 }
  0xd7   : > { %2372 = vmatprep.subr.bf16.mxu1 %v2551_v21  ;;  %1840 = vmatprep.mubr.bf16.mxu0 %v2578_v47 }
  0xd8   : > { %1881 = vmatprep.mubr.bf16.mxu1 %v2583_v51 }
  0xd9   : > { %2351 = vmatpush3.bf16.msra.mxu0 %v2550_v20 }
  0xda   : > { %2373 = vmatpush3.bf16.msra.mxu1 %v2552_v22  ;;  %2352 = vmatprep.subr.bf16.mxu0 %v2553_v23 }
  0xdb   : > { %2374 = vmatprep.subr.bf16.mxu1 %v2555_v25 }
  0xdd   : > { %2353 = vmatpush3.bf16.msra.mxu0 %v2554_v24 }
  0xde   : > { %2375 = vmatpush3.bf16.msra.mxu1 %v2556_v26  ;;  %2354 = vmatprep.subr.bf16.mxu0 %v2557_v27 }
  0xdf   : > { %2376 = vmatprep.subr.bf16.mxu1 %v2559_v29 }
  0xe1   : > { %2355 = vmatpush3.bf16.msra.mxu0 %v2558_v28 }
  0xe2   : > { %2377 = vmatpush3.bf16.msra.mxu1 %v2560_v30  ;;  %2356 = vmatprep.subr.bf16.mxu0 %v2561_v31 }
  0xe3   : > { %2378 = vmatprep.subr.bf16.mxu1 %v2563_v33 }
  0xe5   : > { %2357 = vmatpush3.bf16.msra.mxu0 %v2562_v32 }
  0xe6   : > { %2379 = vmatpush3.bf16.msra.mxu1 %v2564_v34  ;;  %2358 = vmatprep.subr.bf16.mxu0 %v2565_v35 }
  0xe7   : > { %2380 = vmatprep.subr.bf16.mxu1 %v2567_v37  ;;  %v1024_v37 = vld [vmem:[#allocation2] sm:$0xff] }
  0xe9   : > { %2359 = vmatpush3.bf16.msra.mxu0 %v2566_v36 }
  0xea   : > { %2381 = vmatpush3.bf16.msra.mxu1 %v2568_v38  ;;  %2360 = vmatprep.subr.bf16.mxu0 %v2569_v39 }
  0xeb   : > { %2382 = vmatprep.subr.bf16.mxu1 %v2571_v41 }
  0xed   : > { %2361 = vmatpush3.bf16.msra.mxu0 %v2570_v40 }
  0xee   : > { %2383 = vmatpush3.bf16.msra.mxu1 %v2572_v42  ;;  %2362 = vmatprep.subr.bf16.mxu0 %v2573_v43 }
  0xef   : > { %2384 = vmatprep.subr.bf16.mxu1 %v2575_v45 }
  0xf1   : > { %2363 = vmatpush3.bf16.msra.mxu0 %v2574_v44  ;;  %v1025_v44 = vld [vmem:[#allocation2 + $0x8] sm:$0xff] }
  0xf2   : > { %2385 = vmatpush3.bf16.msra.mxu1 %v2579_v48  ;;  %2392 = vmatprep.subr.bf16.mxu0 %v2580_v49 }
  0xf4   : > { %1841 = vmatmul.mubr.bf16.vlgmr.msra.gmra.mxu0 %v2576_v46 }
  0xf5   : > { %2393 = vmatpush3.bf16.msra.mxu0 %v2584_v52  ;;  %1882 = vmatmul.mubr.bf16.vlgmr.msra.gmra.mxu1 %v2581_v50 }
  0xf6   : > { %2394 = vmatprep.subr.bf16.mxu0 %v2585_v53  ;;  %1922 = vmatprep.mubr.bf16.mxu0 %v2601_v62 }
  0xf9   : > { %2395 = vmatpush3.bf16.msra.mxu0 %v2586_v54 }
  0xfa   : > { %2396 = vmatprep.subr.bf16.mxu0 %v2587_v55 }
  0xfd   : > { %2397 = vmatpush3.bf16.msra.mxu0 %v2588_v56 }
  0xfe   : > { %2398 = vmatprep.subr.bf16.mxu0 %v2589_v57 }
 0x101   : > { %2399 = vmatpush3.bf16.msra.mxu0 %v2590_v58 }
 0x102   : > { %2400 = vmatprep.subr.bf16.mxu0 %v2591_v59 }
 0x105   : > { %2401 = vmatpush3.bf16.msra.mxu0 %v2592_v60 }
 0x106   : > { %2402 = vmatprep.subr.bf16.mxu0 %v2593_v61 }
 0x109   : > { %2403 = vmatpush3.bf16.msra.mxu0 %v2594_v63 }
 0x10a   : > { %2404 = vmatprep.subr.bf16.mxu0 %v2595_v0 }
 0x10d   : > { %2405 = vmatpush3.bf16.msra.mxu0 %v2596_v1 }
 0x10e   : > { %2406 = vmatprep.subr.bf16.mxu0 %v2597_v2 }
 0x111   : > { %2407 = vmatpush3.bf16.msra.mxu0 %v2598_v3 }
 0x114   : > { %1923 = vmatmul.mubr.bf16.vlgmr.msra.gmra.mxu0 %v2599_v4 }
 0x194   : > { %v2320_v5 = vpop.f32.mrf.mxu0 }
 0x195   : > { %v2342_v6 = vpop.f32.mrf.mxu1 }
 0x196   : > { %v2321_v7 = vpop.f32.mrf.mxu0 }
 0x197   : > { %v2343_v8 = vpop.f32.mrf.mxu1  ;;  %v2322_v18 = vadd.f32 %v2321_v7, %v2320_v5 }
 0x198   : > { %v2323_v9 = vpop.f32.mrf.mxu0  ;;  %v2344_v19 = vadd.f32 %v2343_v8, %v2342_v6 }
 0x199   : > { %v2345_v10 = vpop.f32.mrf.mxu1 }
 0x19a   : > { %v2324_v11 = vpop.f32.mrf.mxu0  ;;  %v1802_v23 = vadd.f32 %v2344_v19, %v2322_v18 }
 0x19b   : > { %v2346_v13 = vpop.f32.mrf.mxu1  ;;  %v2325_v24 = vadd.f32 %v2324_v11, %v2323_v9 }
 0x19c   : > { %v2347_v25 = vadd.f32 %v2346_v13, %v2345_v10 }
 0x19e   : > { %v1805_v31 = vadd.f32 %v2347_v25, %v2325_v24 }
 0x1b4   : > { %v2364_v12 = vpop.f32.mrf.mxu0 }
 0x1b5   : > { %v2386_v15 = vpop.f32.mrf.mxu1 }
 0x1b6   : > { %v2365_v14 = vpop.f32.mrf.mxu0 }
 0x1b7   : > { %v2387_v17 = vpop.f32.mrf.mxu1  ;;  %v2366_v20 = vadd.f32 %v2365_v14, %v2364_v12 }
 0x1b8   : > { %v2367_v16 = vpop.f32.mrf.mxu0  ;;  %v2388_v27 = vadd.f32 %v2387_v17, %v2386_v15 }
 0x1b9   : > { %v2389_v22 = vpop.f32.mrf.mxu1  ;;  %v1843_v26 = vadd.f32 %v2366_v20, %v1802_v23 }
 0x1ba   : > { %v2368_v21 = vpop.f32.mrf.mxu0 }
 0x1bb   : > { %v2369_v28 = vadd.f32 %v2368_v21, %v2367_v16  ;;  %v2390_v29 = vpop.f32.mrf.mxu1  ;;  %v1884_v33 = vadd.f32 %v2388_v27, %v1843_v26 }
 0x1bc   : > { %v2391_v35 = vadd.f32 %v2390_v29, %v2389_v22 }
 0x1bd   : > { %v1846_v34 = vadd.f32 %v2369_v28, %v1805_v31 }
 0x1bf   : > { %v1887_v41 = vadd.f32 %v2391_v35, %v1846_v34 }
 0x1d4   : > { %v2408_v30 = vpop.f32.mrf.mxu0 }
 0x1d6   : > { %v2409_v32 = vpop.f32.mrf.mxu0 }
 0x1d7   : > { %v2410_v36 = vadd.f32 %v2409_v32, %v2408_v30 }
 0x1d8   : > { %v2411_v38 = vpop.f32.mrf.mxu0 }
 0x1d9   : > { %v1925_v39 = vadd.f32 %v2410_v36, %v1884_v33 }
 0x1da   : > { %v2412_v40 = vpop.f32.mrf.mxu0 }
 0x1db   : > { %v1931_v42 = vadd.f32 %v1925_v39, %v1024_v37  ;;  %v2413_v43 = vadd.f32 %v2412_v40, %v2411_v38 }
 0x1dd   : > { %1933 = vst [vmem:[#allocation2] sm:$0xff] %v1931_v42  ;;  %v1928_v45 = vadd.f32 %v2413_v43, %v1887_v41  ;;  %1938 = sbr.rel (%p2287_p5) target bundleno = 551 (0x227), region = 112 }
 0x1df   : > { %v1932_v46 = vadd.f32 %v1928_v45, %v1025_v44 }
 0x1e1   : > { %1934 = vst [vmem:[#allocation2 + $0x8] sm:$0xff] %v1932_v46 }
 0x1e2   : > { %v2288_v48 = vld [vmem:[%s1010_s13] ss:$0 sm:$0xff]  ;;  %v1987_v3 = vlaneseq }
 0x1e3   : > { %v1979_v6 = vld [vmem:[%s1013_s27] sm:$0x1] }
 0x1e4   : > { %v1939_v47 = vld [vmem:[#allocation2] sm:$0xff]  ;;  %v1988_v4 = vshrl.u32 %v1987_v3, 7 }
 0x1e5   : > { %v1948_v49 = vadd.f32 %v2288_v48, %v1939_v47  ;;  %v1983_v11 = vld [vmem:[%s1016_s18] sm:$0x1] }
 0x1e6   : > { %v1989_v7 = vsub.s32 0, %v1988_v4 }
 0x1e7   : > { %v1958_v50 = vrot.slane %v1948_v49, 4 }
 0x1e8   : > { %v1940_v5 = vld [vmem:[#allocation2 + $0x8] sm:$0xff] }
 0x1e9   : > { %v1959_v51 = vadd.f32 %v1958_v50, %v1948_v49  ;;  %v1949_v9 = vadd.f32 %v2288_v48, %v1940_v5 }
 0x1eb   : > { %v1960_v52 = vrot.slane %v1959_v51, 2 }
 0x1ed   : > { %v1961_v53 = vadd.f32 %v1960_v52, %v1959_v51 }
 0x1ef   : > { %v1962_v54 = vrot.slane %v1961_v53, 1 }
 0x1f1   : > { %v1963_v55 = vadd.f32 %v1962_v54, %v1961_v53 }
 0x1f3   : > { %v1964_v56 = vmul.f32 0.125, %v1963_v55 }
 0x1f5   : > { %v1965_v57 = vsub.f32 %v1948_v49, %v1964_v56 }
 0x1f7   : > { %v1969_v58 = vmul.f32 %v1965_v57, %v1965_v57 }
 0x1f9   : > { %v1972_v59 = vrot.slane %v1969_v58, 4 }
 0x1fb   : > { %v1973_v60 = vadd.f32 %v1972_v59, %v1969_v58 }
 0x1fd   : > { %v1974_v61 = vrot.slane %v1973_v60, 2 }
 0x1ff   : > { %v1975_v62 = vadd.f32 %v1974_v61, %v1973_v60 }
 0x201   : > { %v1976_v63 = vrot.slane %v1975_v62, 1 }
 0x203   : > { %v1977_v0 = vadd.f32 %v1976_v63, %v1975_v62 }
 0x205   : > { %v1978_v1 = vmul.f32 0.125, %v1977_v0 }
 0x207   : > { %v1980_v2 = vadd.f32 1e-05, %v1978_v1 }
 0x209   : > { %2602 = vrsqrt.f32 %v1980_v2 }
 0x216   : > { %v2603_v8 = vpop.eup %2602 }
 0x217   : > { %v1982_v10 = vmul.f32 %v2603_v8, %v1979_v6 }
 0x219   : > { %v1984_v12 = vmul.f32 %v1982_v10, %v1964_v56  ;;  %v1990_v13 = vrot.slane %v1982_v10, %v1989_v7 }
 0x21b   : > { %v1985_v14 = vsub.f32 %v1983_v11, %v1984_v12  ;;  %v1992_v15 = vmul.f32 %v1990_v13, %v1948_v49  ;;  %v1993_v16 = vmul.f32 %v1990_v13, %v1949_v9 }
 0x21d   : > { %v1998_v17 = vrot.slane %v1985_v14, %v1989_v7 }
 0x21f   : > { %v2000_v18 = vadd.f32 %v1998_v17, %v1992_v15  ;;  %v2001_v19 = vadd.f32 %v1998_v17, %v1993_v16 }
 0x221   : > { %vm2002_vm0 = vcmp.gt.f32.partialorder %v2000_v18, 0.0  ;;  %vm2003_vm1 = vcmp.gt.f32.partialorder %v2001_v19, 0.0  ;;  %v2004_v20 = vmul.f32 0.2, %v2000_v18  ;;  %v2005_v21 = vmul.f32 0.2, %v2001_v19 }
 0x223   : > { %v2006_v22 = vsel %vm2002_vm0, %v2000_v18, %v2004_v20  ;;  %v2007_v23 = vsel %vm2003_vm1, %v2001_v19, %v2005_v21 }
 0x224   : > { %v2302_v24 = vpack.c.bf16 %v2007_v23, %v2006_v22 }
 0x226   : > { %2303 = vst [vmem:[%s3186_s9] sm:$0xff] %v2302_v24  }
 0x227 PF: > { %2024 = sbr.rel (!%p2817_p12) target bundleno = 559 (0x22f), region = 116  ;;  %s2292_s27 = sshll.u32 (%p2817_p12), %s2678_s25, 2 }
 0x228   : > { %s2026_s13 = scalar_lea.vmem (%p2817_p12), %s3342_s5, %s2292_s27 }
 0x22d   : > { %v2043_v25 = vld [vmem:[%s3186_s9] sm:$0xf]  ;;  %v2045_v26 = vld [vmem:[%s3186_s9 + $0x4] sm:$0xf] }
 0x22e   : > { %2044 = vst [vmem:[%s2026_s13] sm:$0xf] %v2043_v25  ;;  %2046 = vst [vmem:[%s2026_s13 + $0x8] sm:$0xf] %v2045_v26 }
 0x22f PF: > { %s15_s28 = sadd.s32 1, %s2690_s28   ;;  %s3356_s25 = sld [smem:[#allocation6_spill]] }
 0x230   : > { %p12_p6 = scmp.ge.s32.totalorder %s15_s28, 12   ;;  %s3357_s30 = sld [smem:[#allocation7_spill]] }
 0x231   : > { %s3358_s27 = sld [smem:[#allocation8_spill]]  ;;  %s3359_s18 = smov %s2654_s19 }
 0x232   : > { %s3360_s19 = smov %s2815_s17  ;;  %s3361_s20 = smov %s2662_s21 }
 0x233   : > { %s3362_s21 = smov %s2812_s16  ;;  %s3363_s22 = smov %s2670_s23 }
 0x234   : > { %s3364_s23 = smov %s2798_s11  ;;  %s3365_s24 = smov %s2682_s26 }
 0x235   :  { %14 = sbr.rel (!%p12_p6) target bundleno = 9 (0x9), region = 205 }
 0x236   : > { %s3366_s26 = smov %s3357_s30 }

// kernel: _lambda_.9
= control target key start
LH: loop header
LB: loop body
LE: loop exit
PB: predicated region body
PF: predicated region fallthrough
CT: control target
= control target key end

     0   :  { %s3730_s0 = inlined_call_operand.vmem [shape: bf16[16,1024], index: 0, kind: input, shape index: {}]   ;;  %s3731_s1 = inlined_call_operand.vmem [shape: bf16[1024,2048], index: 1, kind: input, shape index: {}]   ;;  %s3732_s2 = inlined_call_operand.vmem [shape: f32[1,2048], index: 2, kind: input, shape index: {}]   ;;  %s3733_s3 = inlined_call_operand.vmem [shape: f32[1,2048], index: 3, kind: input, shape index: {}]   ;;  %s3734_s4 = inlined_call_operand.<no memory space> [shape: f32[1,1], index: 4, kind: input, shape index: {}]   ;;  %s3735_s5 = inlined_call_operand.vmem [shape: f32[16,1], index: 5, kind: output, shape index: {}]  }
   0x1   :  { %v10_v0 = vstv %s3734_s4 }
   0x2   :  { %11 = vst [vmem:[#allocation3] sm:$0x1] %v10_v0 }
   0x3   :  { %s3134_s20 = smov 0   ;;  %s3136_s21 = smov 0  }
   0x4   :  { %s3138_s22 = smov 0  }
   0x5 LB: > { %s3147_s4 = sadd.s32 4294967295, %s3098_s22   ;;  %s3149_s23 = sadd.s32 1, %s3098_s22   ;;  %s3098_s22 = sphi %s3138_s22, %s3738_s22   ;;  %s3094_s21 = sphi %s3136_s21, %s3737_s21   ;;  %s3090_s20 = sphi %s3134_s20, %s3736_s20  }
   0x6   : > { %s21_s24 = ssub.s32 %s3098_s22, %s3149_s23  ;;  %s24_s25 = sadd.s32 1, %s3094_s21 }
   0x7   : > { %p22_p0 = scmp.eq.s32.totalorder %s21_s24, 0  ;;  %p31_p1 = scmp.ne.s32.totalorder %s3094_s21, %s3090_s20 }
   0x8   : > { %p32_p2 = scmp.eq.s32.totalorder %s3098_s22, 0  ;;  %p2768_p4 = scmp.ge.s32.totalorder %s3098_s22, 4 }
   0x9   : > { %s3156_s26 = scalar_select %p22_p0, %s3094_s21, %s24_s25  }
   0xa   : > { %p33_p3 = por %p32_p2, %p31_p1  ;;  %176 = sbr.rel (%p2768_p4) target bundleno = 21 (0x15), region = 28 }
   0xf   : > { %179 = sbr.rel (!%p33_p3) target bundleno = 21 (0x15), region = 32  ;;  %s181_s27 = sand.u32 (%p33_p3), 1, %s3094_s21  }
  0x10   : > { %s3040_s28 = sshll.u32 (%p33_p3), %s3098_s22, 3  ;;  %s2769_s29 = sshll.u32 (%p33_p3), %s181_s27, 4 }
  0x11   : > { %s186_s7 = scalar_lea.vmem (%p33_p3), %s3730_s0, %s3040_s28  ;;  %s183_s8 = scalar_lea.vmem (%p33_p3), [#allocation4], %s2769_s29 }
  0x12   : > { %v217_v1 = vld [vmem:[%s186_s7] sm:$0xff] (%p33_p3) }
  0x13   : > { %v219_v2 = vld [vmem:[%s186_s7 + $0x20] sm:$0xff] (%p33_p3)  ;;  %218 = vst [vmem:[%s183_s8] sm:$0xff] (%p33_p3), %v217_v1 }
  0x14   : > { %220 = vst [vmem:[%s183_s8 + $0x8] sm:$0xff] %v219_v2 }
  0x15 PF: > { %p2772_p5 = scmp.ge.s32.totalorder %s3098_s22, 1  ;;  %p235_p6 = scmp.lt.s32.totalorder %s3098_s22, 5 }
  0x17   : > { %p236_p7 = pnand %p2772_p5, %p235_p6 }
  0x18   : > { %s242_s9 = sand.u32 (!%p236_p7), 1, %s3090_s20   ;;  %s2774_s10 = sshll.u32 (!%p236_p7), %s3147_s4, 5 }
  0x19   : > { %239 = sbr.rel (%p236_p7) target bundleno = 750 (0x2ee), region = 74  ;;  %s2773_s11 = sshll.u32 (!%p236_p7), %s242_s9, 4 }
  0x1a   : > { %p272_p8 = scmp.lt.s32.totalorder (!%p236_p7), %s2774_s10, 127  ;;  %s3169_s16 = scalar_lea.vmem (!%p236_p7), [#allocation4], %s2773_s11 }
  0x1b   : > { %p2777_p9 = scmp.ne.s32.totalorder (!%p236_p7), %s3147_s4, 0 }
  0x1e   : > { %s3740_s10 = smov (!%p272_p8, %s2774_s10), 127  ;;  %281 = sbr.rel (%p2777_p9) target bundleno = 52 (0x34), region = 82 }
  0x1f   : > { %s3041_s12 = sshll.u32 %s3740_s10, 6 }
  0x20   : > { %s3167_s15 = scalar_lea.vmem %s3731_s1, %s3041_s12 }
  0x23   : > { %v3100_v3 = vmov 0.0  }
  0x24   : > { %282 = vst [vmem:[#allocation2 + $0xb0] sm:$0xff] %v3100_v3  ;;  %283 = vst [vmem:[#allocation2] sm:$0xff] %v3100_v3 }
  0x25   : > { %284 = vst [vmem:[#allocation2 + $0xd8] sm:$0xff] %v3100_v3  ;;  %285 = vst [vmem:[#allocation2 + $0x18] sm:$0xff] %v3100_v3 }
  0x26   : > { %286 = vst [vmem:[#allocation2 + $0x50] sm:$0xff] %v3100_v3  ;;  %287 = vst [vmem:[#allocation2 + $0x68] sm:$0xff] %v3100_v3 }
  0x27   : > { %288 = vst [vmem:[#allocation2 + $0x30] sm:$0xff] %v3100_v3  ;;  %289 = vst [vmem:[#allocation2 + $0x48] sm:$0xff] %v3100_v3 }
  0x28   : > { %290 = vst [vmem:[#allocation2 + $0x80] sm:$0xff] %v3100_v3  ;;  %291 = vst [vmem:[#allocation2 + $0x88] sm:$0xff] %v3100_v3 }
  0x29   : > { %292 = vst [vmem:[#allocation2 + $0xe8] sm:$0xff] %v3100_v3  ;;  %293 = vst [vmem:[#allocation2 + $0xb8] sm:$0xff] %v3100_v3 }
  0x2a   : > { %294 = vst [vmem:[#allocation2 + $0x60] sm:$0xff] %v3100_v3  ;;  %295 = vst [vmem:[#allocation2 + $0xf0] sm:$0xff] %v3100_v3 }
  0x2b   : > { %296 = vst [vmem:[#allocation2 + $0x8] sm:$0xff] %v3100_v3  ;;  %297 = vst [vmem:[#allocation2 + $0x78] sm:$0xff] %v3100_v3 }
  0x2c   : > { %298 = vst [vmem:[#allocation2 + $0x38] sm:$0xff] %v3100_v3  ;;  %299 = vst [vmem:[#allocation2 + $0x58] sm:$0xff] %v3100_v3 }
  0x2d   : > { %300 = vst [vmem:[#allocation2 + $0x40] sm:$0xff] %v3100_v3  ;;  %301 = vst [vmem:[#allocation2 + $0xc8] sm:$0xff] %v3100_v3 }
  0x2e   : > { %302 = vst [vmem:[#allocation2 + $0xe0] sm:$0xff] %v3100_v3  ;;  %303 = vst [vmem:[#allocation2 + $0x90] sm:$0xff] %v3100_v3 }
  0x2f   : > { %304 = vst [vmem:[#allocation2 + $0x70] sm:$0xff] %v3100_v3  ;;  %305 = vst [vmem:[#allocation2 + $0xc0] sm:$0xff] %v3100_v3 }
  0x30   : > { %306 = vst [vmem:[#allocation2 + $0xa8] sm:$0xff] %v3100_v3  ;;  %307 = vst [vmem:[#allocation2 + $0xd0] sm:$0xff] %v3100_v3 }
  0x31   : > { %308 = vst [vmem:[#allocation2 + $0x10] sm:$0xff] %v3100_v3  ;;  %309 = vst [vmem:[#allocation2 + $0x28] sm:$0xff] %v3100_v3 }
  0x32   : > { %310 = vst [vmem:[#allocation2 + $0xa0] sm:$0xff] %v3100_v3  ;;  %311 = vst [vmem:[#allocation2 + $0xf8] sm:$0xff] %v3100_v3 }
  0x33   : > { %312 = vst [vmem:[#allocation2 + $0x20] sm:$0xff] %v3100_v3  ;;  %313 = vst [vmem:[#allocation2 + $0x98] sm:$0xff] %v3100_v3 }
  0x34 PF: > { %v460_v4 = vld [vmem:[%s3167_s15 + $0x380] sm:$0xff]  ;;  %v461_v6 = vld [vmem:[%s3167_s15 + $0x388] sm:$0xff]  ;;  %p3036_p10 = scmp.ne.s32.totalorder %s3147_s4, 3 }
  0x35   : > { %v468_v5 = vld [vmem:[%s3167_s15 + $0x3c0] sm:$0xff]  ;;  %v469_v8 = vld [vmem:[%s3167_s15 + $0x3c8] sm:$0xff] }
  0x36   : > { %v2893_v7 = vcombine.high %v460_v4, %v468_v5  ;;  %v2892_v9 = vcombine.low %v460_v4, %v468_v5  ;;  %v444_v10 = vld [vmem:[%s3167_s15 + $0x300] sm:$0xff]  ;;  %v2895_v12 = vcombine.high %v461_v6, %v469_v8  ;;  %v2894_v13 = vcombine.low %v461_v6, %v469_v8  ;;  %v445_v15 = vld [vmem:[%s3167_s15 + $0x308] sm:$0xff] }
  0x37   : > { %v452_v11 = vld [vmem:[%s3167_s15 + $0x340] sm:$0xff]  ;;  %v453_v16 = vld [vmem:[%s3167_s15 + $0x348] sm:$0xff] }
  0x38   : > { %v2877_v14 = vcombine.high %v444_v10, %v452_v11  ;;  %v428_v17 = vld [vmem:[%s3167_s15 + $0x280] sm:$0xff]  ;;  %1894 = vmatprep.subr.bf16.mxu0 %v2893_v7  ;;  %v2879_v18 = vcombine.high %v445_v15, %v453_v16  ;;  %v429_v20 = vld [vmem:[%s3167_s15 + $0x288] sm:$0xff]  ;;  %1937 = vmatprep.subr.bf16.mxu1 %v2895_v12  ;;  %v2876_v22 = vcombine.low %v444_v10, %v452_v11 }
  0x39   : > { %v436_v19 = vld [vmem:[%s3167_s15 + $0x2c0] sm:$0xff]  ;;  %v437_v21 = vld [vmem:[%s3167_s15 + $0x2c8] sm:$0xff]  ;;  %1895 = vmatpush1.bf16.msra.mxu0 %v2892_v9  ;;  %1938 = vmatpush1.bf16.msra.mxu1 %v2894_v13  ;;  %v2878_v23 = vcombine.low %v445_v15, %v453_v16 }
  0x3a   : > { %1896 = vmatprep.subr.bf16.mxu0 %v2877_v14  ;;  %v2861_v24 = vcombine.high %v428_v17, %v436_v19  ;;  %1939 = vmatprep.subr.bf16.mxu1 %v2879_v18  ;;  %v2863_v25 = vcombine.high %v429_v20, %v437_v21  ;;  %v412_v26 = vld [vmem:[%s3167_s15 + $0x200] sm:$0xff]  ;;  %v413_v28 = vld [vmem:[%s3167_s15 + $0x208] sm:$0xff]  ;;  %v2860_v30 = vcombine.low %v428_v17, %v436_v19 }
  0x3b   : > { %v420_v27 = vld [vmem:[%s3167_s15 + $0x240] sm:$0xff]  ;;  %v421_v29 = vld [vmem:[%s3167_s15 + $0x248] sm:$0xff]  ;;  %v2862_v31 = vcombine.low %v429_v20, %v437_v21 }
  0x3c   : > { %v2845_v32 = vcombine.high %v412_v26, %v420_v27  ;;  %v2847_v33 = vcombine.high %v413_v28, %v421_v29  ;;  %v396_v34 = vld [vmem:[%s3167_s15 + $0x180] sm:$0xff]  ;;  %v397_v36 = vld [vmem:[%s3167_s15 + $0x188] sm:$0xff]  ;;  %v2844_v38 = vcombine.low %v412_v26, %v420_v27  ;;  %v2846_v39 = vcombine.low %v413_v28, %v421_v29 }
  0x3d   : > { %1897 = vmatpush1.bf16.msra.mxu0 %v2876_v22  ;;  %1940 = vmatpush1.bf16.msra.mxu1 %v2878_v23  ;;  %v404_v35 = vld [vmem:[%s3167_s15 + $0x1c0] sm:$0xff]  ;;  %v405_v37 = vld [vmem:[%s3167_s15 + $0x1c8] sm:$0xff] }
  0x3e   : > { %1898 = vmatprep.subr.bf16.mxu0 %v2861_v24  ;;  %1941 = vmatprep.subr.bf16.mxu1 %v2863_v25  ;;  %v2829_v40 = vcombine.high %v396_v34, %v404_v35  ;;  %v2831_v41 = vcombine.high %v397_v36, %v405_v37  ;;  %v380_v42 = vld [vmem:[%s3167_s15 + $0x100] sm:$0xff]  ;;  %v381_v44 = vld [vmem:[%s3167_s15 + $0x108] sm:$0xff]  ;;  %v2828_v46 = vcombine.low %v396_v34, %v404_v35 }
  0x3f   : > { %v388_v43 = vld [vmem:[%s3167_s15 + $0x140] sm:$0xff]  ;;  %v389_v45 = vld [vmem:[%s3167_s15 + $0x148] sm:$0xff]  ;;  %v2830_v47 = vcombine.low %v397_v36, %v405_v37 }
  0x40   : > { %v2813_v48 = vcombine.high %v380_v42, %v388_v43  ;;  %v2815_v49 = vcombine.high %v381_v44, %v389_v45  ;;  %v364_v50 = vld [vmem:[%s3167_s15 + $0x80] sm:$0xff]  ;;  %v365_v52 = vld [vmem:[%s3167_s15 + $0x88] sm:$0xff]  ;;  %v2812_v54 = vcombine.low %v380_v42, %v388_v43  ;;  %v2814_v55 = vcombine.low %v381_v44, %v389_v45 }
  0x41   : > { %1899 = vmatpush1.bf16.msra.mxu0 %v2860_v30  ;;  %1942 = vmatpush1.bf16.msra.mxu1 %v2862_v31  ;;  %v372_v51 = vld [vmem:[%s3167_s15 + $0xc0] sm:$0xff]  ;;  %v373_v53 = vld [vmem:[%s3167_s15 + $0xc8] sm:$0xff] }
  0x42   : > { %1900 = vmatprep.subr.bf16.mxu0 %v2845_v32  ;;  %1943 = vmatprep.subr.bf16.mxu1 %v2847_v33  ;;  %v2797_v56 = vcombine.high %v364_v50, %v372_v51  ;;  %v2799_v57 = vcombine.high %v365_v52, %v373_v53  ;;  %v348_v58 = vld [vmem:[%s3167_s15] sm:$0xff]  ;;  %v349_v61 = vld [vmem:[%s3167_s15 + $0x8] sm:$0xff]  ;;  %v2796_v63 = vcombine.low %v364_v50, %v372_v51 }
  0x43   : > { %v356_v59 = vld [vmem:[%s3167_s15 + $0x40] sm:$0xff]  ;;  %v357_v62 = vld [vmem:[%s3167_s15 + $0x48] sm:$0xff]  ;;  %v2798_v0 = vcombine.low %v365_v52, %v373_v53 }
  0x44   : > { %v3203_v60 = vld [vmem:[%s3169_s16 + $0x4] ss:$8 sps:$4 sm:$0xff]   ;;  %v2781_v1 = vcombine.high %v348_v58, %v356_v59  ;;  %v2783_v2 = vcombine.high %v349_v61, %v357_v62  ;;  %v2780_v7 = vcombine.low %v348_v58, %v356_v59  ;;  %v2782_v8 = vcombine.low %v349_v61, %v357_v62 }
  0x45   : > { %1901 = vmatpush1.bf16.msra.mxu0 %v2844_v38  ;;  %1944 = vmatpush1.bf16.msra.mxu1 %v2846_v39  ;;  %v588_v3 = vld [vmem:[%s3167_s15 + $0x780] sm:$0xff]  ;;  %v589_v5 = vld [vmem:[%s3167_s15 + $0x788] sm:$0xff] }
  0x46   : > { %1902 = vmatprep.subr.bf16.mxu0 %v2829_v40  ;;  %1945 = vmatprep.subr.bf16.mxu1 %v2831_v41  ;;  %v596_v4 = vld [vmem:[%s3167_s15 + $0x7c0] sm:$0xff]  ;;  %v597_v6 = vld [vmem:[%s3167_s15 + $0x7c8] sm:$0xff] }
  0x47   : > { %1926 = vmatprep.mubr.bf16.mxu0 %v3203_v60  ;;  %1969 = vmatprep.mubr.bf16.mxu1 %v3203_v60  ;;  %v3021_v9 = vcombine.high %v588_v3, %v596_v4  ;;  %v3023_v10 = vcombine.high %v589_v5, %v597_v6  ;;  %v572_v11 = vld [vmem:[%s3167_s15 + $0x700] sm:$0xff]  ;;  %v573_v13 = vld [vmem:[%s3167_s15 + $0x708] sm:$0xff]  ;;  %v3020_v15 = vcombine.low %v588_v3, %v596_v4  ;;  %v462_v4 = vld [vmem:[%s3167_s15 + $0x390] sm:$0xff] }
  0x48   : > { %v580_v12 = vld [vmem:[%s3167_s15 + $0x740] sm:$0xff]  ;;  %v581_v14 = vld [vmem:[%s3167_s15 + $0x748] sm:$0xff]  ;;  %v3022_v16 = vcombine.low %v589_v5, %v597_v6  ;;  %v470_v5 = vld [vmem:[%s3167_s15 + $0x3d0] sm:$0xff] }
  0x49   : > { %1903 = vmatpush1.bf16.msra.mxu0 %v2828_v46  ;;  %1946 = vmatpush1.bf16.msra.mxu1 %v2830_v47  ;;  %v3005_v17 = vcombine.high %v572_v11, %v580_v12  ;;  %v3007_v18 = vcombine.high %v573_v13, %v581_v14  ;;  %v556_v19 = vld [vmem:[%s3167_s15 + $0x680] sm:$0xff]  ;;  %v557_v21 = vld [vmem:[%s3167_s15 + $0x688] sm:$0xff]  ;;  %v3004_v23 = vcombine.low %v572_v11, %v580_v12  ;;  %v463_v6 = vld [vmem:[%s3167_s15 + $0x398] sm:$0xff] }
  0x4a   : > { %1904 = vmatprep.subr.bf16.mxu0 %v2813_v48  ;;  %1947 = vmatprep.subr.bf16.mxu1 %v2815_v49  ;;  %v564_v20 = vld [vmem:[%s3167_s15 + $0x6c0] sm:$0xff]  ;;  %v565_v22 = vld [vmem:[%s3167_s15 + $0x6c8] sm:$0xff]  ;;  %v3006_v24 = vcombine.low %v573_v13, %v581_v14  ;;  %v446_v12 = vld [vmem:[%s3167_s15 + $0x310] sm:$0xff] }
  0x4b   : > { %v2989_v25 = vcombine.high %v556_v19, %v564_v20  ;;  %v2991_v26 = vcombine.high %v557_v21, %v565_v22  ;;  %v540_v27 = vld [vmem:[%s3167_s15 + $0x600] sm:$0xff]  ;;  %v541_v29 = vld [vmem:[%s3167_s15 + $0x608] sm:$0xff]  ;;  %v2988_v31 = vcombine.low %v556_v19, %v564_v20  ;;  %v2990_v32 = vcombine.low %v557_v21, %v565_v22  ;;  %v454_v13 = vld [vmem:[%s3167_s15 + $0x350] sm:$0xff] }
  0x4c   : > { %v548_v28 = vld [vmem:[%s3167_s15 + $0x640] sm:$0xff]  ;;  %v549_v30 = vld [vmem:[%s3167_s15 + $0x648] sm:$0xff]  ;;  %v2881_v19 = vcombine.high %v446_v12, %v454_v13  ;;  %v430_v21 = vld [vmem:[%s3167_s15 + $0x290] sm:$0xff] }
  0x4d   : > { %1905 = vmatpush1.bf16.msra.mxu0 %v2812_v54  ;;  %1948 = vmatpush1.bf16.msra.mxu1 %v2814_v55  ;;  %v2973_v33 = vcombine.high %v540_v27, %v548_v28  ;;  %v2975_v34 = vcombine.high %v541_v29, %v549_v30  ;;  %v524_v35 = vld [vmem:[%s3167_s15 + $0x580] sm:$0xff]  ;;  %v525_v37 = vld [vmem:[%s3167_s15 + $0x588] sm:$0xff]  ;;  %v2972_v39 = vcombine.low %v540_v27, %v548_v28  ;;  %v438_v22 = vld [vmem:[%s3167_s15 + $0x2d0] sm:$0xff] }
  0x4e   : > { %1906 = vmatprep.subr.bf16.mxu0 %v2797_v56  ;;  %1949 = vmatprep.subr.bf16.mxu1 %v2799_v57  ;;  %v532_v36 = vld [vmem:[%s3167_s15 + $0x5c0] sm:$0xff]  ;;  %v533_v38 = vld [vmem:[%s3167_s15 + $0x5c8] sm:$0xff]  ;;  %v2974_v40 = vcombine.low %v541_v29, %v549_v30  ;;  %v2865_v27 = vcombine.high %v430_v21, %v438_v22  ;;  %v414_v29 = vld [vmem:[%s3167_s15 + $0x210] sm:$0xff] }
  0x4f   : > { %v2957_v41 = vcombine.high %v524_v35, %v532_v36  ;;  %v2959_v42 = vcombine.high %v525_v37, %v533_v38  ;;  %v508_v43 = vld [vmem:[%s3167_s15 + $0x500] sm:$0xff]  ;;  %v509_v45 = vld [vmem:[%s3167_s15 + $0x508] sm:$0xff]  ;;  %v2956_v47 = vcombine.low %v524_v35, %v532_v36  ;;  %v2958_v48 = vcombine.low %v525_v37, %v533_v38  ;;  %v422_v30 = vld [vmem:[%s3167_s15 + $0x250] sm:$0xff] }
  0x50   : > { %v516_v44 = vld [vmem:[%s3167_s15 + $0x540] sm:$0xff]  ;;  %v517_v46 = vld [vmem:[%s3167_s15 + $0x548] sm:$0xff]  ;;  %v2849_v35 = vcombine.high %v414_v29, %v422_v30  ;;  %v398_v37 = vld [vmem:[%s3167_s15 + $0x190] sm:$0xff] }
  0x51   : > { %1907 = vmatpush1.bf16.msra.mxu0 %v2796_v63  ;;  %1950 = vmatpush1.bf16.msra.mxu1 %v2798_v0  ;;  %v2941_v49 = vcombine.high %v508_v43, %v516_v44  ;;  %v2943_v50 = vcombine.high %v509_v45, %v517_v46  ;;  %v492_v51 = vld [vmem:[%s3167_s15 + $0x480] sm:$0xff]  ;;  %v493_v53 = vld [vmem:[%s3167_s15 + $0x488] sm:$0xff]  ;;  %v2940_v55 = vcombine.low %v508_v43, %v516_v44  ;;  %v406_v38 = vld [vmem:[%s3167_s15 + $0x1d0] sm:$0xff] }
  0x52   : > { %1908 = vmatprep.subr.bf16.mxu0 %v2781_v1  ;;  %1951 = vmatprep.subr.bf16.mxu1 %v2783_v2  ;;  %v500_v52 = vld [vmem:[%s3167_s15 + $0x4c0] sm:$0xff]  ;;  %v501_v54 = vld [vmem:[%s3167_s15 + $0x4c8] sm:$0xff]  ;;  %v2942_v56 = vcombine.low %v509_v45, %v517_v46  ;;  %v2833_v43 = vcombine.high %v398_v37, %v406_v38  ;;  %v382_v45 = vld [vmem:[%s3167_s15 + $0x110] sm:$0xff] }
  0x53   : > { %v2925_v57 = vcombine.high %v492_v51, %v500_v52  ;;  %v2927_v58 = vcombine.high %v493_v53, %v501_v54  ;;  %v476_v59 = vld [vmem:[%s3167_s15 + $0x400] sm:$0xff]  ;;  %v477_v62 = vld [vmem:[%s3167_s15 + $0x408] sm:$0xff]  ;;  %v2924_v0 = vcombine.low %v492_v51, %v500_v52  ;;  %v2926_v1 = vcombine.low %v493_v53, %v501_v54  ;;  %v390_v46 = vld [vmem:[%s3167_s15 + $0x150] sm:$0xff] }
  0x54   : > { %v484_v61 = vld [vmem:[%s3167_s15 + $0x440] sm:$0xff]  ;;  %v485_v63 = vld [vmem:[%s3167_s15 + $0x448] sm:$0xff]  ;;  %v2817_v51 = vcombine.high %v382_v45, %v390_v46  ;;  %v366_v53 = vld [vmem:[%s3167_s15 + $0x90] sm:$0xff] }
  0x55   : > { %1909 = vmatpush1.bf16.msra.mxu0 %v2780_v7  ;;  %1952 = vmatpush1.bf16.msra.mxu1 %v2782_v8  ;;  %v2909_v2 = vcombine.high %v476_v59, %v484_v61  ;;  %v2911_v3 = vcombine.high %v477_v62, %v485_v63  ;;  %v471_v7 = vld [vmem:[%s3167_s15 + $0x3d8] sm:$0xff]  ;;  %v2908_v8 = vcombine.low %v476_v59, %v484_v61  ;;  %v374_v54 = vld [vmem:[%s3167_s15 + $0xd0] sm:$0xff] }
  0x56   : > { %1910 = vmatprep.subr.bf16.mxu0 %v3021_v9  ;;  %1953 = vmatprep.subr.bf16.mxu1 %v3023_v10  ;;  %v2910_v9 = vcombine.low %v477_v62, %v485_v63  ;;  %v2897_v10 = vcombine.high %v462_v4, %v470_v5  ;;  %v2899_v11 = vcombine.high %v463_v6, %v471_v7  ;;  %v3248_v14 = vld [vmem:[%s3169_s16] ss:$8 sps:$4 sm:$0xff]  }
  0x57   : > { %v2801_v59 = vcombine.high %v366_v53, %v374_v54  ;;  %v350_v62 = vld [vmem:[%s3167_s15 + $0x10] sm:$0xff] }
  0x58   : > { %v358_v63 = vld [vmem:[%s3167_s15 + $0x50] sm:$0xff] }
  0x59   : > { %1911 = vmatpush2.bf16.msra.mxu0 %v3020_v15  ;;  %1954 = vmatpush2.bf16.msra.mxu1 %v3022_v16  ;;  %v447_v15 = vld [vmem:[%s3167_s15 + $0x318] sm:$0xff] }
  0x5a   : > { %1912 = vmatprep.subr.bf16.mxu0 %v3005_v17  ;;  %1955 = vmatprep.subr.bf16.mxu1 %v3007_v18  ;;  %v455_v16 = vld [vmem:[%s3167_s15 + $0x358] sm:$0xff]  ;;  %v2896_v17 = vcombine.low %v462_v4, %v470_v5  ;;  %v2898_v18 = vcombine.low %v463_v6, %v471_v7  ;;  %v2785_v4 = vcombine.high %v350_v62, %v358_v63  ;;  %v590_v6 = vld [vmem:[%s3167_s15 + $0x790] sm:$0xff] }
  0x5b   : > { %v2883_v20 = vcombine.high %v447_v15, %v455_v16  ;;  %v598_v7 = vld [vmem:[%s3167_s15 + $0x7d0] sm:$0xff] }
  0x5d   : > { %1913 = vmatpush2.bf16.msra.mxu0 %v3004_v23  ;;  %1956 = vmatpush2.bf16.msra.mxu1 %v3006_v24  ;;  %v431_v23 = vld [vmem:[%s3167_s15 + $0x298] sm:$0xff] }
  0x5e   : > { %1914 = vmatprep.subr.bf16.mxu0 %v2989_v25  ;;  %1957 = vmatprep.subr.bf16.mxu1 %v2991_v26  ;;  %v439_v24 = vld [vmem:[%s3167_s15 + $0x2d8] sm:$0xff]  ;;  %v2880_v25 = vcombine.low %v446_v12, %v454_v13  ;;  %v2882_v26 = vcombine.low %v447_v15, %v455_v16  ;;  %v3025_v12 = vcombine.high %v590_v6, %v598_v7  ;;  %v574_v15 = vld [vmem:[%s3167_s15 + $0x710] sm:$0xff] }
  0x5f   : > { %v2867_v28 = vcombine.high %v431_v23, %v439_v24  ;;  %v582_v16 = vld [vmem:[%s3167_s15 + $0x750] sm:$0xff] }
  0x61   : > { %1915 = vmatpush2.bf16.msra.mxu0 %v2988_v31  ;;  %1958 = vmatpush2.bf16.msra.mxu1 %v2990_v32  ;;  %v415_v31 = vld [vmem:[%s3167_s15 + $0x218] sm:$0xff] }
  0x62   : > { %1916 = vmatprep.subr.bf16.mxu0 %v2973_v33  ;;  %1959 = vmatprep.subr.bf16.mxu1 %v2975_v34  ;;  %v423_v32 = vld [vmem:[%s3167_s15 + $0x258] sm:$0xff]  ;;  %v2864_v33 = vcombine.low %v430_v21, %v438_v22  ;;  %v2866_v34 = vcombine.low %v431_v23, %v439_v24  ;;  %v3009_v21 = vcombine.high %v574_v15, %v582_v16  ;;  %v558_v23 = vld [vmem:[%s3167_s15 + $0x690] sm:$0xff] }
  0x63   : > { %v2851_v36 = vcombine.high %v415_v31, %v423_v32  ;;  %v566_v24 = vld [vmem:[%s3167_s15 + $0x6d0] sm:$0xff] }
  0x65   : > { %1917 = vmatpush2.bf16.msra.mxu0 %v2972_v39  ;;  %1960 = vmatpush2.bf16.msra.mxu1 %v2974_v40  ;;  %v399_v39 = vld [vmem:[%s3167_s15 + $0x198] sm:$0xff] }
  0x66   : > { %1918 = vmatprep.subr.bf16.mxu0 %v2957_v41  ;;  %1961 = vmatprep.subr.bf16.mxu1 %v2959_v42  ;;  %v407_v40 = vld [vmem:[%s3167_s15 + $0x1d8] sm:$0xff]  ;;  %v2848_v41 = vcombine.low %v414_v29, %v422_v30  ;;  %v2850_v42 = vcombine.low %v415_v31, %v423_v32  ;;  %v2993_v29 = vcombine.high %v558_v23, %v566_v24  ;;  %v542_v31 = vld [vmem:[%s3167_s15 + $0x610] sm:$0xff] }
  0x67   : > { %v2835_v44 = vcombine.high %v399_v39, %v407_v40  ;;  %v550_v32 = vld [vmem:[%s3167_s15 + $0x650] sm:$0xff] }
  0x69   : > { %1919 = vmatpush2.bf16.msra.mxu0 %v2956_v47  ;;  %1962 = vmatpush2.bf16.msra.mxu1 %v2958_v48  ;;  %v383_v47 = vld [vmem:[%s3167_s15 + $0x118] sm:$0xff] }
  0x6a   : > { %1920 = vmatprep.subr.bf16.mxu0 %v2941_v49  ;;  %1963 = vmatprep.subr.bf16.mxu1 %v2943_v50  ;;  %v391_v48 = vld [vmem:[%s3167_s15 + $0x158] sm:$0xff]  ;;  %v2832_v49 = vcombine.low %v398_v37, %v406_v38  ;;  %v2834_v50 = vcombine.low %v399_v39, %v407_v40  ;;  %v2977_v37 = vcombine.high %v542_v31, %v550_v32  ;;  %v526_v39 = vld [vmem:[%s3167_s15 + $0x590] sm:$0xff] }
  0x6b   : > { %v2819_v52 = vcombine.high %v383_v47, %v391_v48  ;;  %v534_v40 = vld [vmem:[%s3167_s15 + $0x5d0] sm:$0xff] }
  0x6d   : > { %1921 = vmatpush2.bf16.msra.mxu0 %v2940_v55  ;;  %1964 = vmatpush2.bf16.msra.mxu1 %v2942_v56  ;;  %v367_v55 = vld [vmem:[%s3167_s15 + $0x98] sm:$0xff] }
  0x6e   : > { %1922 = vmatprep.subr.bf16.mxu0 %v2925_v57  ;;  %1965 = vmatprep.subr.bf16.mxu1 %v2927_v58  ;;  %v375_v56 = vld [vmem:[%s3167_s15 + $0xd8] sm:$0xff]  ;;  %v2816_v57 = vcombine.low %v382_v45, %v390_v46  ;;  %v2818_v58 = vcombine.low %v383_v47, %v391_v48  ;;  %v2961_v45 = vcombine.high %v526_v39, %v534_v40  ;;  %v510_v47 = vld [vmem:[%s3167_s15 + $0x510] sm:$0xff] }
  0x6f   : > { %v2803_v61 = vcombine.high %v367_v55, %v375_v56  ;;  %v518_v48 = vld [vmem:[%s3167_s15 + $0x550] sm:$0xff] }
  0x71   : > { %1923 = vmatpush2.bf16.msra.mxu0 %v2924_v0  ;;  %1966 = vmatpush2.bf16.msra.mxu1 %v2926_v1  ;;  %v351_v0 = vld [vmem:[%s3167_s15 + $0x18] sm:$0xff] }
  0x72   : > { %1924 = vmatprep.subr.bf16.mxu0 %v2909_v2  ;;  %1967 = vmatprep.subr.bf16.mxu1 %v2911_v3  ;;  %v359_v1 = vld [vmem:[%s3167_s15 + $0x58] sm:$0xff]  ;;  %v2800_v2 = vcombine.low %v366_v53, %v374_v54  ;;  %v2802_v3 = vcombine.low %v367_v55, %v375_v56  ;;  %v2945_v53 = vcombine.high %v510_v47, %v518_v48  ;;  %v494_v55 = vld [vmem:[%s3167_s15 + $0x490] sm:$0xff] }
  0x73   : > { %v2787_v5 = vcombine.high %v351_v0, %v359_v1  ;;  %v502_v56 = vld [vmem:[%s3167_s15 + $0x4d0] sm:$0xff] }
  0x75   : > { %1925 = vmatpush2.bf16.msra.mxu0 %v2908_v8  ;;  %1968 = vmatpush2.bf16.msra.mxu1 %v2910_v9  ;;  %v591_v8 = vld [vmem:[%s3167_s15 + $0x798] sm:$0xff] }
  0x76   : > { %1980 = vmatprep.subr.bf16.mxu0 %v2897_v10  ;;  %2023 = vmatprep.subr.bf16.mxu1 %v2899_v11  ;;  %v599_v9 = vld [vmem:[%s3167_s15 + $0x7d8] sm:$0xff]  ;;  %v2784_v10 = vcombine.low %v350_v62, %v358_v63  ;;  %v2786_v11 = vcombine.low %v351_v0, %v359_v1  ;;  %v2929_v62 = vcombine.high %v494_v55, %v502_v56  ;;  %v478_v0 = vld [vmem:[%s3167_s15 + $0x410] sm:$0xff] }
  0x77   : > { %v3027_v13 = vcombine.high %v591_v8, %v599_v9  ;;  %v486_v1 = vld [vmem:[%s3167_s15 + $0x450] sm:$0xff] }
  0x78   : > { %1927 = vmatmul.mubr.bf16.vlgmr.msra.gmra.mxu0 %v3248_v14  ;;  %1970 = vmatmul.mubr.bf16.vlgmr.msra.gmra.mxu1 %v3248_v14 }
  0x79   : > { %1981 = vmatpush1.bf16.msra.mxu0 %v2896_v17  ;;  %2024 = vmatpush1.bf16.msra.mxu1 %v2898_v18  ;;  %v575_v17 = vld [vmem:[%s3167_s15 + $0x718] sm:$0xff] }
  0x7a   : > { %1982 = vmatprep.subr.bf16.mxu0 %v2881_v19  ;;  %2025 = vmatprep.subr.bf16.mxu1 %v2883_v20  ;;  %v583_v18 = vld [vmem:[%s3167_s15 + $0x758] sm:$0xff]  ;;  %v3024_v19 = vcombine.low %v590_v6, %v598_v7  ;;  %v3026_v20 = vcombine.low %v591_v8, %v599_v9  ;;  %v2913_v6 = vcombine.high %v478_v0, %v486_v1  ;;  %v464_v8 = vld [vmem:[%s3167_s15 + $0x3a0] sm:$0xff] }
  0x7b   : > { %2012 = vmatprep.mubr.bf16.mxu0 %v3203_v60  ;;  %2055 = vmatprep.mubr.bf16.mxu1 %v3203_v60  ;;  %v3011_v22 = vcombine.high %v575_v17, %v583_v18  ;;  %v472_v9 = vld [vmem:[%s3167_s15 + $0x3e0] sm:$0xff] }
  0x7d   : > { %1983 = vmatpush1.bf16.msra.mxu0 %v2880_v25  ;;  %2026 = vmatpush1.bf16.msra.mxu1 %v2882_v26  ;;  %v559_v25 = vld [vmem:[%s3167_s15 + $0x698] sm:$0xff] }
  0x7e   : > { %1984 = vmatprep.subr.bf16.mxu0 %v2865_v27  ;;  %2027 = vmatprep.subr.bf16.mxu1 %v2867_v28  ;;  %v567_v26 = vld [vmem:[%s3167_s15 + $0x6d8] sm:$0xff]  ;;  %v3008_v27 = vcombine.low %v574_v15, %v582_v16  ;;  %v3010_v28 = vcombine.low %v575_v17, %v583_v18  ;;  %v2901_v15 = vcombine.high %v464_v8, %v472_v9  ;;  %v448_v17 = vld [vmem:[%s3167_s15 + $0x320] sm:$0xff] }
  0x7f   : > { %v2995_v30 = vcombine.high %v559_v25, %v567_v26  ;;  %v456_v18 = vld [vmem:[%s3167_s15 + $0x360] sm:$0xff] }
  0x81   : > { %1985 = vmatpush1.bf16.msra.mxu0 %v2864_v33  ;;  %2028 = vmatpush1.bf16.msra.mxu1 %v2866_v34  ;;  %v543_v33 = vld [vmem:[%s3167_s15 + $0x618] sm:$0xff] }
  0x82   : > { %1986 = vmatprep.subr.bf16.mxu0 %v2849_v35  ;;  %2029 = vmatprep.subr.bf16.mxu1 %v2851_v36  ;;  %v551_v34 = vld [vmem:[%s3167_s15 + $0x658] sm:$0xff]  ;;  %v2992_v35 = vcombine.low %v558_v23, %v566_v24  ;;  %v2994_v36 = vcombine.low %v559_v25, %v567_v26  ;;  %v2885_v23 = vcombine.high %v448_v17, %v456_v18  ;;  %v432_v25 = vld [vmem:[%s3167_s15 + $0x2a0] sm:$0xff] }
  0x83   : > { %v2979_v38 = vcombine.high %v543_v33, %v551_v34  ;;  %v440_v26 = vld [vmem:[%s3167_s15 + $0x2e0] sm:$0xff] }
  0x85   : > { %1987 = vmatpush1.bf16.msra.mxu0 %v2848_v41  ;;  %2030 = vmatpush1.bf16.msra.mxu1 %v2850_v42  ;;  %v527_v41 = vld [vmem:[%s3167_s15 + $0x598] sm:$0xff] }
  0x86   : > { %1988 = vmatprep.subr.bf16.mxu0 %v2833_v43  ;;  %2031 = vmatprep.subr.bf16.mxu1 %v2835_v44  ;;  %v535_v42 = vld [vmem:[%s3167_s15 + $0x5d8] sm:$0xff]  ;;  %v2976_v43 = vcombine.low %v542_v31, %v550_v32  ;;  %v2978_v44 = vcombine.low %v543_v33, %v551_v34  ;;  %v2869_v31 = vcombine.high %v432_v25, %v440_v26  ;;  %v416_v33 = vld [vmem:[%s3167_s15 + $0x220] sm:$0xff] }
  0x87   : > { %v2963_v46 = vcombine.high %v527_v41, %v535_v42  ;;  %v424_v34 = vld [vmem:[%s3167_s15 + $0x260] sm:$0xff] }
  0x89   : > { %1989 = vmatpush1.bf16.msra.mxu0 %v2832_v49  ;;  %2032 = vmatpush1.bf16.msra.mxu1 %v2834_v50  ;;  %v511_v49 = vld [vmem:[%s3167_s15 + $0x518] sm:$0xff] }
  0x8a   : > { %1990 = vmatprep.subr.bf16.mxu0 %v2817_v51  ;;  %2033 = vmatprep.subr.bf16.mxu1 %v2819_v52  ;;  %v519_v50 = vld [vmem:[%s3167_s15 + $0x558] sm:$0xff]  ;;  %v2960_v51 = vcombine.low %v526_v39, %v534_v40  ;;  %v2962_v52 = vcombine.low %v527_v41, %v535_v42  ;;  %v2853_v39 = vcombine.high %v416_v33, %v424_v34  ;;  %v400_v41 = vld [vmem:[%s3167_s15 + $0x1a0] sm:$0xff] }
  0x8b   : > { %v2947_v54 = vcombine.high %v511_v49, %v519_v50  ;;  %v408_v42 = vld [vmem:[%s3167_s15 + $0x1e0] sm:$0xff] }
  0x8d   : > { %1991 = vmatpush1.bf16.msra.mxu0 %v2816_v57  ;;  %2034 = vmatpush1.bf16.msra.mxu1 %v2818_v58  ;;  %v495_v57 = vld [vmem:[%s3167_s15 + $0x498] sm:$0xff] }
  0x8e   : > { %1992 = vmatprep.subr.bf16.mxu0 %v2801_v59  ;;  %2035 = vmatprep.subr.bf16.mxu1 %v2803_v61  ;;  %v503_v58 = vld [vmem:[%s3167_s15 + $0x4d8] sm:$0xff]  ;;  %v2944_v59 = vcombine.low %v510_v47, %v518_v48  ;;  %v2946_v61 = vcombine.low %v511_v49, %v519_v50  ;;  %v384_v48 = vld [vmem:[%s3167_s15 + $0x120] sm:$0xff]  ;;  %v385_v50 = vld [vmem:[%s3167_s15 + $0x128] sm:$0xff] }
  0x8f   : > { %v2931_v63 = vcombine.high %v495_v57, %v503_v58  ;;  %v392_v49 = vld [vmem:[%s3167_s15 + $0x160] sm:$0xff] }
  0x91   : > { %1993 = vmatpush1.bf16.msra.mxu0 %v2800_v2  ;;  %2036 = vmatpush1.bf16.msra.mxu1 %v2802_v3  ;;  %v479_v2 = vld [vmem:[%s3167_s15 + $0x418] sm:$0xff] }
  0x92   : > { %1994 = vmatprep.subr.bf16.mxu0 %v2785_v4  ;;  %2037 = vmatprep.subr.bf16.mxu1 %v2787_v5  ;;  %v487_v3 = vld [vmem:[%s3167_s15 + $0x458] sm:$0xff]  ;;  %v2928_v4 = vcombine.low %v494_v55, %v502_v56  ;;  %v2930_v5 = vcombine.low %v495_v57, %v503_v58  ;;  %v368_v56 = vld [vmem:[%s3167_s15 + $0xa0] sm:$0xff]  ;;  %v369_v58 = vld [vmem:[%s3167_s15 + $0xa8] sm:$0xff] }
  0x93   : > { %v2915_v7 = vcombine.high %v479_v2, %v487_v3  ;;  %v376_v57 = vld [vmem:[%s3167_s15 + $0xe0] sm:$0xff] }
  0x95   : > { %1995 = vmatpush1.bf16.msra.mxu0 %v2784_v10  ;;  %2038 = vmatpush1.bf16.msra.mxu1 %v2786_v11  ;;  %v465_v10 = vld [vmem:[%s3167_s15 + $0x3a8] sm:$0xff] }
  0x96   : > { %1996 = vmatprep.subr.bf16.mxu0 %v3025_v12  ;;  %2039 = vmatprep.subr.bf16.mxu1 %v3027_v13  ;;  %v473_v11 = vld [vmem:[%s3167_s15 + $0x3e8] sm:$0xff]  ;;  %v2912_v12 = vcombine.low %v478_v0, %v486_v1  ;;  %v2914_v13 = vcombine.low %v479_v2, %v487_v3  ;;  %v352_v1 = vld [vmem:[%s3167_s15 + $0x20] sm:$0xff] }
  0x97   : > { %v2903_v16 = vcombine.high %v465_v10, %v473_v11  ;;  %v360_v2 = vld [vmem:[%s3167_s15 + $0x60] sm:$0xff]  ;;  %v353_v3 = vld [vmem:[%s3167_s15 + $0x28] sm:$0xff] }
  0x99   : > { %1997 = vmatpush2.bf16.msra.mxu0 %v3024_v19  ;;  %2040 = vmatpush2.bf16.msra.mxu1 %v3026_v20  ;;  %v449_v19 = vld [vmem:[%s3167_s15 + $0x328] sm:$0xff] }
  0x9a   : > { %1998 = vmatprep.subr.bf16.mxu0 %v3009_v21  ;;  %2041 = vmatprep.subr.bf16.mxu1 %v3011_v22  ;;  %v457_v20 = vld [vmem:[%s3167_s15 + $0x368] sm:$0xff]  ;;  %v2900_v21 = vcombine.low %v464_v8, %v472_v9  ;;  %v2902_v22 = vcombine.low %v465_v10, %v473_v11  ;;  %v592_v9 = vld [vmem:[%s3167_s15 + $0x7a0] sm:$0xff] }
  0x9b   : > { %v2887_v24 = vcombine.high %v449_v19, %v457_v20  ;;  %v600_v10 = vld [vmem:[%s3167_s15 + $0x7e0] sm:$0xff]  ;;  %v593_v11 = vld [vmem:[%s3167_s15 + $0x7a8] sm:$0xff] }
  0x9d   : > { %1999 = vmatpush2.bf16.msra.mxu0 %v3008_v27  ;;  %2042 = vmatpush2.bf16.msra.mxu1 %v3010_v28  ;;  %v433_v27 = vld [vmem:[%s3167_s15 + $0x2a8] sm:$0xff] }
  0x9e   : > { %2000 = vmatprep.subr.bf16.mxu0 %v2993_v29  ;;  %2043 = vmatprep.subr.bf16.mxu1 %v2995_v30  ;;  %v441_v28 = vld [vmem:[%s3167_s15 + $0x2e8] sm:$0xff]  ;;  %v2884_v29 = vcombine.low %v448_v17, %v456_v18  ;;  %v2886_v30 = vcombine.low %v449_v19, %v457_v20  ;;  %v576_v18 = vld [vmem:[%s3167_s15 + $0x720] sm:$0xff] }
  0x9f   : > { %v2871_v32 = vcombine.high %v433_v27, %v441_v28  ;;  %v584_v19 = vld [vmem:[%s3167_s15 + $0x760] sm:$0xff]  ;;  %v577_v20 = vld [vmem:[%s3167_s15 + $0x728] sm:$0xff] }
  0xa1   : > { %2001 = vmatpush2.bf16.msra.mxu0 %v2992_v35  ;;  %2044 = vmatpush2.bf16.msra.mxu1 %v2994_v36  ;;  %v417_v35 = vld [vmem:[%s3167_s15 + $0x228] sm:$0xff] }
  0xa2   : > { %2002 = vmatprep.subr.bf16.mxu0 %v2977_v37  ;;  %2045 = vmatprep.subr.bf16.mxu1 %v2979_v38  ;;  %v425_v36 = vld [vmem:[%s3167_s15 + $0x268] sm:$0xff]  ;;  %v2868_v37 = vcombine.low %v432_v25, %v440_v26  ;;  %v2870_v38 = vcombine.low %v433_v27, %v441_v28  ;;  %v560_v26 = vld [vmem:[%s3167_s15 + $0x6a0] sm:$0xff] }
  0xa3   : > { %v2855_v40 = vcombine.high %v417_v35, %v425_v36  ;;  %v568_v27 = vld [vmem:[%s3167_s15 + $0x6e0] sm:$0xff]  ;;  %v561_v28 = vld [vmem:[%s3167_s15 + $0x6a8] sm:$0xff] }
  0xa5   : > { %2003 = vmatpush2.bf16.msra.mxu0 %v2976_v43  ;;  %2046 = vmatpush2.bf16.msra.mxu1 %v2978_v44  ;;  %v401_v43 = vld [vmem:[%s3167_s15 + $0x1a8] sm:$0xff] }
  0xa6   : > { %2004 = vmatprep.subr.bf16.mxu0 %v2961_v45  ;;  %2047 = vmatprep.subr.bf16.mxu1 %v2963_v46  ;;  %v409_v44 = vld [vmem:[%s3167_s15 + $0x1e8] sm:$0xff]  ;;  %v2852_v45 = vcombine.low %v416_v33, %v424_v34  ;;  %v2837_v46 = vcombine.high %v400_v41, %v408_v42  ;;  %v544_v34 = vld [vmem:[%s3167_s15 + $0x620] sm:$0xff] }
  0xa7   : > { %v2839_v47 = vcombine.high %v401_v43, %v409_v44 }
  0xa9   : > { %2005 = vmatpush2.bf16.msra.mxu0 %v2960_v51  ;;  %2048 = vmatpush2.bf16.msra.mxu1 %v2962_v52  ;;  %v393_v51 = vld [vmem:[%s3167_s15 + $0x168] sm:$0xff]  ;;  %v2836_v52 = vcombine.low %v400_v41, %v408_v42  ;;  %v528_v42 = vld [vmem:[%s3167_s15 + $0x5a0] sm:$0xff] }
  0xaa   : > { %2006 = vmatprep.subr.bf16.mxu0 %v2945_v53  ;;  %2049 = vmatprep.subr.bf16.mxu1 %v2947_v54  ;;  %v2838_v53 = vcombine.low %v401_v43, %v409_v44  ;;  %v2821_v54 = vcombine.high %v384_v48, %v392_v49  ;;  %v2823_v55 = vcombine.high %v385_v50, %v393_v51  ;;  %v536_v43 = vld [vmem:[%s3167_s15 + $0x5e0] sm:$0xff]  ;;  %v529_v44 = vld [vmem:[%s3167_s15 + $0x5a8] sm:$0xff] }
  0xad   : > { %2007 = vmatpush2.bf16.msra.mxu0 %v2944_v59  ;;  %2050 = vmatpush2.bf16.msra.mxu1 %v2946_v61  ;;  %v377_v59 = vld [vmem:[%s3167_s15 + $0xe8] sm:$0xff]  ;;  %v2820_v61 = vcombine.low %v384_v48, %v392_v49  ;;  %v512_v49 = vld [vmem:[%s3167_s15 + $0x520] sm:$0xff] }
  0xae   : > { %2008 = vmatprep.subr.bf16.mxu0 %v2929_v62  ;;  %2051 = vmatprep.subr.bf16.mxu1 %v2931_v63  ;;  %v2822_v62 = vcombine.low %v385_v50, %v393_v51  ;;  %v2805_v63 = vcombine.high %v368_v56, %v376_v57  ;;  %v2807_v0 = vcombine.high %v369_v58, %v377_v59  ;;  %v520_v50 = vld [vmem:[%s3167_s15 + $0x560] sm:$0xff]  ;;  %v513_v51 = vld [vmem:[%s3167_s15 + $0x528] sm:$0xff] }
  0xb1   : > { %2009 = vmatpush2.bf16.msra.mxu0 %v2928_v4  ;;  %2052 = vmatpush2.bf16.msra.mxu1 %v2930_v5  ;;  %v361_v4 = vld [vmem:[%s3167_s15 + $0x68] sm:$0xff]  ;;  %v2804_v5 = vcombine.low %v368_v56, %v376_v57  ;;  %v496_v57 = vld [vmem:[%s3167_s15 + $0x4a0] sm:$0xff] }
  0xb2   : > { %2010 = vmatprep.subr.bf16.mxu0 %v2913_v6  ;;  %2053 = vmatprep.subr.bf16.mxu1 %v2915_v7  ;;  %v2806_v6 = vcombine.low %v369_v58, %v377_v59  ;;  %v2789_v7 = vcombine.high %v352_v1, %v360_v2  ;;  %v2791_v8 = vcombine.high %v353_v3, %v361_v4  ;;  %v504_v58 = vld [vmem:[%s3167_s15 + $0x4e0] sm:$0xff]  ;;  %v497_v59 = vld [vmem:[%s3167_s15 + $0x4a8] sm:$0xff] }
  0xb5   : > { %2011 = vmatpush2.bf16.msra.mxu0 %v2912_v12  ;;  %2054 = vmatpush2.bf16.msra.mxu1 %v2914_v13  ;;  %v601_v12 = vld [vmem:[%s3167_s15 + $0x7e8] sm:$0xff]  ;;  %v2788_v13 = vcombine.low %v352_v1, %v360_v2  ;;  %v480_v2 = vld [vmem:[%s3167_s15 + $0x420] sm:$0xff] }
  0xb6   : > { %2066 = vmatprep.subr.bf16.mxu0 %v2901_v15  ;;  %2109 = vmatprep.subr.bf16.mxu1 %v2903_v16  ;;  %v2790_v15 = vcombine.low %v353_v3, %v361_v4  ;;  %v3029_v16 = vcombine.high %v592_v9, %v600_v10  ;;  %v3031_v17 = vcombine.high %v593_v11, %v601_v12  ;;  %v488_v3 = vld [vmem:[%s3167_s15 + $0x460] sm:$0xff]  ;;  %v481_v4 = vld [vmem:[%s3167_s15 + $0x428] sm:$0xff] }
  0xb8   : > { %2013 = vmatmul.mubr.bf16.vlgmr.msra.gmra.mxu0 %v3248_v14  ;;  %2056 = vmatmul.mubr.bf16.vlgmr.msra.gmra.mxu1 %v3248_v14 }
  0xb9   : > { %2067 = vmatpush1.bf16.msra.mxu0 %v2900_v21  ;;  %2110 = vmatpush1.bf16.msra.mxu1 %v2902_v22  ;;  %v585_v21 = vld [vmem:[%s3167_s15 + $0x768] sm:$0xff]  ;;  %v3028_v22 = vcombine.low %v592_v9, %v600_v10  ;;  %v466_v10 = vld [vmem:[%s3167_s15 + $0x3b0] sm:$0xff] }
  0xba   : > { %2068 = vmatprep.subr.bf16.mxu0 %v2885_v23  ;;  %2111 = vmatprep.subr.bf16.mxu1 %v2887_v24  ;;  %v3030_v23 = vcombine.low %v593_v11, %v601_v12  ;;  %v3013_v24 = vcombine.high %v576_v18, %v584_v19  ;;  %v3015_v25 = vcombine.high %v577_v20, %v585_v21  ;;  %v474_v11 = vld [vmem:[%s3167_s15 + $0x3f0] sm:$0xff]  ;;  %v467_v12 = vld [vmem:[%s3167_s15 + $0x3b8] sm:$0xff] }
  0xbb   : > { %2098 = vmatprep.mubr.bf16.mxu0 %v3203_v60  ;;  %2141 = vmatprep.mubr.bf16.mxu1 %v3203_v60  ;;  %v2854_v60 = vcombine.low %v417_v35, %v425_v36  ;;  %v552_v35 = vld [vmem:[%s3167_s15 + $0x660] sm:$0xff]  ;;  %v545_v36 = vld [vmem:[%s3167_s15 + $0x628] sm:$0xff] }
  0xbd   : > { %2069 = vmatpush1.bf16.msra.mxu0 %v2884_v29  ;;  %2112 = vmatpush1.bf16.msra.mxu1 %v2886_v30  ;;  %v569_v29 = vld [vmem:[%s3167_s15 + $0x6e8] sm:$0xff]  ;;  %v3012_v30 = vcombine.low %v576_v18, %v584_v19  ;;  %v450_v19 = vld [vmem:[%s3167_s15 + $0x330] sm:$0xff] }
  0xbe   : > { %2070 = vmatprep.subr.bf16.mxu0 %v2869_v31  ;;  %2113 = vmatprep.subr.bf16.mxu1 %v2871_v32  ;;  %v3014_v31 = vcombine.low %v577_v20, %v585_v21  ;;  %v2997_v32 = vcombine.high %v560_v26, %v568_v27  ;;  %v2999_v33 = vcombine.high %v561_v28, %v569_v29  ;;  %v458_v20 = vld [vmem:[%s3167_s15 + $0x370] sm:$0xff]  ;;  %v451_v21 = vld [vmem:[%s3167_s15 + $0x338] sm:$0xff] }
  0xc1   : > { %2071 = vmatpush1.bf16.msra.mxu0 %v2868_v37  ;;  %2114 = vmatpush1.bf16.msra.mxu1 %v2870_v38  ;;  %v553_v37 = vld [vmem:[%s3167_s15 + $0x668] sm:$0xff]  ;;  %v2996_v38 = vcombine.low %v560_v26, %v568_v27  ;;  %v434_v27 = vld [vmem:[%s3167_s15 + $0x2b0] sm:$0xff] }
  0xc2   : > { %2072 = vmatprep.subr.bf16.mxu0 %v2853_v39  ;;  %2115 = vmatprep.subr.bf16.mxu1 %v2855_v40  ;;  %v2998_v39 = vcombine.low %v561_v28, %v569_v29  ;;  %v2981_v40 = vcombine.high %v544_v34, %v552_v35  ;;  %v2983_v41 = vcombine.high %v545_v36, %v553_v37  ;;  %v442_v28 = vld [vmem:[%s3167_s15 + $0x2f0] sm:$0xff]  ;;  %v435_v29 = vld [vmem:[%s3167_s15 + $0x2b8] sm:$0xff] }
  0xc5   : > { %2073 = vmatpush1.bf16.msra.mxu0 %v2852_v45  ;;  %2116 = vmatpush1.bf16.msra.mxu1 %v2854_v60  ;;  %v537_v45 = vld [vmem:[%s3167_s15 + $0x5e8] sm:$0xff]  ;;  %v2980_v60 = vcombine.low %v544_v34, %v552_v35  ;;  %v418_v35 = vld [vmem:[%s3167_s15 + $0x230] sm:$0xff] }
  0xc6   : > { %2074 = vmatprep.subr.bf16.mxu0 %v2837_v46  ;;  %2117 = vmatprep.subr.bf16.mxu1 %v2839_v47  ;;  %v2982_v46 = vcombine.low %v545_v36, %v553_v37  ;;  %v2965_v47 = vcombine.high %v528_v42, %v536_v43  ;;  %v2967_v48 = vcombine.high %v529_v44, %v537_v45  ;;  %v426_v36 = vld [vmem:[%s3167_s15 + $0x270] sm:$0xff] }
  0xc7   : > { %v3070_v37 = vld [vmem:[%s3169_s16 + $0x4] ss:$8 sps:$4 sm:$0xff]  }
  0xc9   : > { %2075 = vmatpush1.bf16.msra.mxu0 %v2836_v52  ;;  %2118 = vmatpush1.bf16.msra.mxu1 %v2838_v53  ;;  %v521_v52 = vld [vmem:[%s3167_s15 + $0x568] sm:$0xff]  ;;  %v2964_v53 = vcombine.low %v528_v42, %v536_v43  ;;  %v402_v43 = vld [vmem:[%s3167_s15 + $0x1b0] sm:$0xff] }
  0xca   : > { %2076 = vmatprep.subr.bf16.mxu0 %v2821_v54  ;;  %2119 = vmatprep.subr.bf16.mxu1 %v2823_v55  ;;  %v2966_v54 = vcombine.low %v529_v44, %v537_v45  ;;  %v2949_v55 = vcombine.high %v512_v49, %v520_v50  ;;  %v2951_v56 = vcombine.high %v513_v51, %v521_v52  ;;  %v410_v44 = vld [vmem:[%s3167_s15 + $0x1f0] sm:$0xff]  ;;  %v403_v45 = vld [vmem:[%s3167_s15 + $0x1b8] sm:$0xff] }
  0xcd   : > { %2077 = vmatpush1.bf16.msra.mxu0 %v2820_v61  ;;  %2120 = vmatpush1.bf16.msra.mxu1 %v2822_v62  ;;  %v505_v61 = vld [vmem:[%s3167_s15 + $0x4e8] sm:$0xff]  ;;  %v2948_v62 = vcombine.low %v512_v49, %v520_v50  ;;  %v386_v50 = vld [vmem:[%s3167_s15 + $0x130] sm:$0xff] }
  0xce   : > { %2078 = vmatprep.subr.bf16.mxu0 %v2805_v63  ;;  %2121 = vmatprep.subr.bf16.mxu1 %v2807_v0  ;;  %v2950_v63 = vcombine.low %v513_v51, %v521_v52  ;;  %v2933_v0 = vcombine.high %v496_v57, %v504_v58  ;;  %v2935_v1 = vcombine.high %v497_v59, %v505_v61  ;;  %v394_v51 = vld [vmem:[%s3167_s15 + $0x170] sm:$0xff]  ;;  %v387_v52 = vld [vmem:[%s3167_s15 + $0x138] sm:$0xff] }
  0xd1   : > { %2079 = vmatpush1.bf16.msra.mxu0 %v2804_v5  ;;  %2122 = vmatpush1.bf16.msra.mxu1 %v2806_v6  ;;  %v489_v5 = vld [vmem:[%s3167_s15 + $0x468] sm:$0xff]  ;;  %v2932_v6 = vcombine.low %v496_v57, %v504_v58  ;;  %v370_v58 = vld [vmem:[%s3167_s15 + $0xb0] sm:$0xff] }
  0xd2   : > { %2080 = vmatprep.subr.bf16.mxu0 %v2789_v7  ;;  %2123 = vmatprep.subr.bf16.mxu1 %v2791_v8  ;;  %v2934_v7 = vcombine.low %v497_v59, %v505_v61  ;;  %v2917_v8 = vcombine.high %v480_v2, %v488_v3  ;;  %v2919_v9 = vcombine.high %v481_v4, %v489_v5  ;;  %v378_v59 = vld [vmem:[%s3167_s15 + $0xf0] sm:$0xff]  ;;  %v371_v61 = vld [vmem:[%s3167_s15 + $0xb8] sm:$0xff] }
  0xd5   : > { %2081 = vmatpush1.bf16.msra.mxu0 %v2788_v13  ;;  %2124 = vmatpush1.bf16.msra.mxu1 %v2790_v15  ;;  %v475_v13 = vld [vmem:[%s3167_s15 + $0x3f8] sm:$0xff]  ;;  %v2916_v15 = vcombine.low %v480_v2, %v488_v3  ;;  %v354_v3 = vld [vmem:[%s3167_s15 + $0x30] sm:$0xff] }
  0xd6   : > { %2082 = vmatprep.subr.bf16.mxu0 %v3029_v16  ;;  %2125 = vmatprep.subr.bf16.mxu1 %v3031_v17  ;;  %v2918_v16 = vcombine.low %v481_v4, %v489_v5  ;;  %v2905_v17 = vcombine.high %v466_v10, %v474_v11  ;;  %v2907_v18 = vcombine.high %v467_v12, %v475_v13  ;;  %v362_v4 = vld [vmem:[%s3167_s15 + $0x70] sm:$0xff]  ;;  %v355_v5 = vld [vmem:[%s3167_s15 + $0x38] sm:$0xff] }
  0xd9   : > { %2083 = vmatpush2.bf16.msra.mxu0 %v3028_v22  ;;  %2126 = vmatpush2.bf16.msra.mxu1 %v3030_v23  ;;  %v459_v22 = vld [vmem:[%s3167_s15 + $0x378] sm:$0xff]  ;;  %v2904_v23 = vcombine.low %v466_v10, %v474_v11  ;;  %v594_v11 = vld [vmem:[%s3167_s15 + $0x7b0] sm:$0xff] }
  0xda   : > { %2084 = vmatprep.subr.bf16.mxu0 %v3013_v24  ;;  %2127 = vmatprep.subr.bf16.mxu1 %v3015_v25  ;;  %v2906_v24 = vcombine.low %v467_v12, %v475_v13  ;;  %v2889_v25 = vcombine.high %v450_v19, %v458_v20  ;;  %v2891_v26 = vcombine.high %v451_v21, %v459_v22  ;;  %v602_v12 = vld [vmem:[%s3167_s15 + $0x7f0] sm:$0xff]  ;;  %v595_v13 = vld [vmem:[%s3167_s15 + $0x7b8] sm:$0xff] }
  0xdd   : > { %2085 = vmatpush2.bf16.msra.mxu0 %v3012_v30  ;;  %2128 = vmatpush2.bf16.msra.mxu1 %v3014_v31  ;;  %v443_v30 = vld [vmem:[%s3167_s15 + $0x2f8] sm:$0xff]  ;;  %v2888_v31 = vcombine.low %v450_v19, %v458_v20  ;;  %v578_v20 = vld [vmem:[%s3167_s15 + $0x730] sm:$0xff] }
  0xde   : > { %2086 = vmatprep.subr.bf16.mxu0 %v2997_v32  ;;  %2129 = vmatprep.subr.bf16.mxu1 %v2999_v33  ;;  %v2890_v32 = vcombine.low %v451_v21, %v459_v22  ;;  %v2873_v33 = vcombine.high %v434_v27, %v442_v28  ;;  %v2875_v34 = vcombine.high %v435_v29, %v443_v30  ;;  %v586_v21 = vld [vmem:[%s3167_s15 + $0x770] sm:$0xff]  ;;  %v579_v22 = vld [vmem:[%s3167_s15 + $0x738] sm:$0xff] }
  0xe1   : > { %2087 = vmatpush2.bf16.msra.mxu0 %v2996_v38  ;;  %2130 = vmatpush2.bf16.msra.mxu1 %v2998_v39  ;;  %v419_v38 = vld [vmem:[%s3167_s15 + $0x238] sm:$0xff] }
  0xe2   : > { %2088 = vmatprep.subr.bf16.mxu0 %v2981_v40  ;;  %2131 = vmatprep.subr.bf16.mxu1 %v2983_v41  ;;  %v427_v39 = vld [vmem:[%s3167_s15 + $0x278] sm:$0xff]  ;;  %v2874_v40 = vcombine.low %v435_v29, %v443_v30  ;;  %v2857_v41 = vcombine.high %v418_v35, %v426_v36  ;;  %v570_v29 = vld [vmem:[%s3167_s15 + $0x6f0] sm:$0xff] }
  0xe3   : > { %v2859_v42 = vcombine.high %v419_v38, %v427_v39  ;;  %v563_v30 = vld [vmem:[%s3167_s15 + $0x6b8] sm:$0xff] }
  0xe5   : > { %2089 = vmatpush2.bf16.msra.mxu0 %v2980_v60  ;;  %2132 = vmatpush2.bf16.msra.mxu1 %v2982_v46  ;;  %v411_v60 = vld [vmem:[%s3167_s15 + $0x1f8] sm:$0xff]  ;;  %v2856_v46 = vcombine.low %v418_v35, %v426_v36  ;;  %v546_v36 = vld [vmem:[%s3167_s15 + $0x630] sm:$0xff] }
  0xe6   : > { %2090 = vmatprep.subr.bf16.mxu0 %v2965_v47  ;;  %2133 = vmatprep.subr.bf16.mxu1 %v2967_v48  ;;  %v2858_v47 = vcombine.low %v419_v38, %v427_v39  ;;  %v2841_v48 = vcombine.high %v402_v43, %v410_v44  ;;  %v2843_v49 = vcombine.high %v403_v45, %v411_v60  ;;  %v547_v38 = vld [vmem:[%s3167_s15 + $0x638] sm:$0xff] }
  0xe7   : > { %v555_v39 = vld [vmem:[%s3167_s15 + $0x678] sm:$0xff] }
  0xe9   : > { %2091 = vmatpush2.bf16.msra.mxu0 %v2964_v53  ;;  %2134 = vmatpush2.bf16.msra.mxu1 %v2966_v54  ;;  %v395_v53 = vld [vmem:[%s3167_s15 + $0x178] sm:$0xff]  ;;  %v2840_v54 = vcombine.low %v402_v43, %v410_v44  ;;  %v530_v43 = vld [vmem:[%s3167_s15 + $0x5b0] sm:$0xff] }
  0xea   : > { %2092 = vmatprep.subr.bf16.mxu0 %v2949_v55  ;;  %2135 = vmatprep.subr.bf16.mxu1 %v2951_v56  ;;  %v2842_v55 = vcombine.low %v403_v45, %v411_v60  ;;  %v2825_v56 = vcombine.high %v386_v50, %v394_v51  ;;  %v2827_v57 = vcombine.high %v387_v52, %v395_v53  ;;  %v538_v44 = vld [vmem:[%s3167_s15 + $0x5f0] sm:$0xff]  ;;  %v531_v45 = vld [vmem:[%s3167_s15 + $0x5b8] sm:$0xff] }
  0xeb   : > { %v539_v60 = vld [vmem:[%s3167_s15 + $0x5f8] sm:$0xff] }
  0xed   : > { %2093 = vmatpush2.bf16.msra.mxu0 %v2948_v62  ;;  %2136 = vmatpush2.bf16.msra.mxu1 %v2950_v63  ;;  %v379_v62 = vld [vmem:[%s3167_s15 + $0xf8] sm:$0xff]  ;;  %v2824_v63 = vcombine.low %v386_v50, %v394_v51  ;;  %v514_v50 = vld [vmem:[%s3167_s15 + $0x530] sm:$0xff] }
  0xee   : > { %2094 = vmatprep.subr.bf16.mxu0 %v2933_v0  ;;  %2137 = vmatprep.subr.bf16.mxu1 %v2935_v1  ;;  %v2826_v0 = vcombine.low %v387_v52, %v395_v53  ;;  %v2809_v1 = vcombine.high %v370_v58, %v378_v59  ;;  %v2811_v2 = vcombine.high %v371_v61, %v379_v62  ;;  %v522_v51 = vld [vmem:[%s3167_s15 + $0x570] sm:$0xff]  ;;  %v515_v52 = vld [vmem:[%s3167_s15 + $0x538] sm:$0xff] }
  0xef   : > { %v523_v53 = vld [vmem:[%s3167_s15 + $0x578] sm:$0xff] }
  0xf1   : > { %2095 = vmatpush2.bf16.msra.mxu0 %v2932_v6  ;;  %2138 = vmatpush2.bf16.msra.mxu1 %v2934_v7  ;;  %v363_v6 = vld [vmem:[%s3167_s15 + $0x78] sm:$0xff]  ;;  %v2808_v7 = vcombine.low %v370_v58, %v378_v59  ;;  %v498_v58 = vld [vmem:[%s3167_s15 + $0x4b0] sm:$0xff] }
  0xf2   : > { %2096 = vmatprep.subr.bf16.mxu0 %v2917_v8  ;;  %2139 = vmatprep.subr.bf16.mxu1 %v2919_v9  ;;  %v2810_v8 = vcombine.low %v371_v61, %v379_v62  ;;  %v2793_v9 = vcombine.high %v354_v3, %v362_v4  ;;  %v2795_v10 = vcombine.high %v355_v5, %v363_v6  ;;  %v506_v59 = vld [vmem:[%s3167_s15 + $0x4f0] sm:$0xff]  ;;  %v499_v61 = vld [vmem:[%s3167_s15 + $0x4b8] sm:$0xff] }
  0xf3   : > { %v507_v62 = vld [vmem:[%s3167_s15 + $0x4f8] sm:$0xff] }
  0xf5   : > { %2097 = vmatpush2.bf16.msra.mxu0 %v2916_v15  ;;  %2140 = vmatpush2.bf16.msra.mxu1 %v2918_v16  ;;  %v603_v15 = vld [vmem:[%s3167_s15 + $0x7f8] sm:$0xff]  ;;  %v2792_v16 = vcombine.low %v354_v3, %v362_v4  ;;  %v482_v3 = vld [vmem:[%s3167_s15 + $0x430] sm:$0xff] }
  0xf6   : > { %2152 = vmatprep.subr.bf16.mxu0 %v2905_v17  ;;  %2195 = vmatprep.subr.bf16.mxu1 %v2907_v18  ;;  %v2794_v17 = vcombine.low %v355_v5, %v363_v6  ;;  %v3033_v18 = vcombine.high %v594_v11, %v602_v12  ;;  %v3035_v19 = vcombine.high %v595_v13, %v603_v15  ;;  %v490_v4 = vld [vmem:[%s3167_s15 + $0x470] sm:$0xff]  ;;  %v483_v5 = vld [vmem:[%s3167_s15 + $0x438] sm:$0xff] }
  0xf7   : > { %v491_v6 = vld [vmem:[%s3167_s15 + $0x478] sm:$0xff] }
  0xf8   : > { %2099 = vmatmul.mubr.bf16.vlgmr.msra.gmra.mxu0 %v3248_v14  ;;  %2142 = vmatmul.mubr.bf16.vlgmr.msra.gmra.mxu1 %v3248_v14  ;;  %v2872_v14 = vcombine.low %v434_v27, %v442_v28  ;;  %v562_v28 = vld [vmem:[%s3167_s15 + $0x6b0] sm:$0xff] }
  0xf9   : > { %2153 = vmatpush1.bf16.msra.mxu0 %v2904_v23  ;;  %2196 = vmatpush1.bf16.msra.mxu1 %v2906_v24  ;;  %v587_v23 = vld [vmem:[%s3167_s15 + $0x778] sm:$0xff]  ;;  %v3032_v24 = vcombine.low %v594_v11, %v602_v12  ;;  %v2920_v11 = vcombine.low %v482_v3, %v490_v4  ;;  %v2922_v12 = vcombine.low %v483_v5, %v491_v6 }
  0xfa   : > { %2154 = vmatprep.subr.bf16.mxu0 %v2889_v25  ;;  %2197 = vmatprep.subr.bf16.mxu1 %v2891_v26  ;;  %v3034_v25 = vcombine.low %v595_v13, %v603_v15  ;;  %v3017_v26 = vcombine.high %v578_v20, %v586_v21  ;;  %v3019_v27 = vcombine.high %v579_v22, %v587_v23  ;;  %v314_v13 = vld [vmem:[#allocation2 + $0xb0] sm:$0xff]  ;;  %v316_v15 = vld [vmem:[#allocation2 + $0xd8] sm:$0xff] }
  0xfb   : > { %2184 = vmatprep.mubr.bf16.mxu0 %v3070_v37  ;;  %2227 = vmatprep.mubr.bf16.mxu1 %v3070_v37  ;;  %v554_v37 = vld [vmem:[%s3167_s15 + $0x670] sm:$0xff] }
  0xfd   : > { %2155 = vmatpush1.bf16.msra.mxu0 %v2888_v31  ;;  %2198 = vmatpush1.bf16.msra.mxu1 %v2890_v32  ;;  %v571_v31 = vld [vmem:[%s3167_s15 + $0x6f8] sm:$0xff]  ;;  %v3016_v32 = vcombine.low %v578_v20, %v586_v21 }
  0xfe   : > { %2156 = vmatprep.subr.bf16.mxu0 %v2873_v33  ;;  %2199 = vmatprep.subr.bf16.mxu1 %v2875_v34  ;;  %v3018_v33 = vcombine.low %v579_v22, %v587_v23  ;;  %v3001_v34 = vcombine.high %v562_v28, %v570_v29  ;;  %v3003_v35 = vcombine.high %v563_v30, %v571_v31  ;;  %v317_v21 = vld [vmem:[#allocation2 + $0x18] sm:$0xff] }
 0x101   : > { %2157 = vmatpush1.bf16.msra.mxu0 %v2872_v14  ;;  %2200 = vmatpush1.bf16.msra.mxu1 %v2874_v40  ;;  %v3000_v14 = vcombine.low %v562_v28, %v570_v29  ;;  %v3002_v40 = vcombine.low %v563_v30, %v571_v31  ;;  %v331_v30 = vld [vmem:[#allocation2 + $0x58] sm:$0xff] }
 0x102   : > { %2158 = vmatprep.subr.bf16.mxu0 %v2857_v41  ;;  %2201 = vmatprep.subr.bf16.mxu1 %v2859_v42  ;;  %v2985_v41 = vcombine.high %v546_v36, %v554_v37  ;;  %v2987_v42 = vcombine.high %v547_v38, %v555_v39 }
 0x105   : > { %2159 = vmatpush1.bf16.msra.mxu0 %v2856_v46  ;;  %2202 = vmatpush1.bf16.msra.mxu1 %v2858_v47  ;;  %v2984_v46 = vcombine.low %v546_v36, %v554_v37  ;;  %v2986_v47 = vcombine.low %v547_v38, %v555_v39  ;;  %v318_v39 = vld [vmem:[#allocation2 + $0x50] sm:$0xff] }
 0x106   : > { %2160 = vmatprep.subr.bf16.mxu0 %v2841_v48  ;;  %2203 = vmatprep.subr.bf16.mxu1 %v2843_v49  ;;  %v2969_v48 = vcombine.high %v530_v43, %v538_v44  ;;  %v2971_v49 = vcombine.high %v531_v45, %v539_v60 }
 0x109   : > { %2161 = vmatpush1.bf16.msra.mxu0 %v2840_v54  ;;  %2204 = vmatpush1.bf16.msra.mxu1 %v2842_v55  ;;  %v2968_v54 = vcombine.low %v530_v43, %v538_v44  ;;  %v2970_v55 = vcombine.low %v531_v45, %v539_v60  ;;  %v321_v44 = vld [vmem:[#allocation2 + $0x48] sm:$0xff] }
 0x10a   : > { %2162 = vmatprep.subr.bf16.mxu0 %v2825_v56  ;;  %2205 = vmatprep.subr.bf16.mxu1 %v2827_v57  ;;  %v2953_v56 = vcombine.high %v514_v50, %v522_v51  ;;  %v2955_v57 = vcombine.high %v515_v52, %v523_v53 }
 0x10d   : > { %2163 = vmatpush1.bf16.msra.mxu0 %v2824_v63  ;;  %2206 = vmatpush1.bf16.msra.mxu1 %v2826_v0  ;;  %v2952_v63 = vcombine.low %v514_v50, %v522_v51  ;;  %v2954_v0 = vcombine.low %v515_v52, %v523_v53  ;;  %v335_v52 = vld [vmem:[#allocation2 + $0x90] sm:$0xff] }
 0x10e   : > { %2164 = vmatprep.subr.bf16.mxu0 %v2809_v1  ;;  %2207 = vmatprep.subr.bf16.mxu1 %v2811_v2  ;;  %v2937_v1 = vcombine.high %v498_v58, %v506_v59  ;;  %v2939_v2 = vcombine.high %v499_v61, %v507_v62 }
 0x111   : > { %2165 = vmatpush1.bf16.msra.mxu0 %v2808_v7  ;;  %2208 = vmatpush1.bf16.msra.mxu1 %v2810_v8  ;;  %v2936_v7 = vcombine.low %v498_v58, %v506_v59  ;;  %v2938_v8 = vcombine.low %v499_v61, %v507_v62  ;;  %v322_v62 = vld [vmem:[#allocation2 + $0x80] sm:$0xff] }
 0x112   : > { %2166 = vmatprep.subr.bf16.mxu0 %v2793_v9  ;;  %2209 = vmatprep.subr.bf16.mxu1 %v2795_v10  ;;  %v2921_v9 = vcombine.high %v482_v3, %v490_v4  ;;  %v2923_v10 = vcombine.high %v483_v5, %v491_v6  ;;  %v325_v4 = vld [vmem:[#allocation2 + $0xb8] sm:$0xff] }
 0x115   : > { %2167 = vmatpush1.bf16.msra.mxu0 %v2792_v16  ;;  %2210 = vmatpush1.bf16.msra.mxu1 %v2794_v17  ;;  %v3071_v17 = vld [vmem:[%s3169_s16] ss:$8 sps:$4 sm:$0xff]  }
 0x116   : > { %2168 = vmatprep.subr.bf16.mxu0 %v3033_v18  ;;  %2211 = vmatprep.subr.bf16.mxu1 %v3035_v19  ;;  %v315_v18 = vld [vmem:[#allocation2] sm:$0xff] }
 0x119   : > { %2169 = vmatpush2.bf16.msra.mxu0 %v3032_v24  ;;  %2212 = vmatpush2.bf16.msra.mxu1 %v3034_v25  ;;  %v330_v24 = vld [vmem:[#allocation2 + $0x38] sm:$0xff] }
 0x11a   : > { %2170 = vmatprep.subr.bf16.mxu0 %v3017_v26  ;;  %2213 = vmatprep.subr.bf16.mxu1 %v3019_v27  ;;  %v332_v27 = vld [vmem:[#allocation2 + $0x40] sm:$0xff] }
 0x11d   : > { %2171 = vmatpush2.bf16.msra.mxu0 %v3016_v32  ;;  %2214 = vmatpush2.bf16.msra.mxu1 %v3018_v33  ;;  %v333_v33 = vld [vmem:[#allocation2 + $0xc8] sm:$0xff] }
 0x11e   : > { %2172 = vmatprep.subr.bf16.mxu0 %v3001_v34  ;;  %2215 = vmatprep.subr.bf16.mxu1 %v3003_v35 }
 0x121   : > { %2173 = vmatpush2.bf16.msra.mxu0 %v3000_v14  ;;  %2216 = vmatpush2.bf16.msra.mxu1 %v3002_v40  ;;  %v320_v14 = vld [vmem:[#allocation2 + $0x30] sm:$0xff] }
 0x122   : > { %2174 = vmatprep.subr.bf16.mxu0 %v2985_v41  ;;  %2217 = vmatprep.subr.bf16.mxu1 %v2987_v42  ;;  %v319_v41 = vld [vmem:[#allocation2 + $0x68] sm:$0xff] }
 0x125   : > { %2175 = vmatpush2.bf16.msra.mxu0 %v2984_v46  ;;  %2218 = vmatpush2.bf16.msra.mxu1 %v2986_v47  ;;  %v334_v46 = vld [vmem:[#allocation2 + $0xe0] sm:$0xff] }
 0x126   : > { %2176 = vmatprep.subr.bf16.mxu0 %v2969_v48  ;;  %2219 = vmatprep.subr.bf16.mxu1 %v2971_v49  ;;  %v336_v49 = vld [vmem:[#allocation2 + $0x70] sm:$0xff] }
 0x129   : > { %2177 = vmatpush2.bf16.msra.mxu0 %v2968_v54  ;;  %2220 = vmatpush2.bf16.msra.mxu1 %v2970_v55  ;;  %v337_v55 = vld [vmem:[#allocation2 + $0xc0] sm:$0xff] }
 0x12a   : > { %2178 = vmatprep.subr.bf16.mxu0 %v2953_v56  ;;  %2221 = vmatprep.subr.bf16.mxu1 %v2955_v57 }
 0x12d   : > { %2179 = vmatpush2.bf16.msra.mxu0 %v2952_v63  ;;  %2222 = vmatpush2.bf16.msra.mxu1 %v2954_v0  ;;  %v324_v63 = vld [vmem:[#allocation2 + $0xe8] sm:$0xff] }
 0x12e   : > { %2180 = vmatprep.subr.bf16.mxu0 %v2937_v1  ;;  %2223 = vmatprep.subr.bf16.mxu1 %v2939_v2  ;;  %v323_v1 = vld [vmem:[#allocation2 + $0x88] sm:$0xff] }
 0x131   : > { %2181 = vmatpush2.bf16.msra.mxu0 %v2936_v7  ;;  %2224 = vmatpush2.bf16.msra.mxu1 %v2938_v8  ;;  %v338_v7 = vld [vmem:[#allocation2 + $0xa8] sm:$0xff] }
 0x132   : > { %2182 = vmatprep.subr.bf16.mxu0 %v2921_v9  ;;  %2225 = vmatprep.subr.bf16.mxu1 %v2923_v10  ;;  %v340_v10 = vld [vmem:[#allocation2 + $0x10] sm:$0xff] }
 0x135   : > { %2183 = vmatpush2.bf16.msra.mxu0 %v2920_v11  ;;  %2226 = vmatpush2.bf16.msra.mxu1 %v2922_v12 }
 0x138   : > { %v1928_v16 = vpop.f32.mrf.mxu0  ;;  %2185 = vmatmul.mubr.bf16.vlgmr.msra.gmra.mxu0 %v3071_v17  ;;  %v1971_v20 = vpop.f32.mrf.mxu1  ;;  %2228 = vmatmul.mubr.bf16.vlgmr.msra.gmra.mxu1 %v3071_v17  ;;  %v341_v17 = vld [vmem:[#allocation2 + $0x28] sm:$0xff] }
 0x139   : > { %v2238_v19 = vadd.f32 %v1928_v16, %v314_v13  ;;  %v2240_v22 = vadd.f32 %v1971_v20, %v316_v15  ;;  %v339_v13 = vld [vmem:[#allocation2 + $0xd0] sm:$0xff] }
 0x13a   : > { %v1930_v23 = vpop.f32.mrf.mxu0  ;;  %v1973_v26 = vpop.f32.mrf.mxu1 }
 0x13b   : > { %2270 = vst [vmem:[#allocation2 + $0xb0] sm:$0xff] %v2238_v19  ;;  %v2239_v25 = vadd.f32 %v1930_v23, %v315_v18  ;;  %2272 = vst [vmem:[#allocation2 + $0xd8] sm:$0xff] %v2240_v22  ;;  %v2241_v28 = vadd.f32 %v1973_v26, %v317_v21  ;;  %v326_v23 = vld [vmem:[#allocation2 + $0x60] sm:$0xff]  ;;  %v327_v26 = vld [vmem:[#allocation2 + $0xf0] sm:$0xff] }
 0x13c   : > { %v1932_v29 = vpop.f32.mrf.mxu0  ;;  %v1975_v32 = vpop.f32.mrf.mxu1 }
 0x13d   : > { %2271 = vst [vmem:[#allocation2] sm:$0xff] %v2239_v25  ;;  %v2254_v31 = vadd.f32 %v1932_v29, %v330_v24  ;;  %2273 = vst [vmem:[#allocation2 + $0x18] sm:$0xff] %v2241_v28  ;;  %v2256_v34 = vadd.f32 %v1975_v32, %v332_v27  ;;  %v328_v24 = vld [vmem:[#allocation2 + $0x8] sm:$0xff]  ;;  %v329_v29 = vld [vmem:[#allocation2 + $0x78] sm:$0xff] }
 0x13e   : > { %v1934_v35 = vpop.f32.mrf.mxu0  ;;  %v1977_v37 = vpop.f32.mrf.mxu1  ;;  %v342_v32 = vld [vmem:[#allocation2 + $0xa0] sm:$0xff] }
 0x13f   : > { %2286 = vst [vmem:[#allocation2 + $0x38] sm:$0xff] %v2254_v31  ;;  %v2255_v36 = vadd.f32 %v1934_v35, %v331_v30  ;;  %2288 = vst [vmem:[#allocation2 + $0x40] sm:$0xff] %v2256_v34  ;;  %v2257_v38 = vadd.f32 %v1977_v37, %v333_v33  ;;  %v344_v35 = vld [vmem:[#allocation2 + $0x20] sm:$0xff] }
 0x141   : > { %2287 = vst [vmem:[#allocation2 + $0x58] sm:$0xff] %v2255_v36  ;;  %2289 = vst [vmem:[#allocation2 + $0xc8] sm:$0xff] %v2257_v38  ;;  %v343_v38 = vld [vmem:[#allocation2 + $0xf8] sm:$0xff] }
 0x178   : > { %v2014_v40 = vpop.f32.mrf.mxu0  ;;  %v2057_v43 = vpop.f32.mrf.mxu1 }
 0x179   : > { %v2242_v42 = vadd.f32 %v2014_v40, %v318_v39  ;;  %v2244_v45 = vadd.f32 %v2057_v43, %v320_v14  ;;  %v345_v40 = vld [vmem:[#allocation2 + $0x98] sm:$0xff] }
 0x17a   : > { %v2016_v60 = vpop.f32.mrf.mxu0  ;;  %v2059_v48 = vpop.f32.mrf.mxu1 }
 0x17b   : > { %2274 = vst [vmem:[#allocation2 + $0x50] sm:$0xff] %v2242_v42  ;;  %v2243_v47 = vadd.f32 %v2016_v60, %v319_v41  ;;  %2276 = vst [vmem:[#allocation2 + $0x30] sm:$0xff] %v2244_v45  ;;  %v2245_v50 = vadd.f32 %v2059_v48, %v321_v44 }
 0x17c   : > { %v2018_v51 = vpop.f32.mrf.mxu0  ;;  %v2061_v54 = vpop.f32.mrf.mxu1 }
 0x17d   : > { %2275 = vst [vmem:[#allocation2 + $0x68] sm:$0xff] %v2243_v47  ;;  %v2258_v53 = vadd.f32 %v2018_v51, %v334_v46  ;;  %2277 = vst [vmem:[#allocation2 + $0x48] sm:$0xff] %v2245_v50  ;;  %v2260_v56 = vadd.f32 %v2061_v54, %v336_v49 }
 0x17e   : > { %v2020_v57 = vpop.f32.mrf.mxu0  ;;  %v2063_v59 = vpop.f32.mrf.mxu1 }
 0x17f   : > { %2290 = vst [vmem:[#allocation2 + $0xe0] sm:$0xff] %v2258_v53  ;;  %v2259_v58 = vadd.f32 %v2020_v57, %v335_v52  ;;  %2292 = vst [vmem:[#allocation2 + $0x70] sm:$0xff] %v2260_v56  ;;  %v2261_v61 = vadd.f32 %v2063_v59, %v337_v55 }
 0x181   : > { %2291 = vst [vmem:[#allocation2 + $0x90] sm:$0xff] %v2259_v58  ;;  %2293 = vst [vmem:[#allocation2 + $0xc0] sm:$0xff] %v2261_v61 }
 0x1b8   : > { %v2100_v0 = vpop.f32.mrf.mxu0  ;;  %v2143_v3 = vpop.f32.mrf.mxu1 }
 0x1b9   : > { %v2246_v2 = vadd.f32 %v2100_v0, %v322_v62  ;;  %v2248_v5 = vadd.f32 %v2143_v3, %v324_v63 }
 0x1ba   : > { %v2102_v6 = vpop.f32.mrf.mxu0  ;;  %v2145_v9 = vpop.f32.mrf.mxu1 }
 0x1bb   : > { %2278 = vst [vmem:[#allocation2 + $0x80] sm:$0xff] %v2246_v2  ;;  %v2247_v8 = vadd.f32 %v2102_v6, %v323_v1  ;;  %2280 = vst [vmem:[#allocation2 + $0xe8] sm:$0xff] %v2248_v5  ;;  %v2249_v11 = vadd.f32 %v2145_v9, %v325_v4 }
 0x1bc   : > { %v2104_v12 = vpop.f32.mrf.mxu0  ;;  %v2147_v16 = vpop.f32.mrf.mxu1 }
 0x1bd   : > { %2279 = vst [vmem:[#allocation2 + $0x88] sm:$0xff] %v2247_v8  ;;  %v2262_v15 = vadd.f32 %v2104_v12, %v338_v7  ;;  %2281 = vst [vmem:[#allocation2 + $0xb8] sm:$0xff] %v2249_v11  ;;  %v2264_v18 = vadd.f32 %v2147_v16, %v340_v10 }
 0x1be   : > { %v2106_v19 = vpop.f32.mrf.mxu0  ;;  %v2149_v21 = vpop.f32.mrf.mxu1 }
 0x1bf   : > { %2294 = vst [vmem:[#allocation2 + $0xa8] sm:$0xff] %v2262_v15  ;;  %v2263_v20 = vadd.f32 %v2106_v19, %v339_v13  ;;  %2296 = vst [vmem:[#allocation2 + $0x10] sm:$0xff] %v2264_v18  ;;  %v2265_v22 = vadd.f32 %v2149_v21, %v341_v17 }
 0x1c1   : > { %2295 = vst [vmem:[#allocation2 + $0xd0] sm:$0xff] %v2263_v20  ;;  %2297 = vst [vmem:[#allocation2 + $0x28] sm:$0xff] %v2265_v22 }
 0x1f8   : > { %v2186_v25 = vpop.f32.mrf.mxu0  ;;  %v2229_v28 = vpop.f32.mrf.mxu1 }
 0x1f9   : > { %v2250_v27 = vadd.f32 %v2186_v25, %v326_v23  ;;  %v2252_v30 = vadd.f32 %v2229_v28, %v328_v24 }
 0x1fa   : > { %v2188_v31 = vpop.f32.mrf.mxu0  ;;  %v2231_v34 = vpop.f32.mrf.mxu1 }
 0x1fb   : > { %2282 = vst [vmem:[#allocation2 + $0x60] sm:$0xff] %v2250_v27  ;;  %v2251_v33 = vadd.f32 %v2188_v31, %v327_v26  ;;  %2284 = vst [vmem:[#allocation2 + $0x8] sm:$0xff] %v2252_v30  ;;  %v2253_v36 = vadd.f32 %v2231_v34, %v329_v29 }
 0x1fc   : > { %v2190_v37 = vpop.f32.mrf.mxu0  ;;  %v2233_v14 = vpop.f32.mrf.mxu1 }
 0x1fd   : > { %2283 = vst [vmem:[#allocation2 + $0xf0] sm:$0xff] %v2251_v33  ;;  %v2266_v39 = vadd.f32 %v2190_v37, %v342_v32  ;;  %2285 = vst [vmem:[#allocation2 + $0x78] sm:$0xff] %v2253_v36  ;;  %v2268_v41 = vadd.f32 %v2233_v14, %v344_v35  ;;  %2305 = sbr.rel (%p3036_p10) target bundleno = 750 (0x2ee), region = 86 }
 0x1fe   : > { %v2192_v42 = vpop.f32.mrf.mxu0  ;;  %v2235_v44 = vpop.f32.mrf.mxu1 }
 0x1ff   : > { %2298 = vst [vmem:[#allocation2 + $0xa0] sm:$0xff] %v2266_v39  ;;  %v2267_v43 = vadd.f32 %v2192_v42, %v343_v38  ;;  %2300 = vst [vmem:[#allocation2 + $0x20] sm:$0xff] %v2268_v41  ;;  %v2269_v45 = vadd.f32 %v2235_v44, %v345_v40 }
 0x201   : > { %2299 = vst [vmem:[#allocation2 + $0xf8] sm:$0xff] %v2267_v43  ;;  %2301 = vst [vmem:[#allocation2 + $0x98] sm:$0xff] %v2269_v45 }
 0x202   : > { %v2342_v60 = vlaneseq  ;;  %v2338_v49 = vld [vmem:[%s3732_s2] sm:$0xff]  ;;  %v2306_v54 = vld [vmem:[#allocation2 + $0xb0] sm:$0xff]  ;;  %v2339_v59 = vld [vmem:[%s3732_s2 + $0x8] sm:$0xff] }
 0x203   : > { %v2307_v55 = vld [vmem:[#allocation2] sm:$0xff]  ;;  %v2308_v63 = vld [vmem:[#allocation2 + $0xd8] sm:$0xff]  ;;  %v2310_v8 = vld [vmem:[#allocation2 + $0x50] sm:$0xff] }
 0x204   : > { %v2343_v46 = vshrl.u32 %v2342_v60, 7  ;;  %v2309_v3 = vld [vmem:[#allocation2 + $0x18] sm:$0xff]  ;;  %v2311_v9 = vld [vmem:[#allocation2 + $0x68] sm:$0xff]  ;;  %v2312_v15 = vld [vmem:[#allocation2 + $0x30] sm:$0xff] }
 0x205   : > { %v2313_v16 = vld [vmem:[#allocation2 + $0x48] sm:$0xff]  ;;  %v2314_v17 = vld [vmem:[#allocation2 + $0x80] sm:$0xff]  ;;  %v2317_v31 = vld [vmem:[#allocation2 + $0xb8] sm:$0xff] }
 0x206   : > { %v3449_v47 = vsub.s32 0, %v2343_v46  ;;  %v3451_v48 = vsub.s32 1, %v2343_v46  ;;  %v3456_v50 = vsub.s32 2, %v2343_v46  ;;  %v3464_v53 = vsub.s32 3, %v2343_v46  ;;  %v2315_v22 = vld [vmem:[#allocation2 + $0x88] sm:$0xff]  ;;  %v3526_v27 = vld [vmem:[%s3733_s3] sm:$0xff] }
 0x207   : > { %v3466_v56 = vsub.s32 4, %v2343_v46  ;;  %v3468_v57 = vsub.s32 5, %v2343_v46  ;;  %v3470_v58 = vsub.s32 6, %v2343_v46  ;;  %v3478_v62 = vsub.s32 7, %v2343_v46  ;;  %v2316_v28 = vld [vmem:[#allocation2 + $0xe8] sm:$0xff]  ;;  %v2318_v32 = vld [vmem:[#allocation2 + $0x60] sm:$0xff] }
 0x208   : > { %v3459_v51 = vrot.slane %v2338_v49, %v3449_v47  ;;  %v3462_v52 = vrot.slane %v2338_v49, %v3451_v48  ;;  %v3476_v61 = vrot.slane %v2338_v49, %v3456_v50  ;;  %v3481_v0 = vrot.slane %v2338_v49, %v3464_v53  ;;  %v2319_v37 = vld [vmem:[#allocation2 + $0xf0] sm:$0xff]  ;;  %v2320_v38 = vld [vmem:[#allocation2 + $0x8] sm:$0xff]  ;;  %v2321_v45 = vld [vmem:[#allocation2 + $0x78] sm:$0xff] }
 0x209   : > { %v3486_v4 = vrot.slane %v2338_v49, %v3466_v56  ;;  %v3489_v5 = vrot.slane %v2338_v49, %v3468_v57  ;;  %v3492_v6 = vrot.slane %v2338_v49, %v3470_v58  ;;  %v3495_v7 = vrot.slane %v2339_v59, %v3449_v47 }
 0x20a   : > { %v2422_v1 = vadd.f32 %v3459_v51, %v2306_v54  ;;  %v2423_v2 = vadd.f32 %v3462_v52, %v2307_v55  ;;  %v3498_v10 = vrot.slane %v2338_v49, %v3478_v62  ;;  %v3501_v11 = vrot.slane %v2339_v59, %v3451_v48 }
 0x20b   : > { %v3504_v12 = vrot.slane %v2339_v59, %v3456_v50  ;;  %v2424_v13 = vadd.f32 %v3476_v61, %v2308_v63  ;;  %v3508_v18 = vrot.slane %v2339_v59, %v3464_v53  ;;  %v3511_v19 = vrot.slane %v2339_v59, %v3466_v56 }
 0x20c   : > { %v3514_v20 = vrot.slane %v2339_v59, %v3468_v57  ;;  %v3517_v21 = vrot.slane %v2339_v59, %v3470_v58  ;;  %v3520_v23 = vrot.slane %v2339_v59, %v3478_v62  ;;  %v2425_v24 = vadd.f32 %v3481_v0, %v2309_v3 }
 0x20d   : > { %v2486_v25 = vmul.f32 0.2, %v2422_v1  ;;  %v2487_v26 = vmul.f32 0.2, %v2423_v2  ;;  %v2426_v29 = vadd.f32 %v3486_v4, %v2310_v8  ;;  %v2427_v30 = vadd.f32 %v3489_v5, %v2311_v9 }
 0x20e   : > { %vm2454_vm0 = vcmp.gt.f32.partialorder %v2422_v1, 0.0  ;;  %vm2455_vm1 = vcmp.gt.f32.partialorder %v2423_v2, 0.0  ;;  %v2428_v33 = vadd.f32 %v3492_v6, %v2312_v15  ;;  %v3532_v34 = vadd.f32 %v3498_v10, %v2313_v16 }
 0x20f   : > { %v3535_v35 = vadd.f32 %v3495_v7, %v2314_v17  ;;  %v2488_v36 = vmul.f32 0.2, %v2424_v13  ;;  %v3538_v39 = vadd.f32 %v3501_v11, %v2315_v22  ;;  %vm2456_vm2 = vcmp.gt.f32.partialorder %v2424_v13, 0.0 }
 0x210   : > { %v3542_v14 = vrot.slane %v3526_v27, %v3449_v47  ;;  %v3546_v40 = vrot.slane %v3526_v27, %v3451_v48  ;;  %v3549_v41 = vadd.f32 %v3504_v12, %v2316_v28  ;;  %v2489_v42 = vmul.f32 0.2, %v2425_v24 }
 0x211   : > { %v2518_v43 = vsel %vm2454_vm0, %v2422_v1, %v2486_v25  ;;  %v2519_v44 = vsel %vm2455_vm1, %v2423_v2, %v2487_v26  ;;  %v3554_v60 = vadd.f32 %v3508_v18, %v2317_v31  ;;  %v3557_v46 = vadd.f32 %v3511_v19, %v2318_v32 }
 0x212   : > { %vm2457_vm3 = vcmp.gt.f32.partialorder %v2425_v24, 0.0  ;;  %v3561_v49 = vrot.slane %v3526_v27, %v3456_v50  ;;  %v3564_v54 = vadd.f32 %v3514_v20, %v2319_v37  ;;  %v3567_v55 = vadd.f32 %v3517_v21, %v2320_v38 }
 0x213   : > { %v2490_v59 = vmul.f32 0.2, %v2426_v29  ;;  %v2520_v63 = vsel %vm2456_vm2, %v2424_v13, %v2488_v36  ;;  %vm2458_vm4 = vcmp.gt.f32.partialorder %v2426_v29, 0.0  ;;  %v3571_v1 = vrot.slane %v3526_v27, %v3464_v53 }
 0x214   : > { %v2634_v2 = vmul.f32 %v3542_v14, %v2518_v43  ;;  %v2635_v3 = vmul.f32 %v3546_v40, %v2519_v44  ;;  %v3576_v8 = vadd.f32 %v3520_v23, %v2321_v45  ;;  %vm2459_vm5 = vcmp.gt.f32.partialorder %v2427_v30, 0.0 }
 0x215   : > { %v2491_v9 = vmul.f32 0.2, %v2427_v30  ;;  %v2521_v15 = vsel %vm2457_vm3, %v2425_v24, %v2489_v42  ;;  %vm2460_vm6 = vcmp.gt.f32.partialorder %v2428_v33, 0.0  ;;  %vm2461_vm7 = vcmp.gt.f32.partialorder %v3532_v34, 0.0 }
 0x216   : > { %v3581_v13 = vrot.slane %v3526_v27, %v3466_v56  ;;  %v2636_v16 = vmul.f32 %v3561_v49, %v2520_v63  ;;  %vm2462_vm8 = vcmp.gt.f32.partialorder %v3535_v35, 0.0  ;;  %vm2463_vm9 = vcmp.gt.f32.partialorder %v3538_v39, 0.0  ;;  %v2323_v63 = vld [vmem:[#allocation2 + $0x58] sm:$0xff] }
 0x217   : > { %v2492_v17 = vmul.f32 0.2, %v2428_v33  ;;  %v2522_v22 = vsel %vm2458_vm4, %v2426_v29, %v2490_v59  ;;  %vm2464_vm10 = vcmp.gt.f32.partialorder %v3549_v41, 0.0  ;;  %v3589_v24 = vrot.slane %v3526_v27, %v3468_v57  ;;  %v2322_v59 = vld [vmem:[#allocation2 + $0x38] sm:$0xff] }
 0x218   : > { %v2637_v25 = vmul.f32 %v3571_v1, %v2521_v15  ;;  %v2666_v26 = vadd.f32 %v2635_v3, %v2634_v2  ;;  %vm2465_vm11 = vcmp.gt.f32.partialorder %v3554_v60, 0.0  ;;  %vm2466_vm12 = vcmp.gt.f32.partialorder %v3557_v46, 0.0 }
 0x219   : > { %v2493_v28 = vmul.f32 0.2, %v3532_v34  ;;  %v2523_v31 = vsel %vm2459_vm5, %v2427_v30, %v2491_v9  ;;  %vm2467_vm13 = vcmp.gt.f32.partialorder %v3564_v54, 0.0  ;;  %v3599_v29 = vrot.slane %v3526_v27, %v3470_v58  ;;  %v2551_v30 = vld [vmem:[%s3733_s3 + $0x8] sm:$0xff] }
 0x21a   : > { %v2638_v32 = vmul.f32 %v3581_v13, %v2522_v22  ;;  %v2667_v36 = vadd.f32 %v2666_v26, %v2636_v16  ;;  %vm2468_vm14 = vcmp.gt.f32.partialorder %v3567_v55, 0.0  ;;  %v2494_v37 = vmul.f32 0.2, %v3535_v35 }
 0x21b   : > { %v2495_v38 = vmul.f32 0.2, %v3538_v39  ;;  %v2524_v42 = vsel %vm2460_vm6, %v2428_v33, %v2492_v17  ;;  %vm2469_vm15 = vcmp.gt.f32.partialorder %v3576_v8, 0.0  ;;  %v3612_v43 = vrot.slane %v3526_v27, %v3478_v62 }
 0x21c   : > { %v2639_v44 = vmul.f32 %v3589_v24, %v2523_v31  ;;  %v2668_v45 = vadd.f32 %v2667_v36, %v2637_v25  ;;  %v2496_v2 = vmul.f32 0.2, %v3549_v41  ;;  %v2497_v3 = vmul.f32 0.2, %v3554_v60 }
 0x21d   : > { %v2498_v33 = vmul.f32 0.2, %v3557_v46  ;;  %v2525_v9 = vsel %vm2461_vm7, %v3532_v34, %v2493_v28  ;;  %v2499_v15 = vmul.f32 0.2, %v3564_v54  ;;  %v3623_v27 = vrot.slane %v2551_v30, %v3449_v47  ;;  %v2324_v28 = vld [vmem:[#allocation2 + $0x40] sm:$0xff] }
 0x21e   : > { %v2640_v16 = vmul.f32 %v3599_v29, %v2524_v42  ;;  %v2669_v17 = vadd.f32 %v2668_v45, %v2638_v32  ;;  %v2500_v22 = vmul.f32 0.2, %v3567_v55  ;;  %v2526_v25 = vsel %vm2462_vm8, %v3535_v35, %v2494_v37  ;;  %v2325_v37 = vld [vmem:[#allocation2 + $0xc8] sm:$0xff] }
 0x21f   : > { %v2527_v26 = vsel %vm2463_vm9, %v3538_v39, %v2495_v38  ;;  %v3634_v34 = vrot.slane %v2551_v30, %v3451_v48  ;;  %v2641_v47 = vmul.f32 %v3612_v43, %v2525_v9  ;;  %v2438_v36 = vadd.f32 %v3459_v51, %v2322_v59 }
 0x220   : > { %v2670_v31 = vadd.f32 %v2669_v17, %v2639_v44  ;;  %v2439_v32 = vadd.f32 %v3462_v52, %v2323_v63  ;;  %v2501_v42 = vmul.f32 0.2, %v3576_v8  ;;  %v2528_v35 = vsel %vm2464_vm10, %v3549_v41, %v2496_v2  ;;  %v2327_v63 = vld [vmem:[#allocation2 + $0x90] sm:$0xff] }
 0x221   : > { %v2529_v39 = vsel %vm2465_vm11, %v3554_v60, %v2497_v3  ;;  %v2530_v48 = vsel %vm2466_vm12, %v3557_v46, %v2498_v33  ;;  %v3650_v38 = vrot.slane %v2551_v30, %v3456_v50  ;;  %v2642_v51 = vmul.f32 %v3623_v27, %v2526_v25  ;;  %v2326_v50 = vld [vmem:[#allocation2 + $0xe0] sm:$0xff]  ;;  %v2328_v17 = vld [vmem:[#allocation2 + $0x70] sm:$0xff] }
 0x222   : > { %v2671_v52 = vadd.f32 %v2670_v31, %v2640_v16  ;;  %v2440_v44 = vadd.f32 %v3476_v61, %v2324_v28  ;;  %v2531_v41 = vsel %vm2467_vm13, %v3564_v54, %v2499_v15  ;;  %v2532_v60 = vsel %vm2468_vm14, %v3567_v55, %v2500_v22 }
 0x223   : > { %v3661_v45 = vrot.slane %v2551_v30, %v3464_v53  ;;  %v2643_v46 = vmul.f32 %v3634_v34, %v2527_v26  ;;  %v2441_v2 = vadd.f32 %v3481_v0, %v2325_v37  ;;  %v2502_v3 = vmul.f32 0.2, %v2438_v36  ;;  %v2330_v37 = vld [vmem:[#allocation2 + $0xa8] sm:$0xff] }
 0x224   : > { %v2672_v59 = vadd.f32 %v2671_v52, %v2641_v47  ;;  %v2503_v61 = vmul.f32 0.2, %v2439_v32  ;;  %v2533_v54 = vsel %vm2469_vm15, %v3576_v8, %v2501_v42  ;;  %v3669_v33 = vrot.slane %v2551_v30, %v3466_v56  ;;  %v2331_v52 = vld [vmem:[#allocation2 + $0xd0] sm:$0xff] }
 0x225   : > { %vm2470_vm0 = vcmp.gt.f32.partialorder %v2438_v36, 0.0  ;;  %vm2471_vm1 = vcmp.gt.f32.partialorder %v2439_v32, 0.0  ;;  %v2644_v53 = vmul.f32 %v3650_v38, %v2528_v35  ;;  %v2442_v9 = vadd.f32 %v3486_v4, %v2326_v50 }
 0x226   : > { %v2673_v55 = vadd.f32 %v2672_v59, %v2642_v51  ;;  %v2504_v15 = vmul.f32 0.2, %v2440_v44  ;;  %v3674_v16 = vrot.slane %v2551_v30, %v3468_v57  ;;  %v2645_v0 = vmul.f32 %v3661_v45, %v2529_v39  ;;  %v2329_v57 = vld [vmem:[#allocation2 + $0xc0] sm:$0xff]  ;;  %v2332_v59 = vld [vmem:[#allocation2 + $0x10] sm:$0xff] }
 0x227   : > { %v2443_v22 = vadd.f32 %v3489_v5, %v2327_v63  ;;  %vm2472_vm2 = vcmp.gt.f32.partialorder %v2440_v44, 0.0  ;;  %v2505_v56 = vmul.f32 0.2, %v2441_v2  ;;  %v2534_v25 = vsel %vm2470_vm0, %v2438_v36, %v2502_v3 }
 0x228   : > { %v2674_v8 = vadd.f32 %v2673_v55, %v2643_v46  ;;  %v2535_v26 = vsel %vm2471_vm1, %v2439_v32, %v2503_v61  ;;  %v3679_v28 = vrot.slane %v2551_v30, %v3470_v58  ;;  %v3682_v47 = vrot.slane %v2551_v30, %v3478_v62  ;;  %v2333_v61 = vld [vmem:[#allocation2 + $0x28] sm:$0xff] }
 0x229   : > { %v2646_v4 = vmul.f32 %v3669_v33, %v2530_v48  ;;  %vm2473_vm3 = vcmp.gt.f32.partialorder %v2441_v2, 0.0  ;;  %v2444_v42 = vadd.f32 %v3492_v6, %v2328_v17  ;;  %v2506_v35 = vmul.f32 0.2, %v2442_v9 }
 0x22a   : > { %v2675_v31 = vadd.f32 %v2674_v8, %v2644_v53  ;;  %v2536_v5 = vsel %vm2472_vm2, %v2440_v44, %v2504_v15  ;;  %v2647_v39 = vmul.f32 %v3674_v16, %v2531_v41  ;;  %vm2474_vm4 = vcmp.gt.f32.partialorder %v2442_v9, 0.0  ;;  %v2334_v15 = vld [vmem:[#allocation2 + $0xa0] sm:$0xff] }
 0x22b   : > { %v2650_v36 = vmul.f32 %v3542_v14, %v2534_v25  ;;  %v2651_v58 = vmul.f32 %v3546_v40, %v2535_v26  ;;  %v2445_v62 = vadd.f32 %v3498_v10, %v2329_v57  ;;  %v2507_v30 = vmul.f32 0.2, %v2443_v22  ;;  %v2336_v57 = vld [vmem:[#allocation2 + $0x20] sm:$0xff] }
 0x22c   : > { %v2676_v32 = vadd.f32 %v2675_v31, %v2645_v0  ;;  %v2537_v48 = vsel %vm2473_vm3, %v2441_v2, %v2505_v56  ;;  %v2648_v51 = vmul.f32 %v3679_v28, %v2532_v60  ;;  %vm2475_vm5 = vcmp.gt.f32.partialorder %v2443_v22, 0.0  ;;  %v2335_v56 = vld [vmem:[#allocation2 + $0xf8] sm:$0xff] }
 0x22d   : > { %v2652_v6 = vmul.f32 %v3561_v49, %v2536_v5  ;;  %v2446_v41 = vadd.f32 %v3495_v7, %v2330_v37  ;;  %v2508_v46 = vmul.f32 0.2, %v2444_v42  ;;  %v2538_v50 = vsel %vm2474_vm4, %v2442_v9, %v2506_v35  ;;  %v2337_v5 = vld [vmem:[#allocation2 + $0x98] sm:$0xff] }
 0x22e   : > { %v2677_v44 = vadd.f32 %v2676_v32, %v2646_v4  ;;  %v2649_v14 = vmul.f32 %v3682_v47, %v2533_v54  ;;  %vm2476_vm6 = vcmp.gt.f32.partialorder %v2444_v42, 0.0  ;;  %v2653_v40 = vmul.f32 %v3571_v1, %v2537_v48 }
 0x22f   : > { %v2683_v10 = vadd.f32 %v2651_v58, %v2650_v36  ;;  %v2447_v2 = vadd.f32 %v3501_v11, %v2331_v52  ;;  %v2509_v60 = vmul.f32 0.2, %v2445_v62  ;;  %v2539_v3 = vsel %vm2475_vm5, %v2443_v22, %v2507_v30 }
 0x230   : > { %v2678_v63 = vadd.f32 %v2677_v44, %v2647_v39  ;;  %vm2477_vm7 = vcmp.gt.f32.partialorder %v2445_v62, 0.0  ;;  %v2654_v49 = vmul.f32 %v3581_v13, %v2538_v50  ;;  %v2448_v55 = vadd.f32 %v3504_v12, %v2332_v59 }
 0x231   : > { %v2684_v53 = vadd.f32 %v2683_v10, %v2652_v6  ;;  %v2510_v9 = vmul.f32 0.2, %v2446_v41  ;;  %v2540_v54 = vsel %vm2476_vm6, %v2444_v42, %v2508_v46  ;;  %vm2478_vm8 = vcmp.gt.f32.partialorder %v2446_v41, 0.0 }
 0x232   : > { %v2679_v7 = vadd.f32 %v2678_v63, %v2648_v51  ;;  %v2655_v1 = vmul.f32 %v3589_v24, %v2539_v3  ;;  %v2449_v11 = vadd.f32 %v3508_v18, %v2333_v61  ;;  %v2511_v8 = vmul.f32 0.2, %v2447_v2 }
 0x233   : > { %v2685_v0 = vadd.f32 %v2684_v53, %v2653_v40  ;;  %v2541_v22 = vsel %vm2477_vm7, %v2445_v62, %v2509_v60  ;;  %vm2479_vm9 = vcmp.gt.f32.partialorder %v2447_v2, 0.0  ;;  %v2656_v13 = vmul.f32 %v3599_v29, %v2540_v54 }
 0x234   : > { %v2680_v17 = vadd.f32 %v2679_v7, %v2649_v14  ;;  %v2450_v12 = vadd.f32 %v3511_v19, %v2334_v15  ;;  %v2512_v26 = vmul.f32 0.2, %v2448_v55  ;;  %v2542_v4 = vsel %vm2478_vm8, %v2446_v41, %v2510_v9 }
 0x235   : > { %v2686_v25 = vadd.f32 %v2685_v0, %v2654_v49  ;;  %vm2480_vm10 = vcmp.gt.f32.partialorder %v2448_v55, 0.0  ;;  %v2657_v24 = vmul.f32 %v3612_v43, %v2541_v22  ;;  %v2451_v42 = vadd.f32 %v3514_v20, %v2335_v56 }
 0x236   : > { %2681 = vadd.xlane.f32.xlu0 %v2680_v17  ;;  %v2513_v18 = vmul.f32 0.2, %v2449_v11  ;;  %v2543_v35 = vsel %vm2479_vm9, %v2447_v2, %v2511_v8  ;;  %vm2481_vm11 = vcmp.gt.f32.partialorder %v2449_v11, 0.0  ;;  %v2658_v39 = vmul.f32 %v3623_v27, %v2542_v4  ;;  %v3037_v2 = vld [vmem:[#allocation3] ss:$0 sm:$0xff] }
 0x237   : > { %v2687_v31 = vadd.f32 %v2686_v25, %v2655_v1  ;;  %v2452_v37 = vadd.f32 %v3517_v21, %v2336_v57  ;;  %v2514_v36 = vmul.f32 0.2, %v2450_v12  ;;  %v2544_v19 = vsel %vm2480_vm10, %v2448_v55, %v2512_v26 }
 0x238   : > { %vm2482_vm12 = vcmp.gt.f32.partialorder %v2450_v12, 0.0  ;;  %v2659_v58 = vmul.f32 %v3634_v34, %v2543_v35  ;;  %v2453_v43 = vadd.f32 %v3520_v23, %v2337_v5  ;;  %v2515_v62 = vmul.f32 0.2, %v2451_v42 }
 0x239   : > { %v2688_v29 = vadd.f32 %v2687_v31, %v2656_v13  ;;  %v2545_v30 = vsel %vm2481_vm11, %v2449_v11, %v2513_v18  ;;  %vm2483_vm13 = vcmp.gt.f32.partialorder %v2451_v42, 0.0  ;;  %v2660_v20 = vmul.f32 %v3650_v38, %v2544_v19 }
 0x23a   : > { %v2516_v51 = vmul.f32 0.2, %v2452_v37  ;;  %v2546_v52 = vsel %vm2482_vm12, %v2450_v12, %v2514_v36  ;;  %vm2484_vm14 = vcmp.gt.f32.partialorder %v2452_v37, 0.0  ;;  %v2661_v27 = vmul.f32 %v3661_v45, %v2545_v30 }
 0x23b   : > { %v2689_v32 = vadd.f32 %v2688_v29, %v2657_v24  ;;  %v2517_v6 = vmul.f32 0.2, %v2453_v43  ;;  %v2547_v44 = vsel %vm2483_vm13, %v2451_v42, %v2515_v62  ;;  %vm2485_vm15 = vcmp.gt.f32.partialorder %v2453_v43, 0.0 }
 0x23c   : > { %v2662_v34 = vmul.f32 %v3669_v33, %v2546_v52  ;;  %v2548_v46 = vsel %vm2484_vm14, %v2452_v37, %v2516_v51  ;;  %v2663_v23 = vmul.f32 %v3674_v16, %v2547_v44  ;;  %vm2717_vm0 = vcmask 7168  }
 0x23d   : > { %v2690_v48 = vadd.f32 %v2689_v32, %v2658_v39  ;;  %v2549_v14 = vsel %vm2485_vm15, %v2453_v43, %v2517_v6  ;;  %v2664_v38 = vmul.f32 %v3679_v28, %v2548_v46 }
 0x23e   : > { %v2665_v40 = vmul.f32 %v3682_v47, %v2549_v14 }
 0x23f   : > { %v2691_v21 = vadd.f32 %v2690_v48, %v2659_v58 }
 0x241   : > { %v2692_v41 = vadd.f32 %v2691_v21, %v2660_v20 }
 0x243   : > { %v2693_v50 = vadd.f32 %v2692_v41, %v2661_v27 }
 0x245   : > { %v2694_v59 = vadd.f32 %v2693_v50, %v2662_v34 }
 0x247   : > { %v2695_v10 = vadd.f32 %v2694_v59, %v2663_v23 }
 0x249   : > { %v2696_v63 = vadd.f32 %v2695_v10, %v2664_v38 }
 0x24b   : > { %v2697_v45 = vadd.f32 %v2696_v63, %v2665_v40 }
 0x24d   : > { %2698 = vadd.xlane.f32.xlu0 %v2697_v45 }
 0x2bf   : > { %v2682_v60 = vpop.xlane.xlu0 %2681 }
 0x2c0   : > { %v2707_v3 = vadd.f32 %v3037_v2, %v2682_v60 }
 0x2c2   : > { %v2709_v61 = vmul.f32 0.5, %v2707_v3 }
 0x2c4   : > { %3072 = vtanh.f32 %v2709_v61 }
 0x2d1   : > { %v3073_v33 = vpop.eup %3072 }
 0x2d2   : > { %v2713_v49 = vadd.f32 1.0, %v3073_v33 }
 0x2d4   : > { %v2715_v16 = vmul.f32 0.5, %v2713_v49 }
 0x2d6   : > { %v2699_v53 = vpop.xlane.xlu0 %2698  ;;  %2718 = vst.msk [vmem:[%s3735_s5] sm:$0xff] %vm2717_vm0, %v2715_v16 }
 0x2d7   : > { %v2708_v28 = vadd.f32 %v3037_v2, %v2699_v53 }
 0x2d9   : > { %v2710_v47 = vmul.f32 0.5, %v2708_v28 }
 0x2db   : > { %3074 = vtanh.f32 %v2710_v47 }
 0x2e8   : > { %v3075_v7 = vpop.eup %3074 }
 0x2e9   : > { %v2714_v55 = vadd.f32 1.0, %v3075_v7 }
 0x2eb   : > { %v2716_v9 = vmul.f32 0.5, %v2714_v55 }
 0x2ed   : > { %2719 = vst.msk [vmem:[%s3735_s5 + $0x8] sm:$0xff] %vm2717_vm0, %v2716_v9 }
 0x2ee PF: > { %p14_p11 = scmp.ge.s32.totalorder %s3149_s23, 6   ;;  %s3736_s20 = smov %s3094_s21 }
 0x2ef   : > { %s3737_s21 = smov %s3156_s26  ;;  %s3738_s22 = smov %s3149_s23 }
 0x2f0   :  { %16 = sbr.rel (!%p14_p11) target bundleno = 5 (0x5), region = 120 }

</bundles_post_ra>
